<compile_context>
chip_gen: v7x
topology: tpu7x:2x2x1
jax: 0.10.0
libtpu: 0.0.40
codegen_flags: <defaults>
</compile_context>

<pallas_src>
import functools

import jax
import jax.numpy as jnp
from jax.experimental import pallas as pl
from jax.experimental.pallas import tpu as pltpu


def _round_up(n, m):
    return ((n + m - 1) // m) * m


# ----------------------------------------------------------------------------
# Kernel: full VAE forward for one batch tile.
# refs = [x, (eps if training), 18 weight/bias refs, x_hat_out, mulv_out]
# ----------------------------------------------------------------------------
def _vae_kernel(training, latent_pad, *refs):
    if training:
        x_ref, eps_ref = refs[0], refs[1]
        w_refs = refs[2:20]
    else:
        x_ref, eps_ref = refs[0], None
        w_refs = refs[1:19]
    xhat_ref, mulv_ref = refs[-2], refs[-1]

    (ew0, eb0, ew1, eb1, ew2, eb2, ew3, eb3,
     hw, hb,
     dw0, db0, dw1, db1, dw2, db2, dw3, db3) = w_refs

    def linear(h, w_ref, b_ref, act):
        # bf16 x bf16 MXU pass, f32 accumulation.
        y = jnp.dot(h.astype(w_ref.dtype), w_ref[...],
                    preferred_element_type=jnp.float32)
        y = y + b_ref[...].astype(jnp.float32)
        return jnp.tanh(y) if act else y

    # Encoder: Linear + Tanh x4.  x block is already bf16 (no f32 round-trip).
    h = linear(x_ref[...], ew0, eb0, True)
    h = linear(h, ew1, eb1, True)
    h = linear(h, ew2, eb2, True)
    h = linear(h, ew3, eb3, True)

    # Fused mu || log_var head (single matmul, single packed output).
    # Store immediately so its (tb, 2*l_p) f32 value doesn't stay live across
    # the whole decoder chain.
    mulv = linear(h, hw, hb, False)            # (TB, 2*latent_pad)
    mulv_ref[...] = mulv.astype(mulv_ref.dtype)
    mu = mulv[:, :latent_pad]
    log_var = mulv[:, latent_pad:]

    # Reparameterization trick (training) / identity (eval).
    if training:
        z = eps_ref[...].astype(jnp.float32) * jnp.exp(0.5 * log_var) + mu
    else:
        z = mu

    # Decoder: Linear + Tanh x4
    d = linear(z, dw0, db0, True)
    d = linear(d, dw1, db1, True)
    d = linear(d, dw2, db2, True)
    d = linear(d, dw3, db3, True)

    xhat_ref[...] = d.astype(xhat_ref.dtype)


def init_vae_params(key, num_input, latent_dim, hidden_size=(300, 200, 100)):
    """PyTorch-style uniform init. Weights stored as (in, out), biases (1, out)."""
    dims = [
        (num_input, hidden_size[0]),       # encoder.0
        (hidden_size[0], hidden_size[1]),  # encoder.2
        (hidden_size[1], hidden_size[2]),  # encoder.4
        (hidden_size[2], latent_dim),      # encoder.6
        (latent_dim, latent_dim),          # mu
        (latent_dim, latent_dim),          # log_var
        (latent_dim, hidden_size[2]),      # decoder.0
        (hidden_size[2], hidden_size[1]),  # decoder.2
        (hidden_size[1], hidden_size[0]),  # decoder.4
        (hidden_size[0], num_input),       # decoder.6
    ]
    params = []
    keys = jax.random.split(key, 2 * len(dims))
    for idx, (fan_in, fan_out) in enumerate(dims):
        bound = 1.0 / jnp.sqrt(jnp.float32(fan_in))
        w = jax.random.uniform(keys[2 * idx], (fan_in, fan_out), jnp.float32,
                               minval=-bound, maxval=bound)
        b = jax.random.uniform(keys[2 * idx + 1], (1, fan_out), jnp.float32,
                               minval=-bound, maxval=bound)
        params.append((w, b))
    return params


def _choose_batch_tile(B, block_b):
    """MXU-friendly batch tile: multiple of 128, with >=2 tiles when B allows."""
    tb = _round_up(min(block_b, B), 128)
    if B > 128:
        # Cap at ceil(B/2) rounded to 128 so the grid has at least 2 tiles:
        # on v7x ("parallel",) then shards across both TensorCores; on
        # v5e/v6e the extra step cost is negligible at these sizes.
        tb = min(tb, _round_up(-(-B // 2), 128))
    return tb


def vae_forward(x, eps, params, training=True, block_b=512,
                weight_dtype=jnp.bfloat16, out_dtype=jnp.float32):
    """Fused VAE forward as one pallas_call.

    x:   (B, num_input) f32;  eps: (B, latent_dim) f32 (used iff training).
    params: 10 (W_(in,out), b_(1,out)) pairs from init_vae_params.
    Returns (x_hat, mu, log_var) in f32.
    """
    B, num_input = x.shape
    latent_dim = params[4][0].shape[0]
    hidden = (params[0][0].shape[1], params[1][0].shape[1], params[2][0].shape[1])

    ni_p = _round_up(num_input, 128)
    h_p = tuple(_round_up(h, 128) for h in hidden)     # e.g. 300/200/100 -> 384/256/128
    l_p = _round_up(latent_dim, 128)

    def pad_wb(w, b, in_p, out_p):
        fi, fo = w.shape
        wp = jnp.pad(w, ((0, in_p - fi), (0, out_p - fo))).astype(weight_dtype)
        bp = jnp.pad(b, ((0, 0), (0, out_p - fo))).astype(jnp.float32)
        return wp, bp

    (ew0, eb0), (ew1, eb1), (ew2, eb2), (ew3, eb3), \
        (mw, mb), (lw, lb), \
        (dw0, db0), (dw1, db1), (dw2, db2), (dw3, db3) = params

    layers = [
        pad_wb(ew0, eb0, ni_p, h_p[0]),
        pad_wb(ew1, eb1, h_p[0], h_p[1]),
        pad_wb(ew2, eb2, h_p[1], h_p[2]),
        pad_wb(ew3, eb3, h_p[2], l_p),
    ]
    # Fused mu || log_var head: one (l_p, 2*l_p) matmul instead of two tiny ones.
    mwp, mbp = pad_wb(mw, mb, l_p, l_p)
    lwp, lbp = pad_wb(lw, lb, l_p, l_p)
    layers.append((jnp.concatenate([mwp, lwp], axis=1),
                   jnp.concatenate([mbp, lbp], axis=1)))
    layers += [
        pad_wb(dw0, db0, l_p, h_p[2]),
        pad_wb(dw1, db1, h_p[2], h_p[1]),
        pad_wb(dw2, db2, h_p[1], h_p[0]),
        pad_wb(dw3, db3, h_p[0], ni_p),
    ]

    tb = _choose_batch_tile(B, block_b)
    b_p = _round_up(B, tb)

    # Input stream in bf16: the first matmul casts to bf16 anyway, so this
    # halves the x HBM->VMEM bytes with bit-identical results.
    x_p = jnp.pad(x, ((0, b_p - B), (0, ni_p - num_input))).astype(weight_dtype)

    in_arrays = [x_p]
    in_specs = [pl.BlockSpec((tb, ni_p), lambda i: (i, 0))]
    if training:
        # eps stays f32: it's a tiny stream and keeps the reparameterization
        # math exact vs. the f32 reference.
        # TODO(synk): optionally generate eps on-chip with pltpu.prng_seed +
        # pltpu.stateful_normal to drop this DMA stream (changes the RNG stream).
        eps_p = jnp.pad(eps.astype(jnp.float32),
                        ((0, b_p - B), (0, l_p - latent_dim)))
        in_arrays.append(eps_p)
        in_specs.append(pl.BlockSpec((tb, l_p), lambda i: (i, 0)))

    for w, b in layers:
        in_arrays += [w, b]

    def weight_specs(single_buffer):
        specs = []
        for w, b in layers:
            if single_buffer:
                # Constant block index -> never re-fetched across batch tiles;
                # single-buffer them to halve their VMEM footprint.
                specs += [pl.BlockSpec(w.shape, lambda i: (0, 0),
                                       pipeline_mode=pl.Buffered(1)),
                          pl.BlockSpec(b.shape, lambda i: (0, 0),
                                       pipeline_mode=pl.Buffered(1))]
            else:
                specs += [pl.BlockSpec(w.shape, lambda i: (0, 0)),
                          pl.BlockSpec(b.shape, lambda i: (0, 0))]
        return specs

    out_shape = (
        jax.ShapeDtypeStruct((b_p, ni_p), out_dtype),        # x_hat (lane-padded)
        jax.ShapeDtypeStruct((b_p, 2 * l_p), jnp.float32),   # mu || log_var (packed)
    )
    out_specs = (
        pl.BlockSpec((tb, ni_p), lambda i: (i, 0)),
        pl.BlockSpec((tb, 2 * l_p), lambda i: (i, 0)),
    )

    # Advisory cost estimate so XLA schedules neighboring ops sensibly.
    flops = 2 * b_p * sum(int(w.shape[0]) * int(w.shape[1]) for w, _ in layers)
    tanh_widths = 2 * (h_p[0] + h_p[1] + h_p[2]) + l_p + ni_p
    transcendentals = b_p * (tanh_widths + (l_p if training else 0))
    bytes_accessed = (
        x_p.size * x_p.dtype.itemsize
        + (eps_p.size * eps_p.dtype.itemsize if training else 0)
        + sum(w.size * w.dtype.itemsize + b.size * b.dtype.itemsize
              for w, b in layers)
        + b_p * ni_p * jnp.dtype(out_dtype).itemsize
        + b_p * 2 * l_p * 4
    )
    cost = pl.CostEstimate(flops=int(flops),
                           transcendentals=int(transcendentals),
                           bytes_accessed=int(bytes_accessed))

    kernel = functools.partial(_vae_kernel, training, l_p)

    def call(single_buffer):
        return pl.pallas_call(
            kernel,
            out_shape=out_shape,
            grid_spec=pltpu.PrefetchScalarGridSpec(
                num_scalar_prefetch=0,
                grid=(b_p // tb,),
                in_specs=in_specs + weight_specs(single_buffer),
                out_specs=out_specs,
            ),
            compiler_params=pltpu.CompilerParams(
                dimension_semantics=("parallel",),   # batch tiles -> megacore on v7x
            ),
            cost_estimate=cost,
        )(*in_arrays)

    try:
        x_hat_p, mulv_p = call(single_buffer=True)
    except Exception:
        # Fallback for jax builds where Buffered(1) single-buffering is not
        # supported on the main pallas_call pipeline.
        x_hat_p, mulv_p = call(single_buffer=False)

    x_hat = x_hat_p[:B, :num_input].astype(jnp.float32)
    mu = mulv_p[:B, :latent_dim]
    log_var = mulv_p[:B, l_p:l_p + latent_dim]
    return x_hat, mu, log_var


def vae_forward_ref(x, eps, params, training=True, weight_dtype=jnp.bfloat16):
    """Plain-JAX reference with matching bf16 matmul / f32 accumulation."""
    def lin(h, w, b, act):
        y = jnp.dot(h.astype(weight_dtype), w.astype(weight_dtype),
                    preferred_element_type=jnp.float32) + b
        return jnp.tanh(y) if act else y
    (ew0, eb0), (ew1, eb1), (ew2, eb2), (ew3, eb3), \
        (mw, mb), (lw, lb), \
        (dw0, db0), (dw1, db1), (dw2, db2), (dw3, db3) = params
    h = lin(x, ew0, eb0, True)
    h = lin(h, ew1, eb1, True)
    h = lin(h, ew2, eb2, True)
    h = lin(h, ew3, eb3, True)
    mu = lin(h, mw, mb, False)
    log_var = lin(h, lw, lb, False)
    z = eps * jnp.exp(0.5 * log_var) + mu if training else mu
    d = lin(z, dw0, db0, True)
    d = lin(d, dw1, db1, True)
    d = lin(d, dw2, db2, True)
    d = lin(d, dw3, db3, True)
    return d, mu, log_var


if __name__ == "__main__":
    # Module-consistent small shapes; B > 128 so the batch grid has 2 tiles
    # (exercises the multi-tile path / v7x megacore sharding) and B % tb != 0
    # so batch padding is exercised too.
    B = 200
    NUM_INPUT = 32
    LATENT = 8
    HIDDEN = (300, 200, 100)

    key = jax.random.PRNGKey(0)
    k_x, k_eps, k_p = jax.random.split(key, 3)
    x = jax.random.normal(k_x, (B, NUM_INPUT), jnp.float32)
    # Deterministic stand-in for torch.randn_like(std) in reparameterize().
    eps = jax.random.normal(k_eps, (B, LATENT), jnp.float32)

    params = init_vae_params(k_p, NUM_INPUT, LATENT, HIDDEN)

    x_hat, mu, log_var = vae_forward(x, eps, params, training=True)
    jax.block_until_ready((x_hat, mu, log_var))

    assert x_hat.shape == (B, NUM_INPUT)
    assert mu.shape == (B, LATENT) and log_var.shape == (B, LATENT)

    # Correctness check against plain-JAX reference (same bf16 matmul math).
    r_hat, r_mu, r_lv = vae_forward_ref(x, eps, params, training=True)
    assert jnp.allclose(x_hat, r_hat, atol=2e-3, rtol=2e-3), "x_hat mismatch"
    assert jnp.allclose(mu, r_mu, atol=2e-3, rtol=2e-3), "mu mismatch"
    assert jnp.allclose(log_var, r_lv, atol=2e-3, rtol=2e-3), "log_var mismatch"

    print("KERNEL_OK")
</pallas_src>

<mosaic_0001>
module attributes {stable_mosaic.version = 11 : i64} {
  func.func @_vae_kernel(%arg0: i32, %arg1: memref<128x128xbf16, #tpu.memory_space<vmem>>, %arg2: memref<128x128xf32, #tpu.memory_space<vmem>>, %arg3: memref<128x384xbf16, #tpu.memory_space<vmem>>, %arg4: memref<1x384xf32, #tpu.memory_space<vmem>>, %arg5: memref<384x256xbf16, #tpu.memory_space<vmem>>, %arg6: memref<1x256xf32, #tpu.memory_space<vmem>>, %arg7: memref<256x128xbf16, #tpu.memory_space<vmem>>, %arg8: memref<1x128xf32, #tpu.memory_space<vmem>>, %arg9: memref<128x128xbf16, #tpu.memory_space<vmem>>, %arg10: memref<1x128xf32, #tpu.memory_space<vmem>>, %arg11: memref<128x256xbf16, #tpu.memory_space<vmem>>, %arg12: memref<1x256xf32, #tpu.memory_space<vmem>>, %arg13: memref<128x128xbf16, #tpu.memory_space<vmem>>, %arg14: memref<1x128xf32, #tpu.memory_space<vmem>>, %arg15: memref<128x256xbf16, #tpu.memory_space<vmem>>, %arg16: memref<1x256xf32, #tpu.memory_space<vmem>>, %arg17: memref<256x384xbf16, #tpu.memory_space<vmem>>, %arg18: memref<1x384xf32, #tpu.memory_space<vmem>>, %arg19: memref<384x128xbf16, #tpu.memory_space<vmem>>, %arg20: memref<1x128xf32, #tpu.memory_space<vmem>>, %arg21: memref<128x128xf32, #tpu.memory_space<vmem>>, %arg22: memref<128x256xf32, #tpu.memory_space<vmem>>) attributes {dimension_semantics = [#tpu.dimension_semantics<parallel>], iteration_bounds = array<i64: 2>, scalar_prefetch = 0 : i64, scratch_operands = 0 : i64, tpu.core_type = #tpu.core_type<tc>, window_params = [{transform_indices = @transform_0, window_bounds = array<i64: 128, 128>}, {transform_indices = @transform_1, window_bounds = array<i64: 128, 128>}, {pipeline_mode = #tpu.pipeline_mode<synchronous>, transform_indices = @transform_2, window_bounds = array<i64: 128, 384>}, {pipeline_mode = #tpu.pipeline_mode<synchronous>, transform_indices = @transform_3, window_bounds = array<i64: 1, 384>}, {pipeline_mode = #tpu.pipeline_mode<synchronous>, transform_indices = @transform_4, window_bounds = array<i64: 384, 256>}, {pipeline_mode = #tpu.pipeline_mode<synchronous>, transform_indices = @transform_5, window_bounds = array<i64: 1, 256>}, {pipeline_mode = #tpu.pipeline_mode<synchronous>, transform_indices = @transform_6, window_bounds = array<i64: 256, 128>}, {pipeline_mode = #tpu.pipeline_mode<synchronous>, transform_indices = @transform_7, window_bounds = array<i64: 1, 128>}, {pipeline_mode = #tpu.pipeline_mode<synchronous>, transform_indices = @transform_8, window_bounds = array<i64: 128, 128>}, {pipeline_mode = #tpu.pipeline_mode<synchronous>, transform_indices = @transform_9, window_bounds = array<i64: 1, 128>}, {pipeline_mode = #tpu.pipeline_mode<synchronous>, transform_indices = @transform_10, window_bounds = array<i64: 128, 256>}, {pipeline_mode = #tpu.pipeline_mode<synchronous>, transform_indices = @transform_11, window_bounds = array<i64: 1, 256>}, {pipeline_mode = #tpu.pipeline_mode<synchronous>, transform_indices = @transform_12, window_bounds = array<i64: 128, 128>}, {pipeline_mode = #tpu.pipeline_mode<synchronous>, transform_indices = @transform_13, window_bounds = array<i64: 1, 128>}, {pipeline_mode = #tpu.pipeline_mode<synchronous>, transform_indices = @transform_14, window_bounds = array<i64: 128, 256>}, {pipeline_mode = #tpu.pipeline_mode<synchronous>, transform_indices = @transform_15, window_bounds = array<i64: 1, 256>}, {pipeline_mode = #tpu.pipeline_mode<synchronous>, transform_indices = @transform_16, window_bounds = array<i64: 256, 384>}, {pipeline_mode = #tpu.pipeline_mode<synchronous>, transform_indices = @transform_17, window_bounds = array<i64: 1, 384>}, {pipeline_mode = #tpu.pipeline_mode<synchronous>, transform_indices = @transform_18, window_bounds = array<i64: 384, 128>}, {pipeline_mode = #tpu.pipeline_mode<synchronous>, transform_indices = @transform_19, window_bounds = array<i64: 1, 128>}, {transform_indices = @transform_20, window_bounds = array<i64: 128, 128>}, {transform_indices = @transform_21, window_bounds = array<i64: 128, 256>}]} {
    %c0 = arith.constant 0 : index
    %c0_0 = arith.constant 0 : index
    %0 = vector.load %arg1[%c0, %c0_0] : memref<128x128xbf16, #tpu.memory_space<vmem>>, vector<128x128xbf16>
    %c0_1 = arith.constant 0 : index
    %c0_2 = arith.constant 0 : index
    %1 = vector.load %arg3[%c0_1, %c0_2] : memref<128x384xbf16, #tpu.memory_space<vmem>>, vector<128x384xbf16>
    %cst = arith.constant dense<0.000000e+00> : vector<128x384xf32>
    %2 = tpu.matmul %0, %1, %cst {dimension_numbers = #tpu.dot_dimension_numbers<[1], [0], [0], [1], [0, 0, 1, 1], [], []>} : vector<128x128xbf16>, vector<128x384xbf16>, vector<128x384xf32> -> vector<128x384xf32>
    %c0_3 = arith.constant 0 : index
    %c0_4 = arith.constant 0 : index
    %3 = vector.load %arg4[%c0_3, %c0_4] : memref<1x384xf32, #tpu.memory_space<vmem>>, vector<1x384xf32>
    %4 = vector.broadcast %3 : vector<1x384xf32> to vector<128x384xf32>
    %5 = arith.addf %2, %4 : vector<128x384xf32>
    %6 = math.tanh %5 : vector<128x384xf32>
    %7 = arith.truncf %6 : vector<128x384xf32> to vector<128x384xbf16>
    %c0_5 = arith.constant 0 : index
    %c0_6 = arith.constant 0 : index
    %8 = vector.load %arg5[%c0_5, %c0_6] : memref<384x256xbf16, #tpu.memory_space<vmem>>, vector<384x256xbf16>
    %cst_7 = arith.constant dense<0.000000e+00> : vector<128x256xf32>
    %9 = tpu.matmul %7, %8, %cst_7 {dimension_numbers = #tpu.dot_dimension_numbers<[1], [0], [0], [1], [0, 0, 1, 1], [], []>} : vector<128x384xbf16>, vector<384x256xbf16>, vector<128x256xf32> -> vector<128x256xf32>
    %c0_8 = arith.constant 0 : index
    %c0_9 = arith.constant 0 : index
    %10 = vector.load %arg6[%c0_8, %c0_9] : memref<1x256xf32, #tpu.memory_space<vmem>>, vector<1x256xf32>
    %11 = vector.broadcast %10 : vector<1x256xf32> to vector<128x256xf32>
    %12 = arith.addf %9, %11 : vector<128x256xf32>
    %13 = math.tanh %12 : vector<128x256xf32>
    %14 = arith.truncf %13 : vector<128x256xf32> to vector<128x256xbf16>
    %c0_10 = arith.constant 0 : index
    %c0_11 = arith.constant 0 : index
    %15 = vector.load %arg7[%c0_10, %c0_11] : memref<256x128xbf16, #tpu.memory_space<vmem>>, vector<256x128xbf16>
    %cst_12 = arith.constant dense<0.000000e+00> : vector<128x128xf32>
    %16 = tpu.matmul %14, %15, %cst_12 {dimension_numbers = #tpu.dot_dimension_numbers<[1], [0], [0], [1], [0, 0, 1, 1], [], []>} : vector<128x256xbf16>, vector<256x128xbf16>, vector<128x128xf32> -> vector<128x128xf32>
    %c0_13 = arith.constant 0 : index
    %c0_14 = arith.constant 0 : index
    %17 = vector.load %arg8[%c0_13, %c0_14] : memref<1x128xf32, #tpu.memory_space<vmem>>, vector<1x128xf32>
    %18 = vector.broadcast %17 : vector<1x128xf32> to vector<128x128xf32>
    %19 = arith.addf %16, %18 : vector<128x128xf32>
    %20 = math.tanh %19 : vector<128x128xf32>
    %21 = arith.truncf %20 : vector<128x128xf32> to vector<128x128xbf16>
    %c0_15 = arith.constant 0 : index
    %c0_16 = arith.constant 0 : index
    %22 = vector.load %arg9[%c0_15, %c0_16] : memref<128x128xbf16, #tpu.memory_space<vmem>>, vector<128x128xbf16>
    %cst_17 = arith.constant dense<0.000000e+00> : vector<128x128xf32>
    %23 = tpu.matmul %21, %22, %cst_17 {dimension_numbers = #tpu.dot_dimension_numbers<[1], [0], [0], [1], [0, 0, 1, 1], [], []>} : vector<128x128xbf16>, vector<128x128xbf16>, vector<128x128xf32> -> vector<128x128xf32>
    %c0_18 = arith.constant 0 : index
    %c0_19 = arith.constant 0 : index
    %24 = vector.load %arg10[%c0_18, %c0_19] : memref<1x128xf32, #tpu.memory_space<vmem>>, vector<1x128xf32>
    %25 = vector.broadcast %24 : vector<1x128xf32> to vector<128x128xf32>
    %26 = arith.addf %23, %25 : vector<128x128xf32>
    %27 = math.tanh %26 : vector<128x128xf32>
    %28 = arith.truncf %27 : vector<128x128xf32> to vector<128x128xbf16>
    %c0_20 = arith.constant 0 : index
    %c0_21 = arith.constant 0 : index
    %29 = vector.load %arg11[%c0_20, %c0_21] : memref<128x256xbf16, #tpu.memory_space<vmem>>, vector<128x256xbf16>
    %cst_22 = arith.constant dense<0.000000e+00> : vector<128x256xf32>
    %30 = tpu.matmul %28, %29, %cst_22 {dimension_numbers = #tpu.dot_dimension_numbers<[1], [0], [0], [1], [0, 0, 1, 1], [], []>} : vector<128x128xbf16>, vector<128x256xbf16>, vector<128x256xf32> -> vector<128x256xf32>
    %c0_23 = arith.constant 0 : index
    %c0_24 = arith.constant 0 : index
    %31 = vector.load %arg12[%c0_23, %c0_24] : memref<1x256xf32, #tpu.memory_space<vmem>>, vector<1x256xf32>
    %32 = vector.broadcast %31 : vector<1x256xf32> to vector<128x256xf32>
    %33 = arith.addf %30, %32 : vector<128x256xf32>
    %c0_25 = arith.constant 0 : index
    %c0_26 = arith.constant 0 : index
    %34 = vector.load %arg22[%c0_25, %c0_26] : memref<128x256xf32, #tpu.memory_space<vmem>>, vector<128x256xf32>
    tpu.vector_store %arg22[%c0_25, %c0_26], %33 {strides = array<i32>} : memref<128x256xf32, #tpu.memory_space<vmem>>, vector<128x256xf32>,
    %35 = vector.extract_strided_slice %33 {offsets = [0, 0], sizes = [128, 128], strides = [1, 1]} : vector<128x256xf32> to vector<128x128xf32>
    %36 = vector.extract_strided_slice %33 {offsets = [0, 128], sizes = [128, 128], strides = [1, 1]} : vector<128x256xf32> to vector<128x128xf32>
    %c0_27 = arith.constant 0 : index
    %c0_28 = arith.constant 0 : index
    %37 = vector.load %arg2[%c0_27, %c0_28] : memref<128x128xf32, #tpu.memory_space<vmem>>, vector<128x128xf32>
    %cst_29 = arith.constant 5.000000e-01 : f32
    %38 = vector.broadcast %cst_29 : f32 to vector<128x128xf32>
    %39 = arith.mulf %38, %36 : vector<128x128xf32>
    %40 = math.exp %39 : vector<128x128xf32>
    %41 = arith.mulf %37, %40 : vector<128x128xf32>
    %42 = arith.addf %41, %35 : vector<128x128xf32>
    %43 = arith.truncf %42 : vector<128x128xf32> to vector<128x128xbf16>
    %c0_30 = arith.constant 0 : index
    %c0_31 = arith.constant 0 : index
    %44 = vector.load %arg13[%c0_30, %c0_31] : memref<128x128xbf16, #tpu.memory_space<vmem>>, vector<128x128xbf16>
    %cst_32 = arith.constant dense<0.000000e+00> : vector<128x128xf32>
    %45 = tpu.matmul %43, %44, %cst_32 {dimension_numbers = #tpu.dot_dimension_numbers<[1], [0], [0], [1], [0, 0, 1, 1], [], []>} : vector<128x128xbf16>, vector<128x128xbf16>, vector<128x128xf32> -> vector<128x128xf32>
    %c0_33 = arith.constant 0 : index
    %c0_34 = arith.constant 0 : index
    %46 = vector.load %arg14[%c0_33, %c0_34] : memref<1x128xf32, #tpu.memory_space<vmem>>, vector<1x128xf32>
    %47 = vector.broadcast %46 : vector<1x128xf32> to vector<128x128xf32>
    %48 = arith.addf %45, %47 : vector<128x128xf32>
    %49 = math.tanh %48 : vector<128x128xf32>
    %50 = arith.truncf %49 : vector<128x128xf32> to vector<128x128xbf16>
    %c0_35 = arith.constant 0 : index
    %c0_36 = arith.constant 0 : index
    %51 = vector.load %arg15[%c0_35, %c0_36] : memref<128x256xbf16, #tpu.memory_space<vmem>>, vector<128x256xbf16>
    %cst_37 = arith.constant dense<0.000000e+00> : vector<128x256xf32>
    %52 = tpu.matmul %50, %51, %cst_37 {dimension_numbers = #tpu.dot_dimension_numbers<[1], [0], [0], [1], [0, 0, 1, 1], [], []>} : vector<128x128xbf16>, vector<128x256xbf16>, vector<128x256xf32> -> vector<128x256xf32>
    %c0_38 = arith.constant 0 : index
    %c0_39 = arith.constant 0 : index
    %53 = vector.load %arg16[%c0_38, %c0_39] : memref<1x256xf32, #tpu.memory_space<vmem>>, vector<1x256xf32>
    %54 = vector.broadcast %53 : vector<1x256xf32> to vector<128x256xf32>
    %55 = arith.addf %52, %54 : vector<128x256xf32>
    %56 = math.tanh %55 : vector<128x256xf32>
    %57 = arith.truncf %56 : vector<128x256xf32> to vector<128x256xbf16>
    %c0_40 = arith.constant 0 : index
    %c0_41 = arith.constant 0 : index
    %58 = vector.load %arg17[%c0_40, %c0_41] : memref<256x384xbf16, #tpu.memory_space<vmem>>, vector<256x384xbf16>
    %cst_42 = arith.constant dense<0.000000e+00> : vector<128x384xf32>
    %59 = tpu.matmul %57, %58, %cst_42 {dimension_numbers = #tpu.dot_dimension_numbers<[1], [0], [0], [1], [0, 0, 1, 1], [], []>} : vector<128x256xbf16>, vector<256x384xbf16>, vector<128x384xf32> -> vector<128x384xf32>
    %c0_43 = arith.constant 0 : index
    %c0_44 = arith.constant 0 : index
    %60 = vector.load %arg18[%c0_43, %c0_44] : memref<1x384xf32, #tpu.memory_space<vmem>>, vector<1x384xf32>
    %61 = vector.broadcast %60 : vector<1x384xf32> to vector<128x384xf32>
    %62 = arith.addf %59, %61 : vector<128x384xf32>
    %63 = math.tanh %62 : vector<128x384xf32>
    %64 = arith.truncf %63 : vector<128x384xf32> to vector<128x384xbf16>
    %c0_45 = arith.constant 0 : index
    %c0_46 = arith.constant 0 : index
    %65 = vector.load %arg19[%c0_45, %c0_46] : memref<384x128xbf16, #tpu.memory_space<vmem>>, vector<384x128xbf16>
    %cst_47 = arith.constant dense<0.000000e+00> : vector<128x128xf32>
    %66 = tpu.matmul %64, %65, %cst_47 {dimension_numbers = #tpu.dot_dimension_numbers<[1], [0], [0], [1], [0, 0, 1, 1], [], []>} : vector<128x384xbf16>, vector<384x128xbf16>, vector<128x128xf32> -> vector<128x128xf32>
    %c0_48 = arith.constant 0 : index
    %c0_49 = arith.constant 0 : index
    %67 = vector.load %arg20[%c0_48, %c0_49] : memref<1x128xf32, #tpu.memory_space<vmem>>, vector<1x128xf32>
    %68 = vector.broadcast %67 : vector<1x128xf32> to vector<128x128xf32>
    %69 = arith.addf %66, %68 : vector<128x128xf32>
    %70 = math.tanh %69 : vector<128x128xf32>
    %c0_50 = arith.constant 0 : index
    %c0_51 = arith.constant 0 : index
    %71 = vector.load %arg21[%c0_50, %c0_51] : memref<128x128xf32, #tpu.memory_space<vmem>>, vector<128x128xf32>
    tpu.vector_store %arg21[%c0_50, %c0_51], %70 {strides = array<i32>} : memref<128x128xf32, #tpu.memory_space<vmem>>, vector<128x128xf32>,
    return
  }
  func.func @transform_0(%arg0: i32) -> (i32, i32) {
    %c0_i32 = arith.constant 0 : i32
    %c0_i32_0 = arith.constant 0 : i32
    return %arg0, %c0_i32 : i32, i32
  }
  func.func @transform_1(%arg0: i32) -> (i32, i32) {
    %c0_i32 = arith.constant 0 : i32
    %c0_i32_0 = arith.constant 0 : i32
    return %arg0, %c0_i32 : i32, i32
  }
  func.func @transform_2(%arg0: i32) -> (i32, i32) {
    %c0_i32 = arith.constant 0 : i32
    %c0_i32_0 = arith.constant 0 : i32
    %c0_i32_1 = arith.constant 0 : i32
    return %c0_i32, %c0_i32_0 : i32, i32
  }
  func.func @transform_3(%arg0: i32) -> (i32, i32) {
    %c0_i32 = arith.constant 0 : i32
    %c0_i32_0 = arith.constant 0 : i32
    %c0_i32_1 = arith.constant 0 : i32
    return %c0_i32, %c0_i32_0 : i32, i32
  }
  func.func @transform_4(%arg0: i32) -> (i32, i32) {
    %c0_i32 = arith.constant 0 : i32
    %c0_i32_0 = arith.constant 0 : i32
    %c0_i32_1 = arith.constant 0 : i32
    return %c0_i32, %c0_i32_0 : i32, i32
  }
  func.func @transform_5(%arg0: i32) -> (i32, i32) {
    %c0_i32 = arith.constant 0 : i32
    %c0_i32_0 = arith.constant 0 : i32
    %c0_i32_1 = arith.constant 0 : i32
    return %c0_i32, %c0_i32_0 : i32, i32
  }
  func.func @transform_6(%arg0: i32) -> (i32, i32) {
    %c0_i32 = arith.constant 0 : i32
    %c0_i32_0 = arith.constant 0 : i32
    %c0_i32_1 = arith.constant 0 : i32
    return %c0_i32, %c0_i32_0 : i32, i32
  }
  func.func @transform_7(%arg0: i32) -> (i32, i32) {
    %c0_i32 = arith.constant 0 : i32
    %c0_i32_0 = arith.constant 0 : i32
    %c0_i32_1 = arith.constant 0 : i32
    return %c0_i32, %c0_i32_0 : i32, i32
  }
  func.func @transform_8(%arg0: i32) -> (i32, i32) {
    %c0_i32 = arith.constant 0 : i32
    %c0_i32_0 = arith.constant 0 : i32
    %c0_i32_1 = arith.constant 0 : i32
    return %c0_i32, %c0_i32_0 : i32, i32
  }
  func.func @transform_9(%arg0: i32) -> (i32, i32) {
    %c0_i32 = arith.constant 0 : i32
    %c0_i32_0 = arith.constant 0 : i32
    %c0_i32_1 = arith.constant 0 : i32
    return %c0_i32, %c0_i32_0 : i32, i32
  }
  func.func @transform_10(%arg0: i32) -> (i32, i32) {
    %c0_i32 = arith.constant 0 : i32
    %c0_i32_0 = arith.constant 0 : i32
    %c0_i32_1 = arith.constant 0 : i32
    return %c0_i32, %c0_i32_0 : i32, i32
  }
  func.func @transform_11(%arg0: i32) -> (i32, i32) {
    %c0_i32 = arith.constant 0 : i32
    %c0_i32_0 = arith.constant 0 : i32
    %c0_i32_1 = arith.constant 0 : i32
    return %c0_i32, %c0_i32_0 : i32, i32
  }
  func.func @transform_12(%arg0: i32) -> (i32, i32) {
    %c0_i32 = arith.constant 0 : i32
    %c0_i32_0 = arith.constant 0 : i32
    %c0_i32_1 = arith.constant 0 : i32
    return %c0_i32, %c0_i32_0 : i32, i32
  }
  func.func @transform_13(%arg0: i32) -> (i32, i32) {
    %c0_i32 = arith.constant 0 : i32
    %c0_i32_0 = arith.constant 0 : i32
    %c0_i32_1 = arith.constant 0 : i32
    return %c0_i32, %c0_i32_0 : i32, i32
  }
  func.func @transform_14(%arg0: i32) -> (i32, i32) {
    %c0_i32 = arith.constant 0 : i32
    %c0_i32_0 = arith.constant 0 : i32
    %c0_i32_1 = arith.constant 0 : i32
    return %c0_i32, %c0_i32_0 : i32, i32
  }
  func.func @transform_15(%arg0: i32) -> (i32, i32) {
    %c0_i32 = arith.constant 0 : i32
    %c0_i32_0 = arith.constant 0 : i32
    %c0_i32_1 = arith.constant 0 : i32
    return %c0_i32, %c0_i32_0 : i32, i32
  }
  func.func @transform_16(%arg0: i32) -> (i32, i32) {
    %c0_i32 = arith.constant 0 : i32
    %c0_i32_0 = arith.constant 0 : i32
    %c0_i32_1 = arith.constant 0 : i32
    return %c0_i32, %c0_i32_0 : i32, i32
  }
  func.func @transform_17(%arg0: i32) -> (i32, i32) {
    %c0_i32 = arith.constant 0 : i32
    %c0_i32_0 = arith.constant 0 : i32
    %c0_i32_1 = arith.constant 0 : i32
    return %c0_i32, %c0_i32_0 : i32, i32
  }
  func.func @transform_18(%arg0: i32) -> (i32, i32) {
    %c0_i32 = arith.constant 0 : i32
    %c0_i32_0 = arith.constant 0 : i32
    %c0_i32_1 = arith.constant 0 : i32
    return %c0_i32, %c0_i32_0 : i32, i32
  }
  func.func @transform_19(%arg0: i32) -> (i32, i32) {
    %c0_i32 = arith.constant 0 : i32
    %c0_i32_0 = arith.constant 0 : i32
    %c0_i32_1 = arith.constant 0 : i32
    return %c0_i32, %c0_i32_0 : i32, i32
  }
  func.func @transform_20(%arg0: i32) -> (i32, i32) {
    %c0_i32 = arith.constant 0 : i32
    %c0_i32_0 = arith.constant 0 : i32
    return %arg0, %c0_i32 : i32, i32
  }
  func.func @transform_21(%arg0: i32) -> (i32, i32) {
    %c0_i32 = arith.constant 0 : i32
    %c0_i32_0 = arith.constant 0 : i32
    return %arg0, %c0_i32 : i32, i32
  }
}

module attributes {stable_mosaic.version = 11 : i64} {
  func.func @_vae_kernel(%arg0: i32, %arg1: memref<128x128xbf16, #tpu.memory_space<vmem>>, %arg2: memref<128x128xf32, #tpu.memory_space<vmem>>, %arg3: memref<128x384xbf16, #tpu.memory_space<vmem>>, %arg4: memref<1x384xf32, #tpu.memory_space<vmem>>, %arg5: memref<384x256xbf16, #tpu.memory_space<vmem>>, %arg6: memref<1x256xf32, #tpu.memory_space<vmem>>, %arg7: memref<256x128xbf16, #tpu.memory_space<vmem>>, %arg8: memref<1x128xf32, #tpu.memory_space<vmem>>, %arg9: memref<128x128xbf16, #tpu.memory_space<vmem>>, %arg10: memref<1x128xf32, #tpu.memory_space<vmem>>, %arg11: memref<128x256xbf16, #tpu.memory_space<vmem>>, %arg12: memref<1x256xf32, #tpu.memory_space<vmem>>, %arg13: memref<128x128xbf16, #tpu.memory_space<vmem>>, %arg14: memref<1x128xf32, #tpu.memory_space<vmem>>, %arg15: memref<128x256xbf16, #tpu.memory_space<vmem>>, %arg16: memref<1x256xf32, #tpu.memory_space<vmem>>, %arg17: memref<256x384xbf16, #tpu.memory_space<vmem>>, %arg18: memref<1x384xf32, #tpu.memory_space<vmem>>, %arg19: memref<384x128xbf16, #tpu.memory_space<vmem>>, %arg20: memref<1x128xf32, #tpu.memory_space<vmem>>, %arg21: memref<128x128xf32, #tpu.memory_space<vmem>>, %arg22: memref<128x256xf32, #tpu.memory_space<vmem>>) attributes {dimension_semantics = [#tpu.dimension_semantics<parallel>], iteration_bounds = array<i64: 2>, scalar_prefetch = 0 : i64, scratch_operands = 0 : i64, tpu.core_type = #tpu.core_type<tc>, window_params = [{transform_indices = @transform_0, window_bounds = array<i64: 128, 128>}, {transform_indices = @transform_1, window_bounds = array<i64: 128, 128>}, {pipeline_mode = #tpu.pipeline_mode<synchronous>, transform_indices = @transform_2, window_bounds = array<i64: 128, 384>}, {pipeline_mode = #tpu.pipeline_mode<synchronous>, transform_indices = @transform_3, window_bounds = array<i64: 1, 384>}, {pipeline_mode = #tpu.pipeline_mode<synchronous>, transform_indices = @transform_4, window_bounds = array<i64: 384, 256>}, {pipeline_mode = #tpu.pipeline_mode<synchronous>, transform_indices = @transform_5, window_bounds = array<i64: 1, 256>}, {pipeline_mode = #tpu.pipeline_mode<synchronous>, transform_indices = @transform_6, window_bounds = array<i64: 256, 128>}, {pipeline_mode = #tpu.pipeline_mode<synchronous>, transform_indices = @transform_7, window_bounds = array<i64: 1, 128>}, {pipeline_mode = #tpu.pipeline_mode<synchronous>, transform_indices = @transform_8, window_bounds = array<i64: 128, 128>}, {pipeline_mode = #tpu.pipeline_mode<synchronous>, transform_indices = @transform_9, window_bounds = array<i64: 1, 128>}, {pipeline_mode = #tpu.pipeline_mode<synchronous>, transform_indices = @transform_10, window_bounds = array<i64: 128, 256>}, {pipeline_mode = #tpu.pipeline_mode<synchronous>, transform_indices = @transform_11, window_bounds = array<i64: 1, 256>}, {pipeline_mode = #tpu.pipeline_mode<synchronous>, transform_indices = @transform_12, window_bounds = array<i64: 128, 128>}, {pipeline_mode = #tpu.pipeline_mode<synchronous>, transform_indices = @transform_13, window_bounds = array<i64: 1, 128>}, {pipeline_mode = #tpu.pipeline_mode<synchronous>, transform_indices = @transform_14, window_bounds = array<i64: 128, 256>}, {pipeline_mode = #tpu.pipeline_mode<synchronous>, transform_indices = @transform_15, window_bounds = array<i64: 1, 256>}, {pipeline_mode = #tpu.pipeline_mode<synchronous>, transform_indices = @transform_16, window_bounds = array<i64: 256, 384>}, {pipeline_mode = #tpu.pipeline_mode<synchronous>, transform_indices = @transform_17, window_bounds = array<i64: 1, 384>}, {pipeline_mode = #tpu.pipeline_mode<synchronous>, transform_indices = @transform_18, window_bounds = array<i64: 384, 128>}, {pipeline_mode = #tpu.pipeline_mode<synchronous>, transform_indices = @transform_19, window_bounds = array<i64: 1, 128>}, {transform_indices = @transform_20, window_bounds = array<i64: 128, 128>}, {transform_indices = @transform_21, window_bounds = array<i64: 128, 256>}]} {
    %c0 = arith.constant 0 : index
    %c0_0 = arith.constant 0 : index
    %0 = vector.load %arg1[%c0, %c0_0] : memref<128x128xbf16, #tpu.memory_space<vmem>>, vector<128x128xbf16>
    %c0_1 = arith.constant 0 : index
    %c0_2 = arith.constant 0 : index
    %1 = vector.load %arg3[%c0_1, %c0_2] : memref<128x384xbf16, #tpu.memory_space<vmem>>, vector<128x384xbf16>
    %cst = arith.constant dense<0.000000e+00> : vector<128x384xf32>
    %2 = tpu.matmul %0, %1, %cst {dimension_numbers = #tpu.dot_dimension_numbers<[1], [0], [0], [1], [0, 0, 1, 1], [], []>} : vector<128x128xbf16>, vector<128x384xbf16>, vector<128x384xf32> -> vector<128x384xf32>
    %c0_3 = arith.constant 0 : index
    %c0_4 = arith.constant 0 : index
    %3 = vector.load %arg4[%c0_3, %c0_4] : memref<1x384xf32, #tpu.memory_space<vmem>>, vector<1x384xf32>
    %4 = vector.broadcast %3 : vector<1x384xf32> to vector<128x384xf32>
    %5 = arith.addf %2, %4 : vector<128x384xf32>
    %6 = math.tanh %5 : vector<128x384xf32>
    %7 = arith.truncf %6 : vector<128x384xf32> to vector<128x384xbf16>
    %c0_5 = arith.constant 0 : index
    %c0_6 = arith.constant 0 : index
    %8 = vector.load %arg5[%c0_5, %c0_6] : memref<384x256xbf16, #tpu.memory_space<vmem>>, vector<384x256xbf16>
    %cst_7 = arith.constant dense<0.000000e+00> : vector<128x256xf32>
    %9 = tpu.matmul %7, %8, %cst_7 {dimension_numbers = #tpu.dot_dimension_numbers<[1], [0], [0], [1], [0, 0, 1, 1], [], []>} : vector<128x384xbf16>, vector<384x256xbf16>, vector<128x256xf32> -> vector<128x256xf32>
    %c0_8 = arith.constant 0 : index
    %c0_9 = arith.constant 0 : index
    %10 = vector.load %arg6[%c0_8, %c0_9] : memref<1x256xf32, #tpu.memory_space<vmem>>, vector<1x256xf32>
    %11 = vector.broadcast %10 : vector<1x256xf32> to vector<128x256xf32>
    %12 = arith.addf %9, %11 : vector<128x256xf32>
    %13 = math.tanh %12 : vector<128x256xf32>
    %14 = arith.truncf %13 : vector<128x256xf32> to vector<128x256xbf16>
    %c0_10 = arith.constant 0 : index
    %c0_11 = arith.constant 0 : index
    %15 = vector.load %arg7[%c0_10, %c0_11] : memref<256x128xbf16, #tpu.memory_space<vmem>>, vector<256x128xbf16>
    %cst_12 = arith.constant dense<0.000000e+00> : vector<128x128xf32>
    %16 = tpu.matmul %14, %15, %cst_12 {dimension_numbers = #tpu.dot_dimension_numbers<[1], [0], [0], [1], [0, 0, 1, 1], [], []>} : vector<128x256xbf16>, vector<256x128xbf16>, vector<128x128xf32> -> vector<128x128xf32>
    %c0_13 = arith.constant 0 : index
    %c0_14 = arith.constant 0 : index
    %17 = vector.load %arg8[%c0_13, %c0_14] : memref<1x128xf32, #tpu.memory_space<vmem>>, vector<1x128xf32>
    %18 = vector.broadcast %17 : vector<1x128xf32> to vector<128x128xf32>
    %19 = arith.addf %16, %18 : vector<128x128xf32>
    %20 = math.tanh %19 : vector<128x128xf32>
    %21 = arith.truncf %20 : vector<128x128xf32> to vector<128x128xbf16>
    %c0_15 = arith.constant 0 : index
    %c0_16 = arith.constant 0 : index
    %22 = vector.load %arg9[%c0_15, %c0_16] : memref<128x128xbf16, #tpu.memory_space<vmem>>, vector<128x128xbf16>
    %cst_17 = arith.constant dense<0.000000e+00> : vector<128x128xf32>
    %23 = tpu.matmul %21, %22, %cst_17 {dimension_numbers = #tpu.dot_dimension_numbers<[1], [0], [0], [1], [0, 0, 1, 1], [], []>} : vector<128x128xbf16>, vector<128x128xbf16>, vector<128x128xf32> -> vector<128x128xf32>
    %c0_18 = arith.constant 0 : index
    %c0_19 = arith.constant 0 : index
    %24 = vector.load %arg10[%c0_18, %c0_19] : memref<1x128xf32, #tpu.memory_space<vmem>>, vector<1x128xf32>
    %25 = vector.broadcast %24 : vector<1x128xf32> to vector<128x128xf32>
    %26 = arith.addf %23, %25 : vector<128x128xf32>
    %27 = math.tanh %26 : vector<128x128xf32>
    %28 = arith.truncf %27 : vector<128x128xf32> to vector<128x128xbf16>
    %c0_20 = arith.constant 0 : index
    %c0_21 = arith.constant 0 : index
    %29 = vector.load %arg11[%c0_20, %c0_21] : memref<128x256xbf16, #tpu.memory_space<vmem>>, vector<128x256xbf16>
    %cst_22 = arith.constant dense<0.000000e+00> : vector<128x256xf32>
    %30 = tpu.matmul %28, %29, %cst_22 {dimension_numbers = #tpu.dot_dimension_numbers<[1], [0], [0], [1], [0, 0, 1, 1], [], []>} : vector<128x128xbf16>, vector<128x256xbf16>, vector<128x256xf32> -> vector<128x256xf32>
    %c0_23 = arith.constant 0 : index
    %c0_24 = arith.constant 0 : index
    %31 = vector.load %arg12[%c0_23, %c0_24] : memref<1x256xf32, #tpu.memory_space<vmem>>, vector<1x256xf32>
    %32 = vector.broadcast %31 : vector<1x256xf32> to vector<128x256xf32>
    %33 = arith.addf %30, %32 : vector<128x256xf32>
    %c0_25 = arith.constant 0 : index
    %c0_26 = arith.constant 0 : index
    %34 = vector.load %arg22[%c0_25, %c0_26] : memref<128x256xf32, #tpu.memory_space<vmem>>, vector<128x256xf32>
    tpu.vector_store %arg22[%c0_25, %c0_26], %33 {strides = array<i32>} : memref<128x256xf32, #tpu.memory_space<vmem>>, vector<128x256xf32>,
    %35 = vector.extract_strided_slice %33 {offsets = [0, 0], sizes = [128, 128], strides = [1, 1]} : vector<128x256xf32> to vector<128x128xf32>
    %36 = vector.extract_strided_slice %33 {offsets = [0, 128], sizes = [128, 128], strides = [1, 1]} : vector<128x256xf32> to vector<128x128xf32>
    %c0_27 = arith.constant 0 : index
    %c0_28 = arith.constant 0 : index
    %37 = vector.load %arg2[%c0_27, %c0_28] : memref<128x128xf32, #tpu.memory_space<vmem>>, vector<128x128xf32>
    %cst_29 = arith.constant 5.000000e-01 : f32
    %38 = vector.broadcast %cst_29 : f32 to vector<128x128xf32>
    %39 = arith.mulf %38, %36 : vector<128x128xf32>
    %40 = math.exp %39 : vector<128x128xf32>
    %41 = arith.mulf %37, %40 : vector<128x128xf32>
    %42 = arith.addf %41, %35 : vector<128x128xf32>
    %43 = arith.truncf %42 : vector<128x128xf32> to vector<128x128xbf16>
    %c0_30 = arith.constant 0 : index
    %c0_31 = arith.constant 0 : index
    %44 = vector.load %arg13[%c0_30, %c0_31] : memref<128x128xbf16, #tpu.memory_space<vmem>>, vector<128x128xbf16>
    %cst_32 = arith.constant dense<0.000000e+00> : vector<128x128xf32>
    %45 = tpu.matmul %43, %44, %cst_32 {dimension_numbers = #tpu.dot_dimension_numbers<[1], [0], [0], [1], [0, 0, 1, 1], [], []>} : vector<128x128xbf16>, vector<128x128xbf16>, vector<128x128xf32> -> vector<128x128xf32>
    %c0_33 = arith.constant 0 : index
    %c0_34 = arith.constant 0 : index
    %46 = vector.load %arg14[%c0_33, %c0_34] : memref<1x128xf32, #tpu.memory_space<vmem>>, vector<1x128xf32>
    %47 = vector.broadcast %46 : vector<1x128xf32> to vector<128x128xf32>
    %48 = arith.addf %45, %47 : vector<128x128xf32>
    %49 = math.tanh %48 : vector<128x128xf32>
    %50 = arith.truncf %49 : vector<128x128xf32> to vector<128x128xbf16>
    %c0_35 = arith.constant 0 : index
    %c0_36 = arith.constant 0 : index
    %51 = vector.load %arg15[%c0_35, %c0_36] : memref<128x256xbf16, #tpu.memory_space<vmem>>, vector<128x256xbf16>
    %cst_37 = arith.constant dense<0.000000e+00> : vector<128x256xf32>
    %52 = tpu.matmul %50, %51, %cst_37 {dimension_numbers = #tpu.dot_dimension_numbers<[1], [0], [0], [1], [0, 0, 1, 1], [], []>} : vector<128x128xbf16>, vector<128x256xbf16>, vector<128x256xf32> -> vector<128x256xf32>
    %c0_38 = arith.constant 0 : index
    %c0_39 = arith.constant 0 : index
    %53 = vector.load %arg16[%c0_38, %c0_39] : memref<1x256xf32, #tpu.memory_space<vmem>>, vector<1x256xf32>
    %54 = vector.broadcast %53 : vector<1x256xf32> to vector<128x256xf32>
    %55 = arith.addf %52, %54 : vector<128x256xf32>
    %56 = math.tanh %55 : vector<128x256xf32>
    %57 = arith.truncf %56 : vector<128x256xf32> to vector<128x256xbf16>
    %c0_40 = arith.constant 0 : index
    %c0_41 = arith.constant 0 : index
    %58 = vector.load %arg17[%c0_40, %c0_41] : memref<256x384xbf16, #tpu.memory_space<vmem>>, vector<256x384xbf16>
    %cst_42 = arith.constant dense<0.000000e+00> : vector<128x384xf32>
    %59 = tpu.matmul %57, %58, %cst_42 {dimension_numbers = #tpu.dot_dimension_numbers<[1], [0], [0], [1], [0, 0, 1, 1], [], []>} : vector<128x256xbf16>, vector<256x384xbf16>, vector<128x384xf32> -> vector<128x384xf32>
    %c0_43 = arith.constant 0 : index
    %c0_44 = arith.constant 0 : index
    %60 = vector.load %arg18[%c0_43, %c0_44] : memref<1x384xf32, #tpu.memory_space<vmem>>, vector<1x384xf32>
    %61 = vector.broadcast %60 : vector<1x384xf32> to vector<128x384xf32>
    %62 = arith.addf %59, %61 : vector<128x384xf32>
    %63 = math.tanh %62 : vector<128x384xf32>
    %64 = arith.truncf %63 : vector<128x384xf32> to vector<128x384xbf16>
    %c0_45 = arith.constant 0 : index
    %c0_46 = arith.constant 0 : index
    %65 = vector.load %arg19[%c0_45, %c0_46] : memref<384x128xbf16, #tpu.memory_space<vmem>>, vector<384x128xbf16>
    %cst_47 = arith.constant dense<0.000000e+00> : vector<128x128xf32>
    %66 = tpu.matmul %64, %65, %cst_47 {dimension_numbers = #tpu.dot_dimension_numbers<[1], [0], [0], [1], [0, 0, 1, 1], [], []>} : vector<128x384xbf16>, vector<384x128xbf16>, vector<128x128xf32> -> vector<128x128xf32>
    %c0_48 = arith.constant 0 : index
    %c0_49 = arith.constant 0 : index
    %67 = vector.load %arg20[%c0_48, %c0_49] : memref<1x128xf32, #tpu.memory_space<vmem>>, vector<1x128xf32>
    %68 = vector.broadcast %67 : vector<1x128xf32> to vector<128x128xf32>
    %69 = arith.addf %66, %68 : vector<128x128xf32>
    %70 = math.tanh %69 : vector<128x128xf32>
    %c0_50 = arith.constant 0 : index
    %c0_51 = arith.constant 0 : index
    %71 = vector.load %arg21[%c0_50, %c0_51] : memref<128x128xf32, #tpu.memory_space<vmem>>, vector<128x128xf32>
    tpu.vector_store %arg21[%c0_50, %c0_51], %70 {strides = array<i32>} : memref<128x128xf32, #tpu.memory_space<vmem>>, vector<128x128xf32>,
    return
  }
  func.func @transform_0(%arg0: i32) -> (i32, i32) {
    %c0_i32 = arith.constant 0 : i32
    %c0_i32_0 = arith.constant 0 : i32
    return %arg0, %c0_i32 : i32, i32
  }
  func.func @transform_1(%arg0: i32) -> (i32, i32) {
    %c0_i32 = arith.constant 0 : i32
    %c0_i32_0 = arith.constant 0 : i32
    return %arg0, %c0_i32 : i32, i32
  }
  func.func @transform_2(%arg0: i32) -> (i32, i32) {
    %c0_i32 = arith.constant 0 : i32
    %c0_i32_0 = arith.constant 0 : i32
    %c0_i32_1 = arith.constant 0 : i32
    return %c0_i32, %c0_i32_0 : i32, i32
  }
  func.func @transform_3(%arg0: i32) -> (i32, i32) {
    %c0_i32 = arith.constant 0 : i32
    %c0_i32_0 = arith.constant 0 : i32
    %c0_i32_1 = arith.constant 0 : i32
    return %c0_i32, %c0_i32_0 : i32, i32
  }
  func.func @transform_4(%arg0: i32) -> (i32, i32) {
    %c0_i32 = arith.constant 0 : i32
    %c0_i32_0 = arith.constant 0 : i32
    %c0_i32_1 = arith.constant 0 : i32
    return %c0_i32, %c0_i32_0 : i32, i32
  }
  func.func @transform_5(%arg0: i32) -> (i32, i32) {
    %c0_i32 = arith.constant 0 : i32
    %c0_i32_0 = arith.constant 0 : i32
    %c0_i32_1 = arith.constant 0 : i32
    return %c0_i32, %c0_i32_0 : i32, i32
  }
  func.func @transform_6(%arg0: i32) -> (i32, i32) {
    %c0_i32 = arith.constant 0 : i32
    %c0_i32_0 = arith.constant 0 : i32
    %c0_i32_1 = arith.constant 0 : i32
    return %c0_i32, %c0_i32_0 : i32, i32
  }
  func.func @transform_7(%arg0: i32) -> (i32, i32) {
    %c0_i32 = arith.constant 0 : i32
    %c0_i32_0 = arith.constant 0 : i32
    %c0_i32_1 = arith.constant 0 : i32
    return %c0_i32, %c0_i32_0 : i32, i32
  }
  func.func @transform_8(%arg0: i32) -> (i32, i32) {
    %c0_i32 = arith.constant 0 : i32
    %c0_i32_0 = arith.constant 0 : i32
    %c0_i32_1 = arith.constant 0 : i32
    return %c0_i32, %c0_i32_0 : i32, i32
  }
  func.func @transform_9(%arg0: i32) -> (i32, i32) {
    %c0_i32 = arith.constant 0 : i32
    %c0_i32_0 = arith.constant 0 : i32
    %c0_i32_1 = arith.constant 0 : i32
    return %c0_i32, %c0_i32_0 : i32, i32
  }
  func.func @transform_10(%arg0: i32) -> (i32, i32) {
    %c0_i32 = arith.constant 0 : i32
    %c0_i32_0 = arith.constant 0 : i32
    %c0_i32_1 = arith.constant 0 : i32
    return %c0_i32, %c0_i32_0 : i32, i32
  }
  func.func @transform_11(%arg0: i32) -> (i32, i32) {
    %c0_i32 = arith.constant 0 : i32
    %c0_i32_0 = arith.constant 0 : i32
    %c0_i32_1 = arith.constant 0 : i32
    return %c0_i32, %c0_i32_0 : i32, i32
  }
  func.func @transform_12(%arg0: i32) -> (i32, i32) {
    %c0_i32 = arith.constant 0 : i32
    %c0_i32_0 = arith.constant 0 : i32
    %c0_i32_1 = arith.constant 0 : i32
    return %c0_i32, %c0_i32_0 : i32, i32
  }
  func.func @transform_13(%arg0: i32) -> (i32, i32) {
    %c0_i32 = arith.constant 0 : i32
    %c0_i32_0 = arith.constant 0 : i32
    %c0_i32_1 = arith.constant 0 : i32
    return %c0_i32, %c0_i32_0 : i32, i32
  }
  func.func @transform_14(%arg0: i32) -> (i32, i32) {
    %c0_i32 = arith.constant 0 : i32
    %c0_i32_0 = arith.constant 0 : i32
    %c0_i32_1 = arith.constant 0 : i32
    return %c0_i32, %c0_i32_0 : i32, i32
  }
  func.func @transform_15(%arg0: i32) -> (i32, i32) {
    %c0_i32 = arith.constant 0 : i32
    %c0_i32_0 = arith.constant 0 : i32
    %c0_i32_1 = arith.constant 0 : i32
    return %c0_i32, %c0_i32_0 : i32, i32
  }
  func.func @transform_16(%arg0: i32) -> (i32, i32) {
    %c0_i32 = arith.constant 0 : i32
    %c0_i32_0 = arith.constant 0 : i32
    %c0_i32_1 = arith.constant 0 : i32
    return %c0_i32, %c0_i32_0 : i32, i32
  }
  func.func @transform_17(%arg0: i32) -> (i32, i32) {
    %c0_i32 = arith.constant 0 : i32
    %c0_i32_0 = arith.constant 0 : i32
    %c0_i32_1 = arith.constant 0 : i32
    return %c0_i32, %c0_i32_0 : i32, i32
  }
  func.func @transform_18(%arg0: i32) -> (i32, i32) {
    %c0_i32 = arith.constant 0 : i32
    %c0_i32_0 = arith.constant 0 : i32
    %c0_i32_1 = arith.constant 0 : i32
    return %c0_i32, %c0_i32_0 : i32, i32
  }
  func.func @transform_19(%arg0: i32) -> (i32, i32) {
    %c0_i32 = arith.constant 0 : i32
    %c0_i32_0 = arith.constant 0 : i32
    %c0_i32_1 = arith.constant 0 : i32
    return %c0_i32, %c0_i32_0 : i32, i32
  }
  func.func @transform_20(%arg0: i32) -> (i32, i32) {
    %c0_i32 = arith.constant 0 : i32
    %c0_i32_0 = arith.constant 0 : i32
    return %arg0, %c0_i32 : i32, i32
  }
  func.func @transform_21(%arg0: i32) -> (i32, i32) {
    %c0_i32 = arith.constant 0 : i32
    %c0_i32_0 = arith.constant 0 : i32
    return %arg0, %c0_i32 : i32, i32
  }
}

</mosaic_0001>

<bundles_post_ra>
// kernel: tpu_custom_call.1
= control target key start
LH: loop header
LB: loop body
LE: loop exit
PB: predicated region body
PF: predicated region fallthrough
CT: control target
= control target key end

     0   :  { %s7774_s0 = inlined_call_operand.hbm [shape: bf16[256,128], index: 0, kind: input, shape index: {}]   ;;  %s7775_s1 = inlined_call_operand.hbm [shape: f32[256,128], index: 1, kind: input, shape index: {}]   ;;  %s7776_s2 = inlined_call_operand.hbm [shape: bf16[128,384], index: 2, kind: input, shape index: {}]   ;;  %s7777_s3 = inlined_call_operand.vmem [shape: f32[1,384], index: 3, kind: input, shape index: {}]   ;;  %s7778_s4 = inlined_call_operand.hbm [shape: bf16[384,256], index: 4, kind: input, shape index: {}]   ;;  %s7779_s5 = inlined_call_operand.vmem [shape: f32[1,256], index: 5, kind: input, shape index: {}]   ;;  %s7780_s6 = inlined_call_operand.hbm [shape: bf16[256,128], index: 6, kind: input, shape index: {}]   ;;  %s7781_s7 = inlined_call_operand.vmem [shape: f32[1,128], index: 7, kind: input, shape index: {}]   ;;  %s7782_s8 = inlined_call_operand.hbm [shape: bf16[128,128], index: 8, kind: input, shape index: {}]   ;;  %s7783_s9 = inlined_call_operand.vmem [shape: f32[1,128], index: 9, kind: input, shape index: {}]   ;;  %s7784_s10 = inlined_call_operand.hbm [shape: bf16[128,256], index: 10, kind: input, shape index: {}]   ;;  %s7785_s11 = inlined_call_operand.vmem [shape: f32[1,256], index: 11, kind: input, shape index: {}]   ;;  %s7786_s12 = inlined_call_operand.hbm [shape: bf16[128,128], index: 12, kind: input, shape index: {}]   ;;  %s7787_s13 = inlined_call_operand.vmem [shape: f32[1,128], index: 13, kind: input, shape index: {}]   ;;  %s7788_s14 = inlined_call_operand.hbm [shape: bf16[128,256], index: 14, kind: input, shape index: {}]   ;;  %s7789_s15 = inlined_call_operand.vmem [shape: f32[1,256], index: 15, kind: input, shape index: {}]   ;;  %s7790_s16 = inlined_call_operand.hbm [shape: bf16[256,384], index: 16, kind: input, shape index: {}]   ;;  %s7791_s17 = inlined_call_operand.vmem [shape: f32[1,384], index: 17, kind: input, shape index: {}]   ;;  %s7792_s18 = inlined_call_operand.hbm [shape: bf16[384,128], index: 18, kind: input, shape index: {}]   ;;  %s7793_s19 = inlined_call_operand.vmem [shape: f32[1,128], index: 19, kind: input, shape index: {}]   ;;  %s7794_s20 = inlined_call_operand.hbm [shape: f32[256,128], index: 20, kind: output, shape index: {0}]   ;;  %s7795_s21 = inlined_call_operand.hbm [shape: f32[256,256], index: 21, kind: output, shape index: {1}]  }
   0x1   :  { %7818 = sst [smem:[#allocation33_spill]] %s7774_s0 }
   0x2   :  { %7819 = sst [smem:[#allocation34_spill]] %s7775_s1 }
   0x3   :  { %7820 = sst [smem:[#allocation35_spill]] %s7776_s2 }
   0x4   :  { %7821 = sst [smem:[#allocation36_spill]] %s7777_s3 }
   0x5   :  { %7822 = sst [smem:[#allocation37_spill]] %s7778_s4 }
   0x6   :  { %7823 = sst [smem:[#allocation38_spill]] %s7779_s5 }
   0x7   :  { %7824 = sst [smem:[#allocation39_spill]] %s7780_s6 }
   0x8   :  { %7825 = sst [smem:[#allocation40_spill]] %s7782_s8 }
   0x9   :  { %7826 = sst [smem:[#allocation41_spill]] %s7783_s9 }
   0xa   :  { %7827 = sst [smem:[#allocation42_spill]] %s7784_s10 }
   0xb   :  { %7828 = sst [smem:[#allocation43_spill]] %s7785_s11 }
   0xc   :  { %7829 = sst [smem:[#allocation44_spill]] %s7786_s12 }
   0xd   :  { %7830 = sst [smem:[#allocation45_spill]] %s7787_s13 }
   0xe   :  { %7831 = sst [smem:[#allocation46_spill]] %s7788_s14 }
   0xf   :  { %7832 = sst [smem:[#allocation47_spill]] %s7789_s15 }
  0x10   :  { %7833 = sst [smem:[#allocation48_spill]] %s7790_s16 }
  0x11   :  { %7834 = sst [smem:[#allocation49_spill]] %s7791_s17 }
  0x12   :  { %7835 = sst [smem:[#allocation50_spill]] %s7792_s18 }
  0x13   :  { %7836 = sst [smem:[#allocation51_spill]] %s7793_s19 }
  0x14   :  { %7837 = sst [smem:[#allocation52_spill]] %s7794_s20 }
  0x15   :  { %7838 = sst [smem:[#allocation53_spill]] %s7795_s21 }
  0x16   :  { %27 = vsyncpa [#allocation3], 0 }
  0x17   :  { %29 = vsyncpa [#allocation3 + $0x1], 0 }
  0x18   :  { %30 = vsyncpa [#allocation6], 0 }
  0x19   :  { %32 = vsyncpa [#allocation6 + $0x1], 0 }
  0x1a   :  { %33 = vsyncpa [#allocation9], 0 }
  0x1b   :  { %34 = vsyncpa [#allocation12], 0 }
  0x1c   :  { %35 = vsyncpa [#allocation15], 0 }
  0x1d   :  { %36 = vsyncpa [#allocation18], 0 }
  0x1e   :  { %37 = vsyncpa [#allocation4], 0 }
  0x1f   :  { %39 = vsyncpa [#allocation4 + $0x1], 0 }
  0x20   :  { %40 = vsyncpa [#allocation22], 0 }
  0x21   :  { %42 = vsyncpa [#allocation22 + $0x1], 0  ;;  %s6719_s2 = smov 0   ;;  %s6721_s25 = smov 0  }
  0x22   :  { %s6723_s26 = smov 0   ;;  %s6725_s27 = smov 0  }
  0x23 LB: > { %s6585_s3 = smov [#allocation7]   ;;  %s6740_s29 = sadd.s32 4294967295, %s6583_s27   ;;  %s6583_s27 = sphi %s6725_s27, %s7894_s27   ;;  %s6579_s26 = sphi %s6723_s26, %s7893_s26   ;;  %s6575_s25 = sphi %s6721_s25, %s7892_s25   ;;  %s6571_s2 = sphi %s6719_s2, %s7891_s2  }
  0x24   : > { %s547_s28 = sshll.u32 %s6585_s3, 4  ;;  %p4518_p0 = scmp.ge.s32.totalorder %s6583_s27, 1  ;;  %s6745_s28 = int_to_ptr.vmem [resolvable:$true] %s547_s28 }
  0x25   : > { %p7805_p1 = scmp.eq.s32.totalorder %s6740_s29, 0  ;;  %p535_p2 = scmp.lt.s32.totalorder %s6583_s27, 3 }
  0x26   : > { %s6586_s4 = smov [#allocation8]   ;;  %s7841_s1 = sld [smem:[#allocation35_spill]] }
  0x27   : > { %p6747_p3 = pnand %p4518_p0, %p535_p2  ;;  %s563_s30 = sshll.u32 %s6586_s4, 4  ;;  %s6760_s30 = int_to_ptr.vmem [resolvable:$true] %s563_s30 }
  0x29   : > { %s7839_s0 = scalar_select %p6747_p3, 1, 0 }
  0x2a   : > { %p5275_p5 = pneg %p6747_p3 }
  0x2c   : > { %p6756_p6 = pnand %p5275_p5, %p7805_p1  ;;  %s6149_s24 = scalar_lea.hbm %s7841_s1, 3072 }
  0x2d   : > { %p6150_p7 = scmp.ne.s32.totalorder %s7841_s1, %s6149_s24  ;;  %p6156_p11 = scmp.lt.u32.totalorder %s6149_s24, %s7841_s1 }
  0x2e   : > { %p6770_p8 = pneg %p6756_p6 }
  0x30   : > { %p6152_p9 = pnand %p6770_p8, %p6150_p7 }
  0x32   : > { %p6153_p10 = pneg %p6152_p9 }
  0x34   : > { %p6158_p12 = pnand %p6156_p11, %p6153_p10 }
  0x36   : > { %6161 = shalt.err (!%p6158_p12)
}
  0x37   : > { %s6162_s20 = scalar_lea.vmem %s6745_s28, 3072  ;;  %p6170_p5 = scmp.lt.s32.totalorder %s6745_s28, %s6745_s28 }
  0x38   : > { %p6163_p13 = scmp.ne.s32.totalorder %s6745_s28, %s6162_s20  ;;  %p6171_p4 = scmp.lt.s32.totalorder %s6162_s20, %s6162_s20 }
  0x3a   : > { %p6165_p0 = pnand %p6163_p13, %p6770_p8  ;;  %p6172_p7 = por %p6171_p4, %p6170_p5 }
  0x3c   : > { %p6166_p2 = pneg %p6165_p0 }
  0x3e   : > { %p6173_p9 = pnand %p6172_p7, %p6166_p2 }
  0x40   : > { %6176 = shalt.err (!%p6173_p9)
}
  0x41   : > { %s7802_s22 = smov 192   ;;  %s7803_s21 = smov 12  }
  0x42   : > { %5278 = dma.hbm_to_vmem [thread:$0]  (!%p6756_p6), %s7841_s1, 3072, %s6745_s28, [#allocation6], %s7802_s22, %s7802_s22, %s7803_s21  }
  0x43   : > { %s7843_s17 = sld [smem:[#allocation37_spill]] }
  0x49   : > { %s6177_s20 = scalar_lea.hbm %s7843_s17, 6144 }
  0x4a   : > { %p6178_p4 = scmp.ne.s32.totalorder %s7843_s17, %s6177_s20  ;;  %p6184_p12 = scmp.lt.u32.totalorder %s6177_s20, %s7843_s17 }
  0x4c   : > { %p6180_p10 = pnand %p6178_p4, %p6770_p8 }
  0x4e   : > { %p6181_p11 = pneg %p6180_p10 }
  0x50   : > { %p6186_p13 = pnand %p6184_p12, %p6181_p11 }
  0x52   : > { %6189 = shalt.err (!%p6186_p13)
}
  0x53   : > { %s6190_s28 = scalar_lea.vmem %s6760_s30, 6144  ;;  %p6198_p7 = scmp.lt.s32.totalorder %s6760_s30, %s6760_s30 }
  0x54   : > { %p6191_p0 = scmp.ne.s32.totalorder %s6760_s30, %s6190_s28  ;;  %p6199_p9 = scmp.lt.s32.totalorder %s6190_s28, %s6190_s28 }
  0x56   : > { %p6193_p2 = pnand %p6191_p0, %p6770_p8  ;;  %p6200_p4 = por %p6199_p9, %p6198_p7 }
  0x58   : > { %p6194_p5 = pneg %p6193_p2 }
  0x5a   : > { %p6201_p10 = pnand %p6200_p4, %p6194_p5 }
  0x5c   : > { %6204 = shalt.err (!%p6201_p10)
}
  0x5d   : > { %s7807_s13 = smov 128   ;;  %s7809_s9 = smov 8  }
  0x5e   : > { %5281 = dma.hbm_to_vmem [thread:$0]  (!%p6756_p6), %s7843_s17, 6144, %s6760_s30, [#allocation9], %s7807_s13, %s7807_s13, %s7809_s9  }
  0x5f   : > { %s6591_s23 = smov [#allocation11]   ;;  %s6592_s3 = smov [#allocation14]  }
  0x60   : > { %s595_s24 = sshll.u32 %s6591_s23, 4  ;;  %s627_s4 = sshll.u32 %s6592_s3, 4  ;;  %s596_s24 = int_to_ptr.vmem [resolvable:$true] %s595_s24  ;;  %s6820_s4 = int_to_ptr.vmem [resolvable:$true] %s627_s4 }
  0x61   : > { %s7844_s8 = sld [smem:[#allocation40_spill]] }
  0x67   : > { %s6205_s22 = scalar_lea.hbm %s7844_s8, 1024 }
  0x68   : > { %p6206_p11 = scmp.ne.s32.totalorder %s7844_s8, %s6205_s22  ;;  %p6212_p0 = scmp.lt.u32.totalorder %s6205_s22, %s7844_s8 }
  0x6a   : > { %p6208_p12 = pnand %p6206_p11, %p6770_p8 }
  0x6c   : > { %p6209_p13 = pneg %p6208_p12 }
  0x6e   : > { %p6214_p2 = pnand %p6212_p0, %p6209_p13 }
  0x70   : > { %6217 = shalt.err (!%p6214_p2)
}
  0x71   : > { %s6218_s15 = scalar_lea.vmem %s596_s24, 1024  ;;  %p6226_p4 = scmp.lt.s32.totalorder %s596_s24, %s596_s24 }
  0x72   : > { %p6219_p5 = scmp.ne.s32.totalorder %s596_s24, %s6218_s15  ;;  %p6227_p10 = scmp.lt.s32.totalorder %s6218_s15, %s6218_s15 }
  0x74   : > { %p6221_p7 = pnand %p6219_p5, %p6770_p8  ;;  %p6228_p1 = por %p6227_p10, %p6226_p4 }
  0x76   : > { %p6222_p9 = pneg %p6221_p7 }
  0x78   : > { %p6229_p3 = pnand %p6228_p1, %p6222_p9 }
  0x7a   : > { %6232 = shalt.err (!%p6229_p3)
}
  0x7b   : > { %s7811_s1 = smov 64   ;;  %s7813_s21 = smov 4  }
  0x7c   : > { %5287 = dma.hbm_to_vmem [thread:$0]  (!%p6756_p6), %s7844_s8, 1024, %s596_s24, [#allocation12], %s7811_s1, %s7811_s1, %s7813_s21  }
  0x7d   : > { %s7845_s12 = sld [smem:[#allocation44_spill]] }
  0x83   : > { %s6233_s28 = scalar_lea.hbm %s7845_s12, 1024 }
  0x84   : > { %p6234_p1 = scmp.ne.s32.totalorder %s7845_s12, %s6233_s28  ;;  %p6240_p12 = scmp.lt.u32.totalorder %s6233_s28, %s7845_s12 }
  0x86   : > { %p6236_p3 = pnand %p6234_p1, %p6770_p8 }
  0x88   : > { %p6237_p11 = pneg %p6236_p3 }
  0x8a   : > { %p6242_p13 = pnand %p6240_p12, %p6237_p11 }
  0x8c   : > { %6245 = shalt.err (!%p6242_p13)
}
  0x8d   : > { %s6246_s24 = scalar_lea.vmem %s6820_s4, 1024  ;;  %p6254_p7 = scmp.lt.s32.totalorder %s6820_s4, %s6820_s4 }
  0x8e   : > { %p6247_p0 = scmp.ne.s32.totalorder %s6820_s4, %s6246_s24  ;;  %p6255_p9 = scmp.lt.s32.totalorder %s6246_s24, %s6246_s24 }
  0x90   : > { %p6249_p2 = pnand %p6247_p0, %p6770_p8  ;;  %p6256_p4 = por %p6255_p9, %p6254_p7 }
  0x92   : > { %p6250_p5 = pneg %p6249_p2 }
  0x94   : > { %p6257_p10 = pnand %p6256_p4, %p6250_p5 }
  0x96   : > { %6260 = shalt.err (!%p6257_p10)
}
  0x97   : > { %5293 = dma.hbm_to_vmem [thread:$0]  (!%p6756_p6), %s7845_s12, 1024, %s6820_s4, [#allocation15], %s7811_s1, %s7811_s1, %s7813_s21  }
  0x98   : > { %s6595_s23 = smov [#allocation17]   ;;  %s6596_s20 = smov [#allocation10]  }
  0x99   : > { %s659_s3 = sshll.u32 %s6595_s23, 4  ;;  %s579_s28 = sshll.u32 %s6596_s20, 4  ;;  %s660_s3 = int_to_ptr.vmem [resolvable:$true] %s659_s3  ;;  %s6869_s28 = int_to_ptr.vmem [resolvable:$true] %s579_s28 }
  0x9a   : > { %s7846_s16 = sld [smem:[#allocation48_spill]] }
  0xa0   : > { %s6261_s15 = scalar_lea.hbm %s7846_s16, 6144 }
  0xa1   : > { %p6262_p1 = scmp.ne.s32.totalorder %s7846_s16, %s6261_s15  ;;  %p6268_p12 = scmp.lt.u32.totalorder %s6261_s15, %s7846_s16 }
  0xa3   : > { %p6264_p3 = pnand %p6262_p1, %p6770_p8 }
  0xa5   : > { %p6265_p11 = pneg %p6264_p3 }
  0xa7   : > { %p6270_p13 = pnand %p6268_p12, %p6265_p11 }
  0xa9   : > { %6273 = shalt.err (!%p6270_p13)
}
  0xaa   : > { %s6274_s22 = scalar_lea.vmem %s660_s3, 6144  ;;  %p6282_p7 = scmp.lt.s32.totalorder %s660_s3, %s660_s3 }
  0xab   : > { %p6275_p0 = scmp.ne.s32.totalorder %s660_s3, %s6274_s22  ;;  %p6283_p9 = scmp.lt.s32.totalorder %s6274_s22, %s6274_s22 }
  0xad   : > { %p6277_p2 = pnand %p6275_p0, %p6770_p8  ;;  %p6284_p4 = por %p6283_p9, %p6282_p7 }
  0xaf   : > { %p6278_p5 = pneg %p6277_p2 }
  0xb1   : > { %p6285_p10 = pnand %p6284_p4, %p6278_p5 }
  0xb3   : > { %6288 = shalt.err (!%p6285_p10)
}
  0xb4   : > { %s7847_s9 = smov 12   ;;  %s7848_s23 = smov 192  }
  0xb5   : > { %5299 = dma.hbm_to_vmem [thread:$0]  (!%p6756_p6), %s7846_s16, 6144, %s660_s3, [#allocation18], %s7848_s23, %s7848_s23, %s7847_s9  }
  0xb6   : > { %s7849_s6 = sld [smem:[#allocation39_spill]] }
  0xbc   : > { %s6289_s24 = scalar_lea.hbm %s7849_s6, 2048 }
  0xbd   : > { %p6290_p1 = scmp.ne.s32.totalorder %s7849_s6, %s6289_s24  ;;  %p6296_p12 = scmp.lt.u32.totalorder %s6289_s24, %s7849_s6 }
  0xbf   : > { %p6292_p3 = pnand %p6290_p1, %p6770_p8 }
  0xc1   : > { %p6293_p11 = pneg %p6292_p3 }
  0xc3   : > { %p6298_p13 = pnand %p6296_p12, %p6293_p11 }
  0xc5   : > { %6301 = shalt.err (!%p6298_p13)
}
  0xc6   : > { %s6302_s3 = scalar_lea.vmem %s6869_s28, 2048  ;;  %p6310_p7 = scmp.lt.s32.totalorder %s6869_s28, %s6869_s28 }
  0xc7   : > { %p6303_p0 = scmp.ne.s32.totalorder %s6869_s28, %s6302_s3  ;;  %p6311_p9 = scmp.lt.s32.totalorder %s6302_s3, %s6302_s3 }
  0xc9   : > { %p6305_p2 = pnand %p6303_p0, %p6770_p8  ;;  %p6312_p4 = por %p6311_p9, %p6310_p7 }
  0xcb   : > { %p6306_p5 = pneg %p6305_p2 }
  0xcd   : > { %p6313_p10 = pnand %p6312_p4, %p6306_p5 }
  0xcf   : > { %6316 = shalt.err (!%p6313_p10)
}
  0xd0   : > { %s7850_s1 = smov 64   ;;  %s6597_s20 = smov [#allocation13]  }
  0xd1   : > { %5284 = dma.hbm_to_vmem [thread:$0]  (!%p6756_p6), %s7849_s6, 2048, %s6869_s28, [#allocation9], %s7850_s1, %s7850_s1, %s7813_s21  }
  0xd2   : > { %s611_s11 = sshll.u32 %s6597_s20, 4  ;;  %s6598_s30 = smov [#allocation16]   ;;  %s612_s11 = int_to_ptr.vmem [resolvable:$true] %s611_s11 }
  0xd3   : > { %s643_s15 = sshll.u32 %s6598_s30, 4  ;;  %s7851_s10 = sld [smem:[#allocation42_spill]]  ;;  %s6918_s15 = int_to_ptr.vmem [resolvable:$true] %s643_s15 }
  0xd9   : > { %s6317_s4 = scalar_lea.hbm %s7851_s10, 2048 }
  0xda   : > { %p6318_p1 = scmp.ne.s32.totalorder %s7851_s10, %s6317_s4  ;;  %p6324_p12 = scmp.lt.u32.totalorder %s6317_s4, %s7851_s10 }
  0xdc   : > { %p6320_p3 = pnand %p6318_p1, %p6770_p8 }
  0xde   : > { %p6321_p11 = pneg %p6320_p3 }
  0xe0   : > { %p6326_p13 = pnand %p6324_p12, %p6321_p11 }
  0xe2   : > { %6329 = shalt.err (!%p6326_p13)
}
  0xe3   : > { %s6330_s23 = scalar_lea.vmem %s612_s11, 2048  ;;  %p6338_p7 = scmp.lt.s32.totalorder %s612_s11, %s612_s11 }
  0xe4   : > { %p6331_p0 = scmp.ne.s32.totalorder %s612_s11, %s6330_s23  ;;  %p6339_p9 = scmp.lt.s32.totalorder %s6330_s23, %s6330_s23 }
  0xe6   : > { %p6333_p2 = pnand %p6331_p0, %p6770_p8  ;;  %p6340_p4 = por %p6339_p9, %p6338_p7 }
  0xe8   : > { %p6334_p5 = pneg %p6333_p2 }
  0xea   : > { %p6341_p10 = pnand %p6340_p4, %p6334_p5 }
  0xec   : > { %6344 = shalt.err (!%p6341_p10)
}
  0xed   : > { %s7852_s20 = smov 8   ;;  %s7853_s30 = smov 128  }
  0xee   : > { %5290 = dma.hbm_to_vmem [thread:$0]  (!%p6756_p6), %s7851_s10, 2048, %s612_s11, [#allocation12], %s7853_s30, %s7853_s30, %s7852_s20  }
  0xef   : > { %s7854_s14 = sld [smem:[#allocation46_spill]] }
  0xf5   : > { %s6345_s3 = scalar_lea.hbm %s7854_s14, 2048 }
  0xf6   : > { %p6346_p1 = scmp.ne.s32.totalorder %s7854_s14, %s6345_s3  ;;  %p6352_p12 = scmp.lt.u32.totalorder %s6345_s3, %s7854_s14 }
  0xf8   : > { %p6348_p3 = pnand %p6346_p1, %p6770_p8 }
  0xfa   : > { %p6349_p11 = pneg %p6348_p3 }
  0xfc   : > { %p6354_p13 = pnand %p6352_p12, %p6349_p11 }
  0xfe   : > { %6357 = shalt.err (!%p6354_p13)
}
  0xff   : > { %s6358_s11 = scalar_lea.vmem %s6918_s15, 2048  ;;  %p6366_p7 = scmp.lt.s32.totalorder %s6918_s15, %s6918_s15 }
 0x100   : > { %p6359_p0 = scmp.ne.s32.totalorder %s6918_s15, %s6358_s11  ;;  %p6367_p9 = scmp.lt.s32.totalorder %s6358_s11, %s6358_s11 }
 0x102   : > { %p6361_p2 = pnand %p6359_p0, %p6770_p8  ;;  %p6368_p4 = por %p6367_p9, %p6366_p7 }
 0x104   : > { %p6362_p5 = pneg %p6361_p2 }
 0x106   : > { %p6369_p10 = pnand %p6368_p4, %p6362_p5 }
 0x108   : > { %6372 = shalt.err (!%p6369_p10)
}
 0x109   : > { %5296 = dma.hbm_to_vmem [thread:$0]  (!%p6756_p6), %s7854_s14, 2048, %s6918_s15, [#allocation15], %s7853_s30, %s7853_s30, %s7852_s20  }
 0x10a   : > { %s6599_s13 = smov [#allocation19]   ;;  %s7855_s18 = sld [smem:[#allocation50_spill]] }
 0x10b   : > { %s675_s4 = sshll.u32 %s6599_s13, 4  ;;  %s676_s4 = int_to_ptr.vmem [resolvable:$true] %s675_s4 }
 0x110   : > { %s6373_s9 = scalar_lea.hbm %s7855_s18, 3072 }
 0x111   : > { %p6374_p1 = scmp.ne.s32.totalorder %s7855_s18, %s6373_s9  ;;  %p6380_p12 = scmp.lt.u32.totalorder %s6373_s9, %s7855_s18 }
 0x113   : > { %p6376_p3 = pnand %p6374_p1, %p6770_p8 }
 0x115   : > { %p6377_p11 = pneg %p6376_p3 }
 0x117   : > { %p6382_p13 = pnand %p6380_p12, %p6377_p11 }
 0x119   : > { %6385 = shalt.err (!%p6382_p13)
}
 0x11a   : > { %s6386_s15 = scalar_lea.vmem %s676_s4, 3072  ;;  %p6394_p7 = scmp.lt.s32.totalorder %s676_s4, %s676_s4 }
 0x11b   : > { %p6387_p0 = scmp.ne.s32.totalorder %s676_s4, %s6386_s15  ;;  %p6395_p9 = scmp.lt.s32.totalorder %s6386_s15, %s6386_s15 }
 0x11d   : > { %p6389_p2 = pnand %p6387_p0, %p6770_p8  ;;  %p6396_p4 = por %p6395_p9, %p6394_p7 }
 0x11f   : > { %p6390_p5 = pneg %p6389_p2 }
 0x121   : > { %p6397_p10 = pnand %p6396_p4, %p6390_p5 }
 0x123   : > { %6400 = shalt.err (!%p6397_p10)
}
 0x124   : > { %s7856_s21 = smov 4   ;;  %s4517_s19 = sadd.s32 4294967294, %s6583_s27  }
 0x125   : > { %5302 = dma.hbm_to_vmem [thread:$0]  (!%p6756_p6), %s7855_s18, 3072, %s676_s4, [#allocation18], %s7850_s1, %s7850_s1, %s7856_s21  }
 0x126   : > { %s6990_s5 = sadd.s32 1, %s6583_s27   ;;  %s55_s13 = sadd.s32 1, %s6579_s26 }
 0x127   : > { %s52_s22 = ssub.s32 %s6583_s27, %s6990_s5  ;;  %p62_p8 = scmp.ne.s32.totalorder %s6579_s26, %s6575_s25 }
 0x128   : > { %p53_p1 = scmp.eq.s32.totalorder %s52_s22, 0  ;;  %p63_p3 = scmp.eq.s32.totalorder %s6583_s27, 0 }
 0x129   : > { %p68_p11 = scmp.ne.s32.totalorder %s6575_s25, %s6571_s2  ;;  %p496_p12 = scmp.eq.s32.totalorder %s6740_s29, 1 }
 0x12a   : > { %s7002_s3 = scalar_select %p53_p1, %s6579_s26, %s55_s13  }
 0x12b   : > { %p64_p13 = por %p63_p3, %p62_p8  ;;  %p7858_p0 = scmp.eq.s32.totalorder %s6740_s29, 0 }
 0x12c   : > { %7857 = sst [smem:[#allocation32_spill]] %s7002_s3  ;;  %p7010_p6 = por %p496_p12, %p62_p8 }
 0x12d   : > { %p7006_p2 = por %p7858_p0, %p68_p11  ;;  %p502_p5 = scmp.eq.s32.totalorder %s4517_s19, 1 }
 0x12e   : > { %s7860_s9 = scalar_select %p7010_p6, 1, 0 }
 0x12f   : > { %p5326_p7 = scmp.lt.s32.totalorder %s6583_s27, 2  ;;  %s7016_s28 = sand.u32 1, %s6579_s26  }
 0x130   : > { %p7018_p9 = por %p502_p5, %p68_p11  ;;  %s4529_s11 = sshll.u32 %s7016_s28, 6 }
 0x131   : > { %s4778_s15 = sshll.u32 %s6583_s27, 10  ;;  %s7862_s13 = sld [smem:[#allocation33_spill]] }
 0x132   : > { %s7861_s23 = scalar_select %p7018_p9, 1, 0 }
 0x133   : > { %s696_s19 = scalar_lea.vmem [#allocation2], %s4529_s11  ;;  %p7029_p4 = pnand %p5326_p7, %p64_p13 }
 0x134   : > { %s703_s8 = sshll.u32 %s696_s19, 4  ;;  %s693_s14 = scalar_lea.sflag [#allocation3], %s7016_s28  ;;  %s7033_s8 = int_to_ptr.vmem [resolvable:$true] %s703_s8 }
 0x135   : > { %p6403_p8 = pneg %p7029_p4 }
 0x137   : > { %s7027_s22 = scalar_lea.hbm %s7862_s13, %s4778_s15  ;;  %s6406_s6 = scalar_lea.hbm %s7862_s13, 2048 }
 0x138   : > { %s6401_s16 = scalar_lea.hbm %s7027_s22, 1024  ;;  %p6407_p11 = scmp.lt.u32.totalorder %s7027_s22, %s7862_s13 }
 0x139   : > { %p6402_p10 = scmp.ne.s32.totalorder %s7027_s22, %s6401_s16  ;;  %p6408_p12 = scmp.lt.u32.totalorder %s6406_s6, %s6401_s16 }
 0x13a   : > { %p6410_p0 = scmp.lt.u32.totalorder %s6401_s16, %s7027_s22 }
 0x13b   : > { %p6404_p1 = pnand %p6403_p8, %p6402_p10  ;;  %p6409_p13 = por %p6408_p12, %p6407_p11 }
 0x13d   : > { %p6405_p3 = pneg %p6404_p1  ;;  %p6411_p5 = por %p6410_p0, %p6409_p13 }
 0x13f   : > { %p6412_p7 = pnand %p6411_p5, %p6405_p3 }
 0x141   : > { %6415 = shalt.err (!%p6412_p7)
}
 0x142   : > { %s6416_s12 = scalar_lea.vmem %s7033_s8, 1024  ;;  %s6600_s11 = smov [#allocation2]  }
 0x143   : > { %p6417_p10 = scmp.ne.s32.totalorder %s7033_s8, %s6416_s12  ;;  %s6421_s15 = sshll.u32 %s6600_s11, 4  ;;  %s6422_s15 = int_to_ptr.vmem [resolvable:$false] %s6421_s15 }
 0x144   : > { %s6423_s24 = scalar_lea.vmem %s6422_s15, 2048  ;;  %p6424_p6 = scmp.lt.s32.totalorder %s7033_s8, %s6422_s15 }
 0x145   : > { %p6419_p1 = pnand %p6417_p10, %p6403_p8  ;;  %p6425_p11 = scmp.lt.s32.totalorder %s6423_s24, %s6416_s12 }
 0x147   : > { %p6420_p9 = pneg %p6419_p1  ;;  %p6426_p12 = por %p6425_p11, %p6424_p6 }
 0x149   : > { %p6427_p13 = pnand %p6426_p12, %p6420_p9 }
 0x14b   : > { %6430 = shalt.err (!%p6427_p13)
}
 0x14c   : > { %5306 = dma.hbm_to_vmem [thread:$0]  (!%p7029_p4), %s7027_s22, 1024, %s7033_s8, %s693_s14, %s7850_s1, %s7850_s1, %s7856_s21  }
 0x14d   : > { %s4532_s16 = sshll.u32 %s7016_s28, 7  ;;  %s4779_s6 = sshll.u32 %s6583_s27, 11 }
 0x14e   : > { %s7864_s11 = sld [smem:[#allocation34_spill]]  ;;  %s717_s24 = scalar_lea.vmem [#allocation5], %s4532_s16 }
 0x14f   : > { %s724_s13 = sshll.u32 %s717_s24, 4  ;;  %s7865_s17 = sand.u32 1, %s6583_s27   ;;  %s7074_s13 = int_to_ptr.vmem [resolvable:$true] %s724_s13 }
 0x150   : > { %s7078_s18 = scalar_lea.sflag [#allocation6], %s7865_s17 }
 0x154   : > { %s7072_s15 = scalar_lea.hbm %s7864_s11, %s4779_s6  ;;  %s6436_s1 = scalar_lea.hbm %s7864_s11, 4096 }
 0x155   : > { %s6431_s3 = scalar_lea.hbm %s7072_s15, 2048  ;;  %p6437_p0 = scmp.lt.u32.totalorder %s7072_s15, %s7864_s11 }
 0x156   : > { %p6432_p6 = scmp.ne.s32.totalorder %s7072_s15, %s6431_s3  ;;  %p6438_p5 = scmp.lt.u32.totalorder %s6436_s1, %s6431_s3 }
 0x157   : > { %p6440_p10 = scmp.lt.u32.totalorder %s6431_s3, %s7072_s15 }
 0x158   : > { %p6434_p9 = pnand %p6432_p6, %p6403_p8  ;;  %p6439_p7 = por %p6438_p5, %p6437_p0 }
 0x15a   : > { %p6435_p3 = pneg %p6434_p9  ;;  %p6441_p1 = por %p6440_p10, %p6439_p7 }
 0x15c   : > { %p6442_p11 = pnand %p6441_p1, %p6435_p3 }
 0x15e   : > { %6445 = shalt.err (!%p6442_p11)
}
 0x15f   : > { %s6446_s17 = scalar_lea.vmem %s7074_s13, 2048  ;;  %s6601_s22 = smov [#allocation5]  }
 0x160   : > { %p6447_p12 = scmp.ne.s32.totalorder %s7074_s13, %s6446_s17  ;;  %s6451_s16 = sshll.u32 %s6601_s22, 4  ;;  %s6452_s16 = int_to_ptr.vmem [resolvable:$false] %s6451_s16 }
 0x161   : > { %s6453_s6 = scalar_lea.vmem %s6452_s16, 4096  ;;  %p6454_p9 = scmp.lt.s32.totalorder %s7074_s13, %s6452_s16 }
 0x162   : > { %p6449_p13 = pnand %p6447_p12, %p6403_p8  ;;  %p6455_p0 = scmp.lt.s32.totalorder %s6453_s6, %s6446_s17 }
 0x164   : > { %p6450_p6 = pneg %p6449_p13  ;;  %p6456_p5 = por %p6455_p0, %p6454_p9 }
 0x166   : > { %p6457_p7 = pnand %p6456_p5, %p6450_p6 }
 0x168   : > { %6460 = shalt.err (!%p6457_p7)
}
 0x169   : > { %5309 = dma.hbm_to_vmem [thread:$0]  (!%p7029_p4), %s7072_s15, 2048, %s7074_s13, %s7078_s18, %s7853_s30, %s7853_s30, %s7852_s20  }
 0x16a   : > { %p7866_p8 = scmp.ne.s32.totalorder %s7839_s0, 0 }
 0x16b   : > { %s7110_s3 = sand.u32 (!%p7866_p8), 1, %s6575_s25  }
 0x16c   : > { %736 = sbr.rel (%p7866_p8) target bundleno = 2665 (0xa69), region = 100  ;;  %s4536_s12 = sshll.u32 (!%p7866_p8), %s7110_s3, 6 }
 0x16d   : > { %s739_s19 = scalar_lea.sflag (!%p7866_p8), [#allocation3], %s7110_s3  ;;  %s7114_s24 = scalar_lea.vmem (!%p7866_p8), [#allocation2], %s4536_s12 }
 0x173   : > { %6534 = dma.done.wait (%p7006_p2), %s739_s19, 1024  }
 0x174   : > { %6536 = vsyncadd (%p7006_p2), %s739_s19, 4294966272  ;;  %s747_s10 = sand.u32 1, %s6740_s29   ;;  %s4537_s18 = sshll.u32 %s7110_s3, 7 }
 0x175   : > { %s748_s0 = scalar_lea.sflag [#allocation6], %s747_s10  ;;  %s7124_s20 = scalar_lea.vmem [#allocation5], %s4537_s18 }
 0x176   : > { %6538 = dma.done.wait (%p7006_p2), %s748_s0, 2048  }
 0x177   : > { %6540 = vsyncadd (%p7006_p2), %s748_s0, 4294965248  ;;  %p7867_p4 = scmp.eq.s32.totalorder %s6740_s29, 0 }
 0x179   : > { %6542 = dma.done.wait (%p7867_p4), [#allocation6], 3072   ;;  %p7868_p3 = pmov %p7867_p4 }
 0x17b   : > { %6544 = vsyncadd (%p7868_p3), [#allocation6], 4294964224  ;;  %p7869_p10 = pmov %p7868_p3 }
 0x17c   : > { %p7870_p1 = pmov %p7868_p3 }
 0x17d   : > { %6546 = dma.done.wait (%p7869_p10), [#allocation9], 8192  }
 0x17e   : > { %6548 = vsyncadd (%p7870_p1), [#allocation9], 4294959104  ;;  %p7871_p11 = pmov %p7870_p1 }
 0x17f   : > { %p7872_p12 = pmov %p7870_p1 }
 0x180   : > { %6550 = dma.done.wait (%p7871_p11), [#allocation12], 3072  }
 0x181   : > { %6552 = vsyncadd (%p7872_p12), [#allocation12], 4294964224  ;;  %p7873_p2 = pmov %p7870_p1 }
 0x182   : > { %p7874_p13 = pmov %p7870_p1 }
 0x183   : > { %6554 = dma.done.wait (%p7873_p2), [#allocation15], 3072  }
 0x184   : > { %6556 = vsyncadd (%p7874_p13), [#allocation15], 4294964224  ;;  %p7875_p6 = pmov %p7870_p1 }
 0x185   : > { %p7876_p9 = pmov %p7870_p1 }
 0x186   : > { %6558 = dma.done.wait (%p7875_p6), [#allocation18], 9216  }
 0x187   : > { %6560 = vsyncadd (%p7876_p9), [#allocation18], 4294958080  ;;  %v6602_v0 = vmov 0   ;;  %v5389_v1 = vld [vmem:[#allocation7 + $0x4] ss:$12 sps:$4 sm:$0xff]   ;;  %v5414_v30 = vld [vmem:[%s7114_s24 + $0x8] sm:$0xff]  }
 0x188   : > { %1134 = vmatprep.mubr.bf16.mxu0 %v6602_v0  ;;  %v5391_v2 = vld [vmem:[#allocation7] ss:$12 sps:$4 sm:$0xff]   ;;  %1102 = vmatprep.subr.bf16.mxu0 %v5389_v1  ;;  %v5392_v3 = vld [vmem:[#allocation7 + $0x1c] ss:$12 sps:$4 sm:$0xff]   ;;  %v5394_v4 = vld [vmem:[#allocation7 + $0x18] ss:$12 sps:$4 sm:$0xff]  }
 0x189   : > { %1103 = vmatpush1.bf16.msra.mxu0 %v5391_v2  ;;  %v5395_v5 = vld [vmem:[#allocation7 + $0x34] ss:$12 sps:$4 sm:$0xff]   ;;  %v5397_v6 = vld [vmem:[#allocation7 + $0x30] ss:$12 sps:$4 sm:$0xff]   ;;  %v5398_v7 = vld [vmem:[#allocation7 + $0x4c] ss:$12 sps:$4 sm:$0xff]  }
 0x18a   : > { %1104 = vmatprep.subr.bf16.mxu0 %v5392_v3  ;;  %v5400_v8 = vld [vmem:[#allocation7 + $0x48] ss:$12 sps:$4 sm:$0xff]   ;;  %v5413_v9 = vld [vmem:[%s7114_s24] sm:$0xff]   ;;  %v5409_v18 = vld [vmem:[#allocation7 + $0x90] ss:$12 sps:$4 sm:$0xff]   ;;  %v911_v3 = vlaneseq  ;;  %s7877_s13 = sld [smem:[#allocation36_spill]] }
 0x18b   : > { %v5401_v10 = vld [vmem:[#allocation7 + $0x64] ss:$12 sps:$4 sm:$0xff]   ;;  %5055 = vmatprep.mubr.bf16.mxu1 %v5413_v9  ;;  %v5403_v11 = vld [vmem:[#allocation7 + $0x60] ss:$12 sps:$4 sm:$0xff]   ;;  %v5417_v12 = vld [vmem:[#allocation7 + $0x8] ss:$12 sps:$4 sm:$0xff]  }
 0x18c   : > { %v5404_v13 = vld [vmem:[#allocation7 + $0x7c] ss:$12 sps:$4 sm:$0xff]   ;;  %5039 = vmatprep.subr.bf16.mxu1 %v5417_v12  ;;  %v5419_v14 = vld [vmem:[#allocation7 + $0x20] ss:$12 sps:$4 sm:$0xff]   ;;  %v5406_v15 = vld [vmem:[#allocation7 + $0x78] ss:$12 sps:$4 sm:$0xff]  }
 0x18d   : > { %1105 = vmatpush1.bf16.msra.mxu0 %v5394_v4  ;;  %5040 = vmatpush3.bf16.msra.mxu1 %v5417_v12  ;;  %v5420_v16 = vld [vmem:[#allocation7 + $0x38] ss:$12 sps:$4 sm:$0xff]   ;;  %v5407_v17 = vld [vmem:[#allocation7 + $0x94] ss:$12 sps:$4 sm:$0xff]   ;;  %v5422_v19 = vld [vmem:[#allocation7 + $0x50] ss:$12 sps:$4 sm:$0xff]  }
 0x18e   : > { %1106 = vmatprep.subr.bf16.mxu0 %v5395_v5  ;;  %5041 = vmatprep.subr.bf16.mxu1 %v5419_v14  ;;  %v5410_v20 = vld [vmem:[#allocation7 + $0xac] ss:$12 sps:$4 sm:$0xff]   ;;  %v5412_v21 = vld [vmem:[#allocation7 + $0xa8] ss:$12 sps:$4 sm:$0xff]   ;;  %v5428_v31 = vld [vmem:[#allocation7 + $0xb0] ss:$12 sps:$4 sm:$0xff]  }
 0x18f   : > { %v5423_v22 = vld [vmem:[#allocation7 + $0x68] ss:$12 sps:$4 sm:$0xff]   ;;  %v5431_v23 = vld [vmem:[#allocation8 + $0x4] ss:$8 sps:$4 sm:$0xff]   ;;  %v5432_v28 = vld [vmem:[#allocation8 + $0x10] ss:$8 sps:$4 sm:$0xff]  }
 0x190   : > { %v5425_v24 = vld [vmem:[#allocation7 + $0x80] ss:$12 sps:$4 sm:$0xff]   ;;  %v5434_v26 = vld [vmem:[#allocation8 + $0x14] ss:$8 sps:$4 sm:$0xff]   ;;  %v5426_v27 = vld [vmem:[#allocation7 + $0x98] ss:$12 sps:$4 sm:$0xff]  }
 0x191   : > { %1107 = vmatpush1.bf16.msra.mxu0 %v5397_v6  ;;  %5042 = vmatpush3.bf16.msra.mxu1 %v5419_v14  ;;  %v5429_v25 = vld [vmem:[#allocation8] ss:$8 sps:$4 sm:$0xff]   ;;  %v5437_v29 = vld [vmem:[#allocation8 + $0x24] ss:$8 sps:$4 sm:$0xff]   ;;  %v5440_v33 = vld [vmem:[#allocation8 + $0x34] ss:$8 sps:$4 sm:$0xff]  }
 0x192   : > { %1108 = vmatprep.subr.bf16.mxu0 %v5398_v7  ;;  %5043 = vmatprep.subr.bf16.mxu1 %v5420_v16  ;;  %v5435_v32 = vld [vmem:[#allocation8 + $0x20] ss:$8 sps:$4 sm:$0xff]   ;;  %v5438_v34 = vld [vmem:[#allocation8 + $0x30] ss:$8 sps:$4 sm:$0xff]   ;;  %v5443_v35 = vld [vmem:[#allocation8 + $0x44] ss:$8 sps:$4 sm:$0xff]  }
 0x193   : > { %v5415_v36 = vld [vmem:[%s7114_s24 + $0x10] sm:$0xff]   ;;  %v5441_v37 = vld [vmem:[#allocation8 + $0x40] ss:$8 sps:$4 sm:$0xff]   ;;  %v5449_v40 = vld [vmem:[#allocation8 + $0x64] ss:$8 sps:$4 sm:$0xff]   ;;  %v7166_v4 = vshrl.u32 %v911_v3, 7 }
 0x194   : > { %v5446_v38 = vld [vmem:[#allocation8 + $0x54] ss:$8 sps:$4 sm:$0xff]   ;;  %v5444_v39 = vld [vmem:[#allocation8 + $0x50] ss:$8 sps:$4 sm:$0xff]   ;;  %v5418_v42 = vld [vmem:[%s7114_s24 + $0x20] sm:$0xff]   ;;  %s7878_s14 = sld [smem:[#allocation38_spill]] }
 0x195   : > { %1109 = vmatpush1.bf16.msra.mxu0 %v5400_v8  ;;  %5044 = vmatpush3.bf16.msra.mxu1 %v5420_v16  ;;  %v5416_v41 = vld [vmem:[%s7114_s24 + $0x18] sm:$0xff]   ;;  %v5447_v43 = vld [vmem:[#allocation8 + $0x60] ss:$8 sps:$4 sm:$0xff]   ;;  %v5455_v46 = vld [vmem:[#allocation8 + $0x84] ss:$8 sps:$4 sm:$0xff]   ;;  %v7169_v5 = vsub.s32 0, %v7166_v4 }
 0x196   : > { %1110 = vmatprep.subr.bf16.mxu0 %v5401_v10  ;;  %5045 = vmatprep.subr.bf16.mxu1 %v5422_v19  ;;  %v5452_v44 = vld [vmem:[#allocation8 + $0x74] ss:$8 sps:$4 sm:$0xff]   ;;  %v5450_v45 = vld [vmem:[#allocation8 + $0x70] ss:$8 sps:$4 sm:$0xff]   ;;  %v5421_v47 = vld [vmem:[%s7114_s24 + $0x28] sm:$0xff]   ;;  %v7175_v7 = vsub.s32 1, %v7166_v4 }
 0x197   : > { %v5424_v48 = vld [vmem:[%s7114_s24 + $0x30] sm:$0xff]   ;;  %v5453_v49 = vld [vmem:[#allocation8 + $0x80] ss:$8 sps:$4 sm:$0xff]   ;;  %v5461_v52 = vld [vmem:[#allocation8 + $0xa4] ss:$8 sps:$4 sm:$0xff]   ;;  %s7879_s22 = sld [smem:[#allocation41_spill]] }
 0x198   : > { %v5458_v50 = vld [vmem:[#allocation8 + $0x94] ss:$8 sps:$4 sm:$0xff]   ;;  %v5456_v51 = vld [vmem:[#allocation8 + $0x90] ss:$8 sps:$4 sm:$0xff]   ;;  %v5459_v54 = vld [vmem:[#allocation8 + $0xa0] ss:$8 sps:$4 sm:$0xff]  }
 0x199   : > { %1111 = vmatpush1.bf16.msra.mxu0 %v5403_v11  ;;  %5046 = vmatpush3.bf16.msra.mxu1 %v5422_v19  ;;  %v5427_v53 = vld [vmem:[%s7114_s24 + $0x38] sm:$0xff]   ;;  %v5467_v57 = vld [vmem:[#allocation8 + $0xc4] ss:$8 sps:$4 sm:$0xff]   ;;  %v5465_v58 = vld [vmem:[#allocation8 + $0xc0] ss:$8 sps:$4 sm:$0xff]   ;;  %v921_v19 = vsub.s32 2, %v7166_v4 }
 0x19a   : > { %1112 = vmatprep.subr.bf16.mxu0 %v5404_v13  ;;  %5047 = vmatprep.subr.bf16.mxu1 %v5423_v22  ;;  %v5464_v55 = vld [vmem:[#allocation8 + $0xb4] ss:$8 sps:$4 sm:$0xff]   ;;  %v5462_v56 = vld [vmem:[#allocation8 + $0xb0] ss:$8 sps:$4 sm:$0xff]   ;;  %v5473_v61 = vld [vmem:[#allocation8 + $0xe4] ss:$8 sps:$4 sm:$0xff]  }
 0x19b   : > { %v5468_v59 = vld [vmem:[#allocation8 + $0xd0] ss:$8 sps:$4 sm:$0xff]   ;;  %v5470_v60 = vld [vmem:[#allocation8 + $0xd4] ss:$8 sps:$4 sm:$0xff]   ;;  %v5471_v62 = vld [vmem:[#allocation8 + $0xe0] ss:$8 sps:$4 sm:$0xff]  }
 0x19c   : > { %v5474_v63 = vld [vmem:[#allocation8 + $0xf0] ss:$8 sps:$4 sm:$0xff]   ;;  %v5476_v1 = vld [vmem:[#allocation8 + $0xf4] ss:$8 sps:$4 sm:$0xff]   ;;  %v5479_v2 = vld [vmem:[#allocation8 + $0x104] ss:$8 sps:$4 sm:$0xff]  }
 0x19d   : > { %1113 = vmatpush1.bf16.msra.mxu0 %v5406_v15  ;;  %5048 = vmatpush3.bf16.msra.mxu1 %v5423_v22  ;;  %v909_v6 = vld [vmem:[%s7877_s13] sm:$0x7]  ;;  %s7880_s12 = sld [smem:[#allocation43_spill]]  ;;  %s4548_s19 = sshll.u32 %s7110_s3, 8 }
 0x19e   : > { %1114 = vmatprep.subr.bf16.mxu0 %v5407_v17  ;;  %5049 = vmatprep.subr.bf16.mxu1 %v5425_v24  ;;  %v7178_v8 = vrot.slane %v909_v6, %v7169_v5  ;;  %s7399_s24 = scalar_lea.vmem [#allocation21], %s4548_s19  ;;  %s7882_s13 = sld [smem:[#allocation47_spill]] }
 0x19f   : > { %s4782_s1 = sshll.u32 %s6740_s29, 12  ;;  %s4304_s21 = sshll.u32 %s7399_s24, 4  ;;  %s7656_s21 = int_to_ptr.vmem [resolvable:$true] %s4304_s21 }
 0x1a0   : > { %s4274_s6 = scalar_lea.sflag [#allocation22], %s7110_s3  ;;  %p7885_p5 = scmp.ne.s32.totalorder %s7860_s9, 0 }
 0x1a1   : > { %1115 = vmatpush1.bf16.msra.mxu0 %v5409_v18  ;;  %5050 = vmatpush3.bf16.msra.mxu1 %v5425_v24  ;;  %s6603_s19 = smov [#allocation21]  }
 0x1a2   : > { %1116 = vmatprep.subr.bf16.mxu0 %v5410_v20  ;;  %5051 = vmatprep.subr.bf16.mxu1 %v5426_v27  ;;  %s6465_s10 = sshll.u32 %s6603_s19, 4  ;;  %s6466_s10 = int_to_ptr.vmem [resolvable:$false] %s6465_s10 }
 0x1a3   : > { %p6468_p4 = scmp.lt.s32.totalorder %s7656_s21, %s6466_s10 }
 0x1a5   : > { %1117 = vmatpush1.bf16.msra.mxu0 %v5412_v21  ;;  %5052 = vmatpush3.bf16.msra.mxu1 %v5426_v27  ;;  %v7194_v27 = vrot.slane %v909_v6, %v921_v19 }
 0x1a6   : > { %1684 = vmatprep.subr.bf16.mxu0 %v5431_v23  ;;  %5053 = vmatprep.subr.bf16.mxu1 %v5428_v31 }
 0x1a8   : > { %1135 = vmatmul.mubr.bf16.vlgmr.msra.gmra.mrb[0].mxu0 %v5413_v9  ;;  %v7181_v9 = vrot.slane %v909_v6, %v7175_v7 }
 0x1a9   : > { %1144 = vmatprep.mubr.bf16.mxu0 %v6602_v0  ;;  %1685 = vmatpush1.bf16.msra.mxu0 %v5429_v25 }
 0x1aa   : > { %1686 = vmatprep.subr.bf16.mxu0 %v5434_v26  ;;  %5054 = vmatpush3.bf16.msra.mxu1 %v5428_v31 }
 0x1ad   : > { %1687 = vmatpush1.bf16.msra.mxu0 %v5432_v28  ;;  %5056 = vmatmul.mubr.bf16.vlgmr.msra.gmra.mrb[0].mxu1 %v5414_v30  ;;  %v5501_v28 = vld [vmem:[#allocation10 + $0x40] sm:$0xff]  }
 0x1ae   : > { %1688 = vmatprep.subr.bf16.mxu0 %v5437_v29  ;;  %5059 = vmatprep.mubr.bf16.mxu1 %v5415_v36  ;;  %v5502_v29 = vld [vmem:[#allocation10] sm:$0xff]  }
 0x1af   : > { %4799 = vmatprep.subr.bf16.mxu1 %v5501_v28 }
 0x1b0   : > { %1145 = vmatmul.mubr.bf16.gmra.mrb[4].mxu0 %v5414_v30  ;;  %v5503_v30 = vld [vmem:[#allocation10 + $0x48] sm:$0xff]   ;;  %4800 = vmatpush3.bf16.msra.mxu1 %v5502_v29 }
 0x1b1   : > { %1154 = vmatprep.mubr.bf16.mxu0 %v6602_v0  ;;  %1689 = vmatpush1.bf16.msra.mxu0 %v5435_v32 }
 0x1b2   : > { %1690 = vmatprep.subr.bf16.mxu0 %v5440_v33  ;;  %4801 = vmatprep.subr.bf16.mxu1 %v5503_v30  ;;  %v5486_v30 = vld [vmem:[#allocation8 + $0x130] ss:$8 sps:$4 sm:$0xff]  }
 0x1b5   : > { %1691 = vmatpush1.bf16.msra.mxu0 %v5438_v34  ;;  %5060 = vmatmul.mubr.bf16.gmra.mrb[4].mxu1 %v5416_v41 }
 0x1b6   : > { %1692 = vmatprep.subr.bf16.mxu0 %v5443_v35  ;;  %5063 = vmatprep.mubr.bf16.mxu1 %v5418_v42  ;;  %v5504_v35 = vld [vmem:[#allocation10 + $0x8] sm:$0xff]  }
 0x1b7   : > { %4802 = vmatpush3.bf16.msra.mxu1 %v5504_v35 }
 0x1b8   : > { %1155 = vmatmul.mubr.bf16.gmra.mrb[8].mxu0 %v5415_v36 }
 0x1b9   : > { %1164 = vmatprep.mubr.bf16.mxu0 %v6602_v0  ;;  %1693 = vmatpush1.bf16.msra.mxu0 %v5441_v37 }
 0x1ba   : > { %1694 = vmatprep.subr.bf16.mxu0 %v5446_v38 }
 0x1bd   : > { %1695 = vmatpush1.bf16.msra.mxu0 %v5444_v39  ;;  %5064 = vmatmul.mubr.bf16.gmra.mrb[8].mxu1 %v5421_v47 }
 0x1be   : > { %1696 = vmatprep.subr.bf16.mxu0 %v5449_v40  ;;  %5067 = vmatprep.mubr.bf16.mxu1 %v5424_v48 }
 0x1c0   : > { %1165 = vmatmul.mubr.bf16.gmra.mrb[12].mxu0 %v5416_v41  ;;  %v5505_v41 = vld [vmem:[#allocation10 + $0x50] sm:$0xff]  }
 0x1c1   : > { %1174 = vmatprep.mubr.bf16.mxu0 %v6602_v0  ;;  %1697 = vmatpush1.bf16.msra.mxu0 %v5447_v43 }
 0x1c2   : > { %1698 = vmatprep.subr.bf16.mxu0 %v5452_v44  ;;  %4803 = vmatprep.subr.bf16.mxu1 %v5505_v41 }
 0x1c5   : > { %1699 = vmatpush1.bf16.msra.mxu0 %v5450_v45  ;;  %5068 = vmatmul.mubr.bf16.gmra.mrb[12].mxu1 %v5427_v53  ;;  %v5477_v45 = vld [vmem:[#allocation8 + $0x100] ss:$8 sps:$4 sm:$0xff]  }
 0x1c6   : > { %1700 = vmatprep.subr.bf16.mxu0 %v5455_v46 }
 0x1c8   : > { %1175 = vmatmul.mubr.bf16.gmra.mrb[16].mxu0 %v5418_v42 }
 0x1c9   : > { %1184 = vmatprep.mubr.bf16.mxu0 %v6602_v0  ;;  %1701 = vmatpush1.bf16.msra.mxu0 %v5453_v49  ;;  %v5482_v49 = vld [vmem:[#allocation8 + $0x114] ss:$8 sps:$4 sm:$0xff]  }
 0x1ca   : > { %1702 = vmatprep.subr.bf16.mxu0 %v5458_v50 }
 0x1cd   : > { %1703 = vmatpush1.bf16.msra.mxu0 %v5456_v51 }
 0x1ce   : > { %1704 = vmatprep.subr.bf16.mxu0 %v5461_v52 }
 0x1d0   : > { %1185 = vmatmul.mubr.bf16.gmra.mrb[20].mxu0 %v5421_v47 }
 0x1d1   : > { %1194 = vmatprep.mubr.bf16.mxu0 %v6602_v0  ;;  %1705 = vmatpush1.bf16.msra.mxu0 %v5459_v54  ;;  %v5506_v54 = vld [vmem:[#allocation10 + $0x10] sm:$0xff]  }
 0x1d2   : > { %1706 = vmatprep.subr.bf16.mxu0 %v5464_v55  ;;  %4804 = vmatpush3.bf16.msra.mxu1 %v5506_v54 }
 0x1d5   : > { %1707 = vmatpush1.bf16.msra.mxu0 %v5462_v56 }
 0x1d6   : > { %1708 = vmatprep.subr.bf16.mxu0 %v5467_v57  ;;  %v5507_v57 = vld [vmem:[#allocation10 + $0x58] sm:$0xff]  }
 0x1d7   : > { %4805 = vmatprep.subr.bf16.mxu1 %v5507_v57 }
 0x1d8   : > { %1195 = vmatmul.mubr.bf16.gmra.mrb[24].mxu0 %v5424_v48 }
 0x1d9   : > { %1204 = vmatprep.mubr.bf16.mxu0 %v6602_v0  ;;  %1709 = vmatpush1.bf16.msra.mxu0 %v5465_v58 }
 0x1da   : > { %1710 = vmatprep.subr.bf16.mxu0 %v5470_v60 }
 0x1dd   : > { %1711 = vmatpush1.bf16.msra.mxu0 %v5468_v59  ;;  %v5480_v59 = vld [vmem:[#allocation8 + $0x110] ss:$8 sps:$4 sm:$0xff]  }
 0x1de   : > { %1712 = vmatprep.subr.bf16.mxu0 %v5473_v61 }
 0x1e0   : > { %1205 = vmatmul.mubr.bf16.gmra.mrb[28].mxu0 %v5427_v53 }
 0x1e1   : > { %1713 = vmatpush1.bf16.msra.mxu0 %v5471_v62  ;;  %v5485_v62 = vld [vmem:[#allocation8 + $0x124] ss:$8 sps:$4 sm:$0xff]  }
 0x1e2   : > { %1714 = vmatprep.subr.bf16.mxu0 %v5476_v1 }
 0x1e5   : > { %1715 = vmatpush1.bf16.msra.mxu0 %v5474_v63 }
 0x1e6   : > { %1797 = vmatprep.subr.bf16.mxu0 %v5479_v2 }
 0x27b   : > { %v1136_v10 = vpop.f32.mrb[0].mxu0 }
 0x27c   : > { %v1137_v11 = vadd.f32 %v1136_v10, %v7178_v8  ;;  %v1138_v12 = vpop.f32.mrb[1].mxu0 }
 0x27d   : > { %v1139_v13 = vadd.f32 %v1138_v12, %v7181_v9  ;;  %v1140_v14 = vpop.f32.mrb[2].mxu0 }
 0x27e   : > { %5669 = vtanh.f32 %v1137_v11  ;;  %v1141_v15 = vadd.f32 %v1140_v14, %v7178_v8  ;;  %v1142_v16 = vpop.f32.mrb[3].mxu0 }
 0x27f   : > { %5671 = vtanh.f32 %v1139_v13  ;;  %v1143_v17 = vadd.f32 %v1142_v16, %v7181_v9 }
 0x280   : > { %5673 = vtanh.f32 %v1141_v15  ;;  %v5057_v34 = vpop.f32.mrb[0].mxu1  ;;  %v5483_v15 = vld [vmem:[#allocation8 + $0x120] ss:$8 sps:$4 sm:$0xff]  }
 0x281   : > { %5675 = vtanh.f32 %v1143_v17  ;;  %v1258_v39 = vadd.f32 %v5057_v34, %v7194_v27  ;;  %v1249_v40 = vpop.f32.mrb[1].mxu1 }
 0x282   : > { %v5058_v46 = vpop.f32.mrb[2].mxu1  ;;  %v1250_v53 = vadd.f32 %v1249_v40, %v7194_v27 }
 0x283   : > { %v1146_v18 = vpop.f32.mrb[4].mxu0  ;;  %v1252_v50 = vpop.f32.mrb[3].mxu1  ;;  %v1261_v56 = vadd.f32 %v5058_v46, %v7194_v27 }
 0x284   : > { %v1147_v20 = vadd.f32 %v1146_v18, %v7178_v8  ;;  %v1148_v21 = vpop.f32.mrb[5].mxu0  ;;  %v1253_v60 = vadd.f32 %v1252_v50, %v7194_v27  ;;  %v5494_v50 = vld [vmem:[#allocation8 + $0x154] ss:$8 sps:$4 sm:$0xff]  }
 0x285   : > { %v1149_v22 = vadd.f32 %v1148_v21, %v7181_v9  ;;  %v1150_v23 = vpop.f32.mrb[6].mxu0 }
 0x286   : > { %5677 = vtanh.f32 %v1147_v20  ;;  %v1151_v24 = vadd.f32 %v1150_v23, %v7178_v8  ;;  %v1152_v25 = vpop.f32.mrb[7].mxu0  ;;  %v5488_v20 = vld [vmem:[#allocation8 + $0x134] ss:$8 sps:$4 sm:$0xff]  }
 0x287   : > { %5679 = vtanh.f32 %v1149_v22  ;;  %v1153_v26 = vadd.f32 %v1152_v25, %v7181_v9 }
 0x288   : > { %v5670_v31 = vpop.eup %5669  ;;  %5681 = vtanh.f32 %v1151_v24  ;;  %v5061_v1 = vpop.f32.mrb[4].mxu1 }
 0x289   : > { %v5672_v32 = vpop.eup %5671  ;;  %5683 = vtanh.f32 %v1153_v26  ;;  %v1274_v10 = vadd.f32 %v5061_v1, %v7194_v27  ;;  %v1265_v11 = vpop.f32.mrb[5].mxu1 }
 0x28a   : > { %v5674_v33 = vpop.eup %5673  ;;  %5685 = vtanh.f32 %v1258_v39  ;;  %v5062_v16 = vpop.f32.mrb[6].mxu1  ;;  %v1266_v24 = vadd.f32 %v1265_v11, %v7194_v27 }
 0x28b   : > { %v5676_v36 = vpop.eup %5675  ;;  %v1156_v37 = vpop.f32.mrb[8].mxu0  ;;  %v1360_v38 = vpack.c.bf16 %v5674_v33, %v5670_v31  ;;  %v1277_v28 = vadd.f32 %v5062_v16, %v7194_v27  ;;  %v5491_v33 = vld [vmem:[#allocation8 + $0x144] ss:$8 sps:$4 sm:$0xff]  }
 0x28c   : > { %v1157_v42 = vadd.f32 %v1156_v37, %v7178_v8  ;;  %v1158_v43 = vpop.f32.mrb[9].mxu0  ;;  %v1361_v44 = vpack.c.bf16 %v5676_v36, %v5672_v32  ;;  %v1268_v21 = vpop.f32.mrb[7].mxu1 }
 0x28d   : > { %v1159_v47 = vadd.f32 %v1158_v43, %v7181_v9  ;;  %v1160_v48 = vpop.f32.mrb[10].mxu0  ;;  %v1269_v31 = vadd.f32 %v1268_v21, %v7194_v27 }
 0x28e   : > { %5687 = vtanh.f32 %v1157_v42  ;;  %v1161_v51 = vadd.f32 %v1160_v48, %v7178_v8  ;;  %v1162_v52 = vpop.f32.mrb[11].mxu0  ;;  %1716 = vmatprep.mubr.bf16.mxu0 %v1361_v44 }
 0x28f   : > { %5689 = vtanh.f32 %v1159_v47  ;;  %v1163_v55 = vadd.f32 %v1162_v52, %v7181_v9  ;;  %1717 = vmatmul.mubr.bf16.vlgmr.msra.gmra.mrb[32].mxu0 %v1360_v38 }
 0x290   : > { %v5678_v58 = vpop.eup %5677  ;;  %5691 = vtanh.f32 %v1161_v51  ;;  %1798 = vmatpush1.bf16.msra.mxu0 %v5477_v45  ;;  %v5065_v35 = vpop.f32.mrb[8].mxu1  ;;  %v5489_v45 = vld [vmem:[#allocation8 + $0x140] ss:$8 sps:$4 sm:$0xff]  }
 0x291   : > { %v5680_v61 = vpop.eup %5679  ;;  %5693 = vtanh.f32 %v1163_v55  ;;  %1799 = vmatprep.subr.bf16.mxu0 %v5482_v49  ;;  %v1290_v39 = vadd.f32 %v5065_v35, %v7194_v27  ;;  %v1281_v40 = vpop.f32.mrb[9].mxu1 }
 0x292   : > { %v5682_v63 = vpop.eup %5681  ;;  %5695 = vtanh.f32 %v1250_v53  ;;  %v5066_v46 = vpop.f32.mrb[10].mxu1 }
 0x293   : > { %v5684_v2 = vpop.eup %5683  ;;  %v1166_v3 = vpop.f32.mrb[12].mxu0  ;;  %v1363_v6 = vpack.c.bf16 %v5682_v63, %v5678_v58  ;;  %5697 = vtanh.f32 %v1261_v56  ;;  %v1282_v56 = vadd.f32 %v1281_v40, %v7194_v27 }
 0x294   : > { %v1167_v12 = vadd.f32 %v1166_v3, %v7178_v8  ;;  %v1168_v13 = vpop.f32.mrb[13].mxu0  ;;  %v1364_v14 = vpack.c.bf16 %v5684_v2, %v5680_v61  ;;  %1800 = vmatpush1.bf16.msra.mxu0 %v5480_v59  ;;  %5699 = vtanh.f32 %v1253_v60  ;;  %v7209_v25 = vpop.eup %5685  ;;  %v1293_v60 = vadd.f32 %v5066_v46, %v7194_v27  ;;  %v5497_v2 = vld [vmem:[#allocation8 + $0x164] ss:$8 sps:$4 sm:$0xff]  }
 0x295   : > { %v1169_v17 = vadd.f32 %v1168_v13, %v7181_v9  ;;  %v1170_v18 = vpop.f32.mrb[14].mxu0  ;;  %1801 = vmatprep.subr.bf16.mxu0 %v5485_v62  ;;  %5701 = vtanh.f32 %v1274_v10  ;;  %v1284_v51 = vpop.f32.mrb[11].mxu1  ;;  %v5492_v62 = vld [vmem:[#allocation8 + $0x150] ss:$8 sps:$4 sm:$0xff]  }
 0x296   : > { %5703 = vtanh.f32 %v1167_v12  ;;  %v1171_v22 = vadd.f32 %v1170_v18, %v7178_v8  ;;  %v1172_v23 = vpop.f32.mrb[15].mxu0  ;;  %1726 = vmatprep.mubr.bf16.mxu0 %v1364_v14  ;;  %v1285_v63 = vadd.f32 %v1284_v51, %v7194_v27 }
 0x297   : > { %5705 = vtanh.f32 %v1169_v17  ;;  %v1173_v26 = vadd.f32 %v1172_v23, %v7181_v9  ;;  %1727 = vmatmul.mubr.bf16.gmra.mrb[36].mxu0 %v1363_v6 }
 0x298   : > { %v5688_v29 = vpop.eup %5687  ;;  %5707 = vtanh.f32 %v1171_v22  ;;  %1802 = vmatpush1.bf16.msra.mxu0 %v5483_v15  ;;  %v5069_v6 = vpop.f32.mrb[12].mxu1 }
 0x299   : > { %v5690_v32 = vpop.eup %5689  ;;  %5709 = vtanh.f32 %v1173_v26  ;;  %1803 = vmatprep.subr.bf16.mxu0 %v5488_v20  ;;  %v1306_v13 = vadd.f32 %v5069_v6, %v7194_v27  ;;  %v1297_v14 = vpop.f32.mrb[13].mxu1  ;;  %v5495_v20 = vld [vmem:[#allocation8 + $0x160] ss:$8 sps:$4 sm:$0xff]   ;;  %v5500_v26 = vld [vmem:[#allocation8 + $0x174] ss:$8 sps:$4 sm:$0xff]  }
 0x29a   : > { %v5692_v34 = vpop.eup %5691  ;;  %5711 = vtanh.f32 %v1266_v24  ;;  %v5070_v21 = vpop.f32.mrb[14].mxu1 }
 0x29b   : > { %v5694_v36 = vpop.eup %5693  ;;  %v1176_v37 = vpop.f32.mrb[16].mxu0  ;;  %v1366_v38 = vpack.c.bf16 %v5692_v34, %v5688_v29  ;;  %5713 = vtanh.f32 %v1277_v28 }
 0x29c   : > { %v7215_v41 = vpop.eup %5695  ;;  %v1177_v42 = vadd.f32 %v1176_v37, %v7178_v8  ;;  %v1178_v43 = vpop.f32.mrb[17].mxu0  ;;  %v1367_v44 = vpack.c.bf16 %v5694_v36, %v5690_v32  ;;  %1804 = vmatpush1.bf16.msra.mxu0 %v5486_v30  ;;  %5715 = vtanh.f32 %v1269_v31  ;;  %v1309_v37 = vadd.f32 %v5070_v21, %v7194_v27 }
 0x29d   : > { %v7218_v47 = vpop.eup %5697  ;;  %v1179_v48 = vadd.f32 %v1178_v43, %v7181_v9  ;;  %v1180_v49 = vpop.f32.mrb[18].mxu0  ;;  %1805 = vmatprep.subr.bf16.mxu0 %v5491_v33  ;;  %5717 = vtanh.f32 %v1290_v39  ;;  %v1298_v33 = vadd.f32 %v1297_v14, %v7194_v27  ;;  %v5498_v39 = vld [vmem:[#allocation8 + $0x170] ss:$8 sps:$4 sm:$0xff]  }
 0x29e   : > { %v7221_v52 = vpop.eup %5699  ;;  %5719 = vtanh.f32 %v1177_v42  ;;  %v1181_v53 = vadd.f32 %v1180_v49, %v7178_v8  ;;  %v1182_v54 = vpop.f32.mrb[19].mxu0  ;;  %1736 = vmatprep.mubr.bf16.mxu0 %v1367_v44  ;;  %v1365_v55 = vpack.c.bf16 %v7218_v47, %v7209_v25  ;;  %v5509_v25 = vld [vmem:[#allocation10 + $0x60] sm:$0xff]   ;;  %v5511_v47 = vld [vmem:[#allocation10 + $0x68] sm:$0xff]  }
 0x29f   : > { %v7227_v57 = vpop.eup %5701  ;;  %5721 = vtanh.f32 %v1179_v48  ;;  %v1183_v58 = vadd.f32 %v1182_v54, %v7181_v9  ;;  %1737 = vmatmul.mubr.bf16.gmra.mrb[40].mxu0 %v1366_v38  ;;  %v1362_v59 = vpack.c.bf16 %v7221_v52, %v7215_v41  ;;  %v1300_v28 = vpop.f32.mrb[15].mxu1  ;;  %v5510_v41 = vld [vmem:[#allocation10 + $0x20] sm:$0xff]   ;;  %v5512_v52 = vld [vmem:[#allocation10 + $0x28] sm:$0xff]  }
 0x2a0   : > { %v5704_v61 = vpop.eup %5703  ;;  %5723 = vtanh.f32 %v1181_v53  ;;  %1806 = vmatpush1.bf16.msra.mxu0 %v5489_v45  ;;  %v1301_v40 = vadd.f32 %v1300_v28, %v7194_v27 }
 0x2a1   : > { %v5706_v1 = vpop.eup %5705  ;;  %5725 = vtanh.f32 %v1183_v58  ;;  %1807 = vmatprep.subr.bf16.mxu0 %v5494_v50 }
 0x2a2   : > { %v5708_v3 = vpop.eup %5707  ;;  %5727 = vtanh.f32 %v1282_v56 }
 0x2a3   : > { %v5710_v10 = vpop.eup %5709  ;;  %v1186_v11 = vpop.f32.mrb[20].mxu0  ;;  %v1369_v12 = vpack.c.bf16 %v5708_v3, %v5704_v61  ;;  %5729 = vtanh.f32 %v1293_v60 }
 0x2a4   : > { %v7235_v15 = vpop.eup %5711  ;;  %v1187_v16 = vadd.f32 %v1186_v11, %v7178_v8  ;;  %v1188_v17 = vpop.f32.mrb[21].mxu0  ;;  %v1370_v18 = vpack.c.bf16 %v5710_v10, %v5706_v1  ;;  %1808 = vmatpush1.bf16.msra.mxu0 %v5492_v62  ;;  %5731 = vtanh.f32 %v1285_v63 }
 0x2a5   : > { %v7238_v22 = vpop.eup %5713  ;;  %v1189_v23 = vadd.f32 %v1188_v17, %v7181_v9  ;;  %v1190_v24 = vpop.f32.mrb[22].mxu0  ;;  %1809 = vmatprep.subr.bf16.mxu0 %v5497_v2  ;;  %5733 = vtanh.f32 %v1306_v13 }
 0x2a6   : > { %v7241_v29 = vpop.eup %5715  ;;  %5735 = vtanh.f32 %v1187_v16  ;;  %v1191_v30 = vadd.f32 %v1190_v24, %v7178_v8  ;;  %v1192_v31 = vpop.f32.mrb[23].mxu0  ;;  %1746 = vmatprep.mubr.bf16.mxu0 %v1370_v18  ;;  %v1371_v32 = vpack.c.bf16 %v7238_v22, %v7227_v57  ;;  %v5514_v57 = vld [vmem:[#allocation10 + $0x30] sm:$0xff]   ;;  %v5517_v22 = vld [vmem:[#allocation11] sm:$0xff]  }
 0x2a7   : > { %v7247_v34 = vpop.eup %5717  ;;  %5737 = vtanh.f32 %v1189_v23  ;;  %v1193_v35 = vadd.f32 %v1192_v31, %v7181_v9  ;;  %1747 = vmatmul.mubr.bf16.gmra.mrb[44].mxu0 %v1369_v12  ;;  %v1368_v36 = vpack.c.bf16 %v7241_v29, %v7235_v15  ;;  %v5516_v15 = vld [vmem:[#allocation10 + $0x38] sm:$0xff]   ;;  %v1432_v29 = vld [vmem:[%s7878_s14] sm:$0x3]  ;;  %s7883_s14 = sld [smem:[#allocation49_spill]] }
 0x2a8   : > { %v5720_v38 = vpop.eup %5719  ;;  %5739 = vtanh.f32 %v1191_v30  ;;  %1810 = vmatpush1.bf16.msra.mxu0 %v5495_v20 }
 0x2a9   : > { %v5722_v42 = vpop.eup %5721  ;;  %5741 = vtanh.f32 %v1193_v35  ;;  %1811 = vmatprep.subr.bf16.mxu0 %v5500_v26 }
 0x2aa   : > { %v5724_v43 = vpop.eup %5723  ;;  %5743 = vtanh.f32 %v1298_v33 }
 0x2ab   : > { %v5726_v44 = vpop.eup %5725  ;;  %v1196_v45 = vpop.f32.mrb[24].mxu0  ;;  %v1372_v46 = vpack.c.bf16 %v5724_v43, %v5720_v38  ;;  %5745 = vtanh.f32 %v1309_v37 }
 0x2ac   : > { %v7254_v48 = vpop.eup %5727  ;;  %v1197_v49 = vadd.f32 %v1196_v45, %v7178_v8  ;;  %v1198_v50 = vpop.f32.mrb[25].mxu0  ;;  %v1373_v51 = vpack.c.bf16 %v5726_v44, %v5722_v42  ;;  %1812 = vmatpush1.bf16.msra.mxu0 %v5498_v39  ;;  %5747 = vtanh.f32 %v1301_v40 }
 0x2ad   : > { %v7257_v53 = vpop.eup %5729  ;;  %v1199_v27 = vadd.f32 %v1198_v50, %v7181_v9  ;;  %v1200_v54 = vpop.f32.mrb[26].mxu0 }
 0x2ae   : > { %v7260_v56 = vpop.eup %5731  ;;  %5749 = vtanh.f32 %v1197_v49  ;;  %v1201_v58 = vadd.f32 %v1200_v54, %v7178_v8  ;;  %v1202_v60 = vpop.f32.mrb[27].mxu0  ;;  %1756 = vmatprep.mubr.bf16.mxu0 %v1373_v51  ;;  %v1377_v61 = vpack.c.bf16 %v7257_v53, %v7247_v34 }
 0x2af   : > { %v7265_v62 = vpop.eup %5733  ;;  %5751 = vtanh.f32 %v1199_v27  ;;  %v1203_v63 = vadd.f32 %v1202_v60, %v7181_v9  ;;  %1757 = vmatmul.mubr.bf16.gmra.mrb[48].mxu0 %v1372_v46  ;;  %v1374_v1 = vpack.c.bf16 %v7260_v56, %v7254_v48 }
 0x2b0   : > { %v5736_v2 = vpop.eup %5735  ;;  %5753 = vtanh.f32 %v1201_v58 }
 0x2b1   : > { %v5738_v3 = vpop.eup %5737  ;;  %5755 = vtanh.f32 %v1203_v63 }
 0x2b2   : > { %v5740_v6 = vpop.eup %5739 }
 0x2b3   : > { %v5742_v10 = vpop.eup %5741  ;;  %v1206_v11 = vpop.f32.mrb[28].mxu0  ;;  %v1375_v12 = vpack.c.bf16 %v5740_v6, %v5736_v2 }
 0x2b4   : > { %v5744_v13 = vpop.eup %5743  ;;  %v1207_v14 = vadd.f32 %v1206_v11, %v7178_v8  ;;  %v1208_v16 = vpop.f32.mrb[29].mxu0  ;;  %v1376_v17 = vpack.c.bf16 %v5742_v10, %v5738_v3 }
 0x2b5   : > { %v5746_v18 = vpop.eup %5745  ;;  %v1209_v20 = vadd.f32 %v1208_v16, %v7181_v9  ;;  %v1210_v21 = vpop.f32.mrb[30].mxu0 }
 0x2b6   : > { %v5748_v23 = vpop.eup %5747  ;;  %5757 = vtanh.f32 %v1207_v14  ;;  %v1211_v24 = vadd.f32 %v1210_v21, %v7178_v8  ;;  %v1212_v26 = vpop.f32.mrb[31].mxu0  ;;  %1766 = vmatprep.mubr.bf16.mxu0 %v1376_v17  ;;  %v1383_v28 = vpack.c.bf16 %v5746_v18, %v7265_v62  ;;  %v5518_v21 = vld [vmem:[#allocation11 + $0x8] sm:$0xff]  }
 0x2b7   : > { %5759 = vtanh.f32 %v1209_v20  ;;  %v1213_v30 = vadd.f32 %v1212_v26, %v7181_v9  ;;  %1767 = vmatmul.mubr.bf16.gmra.mrb[52].mxu0 %v1375_v12  ;;  %v1380_v31 = vpack.c.bf16 %v5748_v23, %v5744_v13  ;;  %v5508_v9 = vld [vmem:[#allocation10 + $0x18] sm:$0xff]  }
 0x2b8   : > { %v5750_v33 = vpop.eup %5749  ;;  %5761 = vtanh.f32 %v1211_v24  ;;  %4806 = vmatpush3.bf16.msra.mxu1 %v5508_v9 }
 0x2b9   : > { %v5752_v34 = vpop.eup %5751  ;;  %5763 = vtanh.f32 %v1213_v30  ;;  %4807 = vmatprep.subr.bf16.mxu1 %v5509_v25 }
 0x2ba   : > { %v5754_v35 = vpop.eup %5753 }
 0x2bb   : > { %v5756_v37 = vpop.eup %5755  ;;  %v1378_v38 = vpack.c.bf16 %v5754_v35, %v5750_v33 }
 0x2bc   : > { %v1379_v39 = vpack.c.bf16 %v5756_v37, %v5752_v34  ;;  %4808 = vmatpush3.bf16.msra.mxu1 %v5510_v41 }
 0x2bd   : > { %4809 = vmatprep.subr.bf16.mxu1 %v5511_v47  ;;  %v5521_v47 = vld [vmem:[#allocation11 + $0x20] sm:$0xff]  }
 0x2be   : > { %1776 = vmatprep.mubr.bf16.mxu0 %v1379_v39 }
 0x2bf   : > { %1777 = vmatmul.mubr.bf16.gmra.mrb[56].mxu0 %v1378_v38 }
 0x2c0   : > { %v5758_v8 = vpop.eup %5757  ;;  %4810 = vmatpush3.bf16.msra.mxu1 %v5512_v52 }
 0x2c1   : > { %v5760_v40 = vpop.eup %5759 }
 0x2c2   : > { %v5762_v42 = vpop.eup %5761 }
 0x2c3   : > { %v5764_v43 = vpop.eup %5763  ;;  %v1381_v44 = vpack.c.bf16 %v5762_v42, %v5758_v8 }
 0x2c4   : > { %v1382_v45 = vpack.c.bf16 %v5764_v43, %v5760_v40  ;;  %v5520_v43 = vld [vmem:[#allocation11 + $0x18] sm:$0xff]  }
 0x2c6   : > { %1786 = vmatprep.mubr.bf16.mxu0 %v1382_v45 }
 0x2c7   : > { %1787 = vmatmul.mubr.bf16.gmra.mrb[60].mxu0 %v1381_v44 }
 0x2c8   : > { %1829 = vmatprep.mubr.bf16.mxu0 %v6602_v0 }
 0x2cf   : > { %1830 = vmatmul.mubr.bf16.vlgmr.msra.gmra.mrb[32].mxu0 %v1362_v59  ;;  %v5515_v59 = vld [vmem:[#allocation10 + $0x78] sm:$0xff]  }
 0x2d0   : > { %1839 = vmatprep.mubr.bf16.mxu0 %v6602_v0 }
 0x2d7   : > { %1840 = vmatmul.mubr.bf16.gmra.mrb[36].mxu0 %v1365_v55  ;;  %v5513_v55 = vld [vmem:[#allocation10 + $0x70] sm:$0xff]  }
 0x2d8   : > { %1849 = vmatprep.mubr.bf16.mxu0 %v6602_v0  ;;  %4811 = vmatprep.subr.bf16.mxu1 %v5513_v55 }
 0x2d9   : > { %4812 = vmatpush3.bf16.msra.mxu1 %v5514_v57 }
 0x2da   : > { %4813 = vmatprep.subr.bf16.mxu1 %v5515_v59 }
 0x2dd   : > { %4814 = vmatpush3.bf16.msra.mxu1 %v5516_v15 }
 0x2de   : > { %5071 = vmatprep.subr.bf16.mxu1 %v5517_v22 }
 0x2df   : > { %1850 = vmatmul.mubr.bf16.gmra.mrb[40].mxu0 %v1368_v36  ;;  %v7302_v36 = vrot.slane %v1432_v29, %v7175_v7 }
 0x2e0   : > { %1859 = vmatprep.mubr.bf16.mxu0 %v6602_v0 }
 0x2e7   : > { %1860 = vmatmul.mubr.bf16.gmra.mrb[44].mxu0 %v1371_v32  ;;  %v7299_v32 = vrot.slane %v1432_v29, %v7169_v5 }
 0x2e8   : > { %1869 = vmatprep.mubr.bf16.mxu0 %v6602_v0 }
 0x2ef   : > { %1870 = vmatmul.mubr.bf16.gmra.mrb[48].mxu0 %v1374_v1 }
 0x2f0   : > { %1879 = vmatprep.mubr.bf16.mxu0 %v6602_v0 }
 0x2f7   : > { %1880 = vmatmul.mubr.bf16.gmra.mrb[52].mxu0 %v1377_v61 }
 0x2f8   : > { %1889 = vmatprep.mubr.bf16.mxu0 %v6602_v0 }
 0x2ff   : > { %1890 = vmatmul.mubr.bf16.gmra.mrb[56].mxu0 %v1380_v31  ;;  %v5519_v31 = vld [vmem:[#allocation11 + $0x10] sm:$0xff]  }
 0x300   : > { %1899 = vmatprep.mubr.bf16.mxu0 %v6602_v0 }
 0x307   : > { %1900 = vmatmul.mubr.bf16.gmra.mrb[60].mxu0 %v1383_v28 }
 0x3a2   : > { %v1831_v46 = vpop.f32.mrb[32].mxu0 }
 0x3a3   : > { %v5167_v48 = vadd.f32 %v1831_v46, %v7299_v32  ;;  %v1833_v49 = vpop.f32.mrb[33].mxu0 }
 0x3a4   : > { %v5168_v50 = vadd.f32 %v1833_v49, %v7302_v36  ;;  %v1835_v51 = vpop.f32.mrb[34].mxu0 }
 0x3a5   : > { %5765 = vtanh.f32 %v5167_v48  ;;  %v5169_v53 = vadd.f32 %v1835_v51, %v7299_v32  ;;  %v1837_v27 = vpop.f32.mrb[35].mxu0 }
 0x3a6   : > { %5767 = vtanh.f32 %v5168_v50  ;;  %v5170_v54 = vadd.f32 %v1837_v27, %v7302_v36 }
 0x3a7   : > { %5769 = vtanh.f32 %v5169_v53 }
 0x3a8   : > { %5771 = vtanh.f32 %v5170_v54 }
 0x3aa   : > { %v1841_v56 = vpop.f32.mrb[36].mxu0 }
 0x3ab   : > { %v5171_v58 = vadd.f32 %v1841_v56, %v7299_v32  ;;  %v1843_v60 = vpop.f32.mrb[37].mxu0 }
 0x3ac   : > { %v5172_v61 = vadd.f32 %v1843_v60, %v7302_v36  ;;  %v1845_v62 = vpop.f32.mrb[38].mxu0 }
 0x3ad   : > { %5773 = vtanh.f32 %v5171_v58  ;;  %v5173_v63 = vadd.f32 %v1845_v62, %v7299_v32  ;;  %v1847_v1 = vpop.f32.mrb[39].mxu0 }
 0x3ae   : > { %5775 = vtanh.f32 %v5172_v61  ;;  %v5174_v2 = vadd.f32 %v1847_v1, %v7302_v36 }
 0x3af   : > { %v5766_v3 = vpop.eup %5765  ;;  %5777 = vtanh.f32 %v5173_v63 }
 0x3b0   : > { %v5768_v6 = vpop.eup %5767  ;;  %5779 = vtanh.f32 %v5174_v2 }
 0x3b1   : > { %v5770_v10 = vpop.eup %5769 }
 0x3b2   : > { %v5772_v11 = vpop.eup %5771  ;;  %v1851_v12 = vpop.f32.mrb[40].mxu0  ;;  %v1942_v13 = vpack.c.bf16 %v5770_v10, %v5766_v3 }
 0x3b3   : > { %v5175_v14 = vadd.f32 %v1851_v12, %v7299_v32  ;;  %v1853_v16 = vpop.f32.mrb[41].mxu0  ;;  %v1943_v17 = vpack.c.bf16 %v5772_v11, %v5768_v6 }
 0x3b4   : > { %v5176_v18 = vadd.f32 %v1853_v16, %v7302_v36  ;;  %v1855_v20 = vpop.f32.mrb[42].mxu0 }
 0x3b5   : > { %5781 = vtanh.f32 %v5175_v14  ;;  %v5177_v23 = vadd.f32 %v1855_v20, %v7299_v32  ;;  %v1857_v24 = vpop.f32.mrb[43].mxu0  ;;  %2125 = vmatprep.mubr.bf16.mxu1 %v1943_v17 }
 0x3b6   : > { %5783 = vtanh.f32 %v5176_v18  ;;  %v5178_v26 = vadd.f32 %v1857_v24, %v7302_v36  ;;  %2126 = vmatmul.mubr.bf16.vlgmr.msra.gmra.mrb[16].mxu1 %v1942_v13 }
 0x3b7   : > { %v5774_v28 = vpop.eup %5773  ;;  %5785 = vtanh.f32 %v5177_v23  ;;  %5072 = vmatpush3.bf16.msra.mxu1 %v5517_v22 }
 0x3b8   : > { %v5776_v30 = vpop.eup %5775  ;;  %5787 = vtanh.f32 %v5178_v26  ;;  %5073 = vmatprep.subr.bf16.mxu1 %v5518_v21 }
 0x3b9   : > { %v5778_v33 = vpop.eup %5777 }
 0x3ba   : > { %v5780_v34 = vpop.eup %5779  ;;  %v1861_v35 = vpop.f32.mrb[44].mxu0  ;;  %v1944_v37 = vpack.c.bf16 %v5778_v33, %v5774_v28 }
 0x3bb   : > { %v5179_v38 = vadd.f32 %v1861_v35, %v7299_v32  ;;  %v1863_v39 = vpop.f32.mrb[45].mxu0  ;;  %v1945_v8 = vpack.c.bf16 %v5780_v34, %v5776_v30  ;;  %5074 = vmatpush3.bf16.msra.mxu1 %v5518_v21 }
 0x3bc   : > { %v5180_v40 = vadd.f32 %v1863_v39, %v7302_v36  ;;  %v1865_v42 = vpop.f32.mrb[46].mxu0  ;;  %5075 = vmatprep.subr.bf16.mxu1 %v5519_v31 }
 0x3bd   : > { %5789 = vtanh.f32 %v5179_v38  ;;  %v5181_v44 = vadd.f32 %v1865_v42, %v7299_v32  ;;  %v1867_v45 = vpop.f32.mrb[47].mxu0  ;;  %2133 = vmatprep.mubr.bf16.mxu1 %v1945_v8 }
 0x3be   : > { %5791 = vtanh.f32 %v5180_v40  ;;  %v5182_v9 = vadd.f32 %v1867_v45, %v7302_v36  ;;  %2134 = vmatmul.mubr.bf16.gmra.mrb[20].mxu1 %v1944_v37 }
 0x3bf   : > { %v5782_v25 = vpop.eup %5781  ;;  %5793 = vtanh.f32 %v5181_v44  ;;  %5076 = vmatpush3.bf16.msra.mxu1 %v5519_v31 }
 0x3c0   : > { %v5784_v41 = vpop.eup %5783  ;;  %5795 = vtanh.f32 %v5182_v9  ;;  %5077 = vmatprep.subr.bf16.mxu1 %v5520_v43 }
 0x3c1   : > { %v5786_v52 = vpop.eup %5785 }
 0x3c2   : > { %v5788_v55 = vpop.eup %5787  ;;  %v1871_v57 = vpop.f32.mrb[48].mxu0  ;;  %v1946_v59 = vpack.c.bf16 %v5786_v52, %v5782_v25 }
 0x3c3   : > { %v5183_v15 = vadd.f32 %v1871_v57, %v7299_v32  ;;  %v1873_v22 = vpop.f32.mrb[49].mxu0  ;;  %v1947_v29 = vpack.c.bf16 %v5788_v55, %v5784_v41  ;;  %5078 = vmatpush3.bf16.msra.mxu1 %v5520_v43 }
 0x3c4   : > { %v5184_v46 = vadd.f32 %v1873_v22, %v7302_v36  ;;  %v1875_v48 = vpop.f32.mrb[50].mxu0  ;;  %5079 = vmatprep.subr.bf16.mxu1 %v5521_v47 }
 0x3c5   : > { %5797 = vtanh.f32 %v5183_v15  ;;  %v5185_v49 = vadd.f32 %v1875_v48, %v7299_v32  ;;  %v1877_v50 = vpop.f32.mrb[51].mxu0  ;;  %2141 = vmatprep.mubr.bf16.mxu1 %v1947_v29  ;;  %v5523_v48 = vld [vmem:[#allocation11 + $0x30] sm:$0xff]  }
 0x3c6   : > { %5799 = vtanh.f32 %v5184_v46  ;;  %v5186_v51 = vadd.f32 %v1877_v50, %v7302_v36  ;;  %2142 = vmatmul.mubr.bf16.gmra.mrb[24].mxu1 %v1946_v59  ;;  %v5527_v50 = vld [vmem:[#allocation13 + $0x4] ss:$8 sps:$4 sm:$0xff]  }
 0x3c7   : > { %v5790_v53 = vpop.eup %5789  ;;  %5801 = vtanh.f32 %v5185_v49  ;;  %5080 = vmatpush3.bf16.msra.mxu1 %v5521_v47  ;;  %v5524_v49 = vld [vmem:[#allocation11 + $0x38] sm:$0xff]  }
 0x3c8   : > { %v5792_v27 = vpop.eup %5791  ;;  %5803 = vtanh.f32 %v5186_v51 }
 0x3c9   : > { %v5794_v54 = vpop.eup %5793 }
 0x3ca   : > { %v5796_v56 = vpop.eup %5795  ;;  %v1881_v58 = vpop.f32.mrb[52].mxu0  ;;  %v1948_v60 = vpack.c.bf16 %v5794_v54, %v5790_v53  ;;  %v7339_v53 = vld [vmem:[%s7781_s7] ss:$0 sm:$0xff] }
 0x3cb   : > { %v5187_v61 = vadd.f32 %v1881_v58, %v7299_v32  ;;  %v1883_v62 = vpop.f32.mrb[53].mxu0  ;;  %v1949_v63 = vpack.c.bf16 %v5796_v56, %v5792_v27 }
 0x3cc   : > { %v5188_v1 = vadd.f32 %v1883_v62, %v7302_v36  ;;  %v1885_v2 = vpop.f32.mrb[54].mxu0 }
 0x3cd   : > { %5805 = vtanh.f32 %v5187_v61  ;;  %v5189_v3 = vadd.f32 %v1885_v2, %v7299_v32  ;;  %v1887_v6 = vpop.f32.mrb[55].mxu0  ;;  %2149 = vmatprep.mubr.bf16.mxu1 %v1949_v63 }
 0x3ce   : > { %5807 = vtanh.f32 %v5188_v1  ;;  %v5190_v10 = vadd.f32 %v1887_v6, %v7302_v36  ;;  %2150 = vmatmul.mubr.bf16.gmra.mrb[28].mxu1 %v1948_v60 }
 0x3cf   : > { %v5798_v11 = vpop.eup %5797  ;;  %5809 = vtanh.f32 %v5189_v3 }
 0x3d0   : > { %v5800_v12 = vpop.eup %5799  ;;  %5811 = vtanh.f32 %v5190_v10 }
 0x3d1   : > { %v5802_v13 = vpop.eup %5801 }
 0x3d2   : > { %v5804_v14 = vpop.eup %5803  ;;  %v1891_v16 = vpop.f32.mrb[56].mxu0  ;;  %v1950_v17 = vpack.c.bf16 %v5802_v13, %v5798_v11 }
 0x3d3   : > { %v5191_v18 = vadd.f32 %v1891_v16, %v7299_v32  ;;  %v1893_v20 = vpop.f32.mrb[57].mxu0  ;;  %v1951_v21 = vpack.c.bf16 %v5804_v14, %v5800_v12 }
 0x3d4   : > { %v5192_v23 = vadd.f32 %v1893_v20, %v7302_v36  ;;  %v1895_v24 = vpop.f32.mrb[58].mxu0 }
 0x3d5   : > { %5813 = vtanh.f32 %v5191_v18  ;;  %v5193_v26 = vadd.f32 %v1895_v24, %v7299_v32  ;;  %v1897_v28 = vpop.f32.mrb[59].mxu0  ;;  %2157 = vmatprep.mubr.bf16.mxu1 %v1951_v21 }
 0x3d6   : > { %5815 = vtanh.f32 %v5192_v23  ;;  %v5194_v30 = vadd.f32 %v1897_v28, %v7302_v36  ;;  %2158 = vmatmul.mubr.bf16.gmra.mrb[32].mxu1 %v1950_v17 }
 0x3d7   : > { %v5806_v31 = vpop.eup %5805  ;;  %5817 = vtanh.f32 %v5193_v26 }
 0x3d8   : > { %v5808_v33 = vpop.eup %5807  ;;  %5819 = vtanh.f32 %v5194_v30 }
 0x3d9   : > { %v5810_v34 = vpop.eup %5809 }
 0x3da   : > { %v5812_v35 = vpop.eup %5811  ;;  %v1901_v37 = vpop.f32.mrb[60].mxu0  ;;  %v1952_v38 = vpack.c.bf16 %v5810_v34, %v5806_v31 }
 0x3db   : > { %v5195_v39 = vadd.f32 %v1901_v37, %v7299_v32  ;;  %v1903_v8 = vpop.f32.mrb[61].mxu0  ;;  %v1953_v40 = vpack.c.bf16 %v5812_v35, %v5808_v33 }
 0x3dc   : > { %v5196_v42 = vadd.f32 %v1903_v8, %v7302_v36  ;;  %v1905_v43 = vpop.f32.mrb[62].mxu0 }
 0x3dd   : > { %5821 = vtanh.f32 %v5195_v39  ;;  %v5197_v44 = vadd.f32 %v1905_v43, %v7299_v32  ;;  %v1907_v45 = vpop.f32.mrb[63].mxu0  ;;  %2165 = vmatprep.mubr.bf16.mxu1 %v1953_v40  ;;  %v5530_v40 = vld [vmem:[#allocation13 + $0x14] ss:$8 sps:$4 sm:$0xff]  }
 0x3de   : > { %5823 = vtanh.f32 %v5196_v42  ;;  %v5198_v9 = vadd.f32 %v1907_v45, %v7302_v36  ;;  %2166 = vmatmul.mubr.bf16.gmra.mrb[36].mxu1 %v1952_v38  ;;  %v5522_v36 = vld [vmem:[#allocation11 + $0x28] sm:$0xff]   ;;  %v5528_v45 = vld [vmem:[#allocation13 + $0x10] ss:$8 sps:$4 sm:$0xff]  }
 0x3df   : > { %v5814_v25 = vpop.eup %5813  ;;  %5825 = vtanh.f32 %v5197_v44  ;;  %5081 = vmatprep.subr.bf16.mxu1 %v5522_v36  ;;  %v5525_v38 = vld [vmem:[#allocation13] ss:$8 sps:$4 sm:$0xff]  }
 0x3e0   : > { %v5816_v41 = vpop.eup %5815  ;;  %5827 = vtanh.f32 %v5198_v9  ;;  %5082 = vmatpush3.bf16.msra.mxu1 %v5522_v36  ;;  %v5533_v9 = vld [vmem:[#allocation13 + $0x24] ss:$8 sps:$4 sm:$0xff]  }
 0x3e1   : > { %v5818_v47 = vpop.eup %5817  ;;  %5083 = vmatprep.subr.bf16.mxu1 %v5523_v48 }
 0x3e2   : > { %v5820_v52 = vpop.eup %5819  ;;  %v1954_v55 = vpack.c.bf16 %v5818_v47, %v5814_v25 }
 0x3e3   : > { %v1955_v57 = vpack.c.bf16 %v5820_v52, %v5816_v41 }
 0x3e4   : > { %5084 = vmatpush3.bf16.msra.mxu1 %v5523_v48  ;;  %v5534_v48 = vld [vmem:[#allocation13 + $0x30] ss:$8 sps:$4 sm:$0xff]  }
 0x3e5   : > { %2173 = vmatprep.mubr.bf16.mxu1 %v1955_v57  ;;  %5085 = vmatprep.subr.bf16.mxu1 %v5524_v49 }
 0x3e6   : > { %2174 = vmatmul.mubr.bf16.gmra.mrb[40].mxu1 %v1954_v55 }
 0x3e7   : > { %v5822_v59 = vpop.eup %5821 }
 0x3e8   : > { %v5824_v15 = vpop.eup %5823  ;;  %5086 = vmatpush3.bf16.msra.mxu1 %v5524_v49 }
 0x3e9   : > { %v5826_v22 = vpop.eup %5825  ;;  %2514 = vmatprep.subr.bf16.mxu1 %v5527_v50 }
 0x3ea   : > { %v5828_v32 = vpop.eup %5827  ;;  %v1956_v29 = vpack.c.bf16 %v5826_v22, %v5822_v59  ;;  %v5531_v59 = vld [vmem:[#allocation13 + $0x20] ss:$8 sps:$4 sm:$0xff]  }
 0x3eb   : > { %v1957_v46 = vpack.c.bf16 %v5828_v32, %v5824_v15  ;;  %v5536_v32 = vld [vmem:[#allocation13 + $0x34] ss:$8 sps:$4 sm:$0xff]  }
 0x3ed   : > { %2181 = vmatprep.mubr.bf16.mxu1 %v1957_v46 }
 0x3ee   : > { %2182 = vmatmul.mubr.bf16.gmra.mrb[44].mxu1 %v1956_v29 }
 0x489   : > { %v4815_v51 = vpop.f32.mrb[16].mxu1 }
 0x48a   : > { %v4816_v27 = vpop.f32.mrb[17].mxu1 }
 0x48b   : > { %v4817_v54 = vadd.f32 %v4816_v27, %v4815_v51  ;;  %v4818_v56 = vpop.f32.mrb[18].mxu1 }
 0x48c   : > { %v4819_v58 = vpop.f32.mrb[19].mxu1 }
 0x48d   : > { %v2128_v60 = vadd.f32 %v4817_v54, %v7339_v53  ;;  %v4820_v61 = vadd.f32 %v4819_v58, %v4818_v56 }
 0x48f   : > { %v2131_v62 = vadd.f32 %v4820_v61, %v7339_v53  ;;  %5829 = vtanh.f32 %v2128_v60 }
 0x491   : > { %5831 = vtanh.f32 %v2131_v62  ;;  %v4821_v63 = vpop.f32.mrb[20].mxu1 }
 0x492   : > { %v4822_v1 = vpop.f32.mrb[21].mxu1 }
 0x493   : > { %v4823_v2 = vadd.f32 %v4822_v1, %v4821_v63  ;;  %v4824_v3 = vpop.f32.mrb[22].mxu1 }
 0x494   : > { %v4825_v6 = vpop.f32.mrb[23].mxu1 }
 0x495   : > { %v2136_v10 = vadd.f32 %v4823_v2, %v7339_v53  ;;  %v4826_v11 = vadd.f32 %v4825_v6, %v4824_v3 }
 0x497   : > { %v2139_v12 = vadd.f32 %v4826_v11, %v7339_v53  ;;  %5833 = vtanh.f32 %v2136_v10 }
 0x499   : > { %5835 = vtanh.f32 %v2139_v12  ;;  %v4827_v13 = vpop.f32.mrb[24].mxu1  ;;  %v5830_v14 = vpop.eup %5829 }
 0x49a   : > { %v4828_v16 = vpop.f32.mrb[25].mxu1 }
 0x49b   : > { %v5832_v17 = vpop.eup %5831  ;;  %v4829_v18 = vadd.f32 %v4828_v16, %v4827_v13  ;;  %v4830_v20 = vpop.f32.mrb[26].mxu1 }
 0x49c   : > { %v4831_v21 = vpop.f32.mrb[27].mxu1  ;;  %v2206_v23 = vpack.c.bf16 %v5832_v17, %v5830_v14 }
 0x49d   : > { %v2144_v24 = vadd.f32 %v4829_v18, %v7339_v53  ;;  %v4832_v26 = vadd.f32 %v4831_v21, %v4830_v20 }
 0x49e   : > { %5087 = vmatprep.mubr.bf16.mxu1 %v2206_v23 }
 0x49f   : > { %v2147_v28 = vadd.f32 %v4832_v26, %v7339_v53  ;;  %5837 = vtanh.f32 %v2144_v24 }
 0x4a1   : > { %5839 = vtanh.f32 %v2147_v28  ;;  %v4833_v30 = vpop.f32.mrb[28].mxu1  ;;  %v5834_v31 = vpop.eup %5833 }
 0x4a2   : > { %v4834_v33 = vpop.f32.mrb[29].mxu1 }
 0x4a3   : > { %v5836_v34 = vpop.eup %5835  ;;  %v4835_v35 = vadd.f32 %v4834_v33, %v4833_v30  ;;  %v4836_v37 = vpop.f32.mrb[30].mxu1 }
 0x4a4   : > { %v4837_v39 = vpop.f32.mrb[31].mxu1  ;;  %v2207_v8 = vpack.c.bf16 %v5836_v34, %v5834_v31 }
 0x4a5   : > { %v2152_v42 = vadd.f32 %v4835_v35, %v7339_v53  ;;  %v4838_v43 = vadd.f32 %v4837_v39, %v4836_v37 }
 0x4a6   : > { %5088 = vmatmul.mubr.bf16.vlgmr.msra.gmra.mrb[48].mxu1 %v2207_v8 }
 0x4a7   : > { %v2155_v44 = vadd.f32 %v4838_v43, %v7339_v53  ;;  %2515 = vmatpush1.bf16.msra.mxu1 %v5525_v38  ;;  %5841 = vtanh.f32 %v2152_v42  ;;  %v5539_v42 = vld [vmem:[#allocation13 + $0x44] ss:$8 sps:$4 sm:$0xff]   ;;  %v5537_v43 = vld [vmem:[#allocation13 + $0x40] ss:$8 sps:$4 sm:$0xff]  }
 0x4a8   : > { %2516 = vmatprep.subr.bf16.mxu1 %v5530_v40 }
 0x4a9   : > { %5843 = vtanh.f32 %v2155_v44  ;;  %v4839_v25 = vpop.f32.mrb[32].mxu1  ;;  %v5838_v41 = vpop.eup %5837  ;;  %v5542_v44 = vld [vmem:[#allocation13 + $0x54] ss:$8 sps:$4 sm:$0xff]  }
 0x4aa   : > { %v4840_v47 = vpop.f32.mrb[33].mxu1 }
 0x4ab   : > { %v5840_v52 = vpop.eup %5839  ;;  %v4841_v55 = vadd.f32 %v4840_v47, %v4839_v25  ;;  %v4842_v57 = vpop.f32.mrb[34].mxu1  ;;  %2517 = vmatpush1.bf16.msra.mxu1 %v5528_v45  ;;  %v5540_v45 = vld [vmem:[#allocation13 + $0x50] ss:$8 sps:$4 sm:$0xff]   ;;  %v5548_v25 = vld [vmem:[#allocation13 + $0x74] ss:$8 sps:$4 sm:$0xff]   ;;  %v5549_v47 = vld [vmem:[#allocation14] sm:$0xff]  }
 0x4ac   : > { %v4843_v15 = vpop.f32.mrb[35].mxu1  ;;  %v2208_v22 = vpack.c.bf16 %v5840_v52, %v5838_v41  ;;  %2518 = vmatprep.subr.bf16.mxu1 %v5533_v9  ;;  %v5545_v9 = vld [vmem:[#allocation13 + $0x64] ss:$8 sps:$4 sm:$0xff]   ;;  %v5546_v41 = vld [vmem:[#allocation13 + $0x70] ss:$8 sps:$4 sm:$0xff]   ;;  %5103 = vmatprep.subr.bf16.mxu0 %v5549_v47 }
 0x4ad   : > { %v2160_v29 = vadd.f32 %v4841_v55, %v7339_v53  ;;  %v4844_v46 = vadd.f32 %v4843_v15, %v4842_v57  ;;  %v5550_v52 = vld [vmem:[#allocation14 + $0x8] sm:$0xff]   ;;  %5104 = vmatpush3.bf16.msra.mxu0 %v5549_v47  ;;  %v5551_v55 = vld [vmem:[#allocation14 + $0x10] sm:$0xff]   ;;  %v5552_v57 = vld [vmem:[#allocation14 + $0x18] sm:$0xff]  }
 0x4ae   : > { %5091 = vmatprep.mubr.bf16.mxu1 %v2208_v22  ;;  %5105 = vmatprep.subr.bf16.mxu0 %v5550_v52 }
 0x4af   : > { %v2163_v36 = vadd.f32 %v4844_v46, %v7339_v53  ;;  %2519 = vmatpush1.bf16.msra.mxu1 %v5531_v59  ;;  %5845 = vtanh.f32 %v2160_v29  ;;  %v7361_v59 = vld [vmem:[%s7879_s22] ss:$0 sm:$0xff]  ;;  %s7884_s22 = sld [smem:[#allocation53_spill]] }
 0x4b0   : > { %2520 = vmatprep.subr.bf16.mxu1 %v5536_v32 }
 0x4b1   : > { %5847 = vtanh.f32 %v2163_v36  ;;  %v4845_v49 = vpop.f32.mrb[36].mxu1  ;;  %v5842_v50 = vpop.eup %5841  ;;  %5106 = vmatpush3.bf16.msra.mxu0 %v5550_v52 }
 0x4b2   : > { %v4846_v51 = vpop.f32.mrb[37].mxu1  ;;  %5107 = vmatprep.subr.bf16.mxu0 %v5551_v55 }
 0x4b3   : > { %v5844_v27 = vpop.eup %5843  ;;  %v4847_v54 = vadd.f32 %v4846_v51, %v4845_v49  ;;  %v4848_v56 = vpop.f32.mrb[38].mxu1  ;;  %2521 = vmatpush1.bf16.msra.mxu1 %v5534_v48 }
 0x4b4   : > { %v4849_v58 = vpop.f32.mrb[39].mxu1  ;;  %v2209_v60 = vpack.c.bf16 %v5844_v27, %v5842_v50  ;;  %2522 = vmatprep.subr.bf16.mxu1 %v5539_v42 }
 0x4b5   : > { %v2168_v61 = vadd.f32 %v4847_v54, %v7339_v53  ;;  %v4850_v62 = vadd.f32 %v4849_v58, %v4848_v56  ;;  %5108 = vmatpush3.bf16.msra.mxu0 %v5551_v55  ;;  %v5553_v55 = vld [vmem:[#allocation14 + $0x20] sm:$0xff]   ;;  %s7654_s16 = scalar_lea.hbm %s7884_s22, %s4782_s1 }
 0x4b6   : > { %5092 = vmatmul.mubr.bf16.gmra.mrb[52].mxu1 %v2209_v60  ;;  %5109 = vmatprep.subr.bf16.mxu0 %v5552_v57 }
 0x4b7   : > { %v2171_v63 = vadd.f32 %v4850_v62, %v7339_v53  ;;  %5849 = vtanh.f32 %v2168_v61  ;;  %2523 = vmatpush1.bf16.msra.mxu1 %v5537_v43 }
 0x4b8   : > { %2524 = vmatprep.subr.bf16.mxu1 %v5542_v44 }
 0x4b9   : > { %5851 = vtanh.f32 %v2171_v63  ;;  %v4851_v1 = vpop.f32.mrb[40].mxu1  ;;  %v5846_v2 = vpop.eup %5845  ;;  %5110 = vmatpush3.bf16.msra.mxu0 %v5552_v57  ;;  %v5554_v57 = vld [vmem:[#allocation14 + $0x28] sm:$0xff]  }
 0x4ba   : > { %v4852_v3 = vpop.f32.mrb[41].mxu1  ;;  %5111 = vmatprep.subr.bf16.mxu0 %v5553_v55 }
 0x4bb   : > { %v5848_v6 = vpop.eup %5847  ;;  %v4853_v10 = vadd.f32 %v4852_v3, %v4851_v1  ;;  %v4854_v11 = vpop.f32.mrb[42].mxu1  ;;  %2525 = vmatpush1.bf16.msra.mxu1 %v5540_v45 }
 0x4bc   : > { %v4855_v12 = vpop.f32.mrb[43].mxu1  ;;  %v2210_v13 = vpack.c.bf16 %v5848_v6, %v5846_v2  ;;  %2526 = vmatprep.subr.bf16.mxu1 %v5545_v9 }
 0x4bd   : > { %v2176_v14 = vadd.f32 %v4853_v10, %v7339_v53  ;;  %v4856_v16 = vadd.f32 %v4855_v12, %v4854_v11  ;;  %5112 = vmatpush3.bf16.msra.mxu0 %v5553_v55 }
 0x4be   : > { %5095 = vmatprep.mubr.bf16.mxu1 %v2210_v13  ;;  %5113 = vmatprep.subr.bf16.mxu0 %v5554_v57 }
 0x4bf   : > { %v2179_v17 = vadd.f32 %v4856_v16, %v7339_v53  ;;  %5853 = vtanh.f32 %v2176_v14 }
 0x4c1   : > { %5855 = vtanh.f32 %v2179_v17  ;;  %v4857_v18 = vpop.f32.mrb[44].mxu1  ;;  %v5850_v20 = vpop.eup %5849  ;;  %5114 = vmatpush3.bf16.msra.mxu0 %v5554_v57 }
 0x4c2   : > { %v4858_v21 = vpop.f32.mrb[45].mxu1 }
 0x4c3   : > { %v5852_v23 = vpop.eup %5851  ;;  %v4859_v24 = vadd.f32 %v4858_v21, %v4857_v18  ;;  %v4860_v26 = vpop.f32.mrb[46].mxu1 }
 0x4c4   : > { %v4861_v28 = vpop.f32.mrb[47].mxu1  ;;  %v2211_v30 = vpack.c.bf16 %v5852_v23, %v5850_v20 }
 0x4c5   : > { %v2184_v31 = vadd.f32 %v4859_v24, %v7339_v53  ;;  %v4862_v33 = vadd.f32 %v4861_v28, %v4860_v26 }
 0x4c6   : > { %5096 = vmatmul.mubr.bf16.gmra.mrb[56].mxu1 %v2211_v30 }
 0x4c7   : > { %v2187_v34 = vadd.f32 %v4862_v33, %v7339_v53  ;;  %5857 = vtanh.f32 %v2184_v31  ;;  %v5543_v53 = vld [vmem:[#allocation13 + $0x60] ss:$8 sps:$4 sm:$0xff]  }
 0x4c8   : > { %2527 = vmatpush1.bf16.msra.mxu1 %v5543_v53 }
 0x4c9   : > { %5859 = vtanh.f32 %v2187_v34  ;;  %v5854_v35 = vpop.eup %5853  ;;  %2528 = vmatprep.subr.bf16.mxu1 %v5548_v25 }
 0x4cb   : > { %v5856_v37 = vpop.eup %5855 }
 0x4cc   : > { %v2212_v38 = vpack.c.bf16 %v5856_v37, %v5854_v35  ;;  %2529 = vmatpush1.bf16.msra.mxu1 %v5546_v41 }
 0x4ce   : > { %5099 = vmatprep.mubr.bf16.mxu1 %v2212_v38 }
 0x4d1   : > { %v5858_v39 = vpop.eup %5857 }
 0x4d3   : > { %v5860_v8 = vpop.eup %5859 }
 0x4d4   : > { %v2213_v40 = vpack.c.bf16 %v5860_v8, %v5858_v39 }
 0x4d6   : > { %5100 = vmatmul.mubr.bf16.gmra.mrb[60].mxu1 %v2213_v40 }
 0x4d7   : > { %2546 = vmatprep.mubr.bf16.mxu1 %v6602_v0 }
 0x579   : > { %v5089_v15 = vpop.f32.mrb[48].mxu1 }
 0x57a   : > { %v2328_v22 = vadd.f32 %v5089_v15, %v7361_v59  ;;  %v2319_v32 = vpop.f32.mrb[49].mxu1  ;;  %v5556_v15 = vld [vmem:[#allocation14 + $0x38] sm:$0xff]  }
 0x57b   : > { %v2320_v29 = vadd.f32 %v7361_v59, %v2319_v32  ;;  %v5090_v46 = vpop.f32.mrb[50].mxu1  ;;  %v5559_v32 = vld [vmem:[#allocation16 + $0x4] ss:$8 sps:$4 sm:$0xff]  }
 0x57c   : > { %5861 = vtanh.f32 %v2328_v22  ;;  %v2331_v36 = vadd.f32 %v5090_v46, %v7361_v59  ;;  %v2322_v48 = vpop.f32.mrb[51].mxu1  ;;  %v5557_v22 = vld [vmem:[#allocation16] ss:$8 sps:$4 sm:$0xff]   ;;  %3063 = vmatprep.subr.bf16.mxu1 %v5559_v32  ;;  %v5560_v46 = vld [vmem:[#allocation16 + $0x10] ss:$8 sps:$4 sm:$0xff]  }
 0x57d   : > { %5863 = vtanh.f32 %v2320_v29  ;;  %v2323_v49 = vadd.f32 %v7361_v59, %v2322_v48  ;;  %v5562_v29 = vld [vmem:[#allocation16 + $0x14] ss:$8 sps:$4 sm:$0xff]   ;;  %v5563_v48 = vld [vmem:[#allocation16 + $0x20] ss:$8 sps:$4 sm:$0xff]  }
 0x57e   : > { %5865 = vtanh.f32 %v2331_v36  ;;  %v5565_v36 = vld [vmem:[#allocation16 + $0x24] ss:$8 sps:$4 sm:$0xff]  }
 0x57f   : > { %5867 = vtanh.f32 %v2323_v49  ;;  %v5568_v49 = vld [vmem:[#allocation16 + $0x34] ss:$8 sps:$4 sm:$0xff]  }
 0x586   : > { %v5862_v50 = vpop.eup %5861 }
 0x587   : > { %v5864_v51 = vpop.eup %5863 }
 0x588   : > { %v5866_v27 = vpop.eup %5865 }
 0x589   : > { %v5868_v54 = vpop.eup %5867  ;;  %v5093_v56 = vpop.f32.mrb[52].mxu1  ;;  %v2399_v58 = vpack.c.bf16 %v5866_v27, %v5862_v50  ;;  %v5566_v50 = vld [vmem:[#allocation16 + $0x30] ss:$8 sps:$4 sm:$0xff]   ;;  %v5569_v27 = vld [vmem:[#allocation16 + $0x40] ss:$8 sps:$4 sm:$0xff]  }
 0x58a   : > { %v2344_v60 = vadd.f32 %v5093_v56, %v7361_v59  ;;  %v2335_v61 = vpop.f32.mrb[53].mxu1  ;;  %v2398_v62 = vpack.c.bf16 %v5868_v54, %v5864_v51  ;;  %v5571_v51 = vld [vmem:[#allocation16 + $0x44] ss:$8 sps:$4 sm:$0xff]   ;;  %v5574_v54 = vld [vmem:[#allocation16 + $0x54] ss:$8 sps:$4 sm:$0xff]  }
 0x58b   : > { %v2336_v63 = vadd.f32 %v7361_v59, %v2335_v61  ;;  %v5094_v1 = vpop.f32.mrb[54].mxu1  ;;  %v5572_v56 = vld [vmem:[#allocation16 + $0x50] ss:$8 sps:$4 sm:$0xff]  }
 0x58c   : > { %5869 = vtanh.f32 %v2344_v60  ;;  %v2347_v2 = vadd.f32 %v5094_v1, %v7361_v59  ;;  %v2338_v3 = vpop.f32.mrb[55].mxu1  ;;  %2547 = vmatmul.mubr.bf16.vlgmr.msra.gmra.mrb[64].mxu1 %v2398_v62 }
 0x58d   : > { %5871 = vtanh.f32 %v2336_v63  ;;  %v2339_v6 = vadd.f32 %v7361_v59, %v2338_v3  ;;  %2556 = vmatprep.mubr.bf16.mxu1 %v6602_v0  ;;  %3064 = vmatpush1.bf16.msra.mxu1 %v5557_v22 }
 0x58e   : > { %5873 = vtanh.f32 %v2347_v2  ;;  %3065 = vmatprep.subr.bf16.mxu1 %v5562_v29 }
 0x58f   : > { %5875 = vtanh.f32 %v2339_v6 }
 0x591   : > { %3066 = vmatpush1.bf16.msra.mxu1 %v5560_v46 }
 0x592   : > { %3067 = vmatprep.subr.bf16.mxu1 %v5565_v36 }
 0x594   : > { %2557 = vmatmul.mubr.bf16.gmra.mrb[68].mxu1 %v2399_v58  ;;  %v2422_v58 = vld [vmem:[%s7880_s12] sm:$0x3]  ;;  %s6461_s12 = scalar_lea.vmem %s7656_s21, 4096 }
 0x595   : > { %2566 = vmatprep.mubr.bf16.mxu1 %v6602_v0  ;;  %3068 = vmatpush1.bf16.msra.mxu1 %v5563_v48  ;;  %v7392_v60 = vrot.slane %v2422_v58, %v7169_v5  ;;  %v7395_v61 = vrot.slane %v2422_v58, %v7175_v7  ;;  %p6462_p0 = scmp.ne.s32.totalorder %s7656_s21, %s6461_s12 }
 0x596   : > { %v5870_v10 = vpop.eup %5869  ;;  %3069 = vmatprep.subr.bf16.mxu1 %v5568_v49  ;;  %v2662_v49 = vld [vmem:[%s7124_s20 + $0x18] sm:$0xff] }
 0x597   : > { %v5872_v11 = vpop.eup %5871  ;;  %p6463_p7 = pnand %p6462_p0, %p7885_p5 }
 0x598   : > { %v5874_v12 = vpop.eup %5873 }
 0x599   : > { %v5876_v13 = vpop.eup %5875  ;;  %v5097_v14 = vpop.f32.mrb[56].mxu1  ;;  %v2401_v16 = vpack.c.bf16 %v5874_v12, %v5870_v10  ;;  %3070 = vmatpush1.bf16.msra.mxu1 %v5566_v50  ;;  %p6464_p8 = pneg %p6463_p7 }
 0x59a   : > { %v2360_v17 = vadd.f32 %v5097_v14, %v7361_v59  ;;  %v2351_v18 = vpop.f32.mrb[57].mxu1  ;;  %v2400_v20 = vpack.c.bf16 %v5876_v13, %v5872_v11  ;;  %3071 = vmatprep.subr.bf16.mxu1 %v5571_v51 }
 0x59b   : > { %v2352_v21 = vadd.f32 %v7361_v59, %v2351_v18  ;;  %v5098_v23 = vpop.f32.mrb[58].mxu1 }
 0x59c   : > { %5877 = vtanh.f32 %v2360_v17  ;;  %v2363_v24 = vadd.f32 %v5098_v23, %v7361_v59  ;;  %v2354_v26 = vpop.f32.mrb[59].mxu1  ;;  %2567 = vmatmul.mubr.bf16.gmra.mrb[72].mxu1 %v2400_v20 }
 0x59d   : > { %5879 = vtanh.f32 %v2352_v21  ;;  %v2355_v28 = vadd.f32 %v7361_v59, %v2354_v26  ;;  %2576 = vmatprep.mubr.bf16.mxu1 %v6602_v0  ;;  %3072 = vmatpush1.bf16.msra.mxu1 %v5569_v27 }
 0x59e   : > { %5881 = vtanh.f32 %v2363_v24  ;;  %3073 = vmatprep.subr.bf16.mxu1 %v5574_v54 }
 0x59f   : > { %5883 = vtanh.f32 %v2355_v28 }
 0x5a1   : > { %3074 = vmatpush1.bf16.msra.mxu1 %v5572_v56 }
 0x5a4   : > { %2577 = vmatmul.mubr.bf16.gmra.mrb[76].mxu1 %v2401_v16 }
 0x5a5   : > { %2586 = vmatprep.mubr.bf16.mxu1 %v6602_v0 }
 0x5a6   : > { %v5878_v30 = vpop.eup %5877 }
 0x5a7   : > { %v5880_v31 = vpop.eup %5879 }
 0x5a8   : > { %v5882_v33 = vpop.eup %5881 }
 0x5a9   : > { %v5884_v34 = vpop.eup %5883  ;;  %v5101_v35 = vpop.f32.mrb[60].mxu1  ;;  %v2403_v37 = vpack.c.bf16 %v5882_v33, %v5878_v30 }
 0x5aa   : > { %v2376_v38 = vadd.f32 %v5101_v35, %v7361_v59  ;;  %v2367_v39 = vpop.f32.mrb[61].mxu1  ;;  %v2402_v8 = vpack.c.bf16 %v5884_v34, %v5880_v31 }
 0x5ab   : > { %v2368_v40 = vadd.f32 %v7361_v59, %v2367_v39  ;;  %v5102_v42 = vpop.f32.mrb[62].mxu1 }
 0x5ac   : > { %5885 = vtanh.f32 %v2376_v38  ;;  %v2379_v43 = vadd.f32 %v5102_v42, %v7361_v59  ;;  %v2370_v44 = vpop.f32.mrb[63].mxu1  ;;  %2587 = vmatmul.mubr.bf16.gmra.mrb[80].mxu1 %v2402_v8 }
 0x5ad   : > { %5887 = vtanh.f32 %v2368_v40  ;;  %v2371_v45 = vadd.f32 %v7361_v59, %v2370_v44  ;;  %2596 = vmatprep.mubr.bf16.mxu1 %v6602_v0  ;;  %v5555_v59 = vld [vmem:[#allocation14 + $0x30] sm:$0xff]  }
 0x5ae   : > { %5889 = vtanh.f32 %v2379_v43  ;;  %5115 = vmatprep.subr.bf16.mxu0 %v5555_v59  ;;  %v2660_v43 = vld [vmem:[%s7124_s20 + $0x8] sm:$0xff] }
 0x5af   : > { %5891 = vtanh.f32 %v2371_v45  ;;  %5116 = vmatpush3.bf16.msra.mxu0 %v5555_v59 }
 0x5b0   : > { %5117 = vmatprep.subr.bf16.mxu0 %v5556_v15 }
 0x5b3   : > { %5118 = vmatpush3.bf16.msra.mxu0 %v5556_v15  ;;  %v2661_v15 = vld [vmem:[%s7124_s20 + $0x10] sm:$0xff] }
 0x5b4   : > { %2597 = vmatmul.mubr.bf16.gmra.mrb[84].mxu1 %v2403_v37  ;;  %v2659_v37 = vld [vmem:[%s7124_s20] sm:$0xff] }
 0x5b5   : > { %2606 = vmatprep.mubr.bf16.mxu1 %v6602_v0 }
 0x5b6   : > { %v5886_v9 = vpop.eup %5885 }
 0x5b7   : > { %v5888_v53 = vpop.eup %5887 }
 0x5b8   : > { %v5890_v25 = vpop.eup %5889 }
 0x5b9   : > { %v5892_v41 = vpop.eup %5891  ;;  %v2405_v47 = vpack.c.bf16 %v5890_v25, %v5886_v9 }
 0x5ba   : > { %v2404_v52 = vpack.c.bf16 %v5892_v41, %v5888_v53 }
 0x5bc   : > { %2607 = vmatmul.mubr.bf16.gmra.mrb[88].mxu1 %v2404_v52 }
 0x5bd   : > { %2616 = vmatprep.mubr.bf16.mxu1 %v6602_v0 }
 0x5c4   : > { %2617 = vmatmul.mubr.bf16.gmra.mrb[92].mxu1 %v2405_v47 }
 0x5c5   : > { %3095 = vmatprep.mubr.bf16.mxu1 %v6602_v0 }
 0x65f   : > { %v2548_v62 = vpop.f32.mrb[64].mxu1 }
 0x660   : > { %v2549_v63 = vadd.f32 %v2548_v62, %v7392_v60  ;;  %v2550_v1 = vpop.f32.mrb[65].mxu1 }
 0x661   : > { %v2551_v2 = vadd.f32 %v2550_v1, %v7395_v61  ;;  %v2552_v3 = vpop.f32.mrb[66].mxu1 }
 0x662   : > { %2627 = vst [vmem:[%s7399_s24] sm:$0xff] %v2549_v63  ;;  %v2553_v6 = vadd.f32 %v2552_v3, %v7392_v60  ;;  %v2554_v10 = vpop.f32.mrb[67].mxu1 }
 0x663   : > { %2628 = vst [vmem:[%s7399_s24 + $0x8] sm:$0xff] %v2551_v2  ;;  %v2675_v11 = vmul.f32 0.5, %v2551_v2  ;;  %v2555_v12 = vadd.f32 %v2554_v10, %v7395_v61 }
 0x664   : > { %2629 = vst [vmem:[%s7399_s24 + $0x10] sm:$0xff] %v2553_v6 }
 0x665   : > { %v2691_v13 = vmul.f32 1.442695, %v2675_v11  ;;  %2630 = vst [vmem:[%s7399_s24 + $0x18] sm:$0xff] %v2555_v12  ;;  %v2676_v14 = vmul.f32 0.5, %v2555_v12 }
 0x667   : > { %5893 = vpow2.f32 %v2691_v13  ;;  %v2693_v16 = vmul.f32 1.442695, %v2676_v14  ;;  %v2558_v17 = vpop.f32.mrb[68].mxu1  ;;  %v2663_v13 = vld [vmem:[%s7124_s20 + $0x20] sm:$0xff] }
 0x668   : > { %v7408_v18 = vadd.f32 %v2558_v17, %v7392_v60  ;;  %v2560_v20 = vpop.f32.mrb[69].mxu1 }
 0x669   : > { %5895 = vpow2.f32 %v2693_v16  ;;  %v2561_v21 = vadd.f32 %v2560_v20, %v7395_v61  ;;  %v2562_v23 = vpop.f32.mrb[70].mxu1 }
 0x66a   : > { %2631 = vst [vmem:[%s7399_s24 + $0x20] sm:$0xff] %v7408_v18  ;;  %v2563_v24 = vadd.f32 %v2562_v23, %v7392_v60  ;;  %v2564_v26 = vpop.f32.mrb[71].mxu1  ;;  %v2664_v23 = vld [vmem:[%s7124_s20 + $0x28] sm:$0xff] }
 0x66b   : > { %2632 = vst [vmem:[%s7399_s24 + $0x28] sm:$0xff] %v2561_v21  ;;  %v2677_v28 = vmul.f32 0.5, %v2561_v21  ;;  %v2565_v30 = vadd.f32 %v2564_v26, %v7395_v61 }
 0x66c   : > { %2633 = vst [vmem:[%s7399_s24 + $0x30] sm:$0xff] %v2563_v24 }
 0x66d   : > { %v2695_v31 = vmul.f32 1.442695, %v2677_v28  ;;  %2634 = vst [vmem:[%s7399_s24 + $0x38] sm:$0xff] %v2565_v30  ;;  %v2678_v33 = vmul.f32 0.5, %v2565_v30 }
 0x66f   : > { %5897 = vpow2.f32 %v2695_v31  ;;  %v2697_v34 = vmul.f32 1.442695, %v2678_v33  ;;  %v2568_v35 = vpop.f32.mrb[72].mxu1 }
 0x670   : > { %v7420_v38 = vadd.f32 %v2568_v35, %v7392_v60  ;;  %v2570_v39 = vpop.f32.mrb[73].mxu1 }
 0x671   : > { %v5894_v8 = vpop.eup %5893  ;;  %5899 = vpow2.f32 %v2697_v34  ;;  %v2571_v40 = vadd.f32 %v2570_v39, %v7395_v61  ;;  %v2572_v42 = vpop.f32.mrb[74].mxu1 }
 0x672   : > { %2635 = vst [vmem:[%s7399_s24 + $0x40] sm:$0xff] %v7420_v38  ;;  %v7427_v44 = vadd.f32 %v2572_v42, %v7392_v60  ;;  %v2574_v45 = vpop.f32.mrb[75].mxu1  ;;  %v2723_v9 = vmul.f32 %v5894_v8, %v2659_v37 }
 0x673   : > { %v5896_v53 = vpop.eup %5895  ;;  %2636 = vst [vmem:[%s7399_s24 + $0x48] sm:$0xff] %v2571_v40  ;;  %v2679_v25 = vmul.f32 0.5, %v2571_v40  ;;  %v2575_v41 = vadd.f32 %v2574_v45, %v7395_v61 }
 0x674   : > { %2637 = vst [vmem:[%s7399_s24 + $0x50] sm:$0xff] %v7427_v44  ;;  %v2724_v47 = vmul.f32 %v5896_v53, %v2660_v43  ;;  %v2739_v52 = vadd.f32 %v2723_v9, %v2549_v63  ;;  %v2665_v43 = vld [vmem:[%s7124_s20 + $0x30] sm:$0xff] }
 0x675   : > { %v2699_v55 = vmul.f32 1.442695, %v2679_v25  ;;  %2638 = vst [vmem:[%s7399_s24 + $0x58] sm:$0xff] %v2575_v41  ;;  %v2680_v57 = vmul.f32 0.5, %v2575_v41 }
 0x676   : > { %v2740_v59 = vadd.f32 %v2724_v47, %v2553_v6  ;;  %v2666_v47 = vld [vmem:[%s7124_s20 + $0x38] sm:$0xff] }
 0x677   : > { %5901 = vpow2.f32 %v2699_v55  ;;  %v2701_v22 = vmul.f32 1.442695, %v2680_v57  ;;  %v2578_v32 = vpop.f32.mrb[76].mxu1 }
 0x678   : > { %v7436_v29 = vadd.f32 %v2578_v32, %v7392_v60  ;;  %v2580_v46 = vpop.f32.mrb[77].mxu1  ;;  %v2755_v36 = vpack.c.bf16 %v2740_v59, %v2739_v52 }
 0x679   : > { %v5898_v48 = vpop.eup %5897  ;;  %5903 = vpow2.f32 %v2701_v22  ;;  %v2581_v50 = vadd.f32 %v2580_v46, %v7395_v61  ;;  %v2582_v51 = vpop.f32.mrb[78].mxu1 }
 0x67a   : > { %v2725_v27 = vmul.f32 %v5898_v48, %v2661_v15  ;;  %2639 = vst [vmem:[%s7399_s24 + $0x60] sm:$0xff] %v7436_v29  ;;  %v7443_v54 = vadd.f32 %v2582_v51, %v7392_v60  ;;  %v2584_v56 = vpop.f32.mrb[79].mxu1  ;;  %5119 = vmatprep.mubr.bf16.mxu0 %v2755_v36  ;;  %v2667_v51 = vld [vmem:[%s7124_s20 + $0x40] sm:$0xff] }
 0x67b   : > { %v5900_v58 = vpop.eup %5899  ;;  %2640 = vst [vmem:[%s7399_s24 + $0x68] sm:$0xff] %v2581_v50  ;;  %v2681_v62 = vmul.f32 0.5, %v2581_v50  ;;  %v2585_v63 = vadd.f32 %v2584_v56, %v7395_v61 }
 0x67c   : > { %v2726_v1 = vmul.f32 %v5900_v58, %v2662_v49  ;;  %2641 = vst [vmem:[%s7399_s24 + $0x70] sm:$0xff] %v7443_v54  ;;  %v2741_v2 = vadd.f32 %v2725_v27, %v7408_v18 }
 0x67d   : > { %v2703_v3 = vmul.f32 1.442695, %v2681_v62  ;;  %2642 = vst [vmem:[%s7399_s24 + $0x78] sm:$0xff] %v2585_v63  ;;  %v2682_v6 = vmul.f32 0.5, %v2585_v63 }
 0x67e   : > { %v2742_v10 = vadd.f32 %v2726_v1, %v2563_v24  ;;  %v2668_v1 = vld [vmem:[%s7124_s20 + $0x48] sm:$0xff] }
 0x67f   : > { %5905 = vpow2.f32 %v2703_v3  ;;  %v2705_v11 = vmul.f32 1.442695, %v2682_v6  ;;  %v2588_v12 = vpop.f32.mrb[80].mxu1 }
 0x680   : > { %v7453_v14 = vadd.f32 %v2588_v12, %v7392_v60  ;;  %v2590_v16 = vpop.f32.mrb[81].mxu1  ;;  %v2756_v17 = vpack.c.bf16 %v2742_v10, %v2741_v2 }
 0x681   : > { %v5902_v20 = vpop.eup %5901  ;;  %5907 = vpow2.f32 %v2705_v11  ;;  %v2591_v18 = vadd.f32 %v2590_v16, %v7395_v61  ;;  %v2592_v21 = vpop.f32.mrb[82].mxu1 }
 0x682   : > { %2643 = vst [vmem:[%s7399_s24 + $0x80] sm:$0xff] %v7453_v14  ;;  %v7460_v24 = vadd.f32 %v2592_v21, %v7392_v60  ;;  %v2594_v26 = vpop.f32.mrb[83].mxu1  ;;  %5120 = vmatmul.mubr.bf16.vlgmr.msra.gmra.mrb[64].mxu0 %v2756_v17  ;;  %v2727_v28 = vmul.f32 %v5902_v20, %v2663_v13 }
 0x683   : > { %v5904_v30 = vpop.eup %5903  ;;  %2644 = vst [vmem:[%s7399_s24 + $0x88] sm:$0xff] %v2591_v18  ;;  %v2683_v31 = vmul.f32 0.5, %v2591_v18  ;;  %v2595_v33 = vadd.f32 %v2594_v26, %v7395_v61 }
 0x684   : > { %2645 = vst [vmem:[%s7399_s24 + $0x90] sm:$0xff] %v7460_v24  ;;  %v2728_v34 = vmul.f32 %v5904_v30, %v2664_v23  ;;  %v2743_v35 = vadd.f32 %v2727_v28, %v7420_v38  ;;  %v2669_v23 = vld [vmem:[%s7124_s20 + $0x50] sm:$0xff] }
 0x685   : > { %v2707_v37 = vmul.f32 1.442695, %v2683_v31  ;;  %2646 = vst [vmem:[%s7399_s24 + $0x98] sm:$0xff] %v2595_v33  ;;  %v2684_v39 = vmul.f32 0.5, %v2595_v33 }
 0x686   : > { %v2744_v8 = vadd.f32 %v2728_v34, %v7427_v44  ;;  %v2670_v34 = vld [vmem:[%s7124_s20 + $0x58] sm:$0xff] }
 0x687   : > { %5909 = vpow2.f32 %v2707_v37  ;;  %v2709_v40 = vmul.f32 1.442695, %v2684_v39  ;;  %v2598_v42 = vpop.f32.mrb[84].mxu1 }
 0x688   : > { %v7471_v45 = vadd.f32 %v2598_v42, %v7392_v60  ;;  %v2600_v9 = vpop.f32.mrb[85].mxu1  ;;  %v2757_v53 = vpack.c.bf16 %v2744_v8, %v2743_v35 }
 0x689   : > { %v5906_v25 = vpop.eup %5905  ;;  %5911 = vpow2.f32 %v2709_v40  ;;  %v2601_v38 = vadd.f32 %v2600_v9, %v7395_v61  ;;  %v2602_v41 = vpop.f32.mrb[86].mxu1 }
 0x68a   : > { %2647 = vst [vmem:[%s7399_s24 + $0xa0] sm:$0xff] %v7471_v45  ;;  %v7478_v44 = vadd.f32 %v2602_v41, %v7392_v60  ;;  %v2604_v52 = vpop.f32.mrb[87].mxu1  ;;  %5123 = vmatprep.mubr.bf16.mxu0 %v2757_v53  ;;  %v2729_v55 = vmul.f32 %v5906_v25, %v2665_v43 }
 0x68b   : > { %v5908_v57 = vpop.eup %5907  ;;  %2648 = vst [vmem:[%s7399_s24 + $0xa8] sm:$0xff] %v2601_v38  ;;  %v2685_v59 = vmul.f32 0.5, %v2601_v38  ;;  %v2605_v15 = vadd.f32 %v2604_v52, %v7395_v61  ;;  %v2671_v38 = vld [vmem:[%s7124_s20 + $0x60] sm:$0xff]  ;;  %v2672_v52 = vld [vmem:[%s7124_s20 + $0x68] sm:$0xff] }
 0x68c   : > { %2649 = vst [vmem:[%s7399_s24 + $0xb0] sm:$0xff] %v7478_v44  ;;  %v2730_v22 = vmul.f32 %v5908_v57, %v2666_v47  ;;  %v2745_v32 = vadd.f32 %v2729_v55, %v7436_v29 }
 0x68d   : > { %v2711_v46 = vmul.f32 1.442695, %v2685_v59  ;;  %2650 = vst [vmem:[%s7399_s24 + $0xb8] sm:$0xff] %v2605_v15  ;;  %v2686_v36 = vmul.f32 0.5, %v2605_v15  ;;  %v2673_v15 = vld [vmem:[%s7124_s20 + $0x70] sm:$0xff] }
 0x68e   : > { %v2746_v48 = vadd.f32 %v2730_v22, %v7443_v54 }
 0x68f   : > { %5913 = vpow2.f32 %v2711_v46  ;;  %v2713_v49 = vmul.f32 1.442695, %v2686_v36  ;;  %v2608_v50 = vpop.f32.mrb[88].mxu1  ;;  %v2674_v46 = vld [vmem:[%s7124_s20 + $0x78] sm:$0xff]  ;;  %s7881_s20 = sld [smem:[#allocation45_spill]] }
 0x690   : > { %v7489_v27 = vadd.f32 %v2608_v50, %v7392_v60  ;;  %v2610_v56 = vpop.f32.mrb[89].mxu1  ;;  %v2758_v58 = vpack.c.bf16 %v2746_v48, %v2745_v32 }
 0x691   : > { %v5910_v62 = vpop.eup %5909  ;;  %5915 = vpow2.f32 %v2713_v49  ;;  %v2611_v29 = vadd.f32 %v2610_v56, %v7395_v61  ;;  %v2612_v63 = vpop.f32.mrb[90].mxu1  ;;  %v5575_v56 = vld [vmem:[#allocation16 + $0x60] ss:$8 sps:$4 sm:$0xff]  }
 0x692   : > { %2651 = vst [vmem:[%s7399_s24 + $0xc0] sm:$0xff] %v7489_v27  ;;  %v2613_v54 = vadd.f32 %v2612_v63, %v7392_v60  ;;  %v2614_v2 = vpop.f32.mrb[91].mxu1  ;;  %5124 = vmatmul.mubr.bf16.gmra.mrb[68].mxu0 %v2758_v58  ;;  %v2731_v3 = vmul.f32 %v5910_v62, %v2667_v51  ;;  %v5577_v58 = vld [vmem:[#allocation16 + $0x64] ss:$8 sps:$4 sm:$0xff]   ;;  %v5580_v62 = vld [vmem:[#allocation16 + $0x74] ss:$8 sps:$4 sm:$0xff]  }
 0x693   : > { %v5912_v6 = vpop.eup %5911  ;;  %2652 = vst [vmem:[%s7399_s24 + $0xc8] sm:$0xff] %v2611_v29  ;;  %v2687_v10 = vmul.f32 0.5, %v2611_v29  ;;  %v2615_v11 = vadd.f32 %v2614_v2, %v7395_v61  ;;  %3075 = vmatprep.subr.bf16.mxu1 %v5577_v58  ;;  %v5578_v29 = vld [vmem:[#allocation16 + $0x70] ss:$8 sps:$4 sm:$0xff]  }
 0x694   : > { %2653 = vst [vmem:[%s7399_s24 + $0xd0] sm:$0xff] %v2613_v54  ;;  %v2732_v12 = vmul.f32 %v5912_v6, %v2668_v1  ;;  %v2747_v13 = vadd.f32 %v2731_v3, %v7453_v14  ;;  %3076 = vmatpush1.bf16.msra.mxu1 %v5575_v56  ;;  %v5583_v63 = vld [vmem:[#allocation17 + $0x4] ss:$12 sps:$4 sm:$0xff]   ;;  %v5584_v1 = vld [vmem:[#allocation17 + $0xc8] ss:$12 sps:$4 sm:$0xff]  }
 0x695   : > { %v2715_v16 = vmul.f32 1.442695, %v2687_v10  ;;  %2654 = vst [vmem:[%s7399_s24 + $0xd8] sm:$0xff] %v2615_v11  ;;  %v2688_v17 = vmul.f32 0.5, %v2615_v11  ;;  %3077 = vmatprep.subr.bf16.mxu1 %v5580_v62  ;;  %3561 = vmatprep.subr.bf16.mxu0 %v5583_v63  ;;  %v5586_v2 = vld [vmem:[#allocation17 + $0x18] ss:$12 sps:$4 sm:$0xff]  }
 0x696   : > { %v2748_v20 = vadd.f32 %v2732_v12, %v7460_v24  ;;  %v5591_v3 = vld [vmem:[#allocation17 + $0x34] ss:$12 sps:$4 sm:$0xff]   ;;  %v5589_v6 = vld [vmem:[#allocation17 + $0x30] ss:$12 sps:$4 sm:$0xff]   ;;  %v5596_v10 = vld [vmem:[#allocation17 + $0x4c] ss:$12 sps:$4 sm:$0xff]  }
 0x697   : > { %5917 = vpow2.f32 %v2715_v16  ;;  %v2717_v18 = vmul.f32 1.442695, %v2688_v17  ;;  %v2618_v21 = vpop.f32.mrb[92].mxu1  ;;  %v5594_v11 = vld [vmem:[#allocation17 + $0x48] ss:$12 sps:$4 sm:$0xff]  }
 0x698   : > { %v2619_v26 = vadd.f32 %v2618_v21, %v7392_v60  ;;  %v2620_v28 = vpop.f32.mrb[93].mxu1  ;;  %v2759_v30 = vpack.c.bf16 %v2748_v20, %v2747_v13  ;;  %3078 = vmatpush1.bf16.msra.mxu1 %v5578_v29  ;;  %v5599_v12 = vld [vmem:[#allocation17 + $0x64] ss:$12 sps:$4 sm:$0xff]   ;;  %v5597_v13 = vld [vmem:[#allocation17 + $0x60] ss:$12 sps:$4 sm:$0xff]  }
 0x699   : > { %v5914_v31 = vpop.eup %5913  ;;  %5919 = vpow2.f32 %v2717_v18  ;;  %v2621_v14 = vadd.f32 %v2620_v28, %v7395_v61  ;;  %v2622_v33 = vpop.f32.mrb[94].mxu1  ;;  %4895 = vmatprep.subr.bf16.mxu1 %v5584_v1  ;;  %v5604_v16 = vld [vmem:[#allocation17 + $0x7c] ss:$12 sps:$4 sm:$0xff]   ;;  %v5602_v17 = vld [vmem:[#allocation17 + $0x78] ss:$12 sps:$4 sm:$0xff]  }
 0x69a   : > { %2655 = vst [vmem:[%s7399_s24 + $0xe0] sm:$0xff] %v2619_v26  ;;  %v2623_v24 = vadd.f32 %v2622_v33, %v7392_v60  ;;  %v2624_v35 = vpop.f32.mrb[95].mxu1  ;;  %5127 = vmatprep.mubr.bf16.mxu0 %v2759_v30  ;;  %v2733_v37 = vmul.f32 %v5914_v31, %v2669_v23  ;;  %v5607_v20 = vld [vmem:[#allocation17 + $0x94] ss:$12 sps:$4 sm:$0xff]   ;;  %v5605_v18 = vld [vmem:[#allocation17 + $0x90] ss:$12 sps:$4 sm:$0xff]  }
 0x69b   : > { %v5916_v39 = vpop.eup %5915  ;;  %2656 = vst [vmem:[%s7399_s24 + $0xe8] sm:$0xff] %v2621_v14  ;;  %v2689_v8 = vmul.f32 0.5, %v2621_v14  ;;  %v2625_v40 = vadd.f32 %v2624_v35, %v7395_v61  ;;  %v5612_v21 = vld [vmem:[#allocation17 + $0xac] ss:$12 sps:$4 sm:$0xff]   ;;  %v5610_v23 = vld [vmem:[#allocation17 + $0xa8] ss:$12 sps:$4 sm:$0xff]  }
 0x69c   : > { %2657 = vst [vmem:[%s7399_s24 + $0xf0] sm:$0xff] %v2623_v24  ;;  %v2734_v42 = vmul.f32 %v5916_v39, %v2670_v34  ;;  %v2749_v43 = vadd.f32 %v2733_v37, %v7471_v45  ;;  %v5613_v28 = vld [vmem:[#allocation17 + $0xc0] ss:$12 sps:$4 sm:$0xff]   ;;  %v5620_v30 = vld [vmem:[#allocation17 + $0xdc] ss:$12 sps:$4 sm:$0xff]  }
 0x69d   : > { %v2719_v9 = vmul.f32 1.442695, %v2689_v8  ;;  %2658 = vst [vmem:[%s7399_s24 + $0xf8] sm:$0xff] %v2625_v40  ;;  %v2690_v53 = vmul.f32 0.5, %v2625_v40  ;;  %v5618_v31 = vld [vmem:[#allocation17 + $0xd8] ss:$12 sps:$4 sm:$0xff]  }
 0x69e   : > { %v2750_v60 = vadd.f32 %v2734_v42, %v7478_v44  ;;  %v5623_v14 = vld [vmem:[#allocation17 + $0xf4] ss:$12 sps:$4 sm:$0xff]   ;;  %v5621_v33 = vld [vmem:[#allocation17 + $0xf0] ss:$12 sps:$4 sm:$0xff]   ;;  %s6467_s24 = scalar_lea.vmem %s6466_s10, 8192 }
 0x69f   : > { %5921 = vpow2.f32 %v2719_v9  ;;  %v2721_v25 = vmul.f32 1.442695, %v2690_v53  ;;  %v7522_v34 = vld [vmem:[%s7881_s20] ss:$0 sm:$0xff]  ;;  %v5617_v63 = vld [vmem:[#allocation17 + $0x68] ss:$12 sps:$4 sm:$0xff]   ;;  %p6469_p3 = scmp.lt.s32.totalorder %s6467_s24, %s6461_s12 }
 0x6a0   : > { %v2760_v41 = vpack.c.bf16 %v2750_v60, %v2749_v43 }
 0x6a1   : > { %v5918_v47 = vpop.eup %5917  ;;  %5923 = vpow2.f32 %v2721_v25  ;;  %p6470_p10 = por %p6469_p3, %p6468_p4 }
 0x6a2   : > { %5128 = vmatmul.mubr.bf16.gmra.mrb[72].mxu0 %v2760_v41  ;;  %v2735_v61 = vmul.f32 %v5918_v47, %v2671_v38  ;;  %v5585_v47 = vld [vmem:[#allocation17 + $0x8] ss:$12 sps:$4 sm:$0xff]  }
 0x6a3   : > { %v5920_v55 = vpop.eup %5919  ;;  %p6471_p1 = pnand %p6470_p10, %p6464_p8 }
 0x6a4   : > { %v2736_v57 = vmul.f32 %v5920_v55, %v2672_v52  ;;  %v2751_v45 = vadd.f32 %v2735_v61, %v7489_v27  ;;  %v5581_v27 = vld [vmem:[#allocation17] ss:$12 sps:$4 sm:$0xff]  }
 0x6a5   : > { %3562 = vmatpush1.bf16.msra.mxu0 %v5581_v27 }
 0x6a6   : > { %v2752_v59 = vadd.f32 %v2736_v57, %v2613_v54  ;;  %v5588_v54 = vld [vmem:[#allocation17 + $0x1c] ss:$12 sps:$4 sm:$0xff]   ;;  %v5592_v57 = vld [vmem:[#allocation17 + $0xe0] ss:$12 sps:$4 sm:$0xff]  }
 0x6a7   : > { %3563 = vmatprep.subr.bf16.mxu0 %v5588_v54 }
 0x6a8   : > { %v2761_v22 = vpack.c.bf16 %v2752_v59, %v2751_v45 }
 0x6a9   : > { %v5922_v32 = vpop.eup %5921  ;;  %3564 = vmatpush1.bf16.msra.mxu0 %v5586_v2 }
 0x6aa   : > { %5131 = vmatprep.mubr.bf16.mxu0 %v2761_v22  ;;  %v2737_v44 = vmul.f32 %v5922_v32, %v2673_v15  ;;  %3565 = vmatprep.subr.bf16.mxu0 %v5591_v3  ;;  %v5624_v3 = vld [vmem:[#allocation17 + $0x140] ss:$12 sps:$4 sm:$0xff]  }
 0x6ab   : > { %v5924_v36 = vpop.eup %5923 }
 0x6ac   : > { %v2738_v48 = vmul.f32 %v5924_v36, %v2674_v46  ;;  %v2753_v49 = vadd.f32 %v2737_v44, %v2619_v26  ;;  %v5615_v26 = vld [vmem:[#allocation17 + $0xc4] ss:$12 sps:$4 sm:$0xff]   ;;  %v5593_v46 = vld [vmem:[#allocation17 + $0x20] ss:$12 sps:$4 sm:$0xff]  }
 0x6ad   : > { %3566 = vmatpush1.bf16.msra.mxu0 %v5589_v6  ;;  %v5600_v44 = vld [vmem:[#allocation17 + $0xf8] ss:$12 sps:$4 sm:$0xff]  }
 0x6ae   : > { %v2754_v50 = vadd.f32 %v2738_v48, %v2623_v24  ;;  %3567 = vmatprep.subr.bf16.mxu0 %v5596_v10  ;;  %v5601_v36 = vld [vmem:[#allocation17 + $0x38] ss:$12 sps:$4 sm:$0xff]   ;;  %v5608_v48 = vld [vmem:[#allocation17 + $0x110] ss:$12 sps:$4 sm:$0xff]  }
 0x6b0   : > { %v2762_v51 = vpack.c.bf16 %v2754_v50, %v2753_v49  ;;  %v5609_v49 = vld [vmem:[#allocation17 + $0x50] ss:$12 sps:$4 sm:$0xff]  }
 0x6b1   : > { %3568 = vmatpush1.bf16.msra.mxu0 %v5594_v11 }
 0x6b2   : > { %5132 = vmatmul.mubr.bf16.gmra.mrb[76].mxu0 %v2762_v51  ;;  %3569 = vmatprep.subr.bf16.mxu0 %v5599_v12  ;;  %v5616_v51 = vld [vmem:[#allocation17 + $0x128] ss:$12 sps:$4 sm:$0xff]  }
 0x6b5   : > { %3570 = vmatpush1.bf16.msra.mxu0 %v5597_v13 }
 0x6b6   : > { %3571 = vmatprep.subr.bf16.mxu0 %v5604_v16  ;;  %v5625_v16 = vld [vmem:[#allocation17 + $0x80] ss:$12 sps:$4 sm:$0xff]  }
 0x6b9   : > { %3572 = vmatpush1.bf16.msra.mxu0 %v5602_v17 }
 0x6ba   : > { %3573 = vmatprep.subr.bf16.mxu0 %v5607_v20 }
 0x6bd   : > { %3574 = vmatpush1.bf16.msra.mxu0 %v5605_v18 }
 0x6be   : > { %3575 = vmatprep.subr.bf16.mxu0 %v5612_v21 }
 0x6c1   : > { %3576 = vmatpush1.bf16.msra.mxu0 %v5610_v23 }
 0x6c2   : > { %3577 = vmatprep.subr.bf16.mxu0 %v5615_v26 }
 0x6c5   : > { %3578 = vmatpush1.bf16.msra.mxu0 %v5613_v28 }
 0x6c6   : > { %3579 = vmatprep.subr.bf16.mxu0 %v5620_v30 }
 0x6c9   : > { %3580 = vmatpush1.bf16.msra.mxu0 %v5618_v31 }
 0x6ca   : > { %3581 = vmatprep.subr.bf16.mxu0 %v5623_v14 }
 0x6cd   : > { %3582 = vmatpush1.bf16.msra.mxu0 %v5621_v33 }
 0x755   : > { %v5121_v24 = vpop.f32.mrb[64].mxu0 }
 0x756   : > { %v2877_v35 = vadd.f32 %v5121_v24, %v7522_v34  ;;  %v2868_v37 = vpop.f32.mrb[65].mxu0 }
 0x757   : > { %v2869_v39 = vadd.f32 %v7522_v34, %v2868_v37  ;;  %v5122_v8 = vpop.f32.mrb[66].mxu0 }
 0x758   : > { %5925 = vtanh.f32 %v2877_v35  ;;  %v2880_v40 = vadd.f32 %v5122_v8, %v7522_v34  ;;  %v2871_v42 = vpop.f32.mrb[67].mxu0 }
 0x759   : > { %5927 = vtanh.f32 %v2869_v39  ;;  %v2872_v43 = vadd.f32 %v7522_v34, %v2871_v42 }
 0x75a   : > { %5929 = vtanh.f32 %v2880_v40 }
 0x75b   : > { %5931 = vtanh.f32 %v2872_v43 }
 0x762   : > { %v5926_v9 = vpop.eup %5925 }
 0x763   : > { %v5928_v53 = vpop.eup %5927 }
 0x764   : > { %v5930_v60 = vpop.eup %5929 }
 0x765   : > { %v5932_v25 = vpop.eup %5931  ;;  %v5125_v38 = vpop.f32.mrb[68].mxu0  ;;  %v2948_v41 = vpack.c.bf16 %v5930_v60, %v5926_v9  ;;  %v5626_v60 = vld [vmem:[#allocation17 + $0x108] ss:$12 sps:$4 sm:$0xff]  }
 0x766   : > { %v2893_v52 = vadd.f32 %v5125_v38, %v7522_v34  ;;  %v2884_v61 = vpop.f32.mrb[69].mxu0  ;;  %v2947_v55 = vpack.c.bf16 %v5932_v25, %v5928_v53  ;;  %v5628_v53 = vld [vmem:[#allocation17 + $0x10c] ss:$12 sps:$4 sm:$0xff]  }
 0x767   : > { %v2885_v45 = vadd.f32 %v7522_v34, %v2884_v61  ;;  %v5126_v59 = vpop.f32.mrb[70].mxu0  ;;  %3583 = vmatprep.subr.bf16.mxu0 %v5628_v53  ;;  %v5629_v25 = vld [vmem:[#allocation17 + $0x120] ss:$12 sps:$4 sm:$0xff]   ;;  %v5632_v38 = vld [vmem:[#allocation17 + $0x158] ss:$12 sps:$4 sm:$0xff]  }
 0x768   : > { %5933 = vtanh.f32 %v2893_v52  ;;  %v2896_v15 = vadd.f32 %v5126_v59, %v7522_v34  ;;  %v2887_v22 = vpop.f32.mrb[71].mxu0  ;;  %3096 = vmatmul.mubr.bf16.vlgmr.msra.gmra.mrb[96].mxu1 %v2947_v55  ;;  %3584 = vmatpush1.bf16.msra.mxu0 %v5626_v60  ;;  %v5634_v52 = vld [vmem:[#allocation17 + $0x138] ss:$12 sps:$4 sm:$0xff]   ;;  %v5639_v61 = vld [vmem:[#allocation17 + $0x154] ss:$12 sps:$4 sm:$0xff]  }
 0x769   : > { %5935 = vtanh.f32 %v2885_v45  ;;  %v2888_v32 = vadd.f32 %v7522_v34, %v2887_v22  ;;  %3105 = vmatprep.mubr.bf16.mxu1 %v6602_v0  ;;  %4896 = vmatpush3.bf16.msra.mxu1 %v5585_v47  ;;  %v5636_v47 = vld [vmem:[#allocation17 + $0x13c] ss:$12 sps:$4 sm:$0xff]   ;;  %v5644_v45 = vld [vmem:[#allocation17 + $0x16c] ss:$12 sps:$4 sm:$0xff]   ;;  %v5655_v22 = vld [vmem:[#allocation19 + $0x80] sm:$0xff]  }
 0x76a   : > { %5937 = vtanh.f32 %v2896_v15  ;;  %4897 = vmatprep.subr.bf16.mxu1 %v5592_v57  ;;  %v5637_v55 = vld [vmem:[#allocation17 + $0x150] ss:$12 sps:$4 sm:$0xff]   ;;  %v5642_v59 = vld [vmem:[#allocation17 + $0x168] ss:$12 sps:$4 sm:$0xff]   ;;  %v5645_v15 = vld [vmem:[#allocation19 + $0x40] sm:$0xff]  }
 0x76b   : > { %5939 = vtanh.f32 %v2888_v32  ;;  %v5641_v57 = vld [vmem:[#allocation17 + $0xb0] ss:$12 sps:$4 sm:$0xff]   ;;  %v2971_v32 = vld [vmem:[%s7882_s13] sm:$0x3] }
 0x76d   : > { %4898 = vmatpush3.bf16.msra.mxu1 %v5593_v46  ;;  %v7551_v46 = vrot.slane %v2971_v32, %v7169_v5 }
 0x76e   : > { %4899 = vmatprep.subr.bf16.mxu1 %v5600_v44  ;;  %v7554_v44 = vrot.slane %v2971_v32, %v7175_v7 }
 0x770   : > { %3106 = vmatmul.mubr.bf16.gmra.mrb[100].mxu1 %v2948_v41  ;;  %v5633_v41 = vld [vmem:[#allocation17 + $0x98] ss:$12 sps:$4 sm:$0xff]  }
 0x771   : > { %3115 = vmatprep.mubr.bf16.mxu1 %v6602_v0  ;;  %4900 = vmatpush3.bf16.msra.mxu1 %v5601_v36 }
 0x772   : > { %v5934_v50 = vpop.eup %5933  ;;  %4901 = vmatprep.subr.bf16.mxu1 %v5608_v48 }
 0x773   : > { %v5936_v56 = vpop.eup %5935 }
 0x774   : > { %v5938_v58 = vpop.eup %5937 }
 0x775   : > { %v5940_v62 = vpop.eup %5939  ;;  %v5129_v29 = vpop.f32.mrb[72].mxu0  ;;  %v2950_v27 = vpack.c.bf16 %v5938_v58, %v5934_v50  ;;  %4902 = vmatpush3.bf16.msra.mxu1 %v5609_v49 }
 0x776   : > { %v2909_v1 = vadd.f32 %v5129_v29, %v7522_v34  ;;  %v2900_v54 = vpop.f32.mrb[73].mxu0  ;;  %v2949_v2 = vpack.c.bf16 %v5940_v62, %v5936_v56  ;;  %4903 = vmatprep.subr.bf16.mxu1 %v5616_v51 }
 0x777   : > { %v2901_v6 = vadd.f32 %v7522_v34, %v2900_v54  ;;  %v5130_v10 = vpop.f32.mrb[74].mxu0 }
 0x778   : > { %5941 = vtanh.f32 %v2909_v1  ;;  %v2912_v11 = vadd.f32 %v5130_v10, %v7522_v34  ;;  %v2903_v12 = vpop.f32.mrb[75].mxu0  ;;  %3116 = vmatmul.mubr.bf16.gmra.mrb[104].mxu1 %v2949_v2 }
 0x779   : > { %5943 = vtanh.f32 %v2901_v6  ;;  %v2904_v13 = vadd.f32 %v7522_v34, %v2903_v12  ;;  %3125 = vmatprep.mubr.bf16.mxu1 %v6602_v0  ;;  %4904 = vmatpush3.bf16.msra.mxu1 %v5617_v63 }
 0x77a   : > { %5945 = vtanh.f32 %v2912_v11  ;;  %4905 = vmatprep.subr.bf16.mxu1 %v5624_v3 }
 0x77b   : > { %5947 = vtanh.f32 %v2904_v13 }
 0x77d   : > { %4906 = vmatpush3.bf16.msra.mxu1 %v5625_v16 }
 0x77e   : > { %4907 = vmatprep.subr.bf16.mxu1 %v5632_v38 }
 0x780   : > { %3126 = vmatmul.mubr.bf16.gmra.mrb[108].mxu1 %v2950_v27 }
 0x781   : > { %3135 = vmatprep.mubr.bf16.mxu1 %v6602_v0  ;;  %4908 = vmatpush3.bf16.msra.mxu1 %v5633_v41 }
 0x782   : > { %v5942_v17 = vpop.eup %5941 }
 0x783   : > { %v5944_v20 = vpop.eup %5943 }
 0x784   : > { %v5946_v18 = vpop.eup %5945 }
 0x785   : > { %v5948_v21 = vpop.eup %5947  ;;  %v5133_v23 = vpop.f32.mrb[76].mxu0  ;;  %v2952_v26 = vpack.c.bf16 %v5946_v18, %v5942_v17 }
 0x786   : > { %v2925_v28 = vadd.f32 %v5133_v23, %v7522_v34  ;;  %v2916_v30 = vpop.f32.mrb[77].mxu0  ;;  %v2951_v31 = vpack.c.bf16 %v5948_v21, %v5944_v20  ;;  %v5646_v23 = vld [vmem:[#allocation19] sm:$0xff]  }
 0x787   : > { %v2917_v14 = vadd.f32 %v7522_v34, %v2916_v30  ;;  %v5134_v33 = vpop.f32.mrb[78].mxu0  ;;  %v5647_v30 = vld [vmem:[#allocation19 + $0x48] sm:$0xff]  }
 0x788   : > { %5949 = vtanh.f32 %v2925_v28  ;;  %v2928_v24 = vadd.f32 %v5134_v33, %v7522_v34  ;;  %v2919_v35 = vpop.f32.mrb[79].mxu0  ;;  %3136 = vmatmul.mubr.bf16.gmra.mrb[112].mxu1 %v2951_v31  ;;  %v5658_v31 = vld [vmem:[#allocation19 + $0x88] sm:$0xff]  }
 0x789   : > { %5951 = vtanh.f32 %v2917_v14  ;;  %v2920_v37 = vadd.f32 %v7522_v34, %v2919_v35  ;;  %3145 = vmatprep.mubr.bf16.mxu1 %v6602_v0  ;;  %v5631_v34 = vld [vmem:[#allocation17 + $0x124] ss:$12 sps:$4 sm:$0xff]  }
 0x78a   : > { %5953 = vtanh.f32 %v2928_v24  ;;  %3585 = vmatprep.subr.bf16.mxu0 %v5631_v34 }
 0x78b   : > { %5955 = vtanh.f32 %v2920_v37  ;;  %3586 = vmatpush1.bf16.msra.mxu0 %v5629_v25  ;;  %v5648_v37 = vld [vmem:[#allocation19 + $0x8] sm:$0xff]   ;;  %v5650_v25 = vld [vmem:[#allocation19 + $0x10] sm:$0xff]  }
 0x78c   : > { %3587 = vmatprep.subr.bf16.mxu0 %v5636_v47  ;;  %v5651_v47 = vld [vmem:[#allocation19 + $0x58] sm:$0xff]  }
 0x78f   : > { %3588 = vmatpush1.bf16.msra.mxu0 %v5634_v52 }
 0x790   : > { %3146 = vmatmul.mubr.bf16.gmra.mrb[116].mxu1 %v2952_v26  ;;  %3589 = vmatprep.subr.bf16.mxu0 %v5639_v61 }
 0x791   : > { %3155 = vmatprep.mubr.bf16.mxu1 %v6602_v0 }
 0x792   : > { %v5950_v39 = vpop.eup %5949 }
 0x793   : > { %v5952_v8 = vpop.eup %5951  ;;  %3590 = vmatpush1.bf16.msra.mxu0 %v5637_v55 }
 0x794   : > { %v5954_v40 = vpop.eup %5953  ;;  %3591 = vmatprep.subr.bf16.mxu0 %v5644_v45 }
 0x795   : > { %v5956_v42 = vpop.eup %5955  ;;  %v2954_v43 = vpack.c.bf16 %v5954_v40, %v5950_v39 }
 0x796   : > { %v2953_v9 = vpack.c.bf16 %v5956_v42, %v5952_v8  ;;  %v5649_v8 = vld [vmem:[#allocation19 + $0x50] sm:$0xff]  }
 0x797   : > { %3592 = vmatpush1.bf16.msra.mxu0 %v5642_v59  ;;  %v5653_v59 = vld [vmem:[#allocation19 + $0x60] sm:$0xff]  }
 0x798   : > { %3156 = vmatmul.mubr.bf16.gmra.mrb[120].mxu1 %v2953_v9  ;;  %4959 = vmatprep.subr.bf16.mxu0 %v5645_v15 }
 0x799   : > { %3165 = vmatprep.mubr.bf16.mxu1 %v6602_v0  ;;  %v5640_v0 = vld [vmem:[#allocation17 + $0x170] ss:$12 sps:$4 sm:$0xff]  }
 0x79a   : > { %4909 = vmatprep.subr.bf16.mxu1 %v5640_v0 }
 0x79b   : > { %4910 = vmatpush3.bf16.msra.mxu1 %v5641_v57  ;;  %v5652_v57 = vld [vmem:[#allocation19 + $0x18] sm:$0xff]  }
 0x79c   : > { %5135 = vmatprep.subr.bf16.mxu1 %v5655_v22 }
 0x7a0   : > { %3166 = vmatmul.mubr.bf16.gmra.mrb[124].mxu1 %v2954_v43 }
 0x83b   : > { %v3097_v36 = vpop.f32.mrb[96].mxu1 }
 0x83c   : > { %v3098_v48 = vadd.f32 %v3097_v36, %v7551_v46  ;;  %v3099_v49 = vpop.f32.mrb[97].mxu1 }
 0x83d   : > { %v3100_v50 = vadd.f32 %v3099_v49, %v7554_v44  ;;  %v3101_v51 = vpop.f32.mrb[98].mxu1 }
 0x83e   : > { %5957 = vtanh.f32 %v3098_v48  ;;  %v3102_v56 = vadd.f32 %v3101_v51, %v7551_v46  ;;  %v3103_v58 = vpop.f32.mrb[99].mxu1  ;;  %v5654_v51 = vld [vmem:[#allocation19 + $0x20] sm:$0xff]  }
 0x83f   : > { %5959 = vtanh.f32 %v3100_v50  ;;  %v3104_v62 = vadd.f32 %v3103_v58, %v7554_v44 }
 0x840   : > { %5961 = vtanh.f32 %v3102_v56 }
 0x841   : > { %5963 = vtanh.f32 %v3104_v62  ;;  %v5656_v62 = vld [vmem:[#allocation19 + $0x68] sm:$0xff]  }
 0x843   : > { %v3107_v29 = vpop.f32.mrb[100].mxu1 }
 0x844   : > { %v3108_v27 = vadd.f32 %v3107_v29, %v7551_v46  ;;  %v3109_v63 = vpop.f32.mrb[101].mxu1 }
 0x845   : > { %v3110_v1 = vadd.f32 %v3109_v63, %v7554_v44  ;;  %v3111_v54 = vpop.f32.mrb[102].mxu1 }
 0x846   : > { %5965 = vtanh.f32 %v3108_v27  ;;  %v3112_v2 = vadd.f32 %v3111_v54, %v7551_v46  ;;  %v3113_v3 = vpop.f32.mrb[103].mxu1  ;;  %v5657_v54 = vld [vmem:[#allocation19 + $0x28] sm:$0xff]  }
 0x847   : > { %5967 = vtanh.f32 %v3110_v1  ;;  %v3114_v6 = vadd.f32 %v3113_v3, %v7554_v44 }
 0x848   : > { %v5958_v10 = vpop.eup %5957  ;;  %5969 = vtanh.f32 %v3112_v2 }
 0x849   : > { %v5960_v11 = vpop.eup %5959  ;;  %5971 = vtanh.f32 %v3114_v6 }
 0x84a   : > { %v5962_v12 = vpop.eup %5961 }
 0x84b   : > { %v5964_v13 = vpop.eup %5963  ;;  %v3117_v16 = vpop.f32.mrb[104].mxu1  ;;  %v3208_v17 = vpack.c.bf16 %v5962_v12, %v5958_v10 }
 0x84c   : > { %v3118_v20 = vadd.f32 %v3117_v16, %v7551_v46  ;;  %v3119_v18 = vpop.f32.mrb[105].mxu1  ;;  %v3209_v21 = vpack.c.bf16 %v5964_v13, %v5960_v11 }
 0x84d   : > { %v3120_v26 = vadd.f32 %v3119_v18, %v7554_v44  ;;  %v3121_v28 = vpop.f32.mrb[106].mxu1 }
 0x84e   : > { %5973 = vtanh.f32 %v3118_v20  ;;  %v3122_v14 = vadd.f32 %v3121_v28, %v7551_v46  ;;  %v3123_v33 = vpop.f32.mrb[107].mxu1  ;;  %3593 = vmatprep.mubr.bf16.mxu0 %v3209_v21  ;;  %3706 = vmatprep.mubr.bf16.mxu1 %v3209_v21 }
 0x84f   : > { %5975 = vtanh.f32 %v3120_v26  ;;  %v3124_v24 = vadd.f32 %v3123_v33, %v7554_v44  ;;  %3594 = vmatmul.mubr.bf16.vlgmr.msra.gmra.mrb[80].mxu0 %v3208_v17  ;;  %3707 = vmatmul.mubr.bf16.vlgmr.msra.gmra.mrb[128].mxu1 %v3208_v17 }
 0x850   : > { %v5966_v35 = vpop.eup %5965  ;;  %5977 = vtanh.f32 %v3122_v14  ;;  %4960 = vmatpush3.bf16.msra.mxu0 %v5646_v23  ;;  %5136 = vmatpush3.bf16.msra.mxu1 %v5655_v22 }
 0x851   : > { %v5968_v39 = vpop.eup %5967  ;;  %5979 = vtanh.f32 %v3124_v24  ;;  %4961 = vmatprep.subr.bf16.mxu0 %v5647_v30  ;;  %5137 = vmatprep.subr.bf16.mxu1 %v5658_v31 }
 0x852   : > { %v5970_v40 = vpop.eup %5969 }
 0x853   : > { %v5972_v42 = vpop.eup %5971  ;;  %v3127_v43 = vpop.f32.mrb[108].mxu1  ;;  %v3210_v9 = vpack.c.bf16 %v5970_v40, %v5966_v35 }
 0x854   : > { %v3128_v53 = vadd.f32 %v3127_v43, %v7551_v46  ;;  %v3129_v60 = vpop.f32.mrb[109].mxu1  ;;  %v3211_v34 = vpack.c.bf16 %v5972_v42, %v5968_v39  ;;  %4962 = vmatpush3.bf16.msra.mxu0 %v5648_v37  ;;  %5138 = vmatpush3.bf16.msra.mxu1 %v5658_v31 }
 0x855   : > { %v3130_v38 = vadd.f32 %v3129_v60, %v7554_v44  ;;  %v3131_v41 = vpop.f32.mrb[110].mxu1  ;;  %4963 = vmatprep.subr.bf16.mxu0 %v5649_v8 }
 0x856   : > { %5981 = vtanh.f32 %v3128_v53  ;;  %v3132_v52 = vadd.f32 %v3131_v41, %v7551_v46  ;;  %v3133_v61 = vpop.f32.mrb[111].mxu1  ;;  %3603 = vmatprep.mubr.bf16.mxu0 %v3211_v34  ;;  %3714 = vmatprep.mubr.bf16.mxu1 %v3211_v34 }
 0x857   : > { %5983 = vtanh.f32 %v3130_v38  ;;  %v3134_v55 = vadd.f32 %v3133_v61, %v7554_v44  ;;  %3604 = vmatmul.mubr.bf16.gmra.mrb[84].mxu0 %v3210_v9  ;;  %3715 = vmatmul.mubr.bf16.gmra.mrb[132].mxu1 %v3210_v9 }
 0x858   : > { %v5974_v0 = vpop.eup %5973  ;;  %5985 = vtanh.f32 %v3132_v52  ;;  %4964 = vmatpush3.bf16.msra.mxu0 %v5650_v25 }
 0x859   : > { %v5976_v45 = vpop.eup %5975  ;;  %5987 = vtanh.f32 %v3134_v55  ;;  %4965 = vmatprep.subr.bf16.mxu0 %v5651_v47 }
 0x85a   : > { %v5978_v15 = vpop.eup %5977 }
 0x85b   : > { %v5980_v22 = vpop.eup %5979  ;;  %v3137_v32 = vpop.f32.mrb[112].mxu1  ;;  %v3212_v36 = vpack.c.bf16 %v5978_v15, %v5974_v0 }
 0x85c   : > { %v3138_v48 = vadd.f32 %v3137_v32, %v7551_v46  ;;  %v3139_v49 = vpop.f32.mrb[113].mxu1  ;;  %v3213_v50 = vpack.c.bf16 %v5980_v22, %v5976_v45  ;;  %4966 = vmatpush3.bf16.msra.mxu0 %v5652_v57 }
 0x85d   : > { %v3140_v56 = vadd.f32 %v3139_v49, %v7554_v44  ;;  %v3141_v58 = vpop.f32.mrb[114].mxu1  ;;  %4967 = vmatprep.subr.bf16.mxu0 %v5653_v59 }
 0x85e   : > { %5989 = vtanh.f32 %v3138_v48  ;;  %v3142_v29 = vadd.f32 %v3141_v58, %v7551_v46  ;;  %v3143_v27 = vpop.f32.mrb[115].mxu1  ;;  %3613 = vmatprep.mubr.bf16.mxu0 %v3213_v50  ;;  %3722 = vmatprep.mubr.bf16.mxu1 %v3213_v50  ;;  %v5661_v58 = vld [vmem:[#allocation19 + $0x90] sm:$0xff]  }
 0x85f   : > { %5991 = vtanh.f32 %v3140_v56  ;;  %v3144_v63 = vadd.f32 %v3143_v27, %v7554_v44  ;;  %3614 = vmatmul.mubr.bf16.gmra.mrb[88].mxu0 %v3212_v36  ;;  %3723 = vmatmul.mubr.bf16.gmra.mrb[136].mxu1 %v3212_v36  ;;  %v5662_v27 = vld [vmem:[#allocation19 + $0x98] sm:$0xff]  }
 0x860   : > { %v5982_v1 = vpop.eup %5981  ;;  %5993 = vtanh.f32 %v3142_v29  ;;  %4968 = vmatpush3.bf16.msra.mxu0 %v5654_v51  ;;  %5139 = vmatprep.subr.bf16.mxu1 %v5661_v58  ;;  %v5660_v29 = vld [vmem:[#allocation19 + $0x30] sm:$0xff]  }
 0x861   : > { %v5984_v2 = vpop.eup %5983  ;;  %5995 = vtanh.f32 %v3144_v63  ;;  %4969 = vmatprep.subr.bf16.mxu0 %v5656_v62  ;;  %5140 = vmatpush3.bf16.msra.mxu1 %v5661_v58  ;;  %v5659_v62 = vld [vmem:[#allocation19 + $0x70] sm:$0xff]   ;;  %v5665_v63 = vld [vmem:[#allocation19 + $0xa0] sm:$0xff]  }
 0x862   : > { %v5986_v3 = vpop.eup %5985  ;;  %5141 = vmatprep.subr.bf16.mxu1 %v5662_v27 }
 0x863   : > { %v5988_v6 = vpop.eup %5987  ;;  %v3147_v10 = vpop.f32.mrb[116].mxu1  ;;  %v3214_v11 = vpack.c.bf16 %v5986_v3, %v5982_v1  ;;  %v5663_v1 = vld [vmem:[#allocation19 + $0x78] sm:$0xff]   ;;  %v5667_v3 = vld [vmem:[#allocation19 + $0xb0] sm:$0xff]  }
 0x864   : > { %v3148_v12 = vadd.f32 %v3147_v10, %v7551_v46  ;;  %v3149_v13 = vpop.f32.mrb[117].mxu1  ;;  %v3215_v16 = vpack.c.bf16 %v5988_v6, %v5984_v2  ;;  %4970 = vmatpush3.bf16.msra.mxu0 %v5657_v54  ;;  %v5664_v54 = vld [vmem:[#allocation19 + $0x38] sm:$0xff]   ;;  %v5666_v2 = vld [vmem:[#allocation19 + $0xa8] sm:$0xff]   ;;  %v3288_v10 = vld [vmem:[%s7883_s14] sm:$0x7] }
 0x865   : > { %v3150_v17 = vadd.f32 %v3149_v13, %v7554_v44  ;;  %v3151_v20 = vpop.f32.mrb[118].mxu1  ;;  %4971 = vmatprep.subr.bf16.mxu0 %v5659_v62  ;;  %5142 = vmatpush3.bf16.msra.mxu1 %v5662_v27  ;;  %v5668_v6 = vld [vmem:[#allocation19 + $0xb8] sm:$0xff]  }
 0x866   : > { %5997 = vtanh.f32 %v3148_v12  ;;  %v3152_v18 = vadd.f32 %v3151_v20, %v7551_v46  ;;  %v3153_v21 = vpop.f32.mrb[119].mxu1  ;;  %3623 = vmatprep.mubr.bf16.mxu0 %v3215_v16  ;;  %3730 = vmatprep.mubr.bf16.mxu1 %v3215_v16  ;;  %v7595_v12 = vrot.slane %v3288_v10, %v7175_v7 }
 0x867   : > { %5999 = vtanh.f32 %v3150_v17  ;;  %v3154_v23 = vadd.f32 %v3153_v21, %v7554_v44  ;;  %3624 = vmatmul.mubr.bf16.gmra.mrb[92].mxu0 %v3214_v11  ;;  %3731 = vmatmul.mubr.bf16.gmra.mrb[140].mxu1 %v3214_v11  ;;  %v7592_v11 = vrot.slane %v3288_v10, %v7169_v5  ;;  %v7599_v17 = vrot.slane %v3288_v10, %v921_v19 }
 0x868   : > { %v5990_v26 = vpop.eup %5989  ;;  %6001 = vtanh.f32 %v3152_v18  ;;  %4972 = vmatpush3.bf16.msra.mxu0 %v5660_v29  ;;  %5143 = vmatprep.subr.bf16.mxu1 %v5665_v63 }
 0x869   : > { %v5992_v28 = vpop.eup %5991  ;;  %6003 = vtanh.f32 %v3154_v23  ;;  %5144 = vmatpush3.bf16.msra.mxu1 %v5665_v63  ;;  %4973 = vmatprep.subr.bf16.mxu0 %v5663_v1 }
 0x86a   : > { %v5994_v30 = vpop.eup %5993  ;;  %5145 = vmatprep.subr.bf16.mxu1 %v5666_v2 }
 0x86b   : > { %v5996_v31 = vpop.eup %5995  ;;  %v3157_v14 = vpop.f32.mrb[120].mxu1  ;;  %v3216_v33 = vpack.c.bf16 %v5994_v30, %v5990_v26 }
 0x86c   : > { %v3158_v24 = vadd.f32 %v3157_v14, %v7551_v46  ;;  %v3159_v35 = vpop.f32.mrb[121].mxu1  ;;  %v3217_v37 = vpack.c.bf16 %v5996_v31, %v5992_v28  ;;  %4974 = vmatpush3.bf16.msra.mxu0 %v5664_v54 }
 0x86d   : > { %v3160_v39 = vadd.f32 %v3159_v35, %v7554_v44  ;;  %v3161_v8 = vpop.f32.mrb[122].mxu1  ;;  %5146 = vmatpush3.bf16.msra.mxu1 %v5666_v2 }
 0x86e   : > { %6005 = vtanh.f32 %v3158_v24  ;;  %v3162_v40 = vadd.f32 %v3161_v8, %v7551_v46  ;;  %v3163_v42 = vpop.f32.mrb[123].mxu1  ;;  %3633 = vmatprep.mubr.bf16.mxu0 %v3217_v37  ;;  %3738 = vmatprep.mubr.bf16.mxu1 %v3217_v37 }
 0x86f   : > { %6007 = vtanh.f32 %v3160_v39  ;;  %v3164_v43 = vadd.f32 %v3163_v42, %v7554_v44  ;;  %3634 = vmatmul.mubr.bf16.gmra.mrb[96].mxu0 %v3216_v33  ;;  %3739 = vmatmul.mubr.bf16.gmra.mrb[144].mxu1 %v3216_v33 }
 0x870   : > { %v5998_v9 = vpop.eup %5997  ;;  %6009 = vtanh.f32 %v3162_v40  ;;  %5147 = vmatprep.subr.bf16.mxu1 %v5667_v3 }
 0x871   : > { %v6000_v53 = vpop.eup %5999  ;;  %6011 = vtanh.f32 %v3164_v43  ;;  %5148 = vmatpush3.bf16.msra.mxu1 %v5667_v3 }
 0x872   : > { %v6002_v60 = vpop.eup %6001  ;;  %5149 = vmatprep.subr.bf16.mxu1 %v5668_v6 }
 0x873   : > { %v6004_v34 = vpop.eup %6003  ;;  %v3167_v25 = vpop.f32.mrb[124].mxu1  ;;  %v3218_v38 = vpack.c.bf16 %v6002_v60, %v5998_v9 }
 0x874   : > { %v3168_v41 = vadd.f32 %v3167_v25, %v7551_v46  ;;  %v3169_v47 = vpop.f32.mrb[125].mxu1  ;;  %v3219_v52 = vpack.c.bf16 %v6004_v34, %v6000_v53 }
 0x875   : > { %v3170_v61 = vadd.f32 %v3169_v47, %v7554_v44  ;;  %v3171_v55 = vpop.f32.mrb[126].mxu1  ;;  %5150 = vmatpush3.bf16.msra.mxu1 %v5668_v6 }
 0x876   : > { %6013 = vtanh.f32 %v3168_v41  ;;  %v3172_v0 = vadd.f32 %v3171_v55, %v7551_v46  ;;  %v3173_v57 = vpop.f32.mrb[127].mxu1  ;;  %3643 = vmatprep.mubr.bf16.mxu0 %v3219_v52  ;;  %3746 = vmatprep.mubr.bf16.mxu1 %v3219_v52 }
 0x877   : > { %6015 = vtanh.f32 %v3170_v61  ;;  %v3174_v45 = vadd.f32 %v3173_v57, %v7554_v44  ;;  %3644 = vmatmul.mubr.bf16.gmra.mrb[100].mxu0 %v3218_v38  ;;  %3747 = vmatmul.mubr.bf16.gmra.mrb[148].mxu1 %v3218_v38 }
 0x878   : > { %v6006_v59 = vpop.eup %6005  ;;  %6017 = vtanh.f32 %v3172_v0 }
 0x879   : > { %v6008_v15 = vpop.eup %6007  ;;  %6019 = vtanh.f32 %v3174_v45 }
 0x87a   : > { %v6010_v22 = vpop.eup %6009 }
 0x87b   : > { %v6012_v32 = vpop.eup %6011  ;;  %v3220_v36 = vpack.c.bf16 %v6010_v22, %v6006_v59 }
 0x87c   : > { %v3221_v48 = vpack.c.bf16 %v6012_v32, %v6008_v15 }
 0x87e   : > { %3653 = vmatprep.mubr.bf16.mxu0 %v3221_v48  ;;  %3754 = vmatprep.mubr.bf16.mxu1 %v3221_v48 }
 0x87f   : > { %3654 = vmatmul.mubr.bf16.gmra.mrb[104].mxu0 %v3220_v36  ;;  %3755 = vmatmul.mubr.bf16.gmra.mrb[152].mxu1 %v3220_v36 }
 0x880   : > { %v6014_v46 = vpop.eup %6013 }
 0x881   : > { %v6016_v49 = vpop.eup %6015 }
 0x882   : > { %v6018_v50 = vpop.eup %6017 }
 0x883   : > { %v6020_v51 = vpop.eup %6019  ;;  %v3222_v56 = vpack.c.bf16 %v6018_v50, %v6014_v46 }
 0x884   : > { %v3223_v44 = vpack.c.bf16 %v6020_v51, %v6016_v49 }
 0x886   : > { %3663 = vmatprep.mubr.bf16.mxu0 %v3223_v44  ;;  %3762 = vmatprep.mubr.bf16.mxu1 %v3223_v44 }
 0x887   : > { %3664 = vmatmul.mubr.bf16.gmra.mrb[108].mxu0 %v3222_v56  ;;  %3763 = vmatmul.mubr.bf16.gmra.mrb[156].mxu1 %v3222_v56 }
 0x922   : > { %v3595_v13 = vpop.f32.mrb[80].mxu0  ;;  %v4911_v16 = vpop.f32.mrb[128].mxu1 }
 0x923   : > { %v3596_v20 = vadd.f32 %v3595_v13, %v7592_v11  ;;  %v3597_v18 = vpop.f32.mrb[81].mxu0  ;;  %v4912_v21 = vpop.f32.mrb[129].mxu1 }
 0x924   : > { %v3598_v23 = vadd.f32 %v3597_v18, %v7595_v12  ;;  %v4913_v26 = vadd.f32 %v4912_v21, %v4911_v16  ;;  %v3599_v28 = vpop.f32.mrb[82].mxu0  ;;  %v4914_v30 = vpop.f32.mrb[130].mxu1 }
 0x925   : > { %6021 = vtanh.f32 %v3596_v20  ;;  %v3600_v5 = vadd.f32 %v3599_v28, %v7592_v11  ;;  %v3601_v7 = vpop.f32.mrb[83].mxu0  ;;  %v4915_v31 = vpop.f32.mrb[131].mxu1 }
 0x926   : > { %6023 = vtanh.f32 %v3598_v23  ;;  %v3709_v14 = vadd.f32 %v4913_v26, %v7599_v17  ;;  %v3602_v4 = vadd.f32 %v3601_v7, %v7595_v12  ;;  %v4916_v19 = vadd.f32 %v4915_v31, %v4914_v30 }
 0x927   : > { %6025 = vtanh.f32 %v3600_v5 }
 0x928   : > { %6027 = vtanh.f32 %v3709_v14  ;;  %v3712_v33 = vadd.f32 %v4916_v19, %v7599_v17 }
 0x929   : > { %6029 = vtanh.f32 %v3602_v4 }
 0x92a   : > { %6031 = vtanh.f32 %v3712_v33  ;;  %v3605_v24 = vpop.f32.mrb[84].mxu0  ;;  %v4917_v35 = vpop.f32.mrb[132].mxu1 }
 0x92b   : > { %v3606_v37 = vadd.f32 %v3605_v24, %v7592_v11  ;;  %v3607_v39 = vpop.f32.mrb[85].mxu0  ;;  %v4918_v8 = vpop.f32.mrb[133].mxu1 }
 0x92c   : > { %v3608_v40 = vadd.f32 %v3607_v39, %v7595_v12  ;;  %v4919_v42 = vadd.f32 %v4918_v8, %v4917_v35  ;;  %v3609_v43 = vpop.f32.mrb[86].mxu0  ;;  %v4920_v9 = vpop.f32.mrb[134].mxu1 }
 0x92d   : > { %6033 = vtanh.f32 %v3606_v37  ;;  %v3610_v53 = vadd.f32 %v3609_v43, %v7592_v11  ;;  %v3611_v60 = vpop.f32.mrb[87].mxu0  ;;  %v4921_v34 = vpop.f32.mrb[135].mxu1 }
 0x92e   : > { %6035 = vtanh.f32 %v3608_v40  ;;  %v3717_v25 = vadd.f32 %v4919_v42, %v7599_v17  ;;  %v3612_v38 = vadd.f32 %v3611_v60, %v7595_v12  ;;  %v4922_v41 = vadd.f32 %v4921_v34, %v4920_v9 }
 0x92f   : > { %v6022_v47 = vpop.eup %6021  ;;  %6037 = vtanh.f32 %v3610_v53 }
 0x930   : > { %v6024_v52 = vpop.eup %6023  ;;  %6039 = vtanh.f32 %v3717_v25  ;;  %v3720_v61 = vadd.f32 %v4922_v41, %v7599_v17 }
 0x931   : > { %v6026_v55 = vpop.eup %6025  ;;  %6041 = vtanh.f32 %v3612_v38 }
 0x932   : > { %v6028_v0 = vpop.eup %6027  ;;  %6043 = vtanh.f32 %v3720_v61  ;;  %v3615_v57 = vpop.f32.mrb[88].mxu0  ;;  %v3819_v59 = vpack.c.bf16 %v6026_v55, %v6022_v47 }
 0x933   : > { %v4923_v45 = vpop.f32.mrb[136].mxu1  ;;  %v6030_v15 = vpop.eup %6029  ;;  %v3616_v22 = vadd.f32 %v3615_v57, %v7592_v11 }
 0x934   : > { %v3617_v32 = vpop.f32.mrb[89].mxu0  ;;  %v4924_v36 = vpop.f32.mrb[137].mxu1  ;;  %v3820_v56 = vpack.c.bf16 %v6030_v15, %v6024_v52 }
 0x935   : > { %v6032_v48 = vpop.eup %6031  ;;  %v3618_v46 = vadd.f32 %v3617_v32, %v7595_v12  ;;  %v4925_v49 = vadd.f32 %v4924_v36, %v4923_v45  ;;  %v3619_v50 = vpop.f32.mrb[90].mxu0  ;;  %6045 = vtanh.f32 %v3616_v22 }
 0x936   : > { %v4926_v51 = vpop.f32.mrb[138].mxu1  ;;  %v3620_v44 = vadd.f32 %v3619_v50, %v7592_v11  ;;  %v3621_v58 = vpop.f32.mrb[91].mxu0  ;;  %v3821_v29 = vpack.c.bf16 %v6032_v48, %v6028_v0  ;;  %4074 = vmatprep.mubr.bf16.mxu0 %v3820_v56 }
 0x937   : > { %v4927_v62 = vpop.f32.mrb[139].mxu1  ;;  %6047 = vtanh.f32 %v3618_v46  ;;  %v3725_v27 = vadd.f32 %v4925_v49, %v7599_v17  ;;  %v3622_v63 = vadd.f32 %v3621_v58, %v7595_v12  ;;  %v6034_v54 = vpop.eup %6033  ;;  %4075 = vmatmul.mubr.bf16.vlgmr.msra.gmra.mrb[112].mxu0 %v3819_v59 }
 0x938   : > { %v4928_v1 = vadd.f32 %v4927_v62, %v4926_v51  ;;  %6049 = vtanh.f32 %v3620_v44  ;;  %5151 = vmatprep.mubr.bf16.mxu1 %v3821_v29  ;;  %v6036_v2 = vpop.eup %6035 }
 0x939   : > { %6051 = vtanh.f32 %v3725_v27  ;;  %v6038_v6 = vpop.eup %6037 }
 0x93a   : > { %v3728_v3 = vadd.f32 %v4928_v1, %v7599_v17  ;;  %6053 = vtanh.f32 %v3622_v63  ;;  %v6040_v10 = vpop.eup %6039  ;;  %v3625_v13 = vpop.f32.mrb[92].mxu0  ;;  %v3822_v20 = vpack.c.bf16 %v6038_v6, %v6034_v54 }
 0x93b   : > { %v4929_v16 = vpop.f32.mrb[140].mxu1  ;;  %v6042_v18 = vpop.eup %6041  ;;  %v3626_v21 = vadd.f32 %v3625_v13, %v7592_v11 }
 0x93c   : > { %6055 = vtanh.f32 %v3728_v3  ;;  %v3627_v23 = vpop.f32.mrb[93].mxu0  ;;  %v4930_v26 = vpop.f32.mrb[141].mxu1  ;;  %v3823_v14 = vpack.c.bf16 %v6042_v18, %v6036_v2 }
 0x93d   : > { %v6044_v28 = vpop.eup %6043  ;;  %v3628_v30 = vadd.f32 %v3627_v23, %v7595_v12  ;;  %v4931_v5 = vadd.f32 %v4930_v26, %v4929_v16  ;;  %v3629_v7 = vpop.f32.mrb[94].mxu0  ;;  %6057 = vtanh.f32 %v3626_v21 }
 0x93e   : > { %v4932_v31 = vpop.f32.mrb[142].mxu1  ;;  %v3630_v4 = vadd.f32 %v3629_v7, %v7592_v11  ;;  %v3631_v19 = vpop.f32.mrb[95].mxu0  ;;  %v3824_v24 = vpack.c.bf16 %v6044_v28, %v6040_v10  ;;  %4082 = vmatprep.mubr.bf16.mxu0 %v3823_v14 }
 0x93f   : > { %v4933_v33 = vpop.f32.mrb[143].mxu1  ;;  %6059 = vtanh.f32 %v3628_v30  ;;  %v3733_v35 = vadd.f32 %v4931_v5, %v7599_v17  ;;  %v3632_v37 = vadd.f32 %v3631_v19, %v7595_v12  ;;  %v6046_v8 = vpop.eup %6045  ;;  %4083 = vmatmul.mubr.bf16.gmra.mrb[116].mxu0 %v3822_v20 }
 0x940   : > { %v4934_v39 = vadd.f32 %v4933_v33, %v4932_v31  ;;  %6061 = vtanh.f32 %v3630_v4  ;;  %5152 = vmatmul.mubr.bf16.vlgmr.msra.gmra.mrb[160].mxu1 %v3824_v24 }
 0x941   : > { %v6048_v40 = vpop.eup %6047  ;;  %6063 = vtanh.f32 %v3733_v35 }
 0x942   : > { %v3736_v42 = vadd.f32 %v4934_v39, %v7599_v17  ;;  %v6050_v43 = vpop.eup %6049  ;;  %6065 = vtanh.f32 %v3632_v37  ;;  %v3635_v53 = vpop.f32.mrb[96].mxu0 }
 0x943   : > { %v6052_v9 = vpop.eup %6051  ;;  %v4935_v60 = vpop.f32.mrb[144].mxu1  ;;  %v3825_v34 = vpack.c.bf16 %v6050_v43, %v6046_v8  ;;  %v3636_v38 = vadd.f32 %v3635_v53, %v7592_v11 }
 0x944   : > { %6067 = vtanh.f32 %v3736_v42  ;;  %v6054_v25 = vpop.eup %6053  ;;  %v3637_v41 = vpop.f32.mrb[97].mxu0 }
 0x945   : > { %v4936_v47 = vpop.f32.mrb[145].mxu1  ;;  %v3638_v61 = vadd.f32 %v3637_v41, %v7595_v12  ;;  %v3639_v0 = vpop.f32.mrb[98].mxu0  ;;  %v3826_v45 = vpack.c.bf16 %v6054_v25, %v6048_v40  ;;  %6069 = vtanh.f32 %v3636_v38 }
 0x946   : > { %v6056_v52 = vpop.eup %6055  ;;  %v4937_v55 = vadd.f32 %v4936_v47, %v4935_v60  ;;  %v4938_v57 = vpop.f32.mrb[146].mxu1  ;;  %v3640_v59 = vadd.f32 %v3639_v0, %v7592_v11 }
 0x947   : > { %v3641_v15 = vpop.f32.mrb[99].mxu0  ;;  %v4939_v22 = vpop.f32.mrb[147].mxu1  ;;  %v3827_v32 = vpack.c.bf16 %v6056_v52, %v6052_v9  ;;  %6071 = vtanh.f32 %v3638_v61  ;;  %4090 = vmatprep.mubr.bf16.mxu0 %v3826_v45 }
 0x948   : > { %v3741_v36 = vadd.f32 %v4937_v55, %v7599_v17  ;;  %v3642_v48 = vadd.f32 %v3641_v15, %v7595_v12  ;;  %v4940_v46 = vadd.f32 %v4939_v22, %v4938_v57  ;;  %v6058_v49 = vpop.eup %6057  ;;  %6073 = vtanh.f32 %v3640_v59  ;;  %4091 = vmatmul.mubr.bf16.gmra.mrb[120].mxu0 %v3825_v34 }
 0x949   : > { %5155 = vmatprep.mubr.bf16.mxu1 %v3827_v32  ;;  %v6060_v50 = vpop.eup %6059 }
 0x94a   : > { %6075 = vtanh.f32 %v3741_v36  ;;  %v3744_v51 = vadd.f32 %v4940_v46, %v7599_v17  ;;  %v6062_v56 = vpop.eup %6061  ;;  %v3645_v58 = vpop.f32.mrb[100].mxu0 }
 0x94b   : > { %6077 = vtanh.f32 %v3642_v48  ;;  %v6064_v44 = vpop.eup %6063  ;;  %v4941_v62 = vpop.f32.mrb[148].mxu1  ;;  %v3828_v29 = vpack.c.bf16 %v6062_v56, %v6058_v49  ;;  %v3646_v63 = vadd.f32 %v3645_v58, %v7592_v11 }
 0x94c   : > { %6079 = vtanh.f32 %v3744_v51  ;;  %v6066_v27 = vpop.eup %6065  ;;  %v3647_v1 = vpop.f32.mrb[101].mxu0 }
 0x94d   : > { %v4942_v54 = vpop.f32.mrb[149].mxu1  ;;  %v3648_v3 = vadd.f32 %v3647_v1, %v7595_v12  ;;  %v3649_v10 = vpop.f32.mrb[102].mxu0  ;;  %v3829_v16 = vpack.c.bf16 %v6066_v27, %v6060_v50  ;;  %6081 = vtanh.f32 %v3646_v63 }
 0x94e   : > { %v6068_v2 = vpop.eup %6067  ;;  %v4943_v6 = vadd.f32 %v4942_v54, %v4941_v62  ;;  %v4944_v13 = vpop.f32.mrb[150].mxu1  ;;  %v3650_v20 = vadd.f32 %v3649_v10, %v7592_v11 }
 0x94f   : > { %v3651_v18 = vpop.f32.mrb[103].mxu0  ;;  %v4945_v21 = vpop.f32.mrb[151].mxu1  ;;  %v3830_v23 = vpack.c.bf16 %v6068_v2, %v6064_v44  ;;  %6083 = vtanh.f32 %v3648_v3  ;;  %4098 = vmatprep.mubr.bf16.mxu0 %v3829_v16 }
 0x950   : > { %v3749_v26 = vadd.f32 %v4943_v6, %v7599_v17  ;;  %v3652_v28 = vadd.f32 %v3651_v18, %v7595_v12  ;;  %v4946_v30 = vadd.f32 %v4945_v21, %v4944_v13  ;;  %v6070_v5 = vpop.eup %6069  ;;  %6085 = vtanh.f32 %v3650_v20  ;;  %4099 = vmatmul.mubr.bf16.gmra.mrb[124].mxu0 %v3828_v29 }
 0x951   : > { %5156 = vmatmul.mubr.bf16.gmra.mrb[164].mxu1 %v3830_v23  ;;  %v6072_v7 = vpop.eup %6071 }
 0x952   : > { %6087 = vtanh.f32 %v3749_v26  ;;  %v3752_v31 = vadd.f32 %v4946_v30, %v7599_v17  ;;  %v6074_v14 = vpop.eup %6073  ;;  %v3655_v19 = vpop.f32.mrb[104].mxu0 }
 0x953   : > { %6089 = vtanh.f32 %v3652_v28  ;;  %v4947_v33 = vpop.f32.mrb[152].mxu1  ;;  %v3831_v24 = vpack.c.bf16 %v6074_v14, %v6070_v5  ;;  %v3656_v37 = vadd.f32 %v3655_v19, %v7592_v11  ;;  %v3657_v39 = vpop.f32.mrb[105].mxu0 }
 0x954   : > { %v6076_v4 = vpop.eup %6075  ;;  %6091 = vtanh.f32 %v3752_v31  ;;  %v4948_v8 = vpop.f32.mrb[153].mxu1  ;;  %v3658_v42 = vadd.f32 %v3657_v39, %v7595_v12 }
 0x955   : > { %v6078_v35 = vpop.eup %6077  ;;  %v4949_v43 = vadd.f32 %v4948_v8, %v4947_v33  ;;  %v3659_v9 = vpop.f32.mrb[106].mxu0  ;;  %6093 = vtanh.f32 %v3656_v37 }
 0x956   : > { %v6080_v40 = vpop.eup %6079  ;;  %v4950_v53 = vpop.f32.mrb[154].mxu1  ;;  %v3832_v60 = vpack.c.bf16 %v6078_v35, %v6072_v7  ;;  %v3660_v34 = vadd.f32 %v3659_v9, %v7592_v11  ;;  %6095 = vtanh.f32 %v3658_v42 }
 0x957   : > { %v3661_v25 = vpop.f32.mrb[107].mxu0  ;;  %v4951_v38 = vpop.f32.mrb[155].mxu1  ;;  %v3833_v41 = vpack.c.bf16 %v6080_v40, %v6076_v4  ;;  %v3757_v47 = vadd.f32 %v4949_v43, %v7599_v17 }
 0x958   : > { %v3662_v52 = vadd.f32 %v3661_v25, %v7595_v12  ;;  %v4952_v61 = vadd.f32 %v4951_v38, %v4950_v53  ;;  %4106 = vmatprep.mubr.bf16.mxu0 %v3832_v60  ;;  %v6082_v55 = vpop.eup %6081  ;;  %6097 = vtanh.f32 %v3660_v34 }
 0x959   : > { %4107 = vmatmul.mubr.bf16.gmra.mrb[128].mxu0 %v3831_v24  ;;  %5159 = vmatprep.mubr.bf16.mxu1 %v3833_v41  ;;  %v6084_v0 = vpop.eup %6083  ;;  %6099 = vtanh.f32 %v3757_v47 }
 0x95a   : > { %v3760_v57 = vadd.f32 %v4952_v61, %v7599_v17  ;;  %v6086_v45 = vpop.eup %6085  ;;  %6101 = vtanh.f32 %v3662_v52  ;;  %v3665_v15 = vpop.f32.mrb[108].mxu0 }
 0x95b   : > { %v4953_v22 = vpop.f32.mrb[156].mxu1  ;;  %v3834_v32 = vpack.c.bf16 %v6086_v45, %v6082_v55  ;;  %v3666_v48 = vadd.f32 %v3665_v15, %v7592_v11  ;;  %v3667_v46 = vpop.f32.mrb[109].mxu0 }
 0x95c   : > { %v6088_v59 = vpop.eup %6087  ;;  %6103 = vtanh.f32 %v3760_v57  ;;  %v4954_v49 = vpop.f32.mrb[157].mxu1  ;;  %v3668_v51 = vadd.f32 %v3667_v46, %v7595_v12 }
 0x95d   : > { %v6090_v36 = vpop.eup %6089  ;;  %v4955_v56 = vadd.f32 %v4954_v49, %v4953_v22  ;;  %v3669_v44 = vpop.f32.mrb[110].mxu0  ;;  %6105 = vtanh.f32 %v3666_v48 }
 0x95e   : > { %v6092_v50 = vpop.eup %6091  ;;  %v4956_v58 = vpop.f32.mrb[158].mxu1  ;;  %v3835_v62 = vpack.c.bf16 %v6090_v36, %v6084_v0  ;;  %v3670_v29 = vadd.f32 %v3669_v44, %v7592_v11  ;;  %6107 = vtanh.f32 %v3668_v51 }
 0x95f   : > { %v3671_v27 = vpop.f32.mrb[111].mxu0  ;;  %v4957_v63 = vpop.f32.mrb[159].mxu1  ;;  %v3836_v1 = vpack.c.bf16 %v6092_v50, %v6088_v59  ;;  %v3765_v54 = vadd.f32 %v4955_v56, %v7599_v17 }
 0x960   : > { %v3672_v2 = vadd.f32 %v3671_v27, %v7595_v12  ;;  %v4958_v3 = vadd.f32 %v4957_v63, %v4956_v58  ;;  %4114 = vmatprep.mubr.bf16.mxu0 %v3835_v62  ;;  %v6094_v6 = vpop.eup %6093  ;;  %6109 = vtanh.f32 %v3670_v29 }
 0x961   : > { %4115 = vmatmul.mubr.bf16.gmra.mrb[132].mxu0 %v3834_v32  ;;  %5160 = vmatmul.mubr.bf16.gmra.mrb[168].mxu1 %v3836_v1  ;;  %v6096_v10 = vpop.eup %6095  ;;  %6111 = vtanh.f32 %v3765_v54 }
 0x962   : > { %v3768_v13 = vadd.f32 %v4958_v3, %v7599_v17  ;;  %v6098_v16 = vpop.eup %6097  ;;  %6113 = vtanh.f32 %v3672_v2 }
 0x963   : > { %v6100_v11 = vpop.eup %6099  ;;  %v3837_v20 = vpack.c.bf16 %v6098_v16, %v6094_v6 }
 0x964   : > { %6115 = vtanh.f32 %v3768_v13  ;;  %v6102_v18 = vpop.eup %6101 }
 0x965   : > { %v3838_v23 = vpack.c.bf16 %v6102_v18, %v6096_v10 }
 0x966   : > { %v6104_v21 = vpop.eup %6103 }
 0x967   : > { %v3839_v26 = vpack.c.bf16 %v6104_v21, %v6100_v11  ;;  %4122 = vmatprep.mubr.bf16.mxu0 %v3838_v23  ;;  %v6106_v12 = vpop.eup %6105 }
 0x968   : > { %v6108_v28 = vpop.eup %6107 }
 0x969   : > { %4123 = vmatmul.mubr.bf16.gmra.mrb[136].mxu0 %v3837_v20  ;;  %5163 = vmatprep.mubr.bf16.mxu1 %v3839_v26 }
 0x96a   : > { %v6110_v30 = vpop.eup %6109 }
 0x96b   : > { %v6112_v5 = vpop.eup %6111  ;;  %v3840_v17 = vpack.c.bf16 %v6110_v30, %v6106_v12 }
 0x96c   : > { %v6114_v7 = vpop.eup %6113 }
 0x96d   : > { %v3841_v14 = vpack.c.bf16 %v6114_v7, %v6108_v28 }
 0x96e   : > { %v6116_v31 = vpop.eup %6115 }
 0x96f   : > { %v3842_v4 = vpack.c.bf16 %v6116_v31, %v6112_v5  ;;  %4130 = vmatprep.mubr.bf16.mxu0 %v3841_v14 }
 0x971   : > { %4131 = vmatmul.mubr.bf16.gmra.mrb[140].mxu0 %v3840_v17  ;;  %5164 = vmatmul.mubr.bf16.gmra.mrb[172].mxu1 %v3842_v4 }
 0x972   : > { %6474 = shalt.err (!%p6471_p1)
}
 0x973   : > { %s6475_s0 = scalar_lea.hbm %s7654_s16, 4096  ;;  %s6479_s4 = scalar_lea.hbm %s7884_s22, 8192 }
 0x974   : > { %p6476_p11 = scmp.ne.s32.totalorder %s7654_s16, %s6475_s0  ;;  %p6480_p13 = scmp.lt.u32.totalorder %s7654_s16, %s7884_s22 }
 0x975   : > { %p6481_p6 = scmp.lt.u32.totalorder %s6479_s4, %s6475_s0  ;;  %p6483_p0 = scmp.lt.u32.totalorder %s6475_s0, %s7654_s16 }
 0x976   : > { %p6477_p12 = pnand %p6476_p11, %p7885_p5 }
 0x977   : > { %p6482_p9 = por %p6481_p6, %p6480_p13 }
 0x978   : > { %p6478_p2 = pneg %p6477_p12 }
 0x979   : > { %p6484_p7 = por %p6483_p0, %p6482_p9 }
 0x97b   : > { %p6485_p8 = pnand %p6484_p7, %p6478_p2 }
 0x97d   : > { %6488 = shalt.err (!%p6485_p8)
}
 0x97e   : > { %s6604_s8 = smov 256   ;;  %s6605_s14 = smov 16  }
 0x97f   : > { %5272 = dma.vmem_to_hbm [thread:$0]  (%p7885_p5), %s7656_s21, 4096, %s7654_s16, %s4274_s6, %s6604_s8, %s6604_s8, %s6605_s14  }
 0x980   : > { %s7886_s17 = sld [smem:[#allocation51_spill]]  ;;  %s7693_s21 = scalar_lea.vmem [#allocation20], %s4537_s18 }
 0x981   : > { %s4780_s18 = sshll.u32 %s6740_s29, 11  ;;  %s4287_s16 = sshll.u32 %s7693_s21, 4  ;;  %s7728_s16 = int_to_ptr.vmem [resolvable:$true] %s4287_s16 }
 0x982   : > { %s7887_s19 = sld [smem:[#allocation52_spill]]  ;;  %s4269_s24 = scalar_lea.sflag [#allocation4], %s7110_s3 }
 0x983   : > { %s6489_s0 = scalar_lea.vmem %s7728_s16, 2048  ;;  %s6606_s29 = smov [#allocation20]  }
 0x984   : > { %p6490_p4 = scmp.ne.s32.totalorder %s7728_s16, %s6489_s0  ;;  %s6493_s20 = sshll.u32 %s6606_s29, 4  ;;  %s6494_s20 = int_to_ptr.vmem [resolvable:$false] %s6493_s20 }
 0x985   : > { %s6495_s30 = scalar_lea.vmem %s6494_s20, 4096  ;;  %p6496_p1 = scmp.lt.s32.totalorder %s7728_s16, %s6494_s20 }
 0x986   : > { %v7685_v8 = vld [vmem:[%s7886_s17] ss:$0 sm:$0xff]  ;;  %p6491_p3 = pnand %p6490_p4, %p7885_p5  ;;  %p6497_p11 = scmp.lt.s32.totalorder %s6495_s30, %s6489_s0 }
 0x988   : > { %s7726_s10 = scalar_lea.hbm %s7887_s19, %s4780_s18  ;;  %p6492_p10 = pneg %p6491_p3 }
 0x989   : > { %p6498_p12 = por %p6497_p11, %p6496_p1 }
 0x98b   : > { %p6499_p2 = pnand %p6498_p12, %p6492_p10 }
 0xa0a   : > { %v4975_v19 = vpop.f32.mrb[112].mxu0 }
 0xa0b   : > { %v4976_v33 = vpop.f32.mrb[113].mxu0 }
 0xa0c   : > { %v4977_v24 = vadd.f32 %v4976_v33, %v4975_v19  ;;  %v4978_v35 = vpop.f32.mrb[114].mxu0 }
 0xa0d   : > { %v4979_v37 = vpop.f32.mrb[115].mxu0 }
 0xa0e   : > { %v4980_v39 = vadd.f32 %v4979_v37, %v4978_v35  ;;  %v4077_v43 = vadd.f32 %v4977_v24, %v7685_v8 }
 0xa10   : > { %v4080_v41 = vadd.f32 %v4980_v39, %v7685_v8 }
 0xa12   : > { %v4981_v40 = vpop.f32.mrb[116].mxu0 }
 0xa13   : > { %v5153_v42 = vpop.f32.mrb[160].mxu1  ;;  %v4982_v9 = vpop.f32.mrb[117].mxu0 }
 0xa14   : > { %v4173_v53 = vpop.f32.mrb[161].mxu1  ;;  %v4983_v60 = vadd.f32 %v4982_v9, %v4981_v40  ;;  %v4984_v34 = vpop.f32.mrb[118].mxu0 }
 0xa15   : > { %v4174_v25 = vadd.f32 %v4173_v53, %v4077_v43  ;;  %v5154_v38 = vpop.f32.mrb[162].mxu1  ;;  %v4985_v47 = vpop.f32.mrb[119].mxu0 }
 0xa16   : > { %v4176_v52 = vpop.f32.mrb[163].mxu1  ;;  %v4085_v61 = vadd.f32 %v4983_v60, %v7685_v8  ;;  %v4986_v55 = vadd.f32 %v4985_v47, %v4984_v34 }
 0xa17   : > { %6117 = vtanh.f32 %v4174_v25  ;;  %v4177_v0 = vadd.f32 %v4176_v52, %v4080_v41 }
 0xa18   : > { %v4182_v57 = vadd.f32 %v5153_v42, %v4085_v61  ;;  %v4088_v45 = vadd.f32 %v4986_v55, %v7685_v8 }
 0xa19   : > { %6119 = vtanh.f32 %v4177_v0 }
 0xa1a   : > { %6121 = vtanh.f32 %v4182_v57  ;;  %v4185_v59 = vadd.f32 %v5154_v38, %v4088_v45 }
 0xa1b   : > { %v4987_v15 = vpop.f32.mrb[120].mxu0 }
 0xa1c   : > { %v4988_v22 = vpop.f32.mrb[121].mxu0  ;;  %6123 = vtanh.f32 %v4185_v59 }
 0xa1d   : > { %v4989_v32 = vadd.f32 %v4988_v22, %v4987_v15  ;;  %v4990_v36 = vpop.f32.mrb[122].mxu0 }
 0xa1e   : > { %v4991_v48 = vpop.f32.mrb[123].mxu0 }
 0xa1f   : > { %v4992_v46 = vadd.f32 %v4991_v48, %v4990_v36  ;;  %v4093_v44 = vadd.f32 %v4989_v32, %v7685_v8 }
 0xa21   : > { %v6118_v49 = vpop.eup %6117  ;;  %v4096_v2 = vadd.f32 %v4992_v46, %v7685_v8 }
 0xa22   : > { %4252 = vst [vmem:[%s7693_s21] sm:$0xff] %v6118_v49 }
 0xa23   : > { %v6120_v50 = vpop.eup %6119  ;;  %v4993_v51 = vpop.f32.mrb[124].mxu0 }
 0xa24   : > { %v5157_v56 = vpop.f32.mrb[164].mxu1  ;;  %4253 = vst [vmem:[%s7693_s21 + $0x8] sm:$0xff] %v6120_v50  ;;  %v4994_v58 = vpop.f32.mrb[125].mxu0 }
 0xa25   : > { %v4189_v62 = vpop.f32.mrb[165].mxu1  ;;  %v6122_v29 = vpop.eup %6121  ;;  %v4995_v27 = vadd.f32 %v4994_v58, %v4993_v51 }
 0xa26   : > { %v4996_v63 = vpop.f32.mrb[126].mxu0  ;;  %v4190_v1 = vadd.f32 %v4189_v62, %v4093_v44  ;;  %v5158_v54 = vpop.f32.mrb[166].mxu1  ;;  %4254 = vst [vmem:[%s7693_s21 + $0x10] sm:$0xff] %v6122_v29 }
 0xa27   : > { %v4997_v3 = vpop.f32.mrb[127].mxu0  ;;  %v4192_v6 = vpop.f32.mrb[167].mxu1  ;;  %v4101_v13 = vadd.f32 %v4995_v27, %v7685_v8 }
 0xa28   : > { %v6124_v10 = vpop.eup %6123  ;;  %6125 = vtanh.f32 %v4190_v1  ;;  %v4998_v16 = vadd.f32 %v4997_v3, %v4996_v63  ;;  %v4193_v11 = vadd.f32 %v4192_v6, %v4096_v2 }
 0xa29   : > { %4255 = vst [vmem:[%s7693_s21 + $0x18] sm:$0xff] %v6124_v10  ;;  %v4198_v20 = vadd.f32 %v5157_v56, %v4101_v13 }
 0xa2a   : > { %v4104_v18 = vadd.f32 %v4998_v16, %v7685_v8  ;;  %6127 = vtanh.f32 %v4193_v11 }
 0xa2b   : > { %6129 = vtanh.f32 %v4198_v20 }
 0xa2c   : > { %v4201_v21 = vadd.f32 %v5158_v54, %v4104_v18  ;;  %v4999_v23 = vpop.f32.mrb[128].mxu0 }
 0xa2d   : > { %v5000_v26 = vpop.f32.mrb[129].mxu0 }
 0xa2e   : > { %6131 = vtanh.f32 %v4201_v21  ;;  %v5001_v12 = vadd.f32 %v5000_v26, %v4999_v23  ;;  %v5002_v28 = vpop.f32.mrb[130].mxu0 }
 0xa2f   : > { %v5003_v30 = vpop.f32.mrb[131].mxu0 }
 0xa30   : > { %v5004_v5 = vadd.f32 %v5003_v30, %v5002_v28  ;;  %v4109_v4 = vadd.f32 %v5001_v12, %v7685_v8 }
 0xa32   : > { %v6126_v17 = vpop.eup %6125  ;;  %v4112_v42 = vadd.f32 %v5004_v5, %v7685_v8 }
 0xa33   : > { %4256 = vst [vmem:[%s7693_s21 + $0x20] sm:$0xff] %v6126_v17 }
 0xa34   : > { %v6128_v7 = vpop.eup %6127  ;;  %v5005_v31 = vpop.f32.mrb[132].mxu0 }
 0xa35   : > { %v5161_v14 = vpop.f32.mrb[168].mxu1  ;;  %4257 = vst [vmem:[%s7693_s21 + $0x28] sm:$0xff] %v6128_v7  ;;  %v5006_v19 = vpop.f32.mrb[133].mxu0 }
 0xa36   : > { %v4205_v33 = vpop.f32.mrb[169].mxu1  ;;  %v6130_v24 = vpop.eup %6129  ;;  %v5007_v35 = vadd.f32 %v5006_v19, %v5005_v31 }
 0xa37   : > { %v5008_v37 = vpop.f32.mrb[134].mxu0  ;;  %v4206_v39 = vadd.f32 %v4205_v33, %v4109_v4  ;;  %v5162_v40 = vpop.f32.mrb[170].mxu1  ;;  %4258 = vst [vmem:[%s7693_s21 + $0x30] sm:$0xff] %v6130_v24 }
 0xa38   : > { %v5009_v43 = vpop.f32.mrb[135].mxu0  ;;  %v4208_v9 = vpop.f32.mrb[171].mxu1  ;;  %v4117_v60 = vadd.f32 %v5007_v35, %v7685_v8 }
 0xa39   : > { %v6132_v53 = vpop.eup %6131  ;;  %6133 = vtanh.f32 %v4206_v39  ;;  %v5010_v34 = vadd.f32 %v5009_v43, %v5008_v37  ;;  %v4209_v25 = vadd.f32 %v4208_v9, %v4112_v42 }
 0xa3a   : > { %4259 = vst [vmem:[%s7693_s21 + $0x38] sm:$0xff] %v6132_v53  ;;  %v4214_v38 = vadd.f32 %v5161_v14, %v4117_v60 }
 0xa3b   : > { %v4120_v41 = vadd.f32 %v5010_v34, %v7685_v8  ;;  %6135 = vtanh.f32 %v4209_v25 }
 0xa3c   : > { %6137 = vtanh.f32 %v4214_v38  ;;  %v5011_v52 = vpop.f32.mrb[136].mxu0 }
 0xa3d   : > { %v4217_v47 = vadd.f32 %v5162_v40, %v4120_v41  ;;  %v5012_v61 = vpop.f32.mrb[137].mxu0 }
 0xa3e   : > { %v5013_v55 = vadd.f32 %v5012_v61, %v5011_v52  ;;  %v5014_v0 = vpop.f32.mrb[138].mxu0 }
 0xa3f   : > { %6139 = vtanh.f32 %v4217_v47  ;;  %v5015_v57 = vpop.f32.mrb[139].mxu0 }
 0xa40   : > { %v5016_v45 = vadd.f32 %v5015_v57, %v5014_v0  ;;  %v4125_v36 = vadd.f32 %v5013_v55, %v7685_v8 }
 0xa42   : > { %v4128_v58 = vadd.f32 %v5016_v45, %v7685_v8 }
 0xa43   : > { %v6134_v59 = vpop.eup %6133 }
 0xa44   : > { %4260 = vst [vmem:[%s7693_s21 + $0x40] sm:$0xff] %v6134_v59  ;;  %v5017_v22 = vpop.f32.mrb[140].mxu0  ;;  %v5165_v32 = vpop.f32.mrb[172].mxu1 }
 0xa45   : > { %v6136_v15 = vpop.eup %6135  ;;  %v5018_v48 = vpop.f32.mrb[141].mxu0 }
 0xa46   : > { %4261 = vst [vmem:[%s7693_s21 + $0x48] sm:$0xff] %v6136_v15  ;;  %v4221_v46 = vpop.f32.mrb[173].mxu1  ;;  %v6138_v49 = vpop.eup %6137  ;;  %v5019_v50 = vadd.f32 %v5018_v48, %v5017_v22 }
 0xa47   : > { %v5020_v51 = vpop.f32.mrb[142].mxu0  ;;  %v4222_v56 = vadd.f32 %v4221_v46, %v4125_v36  ;;  %v5166_v44 = vpop.f32.mrb[174].mxu1  ;;  %4262 = vst [vmem:[%s7693_s21 + $0x50] sm:$0xff] %v6138_v49 }
 0xa48   : > { %v5021_v62 = vpop.f32.mrb[143].mxu0  ;;  %v4224_v29 = vpop.f32.mrb[175].mxu1  ;;  %v4133_v63 = vadd.f32 %v5019_v50, %v7685_v8 }
 0xa49   : > { %v6140_v27 = vpop.eup %6139  ;;  %6141 = vtanh.f32 %v4222_v56  ;;  %v5022_v1 = vadd.f32 %v5021_v62, %v5020_v51  ;;  %v4225_v54 = vadd.f32 %v4224_v29, %v4128_v58 }
 0xa4a   : > { %4263 = vst [vmem:[%s7693_s21 + $0x58] sm:$0xff] %v6140_v27  ;;  %v4230_v2 = vadd.f32 %v5165_v32, %v4133_v63 }
 0xa4b   : > { %v4136_v3 = vadd.f32 %v5022_v1, %v7685_v8  ;;  %6143 = vtanh.f32 %v4225_v54 }
 0xa4c   : > { %6145 = vtanh.f32 %v4230_v2 }
 0xa4d   : > { %v4233_v6 = vadd.f32 %v5166_v44, %v4136_v3 }
 0xa4f   : > { %6147 = vtanh.f32 %v4233_v6 }
 0xa53   : > { %v6142_v10 = vpop.eup %6141 }
 0xa54   : > { %4264 = vst [vmem:[%s7693_s21 + $0x60] sm:$0xff] %v6142_v10 }
 0xa55   : > { %v6144_v13 = vpop.eup %6143 }
 0xa56   : > { %4265 = vst [vmem:[%s7693_s21 + $0x68] sm:$0xff] %v6144_v13  ;;  %v6146_v16 = vpop.eup %6145 }
 0xa57   : > { %4266 = vst [vmem:[%s7693_s21 + $0x70] sm:$0xff] %v6146_v16 }
 0xa59   : > { %v6148_v8 = vpop.eup %6147 }
 0xa5a   : > { %4267 = vst [vmem:[%s7693_s21 + $0x78] sm:$0xff] %v6148_v8 }
 0xa5b   : > { %6502 = shalt.err (!%p6499_p2)
}
 0xa5c   : > { %s6503_s4 = scalar_lea.hbm %s7726_s10, 2048  ;;  %s6507_s8 = scalar_lea.hbm %s7887_s19, 4096 }
 0xa5d   : > { %p6504_p13 = scmp.ne.s32.totalorder %s7726_s10, %s6503_s4  ;;  %p6508_p0 = scmp.lt.u32.totalorder %s7726_s10, %s7887_s19 }
 0xa5e   : > { %p6509_p7 = scmp.lt.u32.totalorder %s6507_s8, %s6503_s4  ;;  %p6511_p4 = scmp.lt.u32.totalorder %s6503_s4, %s7726_s10 }
 0xa5f   : > { %p6505_p6 = pnand %p6504_p13, %p7885_p5 }
 0xa60   : > { %p6510_p8 = por %p6509_p7, %p6508_p0 }
 0xa61   : > { %p6506_p9 = pneg %p6505_p6 }
 0xa62   : > { %p6512_p3 = por %p6511_p4, %p6510_p8 }
 0xa64   : > { %p6513_p10 = pnand %p6512_p3, %p6506_p9 }
 0xa66   : > { %6516 = shalt.err (!%p6513_p10)
}
 0xa67   : > { %s6607_s28 = smov 128   ;;  %s6608_s17 = smov 8  }
 0xa68   : > { %5271 = dma.vmem_to_hbm [thread:$0]  (%p7885_p5), %s7728_s16, 2048, %s7726_s10, %s4269_s24, %s6607_s28, %s6607_s28, %s6608_s17  }
 0xa69 PF: > { %s4319_s21 = sand.u32 1, %s6571_s2   ;;  %p7888_p1 = scmp.ne.s32.totalorder %s7861_s23, 0 }
 0xa6a   : > { %p7889_p11 = scmp.ge.s32.totalorder %s6583_s27, 2  ;;  %s4320_s18 = scalar_lea.sflag [#allocation4], %s4319_s21 }
 0xa6c   : > { %p5311_p12 = pnand %p7889_p11, %p7888_p1 }
 0xa6e   : > { %6562 = dma.done.wait (!%p5311_p12), %s4320_s18, 2048  }
 0xa6f   : > { %6564 = vsyncadd (!%p5311_p12), %s4320_s18, 4294965248  ;;  %s4329_s6 = scalar_lea.sflag [#allocation22], %s4319_s21 }
 0xa70   : > { %6566 = dma.done.wait (!%p5311_p12), %s4329_s6, 4096  }
 0xa71   : > { %6568 = vsyncadd (!%p5311_p12), %s4329_s6, 4294963200  ;;  %s7890_s9 = sld [smem:[#allocation32_spill]]  ;;  %p45_p5 = scmp.ge.s32.totalorder %s6990_s5, 4  }
 0xa72   : > { %s7891_s2 = smov %s6575_s25  ;;  %s7892_s25 = smov %s6579_s26 }
 0xa73   : > { %s7894_s27 = smov %s6990_s5  ;;  %47 = sbr.rel (!%p45_p5) target bundleno = 35 (0x23), region = 211 }
 0xa77   : > { %s7893_s26 = smov %s7890_s9 }
 0xa7a   :  { %4334 = vsyncpa [#allocation3], 1 }
 0xa7b   :  { %4336 = vsyncpa [#allocation3 + $0x1], 1 }
 0xa7c   :  { %4337 = vsyncpa [#allocation6], 1 }
 0xa7d   :  { %4339 = vsyncpa [#allocation6 + $0x1], 1 }
 0xa7e   :  { %4340 = vsyncpa [#allocation9], 1 }
 0xa7f   :  { %4341 = vsyncpa [#allocation12], 1 }
 0xa80   :  { %4342 = vsyncpa [#allocation15], 1 }
 0xa81   :  { %4343 = vsyncpa [#allocation18], 1 }
 0xa82   :  { %4344 = vsyncpa [#allocation4], 1 }
 0xa83   :  { %4346 = vsyncpa [#allocation4 + $0x1], 1 }
 0xa84   :  { %4347 = vsyncpa [#allocation22], 1 }
 0xa85   :  { %4349 = vsyncpa [#allocation22 + $0x1], 1 }

// kernel: tpu_custom_call.1
= control target key start
LH: loop header
LB: loop body
LE: loop exit
PB: predicated region body
PF: predicated region fallthrough
CT: control target
= control target key end

     0   :  { %s7774_s0 = inlined_call_operand.hbm [shape: bf16[256,128], index: 0, kind: input, shape index: {}]   ;;  %s7775_s1 = inlined_call_operand.hbm [shape: f32[256,128], index: 1, kind: input, shape index: {}]   ;;  %s7776_s2 = inlined_call_operand.hbm [shape: bf16[128,384], index: 2, kind: input, shape index: {}]   ;;  %s7777_s3 = inlined_call_operand.vmem [shape: f32[1,384], index: 3, kind: input, shape index: {}]   ;;  %s7778_s4 = inlined_call_operand.hbm [shape: bf16[384,256], index: 4, kind: input, shape index: {}]   ;;  %s7779_s5 = inlined_call_operand.vmem [shape: f32[1,256], index: 5, kind: input, shape index: {}]   ;;  %s7780_s6 = inlined_call_operand.hbm [shape: bf16[256,128], index: 6, kind: input, shape index: {}]   ;;  %s7781_s7 = inlined_call_operand.vmem [shape: f32[1,128], index: 7, kind: input, shape index: {}]   ;;  %s7782_s8 = inlined_call_operand.hbm [shape: bf16[128,128], index: 8, kind: input, shape index: {}]   ;;  %s7783_s9 = inlined_call_operand.vmem [shape: f32[1,128], index: 9, kind: input, shape index: {}]   ;;  %s7784_s10 = inlined_call_operand.hbm [shape: bf16[128,256], index: 10, kind: input, shape index: {}]   ;;  %s7785_s11 = inlined_call_operand.vmem [shape: f32[1,256], index: 11, kind: input, shape index: {}]   ;;  %s7786_s12 = inlined_call_operand.hbm [shape: bf16[128,128], index: 12, kind: input, shape index: {}]   ;;  %s7787_s13 = inlined_call_operand.vmem [shape: f32[1,128], index: 13, kind: input, shape index: {}]   ;;  %s7788_s14 = inlined_call_operand.hbm [shape: bf16[128,256], index: 14, kind: input, shape index: {}]   ;;  %s7789_s15 = inlined_call_operand.vmem [shape: f32[1,256], index: 15, kind: input, shape index: {}]   ;;  %s7790_s16 = inlined_call_operand.hbm [shape: bf16[256,384], index: 16, kind: input, shape index: {}]   ;;  %s7791_s17 = inlined_call_operand.vmem [shape: f32[1,384], index: 17, kind: input, shape index: {}]   ;;  %s7792_s18 = inlined_call_operand.hbm [shape: bf16[384,128], index: 18, kind: input, shape index: {}]   ;;  %s7793_s19 = inlined_call_operand.vmem [shape: f32[1,128], index: 19, kind: input, shape index: {}]   ;;  %s7794_s20 = inlined_call_operand.hbm [shape: f32[256,128], index: 20, kind: output, shape index: {0}]   ;;  %s7795_s21 = inlined_call_operand.hbm [shape: f32[256,256], index: 21, kind: output, shape index: {1}]  }
   0x1   :  { %7818 = sst [smem:[#allocation33_spill]] %s7774_s0 }
   0x2   :  { %7819 = sst [smem:[#allocation34_spill]] %s7775_s1 }
   0x3   :  { %7820 = sst [smem:[#allocation35_spill]] %s7776_s2 }
   0x4   :  { %7821 = sst [smem:[#allocation36_spill]] %s7777_s3 }
   0x5   :  { %7822 = sst [smem:[#allocation37_spill]] %s7778_s4 }
   0x6   :  { %7823 = sst [smem:[#allocation38_spill]] %s7779_s5 }
   0x7   :  { %7824 = sst [smem:[#allocation39_spill]] %s7780_s6 }
   0x8   :  { %7825 = sst [smem:[#allocation40_spill]] %s7782_s8 }
   0x9   :  { %7826 = sst [smem:[#allocation41_spill]] %s7783_s9 }
   0xa   :  { %7827 = sst [smem:[#allocation42_spill]] %s7784_s10 }
   0xb   :  { %7828 = sst [smem:[#allocation43_spill]] %s7785_s11 }
   0xc   :  { %7829 = sst [smem:[#allocation44_spill]] %s7786_s12 }
   0xd   :  { %7830 = sst [smem:[#allocation45_spill]] %s7787_s13 }
   0xe   :  { %7831 = sst [smem:[#allocation46_spill]] %s7788_s14 }
   0xf   :  { %7832 = sst [smem:[#allocation47_spill]] %s7789_s15 }
  0x10   :  { %7833 = sst [smem:[#allocation48_spill]] %s7790_s16 }
  0x11   :  { %7834 = sst [smem:[#allocation49_spill]] %s7791_s17 }
  0x12   :  { %7835 = sst [smem:[#allocation50_spill]] %s7792_s18 }
  0x13   :  { %7836 = sst [smem:[#allocation51_spill]] %s7793_s19 }
  0x14   :  { %7837 = sst [smem:[#allocation52_spill]] %s7794_s20 }
  0x15   :  { %7838 = sst [smem:[#allocation53_spill]] %s7795_s21 }
  0x16   :  { %27 = vsyncpa [#allocation3], 0 }
  0x17   :  { %29 = vsyncpa [#allocation3 + $0x1], 0 }
  0x18   :  { %30 = vsyncpa [#allocation6], 0 }
  0x19   :  { %32 = vsyncpa [#allocation6 + $0x1], 0 }
  0x1a   :  { %33 = vsyncpa [#allocation9], 0 }
  0x1b   :  { %34 = vsyncpa [#allocation12], 0 }
  0x1c   :  { %35 = vsyncpa [#allocation15], 0 }
  0x1d   :  { %36 = vsyncpa [#allocation18], 0 }
  0x1e   :  { %37 = vsyncpa [#allocation4], 0 }
  0x1f   :  { %39 = vsyncpa [#allocation4 + $0x1], 0 }
  0x20   :  { %40 = vsyncpa [#allocation22], 0 }
  0x21   :  { %42 = vsyncpa [#allocation22 + $0x1], 0  ;;  %s6719_s2 = smov 0   ;;  %s6721_s25 = smov 0  }
  0x22   :  { %s6723_s26 = smov 0   ;;  %s6725_s27 = smov 0  }
  0x23 LB: > { %s6585_s3 = smov [#allocation7]   ;;  %s6740_s29 = sadd.s32 4294967295, %s6583_s27   ;;  %s6583_s27 = sphi %s6725_s27, %s7894_s27   ;;  %s6579_s26 = sphi %s6723_s26, %s7893_s26   ;;  %s6575_s25 = sphi %s6721_s25, %s7892_s25   ;;  %s6571_s2 = sphi %s6719_s2, %s7891_s2  }
  0x24   : > { %s547_s28 = sshll.u32 %s6585_s3, 4  ;;  %p4518_p0 = scmp.ge.s32.totalorder %s6583_s27, 1  ;;  %s6745_s28 = int_to_ptr.vmem [resolvable:$true] %s547_s28 }
  0x25   : > { %p7805_p1 = scmp.eq.s32.totalorder %s6740_s29, 0  ;;  %p535_p2 = scmp.lt.s32.totalorder %s6583_s27, 3 }
  0x26   : > { %s6586_s4 = smov [#allocation8]   ;;  %s7841_s1 = sld [smem:[#allocation35_spill]] }
  0x27   : > { %p6747_p3 = pnand %p4518_p0, %p535_p2  ;;  %s563_s30 = sshll.u32 %s6586_s4, 4  ;;  %s6760_s30 = int_to_ptr.vmem [resolvable:$true] %s563_s30 }
  0x29   : > { %s7839_s0 = scalar_select %p6747_p3, 1, 0 }
  0x2a   : > { %p5275_p5 = pneg %p6747_p3 }
  0x2c   : > { %p6756_p6 = pnand %p5275_p5, %p7805_p1  ;;  %s6149_s24 = scalar_lea.hbm %s7841_s1, 3072 }
  0x2d   : > { %p6150_p7 = scmp.ne.s32.totalorder %s7841_s1, %s6149_s24  ;;  %p6156_p11 = scmp.lt.u32.totalorder %s6149_s24, %s7841_s1 }
  0x2e   : > { %p6770_p8 = pneg %p6756_p6 }
  0x30   : > { %p6152_p9 = pnand %p6770_p8, %p6150_p7 }
  0x32   : > { %p6153_p10 = pneg %p6152_p9 }
  0x34   : > { %p6158_p12 = pnand %p6156_p11, %p6153_p10 }
  0x36   : > { %6161 = shalt.err (!%p6158_p12)
}
  0x37   : > { %s6162_s20 = scalar_lea.vmem %s6745_s28, 3072  ;;  %p6170_p5 = scmp.lt.s32.totalorder %s6745_s28, %s6745_s28 }
  0x38   : > { %p6163_p13 = scmp.ne.s32.totalorder %s6745_s28, %s6162_s20  ;;  %p6171_p4 = scmp.lt.s32.totalorder %s6162_s20, %s6162_s20 }
  0x3a   : > { %p6165_p0 = pnand %p6163_p13, %p6770_p8  ;;  %p6172_p7 = por %p6171_p4, %p6170_p5 }
  0x3c   : > { %p6166_p2 = pneg %p6165_p0 }
  0x3e   : > { %p6173_p9 = pnand %p6172_p7, %p6166_p2 }
  0x40   : > { %6176 = shalt.err (!%p6173_p9)
}
  0x41   : > { %s7802_s22 = smov 192   ;;  %s7803_s21 = smov 12  }
  0x42   : > { %5278 = dma.hbm_to_vmem [thread:$0]  (!%p6756_p6), %s7841_s1, 3072, %s6745_s28, [#allocation6], %s7802_s22, %s7802_s22, %s7803_s21  }
  0x43   : > { %s7843_s17 = sld [smem:[#allocation37_spill]] }
  0x49   : > { %s6177_s20 = scalar_lea.hbm %s7843_s17, 6144 }
  0x4a   : > { %p6178_p4 = scmp.ne.s32.totalorder %s7843_s17, %s6177_s20  ;;  %p6184_p12 = scmp.lt.u32.totalorder %s6177_s20, %s7843_s17 }
  0x4c   : > { %p6180_p10 = pnand %p6178_p4, %p6770_p8 }
  0x4e   : > { %p6181_p11 = pneg %p6180_p10 }
  0x50   : > { %p6186_p13 = pnand %p6184_p12, %p6181_p11 }
  0x52   : > { %6189 = shalt.err (!%p6186_p13)
}
  0x53   : > { %s6190_s28 = scalar_lea.vmem %s6760_s30, 6144  ;;  %p6198_p7 = scmp.lt.s32.totalorder %s6760_s30, %s6760_s30 }
  0x54   : > { %p6191_p0 = scmp.ne.s32.totalorder %s6760_s30, %s6190_s28  ;;  %p6199_p9 = scmp.lt.s32.totalorder %s6190_s28, %s6190_s28 }
  0x56   : > { %p6193_p2 = pnand %p6191_p0, %p6770_p8  ;;  %p6200_p4 = por %p6199_p9, %p6198_p7 }
  0x58   : > { %p6194_p5 = pneg %p6193_p2 }
  0x5a   : > { %p6201_p10 = pnand %p6200_p4, %p6194_p5 }
  0x5c   : > { %6204 = shalt.err (!%p6201_p10)
}
  0x5d   : > { %s7807_s13 = smov 128   ;;  %s7809_s9 = smov 8  }
  0x5e   : > { %5281 = dma.hbm_to_vmem [thread:$0]  (!%p6756_p6), %s7843_s17, 6144, %s6760_s30, [#allocation9], %s7807_s13, %s7807_s13, %s7809_s9  }
  0x5f   : > { %s6591_s23 = smov [#allocation11]   ;;  %s6592_s3 = smov [#allocation14]  }
  0x60   : > { %s595_s24 = sshll.u32 %s6591_s23, 4  ;;  %s627_s4 = sshll.u32 %s6592_s3, 4  ;;  %s596_s24 = int_to_ptr.vmem [resolvable:$true] %s595_s24  ;;  %s6820_s4 = int_to_ptr.vmem [resolvable:$true] %s627_s4 }
  0x61   : > { %s7844_s8 = sld [smem:[#allocation40_spill]] }
  0x67   : > { %s6205_s22 = scalar_lea.hbm %s7844_s8, 1024 }
  0x68   : > { %p6206_p11 = scmp.ne.s32.totalorder %s7844_s8, %s6205_s22  ;;  %p6212_p0 = scmp.lt.u32.totalorder %s6205_s22, %s7844_s8 }
  0x6a   : > { %p6208_p12 = pnand %p6206_p11, %p6770_p8 }
  0x6c   : > { %p6209_p13 = pneg %p6208_p12 }
  0x6e   : > { %p6214_p2 = pnand %p6212_p0, %p6209_p13 }
  0x70   : > { %6217 = shalt.err (!%p6214_p2)
}
  0x71   : > { %s6218_s15 = scalar_lea.vmem %s596_s24, 1024  ;;  %p6226_p4 = scmp.lt.s32.totalorder %s596_s24, %s596_s24 }
  0x72   : > { %p6219_p5 = scmp.ne.s32.totalorder %s596_s24, %s6218_s15  ;;  %p6227_p10 = scmp.lt.s32.totalorder %s6218_s15, %s6218_s15 }
  0x74   : > { %p6221_p7 = pnand %p6219_p5, %p6770_p8  ;;  %p6228_p1 = por %p6227_p10, %p6226_p4 }
  0x76   : > { %p6222_p9 = pneg %p6221_p7 }
  0x78   : > { %p6229_p3 = pnand %p6228_p1, %p6222_p9 }
  0x7a   : > { %6232 = shalt.err (!%p6229_p3)
}
  0x7b   : > { %s7811_s1 = smov 64   ;;  %s7813_s21 = smov 4  }
  0x7c   : > { %5287 = dma.hbm_to_vmem [thread:$0]  (!%p6756_p6), %s7844_s8, 1024, %s596_s24, [#allocation12], %s7811_s1, %s7811_s1, %s7813_s21  }
  0x7d   : > { %s7845_s12 = sld [smem:[#allocation44_spill]] }
  0x83   : > { %s6233_s28 = scalar_lea.hbm %s7845_s12, 1024 }
  0x84   : > { %p6234_p1 = scmp.ne.s32.totalorder %s7845_s12, %s6233_s28  ;;  %p6240_p12 = scmp.lt.u32.totalorder %s6233_s28, %s7845_s12 }
  0x86   : > { %p6236_p3 = pnand %p6234_p1, %p6770_p8 }
  0x88   : > { %p6237_p11 = pneg %p6236_p3 }
  0x8a   : > { %p6242_p13 = pnand %p6240_p12, %p6237_p11 }
  0x8c   : > { %6245 = shalt.err (!%p6242_p13)
}
  0x8d   : > { %s6246_s24 = scalar_lea.vmem %s6820_s4, 1024  ;;  %p6254_p7 = scmp.lt.s32.totalorder %s6820_s4, %s6820_s4 }
  0x8e   : > { %p6247_p0 = scmp.ne.s32.totalorder %s6820_s4, %s6246_s24  ;;  %p6255_p9 = scmp.lt.s32.totalorder %s6246_s24, %s6246_s24 }
  0x90   : > { %p6249_p2 = pnand %p6247_p0, %p6770_p8  ;;  %p6256_p4 = por %p6255_p9, %p6254_p7 }
  0x92   : > { %p6250_p5 = pneg %p6249_p2 }
  0x94   : > { %p6257_p10 = pnand %p6256_p4, %p6250_p5 }
  0x96   : > { %6260 = shalt.err (!%p6257_p10)
}
  0x97   : > { %5293 = dma.hbm_to_vmem [thread:$0]  (!%p6756_p6), %s7845_s12, 1024, %s6820_s4, [#allocation15], %s7811_s1, %s7811_s1, %s7813_s21  }
  0x98   : > { %s6595_s23 = smov [#allocation17]   ;;  %s6596_s20 = smov [#allocation10]  }
  0x99   : > { %s659_s3 = sshll.u32 %s6595_s23, 4  ;;  %s579_s28 = sshll.u32 %s6596_s20, 4  ;;  %s660_s3 = int_to_ptr.vmem [resolvable:$true] %s659_s3  ;;  %s6869_s28 = int_to_ptr.vmem [resolvable:$true] %s579_s28 }
  0x9a   : > { %s7846_s16 = sld [smem:[#allocation48_spill]] }
  0xa0   : > { %s6261_s15 = scalar_lea.hbm %s7846_s16, 6144 }
  0xa1   : > { %p6262_p1 = scmp.ne.s32.totalorder %s7846_s16, %s6261_s15  ;;  %p6268_p12 = scmp.lt.u32.totalorder %s6261_s15, %s7846_s16 }
  0xa3   : > { %p6264_p3 = pnand %p6262_p1, %p6770_p8 }
  0xa5   : > { %p6265_p11 = pneg %p6264_p3 }
  0xa7   : > { %p6270_p13 = pnand %p6268_p12, %p6265_p11 }
  0xa9   : > { %6273 = shalt.err (!%p6270_p13)
}
  0xaa   : > { %s6274_s22 = scalar_lea.vmem %s660_s3, 6144  ;;  %p6282_p7 = scmp.lt.s32.totalorder %s660_s3, %s660_s3 }
  0xab   : > { %p6275_p0 = scmp.ne.s32.totalorder %s660_s3, %s6274_s22  ;;  %p6283_p9 = scmp.lt.s32.totalorder %s6274_s22, %s6274_s22 }
  0xad   : > { %p6277_p2 = pnand %p6275_p0, %p6770_p8  ;;  %p6284_p4 = por %p6283_p9, %p6282_p7 }
  0xaf   : > { %p6278_p5 = pneg %p6277_p2 }
  0xb1   : > { %p6285_p10 = pnand %p6284_p4, %p6278_p5 }
  0xb3   : > { %6288 = shalt.err (!%p6285_p10)
}
  0xb4   : > { %s7847_s9 = smov 12   ;;  %s7848_s23 = smov 192  }
  0xb5   : > { %5299 = dma.hbm_to_vmem [thread:$0]  (!%p6756_p6), %s7846_s16, 6144, %s660_s3, [#allocation18], %s7848_s23, %s7848_s23, %s7847_s9  }
  0xb6   : > { %s7849_s6 = sld [smem:[#allocation39_spill]] }
  0xbc   : > { %s6289_s24 = scalar_lea.hbm %s7849_s6, 2048 }
  0xbd   : > { %p6290_p1 = scmp.ne.s32.totalorder %s7849_s6, %s6289_s24  ;;  %p6296_p12 = scmp.lt.u32.totalorder %s6289_s24, %s7849_s6 }
  0xbf   : > { %p6292_p3 = pnand %p6290_p1, %p6770_p8 }
  0xc1   : > { %p6293_p11 = pneg %p6292_p3 }
  0xc3   : > { %p6298_p13 = pnand %p6296_p12, %p6293_p11 }
  0xc5   : > { %6301 = shalt.err (!%p6298_p13)
}
  0xc6   : > { %s6302_s3 = scalar_lea.vmem %s6869_s28, 2048  ;;  %p6310_p7 = scmp.lt.s32.totalorder %s6869_s28, %s6869_s28 }
  0xc7   : > { %p6303_p0 = scmp.ne.s32.totalorder %s6869_s28, %s6302_s3  ;;  %p6311_p9 = scmp.lt.s32.totalorder %s6302_s3, %s6302_s3 }
  0xc9   : > { %p6305_p2 = pnand %p6303_p0, %p6770_p8  ;;  %p6312_p4 = por %p6311_p9, %p6310_p7 }
  0xcb   : > { %p6306_p5 = pneg %p6305_p2 }
  0xcd   : > { %p6313_p10 = pnand %p6312_p4, %p6306_p5 }
  0xcf   : > { %6316 = shalt.err (!%p6313_p10)
}
  0xd0   : > { %s7850_s1 = smov 64   ;;  %s6597_s20 = smov [#allocation13]  }
  0xd1   : > { %5284 = dma.hbm_to_vmem [thread:$0]  (!%p6756_p6), %s7849_s6, 2048, %s6869_s28, [#allocation9], %s7850_s1, %s7850_s1, %s7813_s21  }
  0xd2   : > { %s611_s11 = sshll.u32 %s6597_s20, 4  ;;  %s6598_s30 = smov [#allocation16]   ;;  %s612_s11 = int_to_ptr.vmem [resolvable:$true] %s611_s11 }
  0xd3   : > { %s643_s15 = sshll.u32 %s6598_s30, 4  ;;  %s7851_s10 = sld [smem:[#allocation42_spill]]  ;;  %s6918_s15 = int_to_ptr.vmem [resolvable:$true] %s643_s15 }
  0xd9   : > { %s6317_s4 = scalar_lea.hbm %s7851_s10, 2048 }
  0xda   : > { %p6318_p1 = scmp.ne.s32.totalorder %s7851_s10, %s6317_s4  ;;  %p6324_p12 = scmp.lt.u32.totalorder %s6317_s4, %s7851_s10 }
  0xdc   : > { %p6320_p3 = pnand %p6318_p1, %p6770_p8 }
  0xde   : > { %p6321_p11 = pneg %p6320_p3 }
  0xe0   : > { %p6326_p13 = pnand %p6324_p12, %p6321_p11 }
  0xe2   : > { %6329 = shalt.err (!%p6326_p13)
}
  0xe3   : > { %s6330_s23 = scalar_lea.vmem %s612_s11, 2048  ;;  %p6338_p7 = scmp.lt.s32.totalorder %s612_s11, %s612_s11 }
  0xe4   : > { %p6331_p0 = scmp.ne.s32.totalorder %s612_s11, %s6330_s23  ;;  %p6339_p9 = scmp.lt.s32.totalorder %s6330_s23, %s6330_s23 }
  0xe6   : > { %p6333_p2 = pnand %p6331_p0, %p6770_p8  ;;  %p6340_p4 = por %p6339_p9, %p6338_p7 }
  0xe8   : > { %p6334_p5 = pneg %p6333_p2 }
  0xea   : > { %p6341_p10 = pnand %p6340_p4, %p6334_p5 }
  0xec   : > { %6344 = shalt.err (!%p6341_p10)
}
  0xed   : > { %s7852_s20 = smov 8   ;;  %s7853_s30 = smov 128  }
  0xee   : > { %5290 = dma.hbm_to_vmem [thread:$0]  (!%p6756_p6), %s7851_s10, 2048, %s612_s11, [#allocation12], %s7853_s30, %s7853_s30, %s7852_s20  }
  0xef   : > { %s7854_s14 = sld [smem:[#allocation46_spill]] }
  0xf5   : > { %s6345_s3 = scalar_lea.hbm %s7854_s14, 2048 }
  0xf6   : > { %p6346_p1 = scmp.ne.s32.totalorder %s7854_s14, %s6345_s3  ;;  %p6352_p12 = scmp.lt.u32.totalorder %s6345_s3, %s7854_s14 }
  0xf8   : > { %p6348_p3 = pnand %p6346_p1, %p6770_p8 }
  0xfa   : > { %p6349_p11 = pneg %p6348_p3 }
  0xfc   : > { %p6354_p13 = pnand %p6352_p12, %p6349_p11 }
  0xfe   : > { %6357 = shalt.err (!%p6354_p13)
}
  0xff   : > { %s6358_s11 = scalar_lea.vmem %s6918_s15, 2048  ;;  %p6366_p7 = scmp.lt.s32.totalorder %s6918_s15, %s6918_s15 }
 0x100   : > { %p6359_p0 = scmp.ne.s32.totalorder %s6918_s15, %s6358_s11  ;;  %p6367_p9 = scmp.lt.s32.totalorder %s6358_s11, %s6358_s11 }
 0x102   : > { %p6361_p2 = pnand %p6359_p0, %p6770_p8  ;;  %p6368_p4 = por %p6367_p9, %p6366_p7 }
 0x104   : > { %p6362_p5 = pneg %p6361_p2 }
 0x106   : > { %p6369_p10 = pnand %p6368_p4, %p6362_p5 }
 0x108   : > { %6372 = shalt.err (!%p6369_p10)
}
 0x109   : > { %5296 = dma.hbm_to_vmem [thread:$0]  (!%p6756_p6), %s7854_s14, 2048, %s6918_s15, [#allocation15], %s7853_s30, %s7853_s30, %s7852_s20  }
 0x10a   : > { %s6599_s13 = smov [#allocation19]   ;;  %s7855_s18 = sld [smem:[#allocation50_spill]] }
 0x10b   : > { %s675_s4 = sshll.u32 %s6599_s13, 4  ;;  %s676_s4 = int_to_ptr.vmem [resolvable:$true] %s675_s4 }
 0x110   : > { %s6373_s9 = scalar_lea.hbm %s7855_s18, 3072 }
 0x111   : > { %p6374_p1 = scmp.ne.s32.totalorder %s7855_s18, %s6373_s9  ;;  %p6380_p12 = scmp.lt.u32.totalorder %s6373_s9, %s7855_s18 }
 0x113   : > { %p6376_p3 = pnand %p6374_p1, %p6770_p8 }
 0x115   : > { %p6377_p11 = pneg %p6376_p3 }
 0x117   : > { %p6382_p13 = pnand %p6380_p12, %p6377_p11 }
 0x119   : > { %6385 = shalt.err (!%p6382_p13)
}
 0x11a   : > { %s6386_s15 = scalar_lea.vmem %s676_s4, 3072  ;;  %p6394_p7 = scmp.lt.s32.totalorder %s676_s4, %s676_s4 }
 0x11b   : > { %p6387_p0 = scmp.ne.s32.totalorder %s676_s4, %s6386_s15  ;;  %p6395_p9 = scmp.lt.s32.totalorder %s6386_s15, %s6386_s15 }
 0x11d   : > { %p6389_p2 = pnand %p6387_p0, %p6770_p8  ;;  %p6396_p4 = por %p6395_p9, %p6394_p7 }
 0x11f   : > { %p6390_p5 = pneg %p6389_p2 }
 0x121   : > { %p6397_p10 = pnand %p6396_p4, %p6390_p5 }
 0x123   : > { %6400 = shalt.err (!%p6397_p10)
}
 0x124   : > { %s7856_s21 = smov 4   ;;  %s4517_s19 = sadd.s32 4294967294, %s6583_s27  }
 0x125   : > { %5302 = dma.hbm_to_vmem [thread:$0]  (!%p6756_p6), %s7855_s18, 3072, %s676_s4, [#allocation18], %s7850_s1, %s7850_s1, %s7856_s21  }
 0x126   : > { %s6990_s5 = sadd.s32 1, %s6583_s27   ;;  %s55_s13 = sadd.s32 1, %s6579_s26 }
 0x127   : > { %s52_s22 = ssub.s32 %s6583_s27, %s6990_s5  ;;  %p62_p8 = scmp.ne.s32.totalorder %s6579_s26, %s6575_s25 }
 0x128   : > { %p53_p1 = scmp.eq.s32.totalorder %s52_s22, 0  ;;  %p63_p3 = scmp.eq.s32.totalorder %s6583_s27, 0 }
 0x129   : > { %p68_p11 = scmp.ne.s32.totalorder %s6575_s25, %s6571_s2  ;;  %p496_p12 = scmp.eq.s32.totalorder %s6740_s29, 1 }
 0x12a   : > { %s7002_s3 = scalar_select %p53_p1, %s6579_s26, %s55_s13  }
 0x12b   : > { %p64_p13 = por %p63_p3, %p62_p8  ;;  %p7858_p0 = scmp.eq.s32.totalorder %s6740_s29, 0 }
 0x12c   : > { %7857 = sst [smem:[#allocation32_spill]] %s7002_s3  ;;  %p7010_p6 = por %p496_p12, %p62_p8 }
 0x12d   : > { %p7006_p2 = por %p7858_p0, %p68_p11  ;;  %p502_p5 = scmp.eq.s32.totalorder %s4517_s19, 1 }
 0x12e   : > { %s7860_s9 = scalar_select %p7010_p6, 1, 0 }
 0x12f   : > { %p5326_p7 = scmp.lt.s32.totalorder %s6583_s27, 2  ;;  %s7016_s28 = sand.u32 1, %s6579_s26  }
 0x130   : > { %p7018_p9 = por %p502_p5, %p68_p11  ;;  %s4529_s11 = sshll.u32 %s7016_s28, 6 }
 0x131   : > { %s4778_s15 = sshll.u32 %s6583_s27, 10  ;;  %s7862_s13 = sld [smem:[#allocation33_spill]] }
 0x132   : > { %s7861_s23 = scalar_select %p7018_p9, 1, 0 }
 0x133   : > { %s696_s19 = scalar_lea.vmem [#allocation2], %s4529_s11  ;;  %p7029_p4 = pnand %p5326_p7, %p64_p13 }
 0x134   : > { %s703_s8 = sshll.u32 %s696_s19, 4  ;;  %s693_s14 = scalar_lea.sflag [#allocation3], %s7016_s28  ;;  %s7033_s8 = int_to_ptr.vmem [resolvable:$true] %s703_s8 }
 0x135   : > { %p6403_p8 = pneg %p7029_p4 }
 0x137   : > { %s7027_s22 = scalar_lea.hbm %s7862_s13, %s4778_s15  ;;  %s6406_s6 = scalar_lea.hbm %s7862_s13, 2048 }
 0x138   : > { %s6401_s16 = scalar_lea.hbm %s7027_s22, 1024  ;;  %p6407_p11 = scmp.lt.u32.totalorder %s7027_s22, %s7862_s13 }
 0x139   : > { %p6402_p10 = scmp.ne.s32.totalorder %s7027_s22, %s6401_s16  ;;  %p6408_p12 = scmp.lt.u32.totalorder %s6406_s6, %s6401_s16 }
 0x13a   : > { %p6410_p0 = scmp.lt.u32.totalorder %s6401_s16, %s7027_s22 }
 0x13b   : > { %p6404_p1 = pnand %p6403_p8, %p6402_p10  ;;  %p6409_p13 = por %p6408_p12, %p6407_p11 }
 0x13d   : > { %p6405_p3 = pneg %p6404_p1  ;;  %p6411_p5 = por %p6410_p0, %p6409_p13 }
 0x13f   : > { %p6412_p7 = pnand %p6411_p5, %p6405_p3 }
 0x141   : > { %6415 = shalt.err (!%p6412_p7)
}
 0x142   : > { %s6416_s12 = scalar_lea.vmem %s7033_s8, 1024  ;;  %s6600_s11 = smov [#allocation2]  }
 0x143   : > { %p6417_p10 = scmp.ne.s32.totalorder %s7033_s8, %s6416_s12  ;;  %s6421_s15 = sshll.u32 %s6600_s11, 4  ;;  %s6422_s15 = int_to_ptr.vmem [resolvable:$false] %s6421_s15 }
 0x144   : > { %s6423_s24 = scalar_lea.vmem %s6422_s15, 2048  ;;  %p6424_p6 = scmp.lt.s32.totalorder %s7033_s8, %s6422_s15 }
 0x145   : > { %p6419_p1 = pnand %p6417_p10, %p6403_p8  ;;  %p6425_p11 = scmp.lt.s32.totalorder %s6423_s24, %s6416_s12 }
 0x147   : > { %p6420_p9 = pneg %p6419_p1  ;;  %p6426_p12 = por %p6425_p11, %p6424_p6 }
 0x149   : > { %p6427_p13 = pnand %p6426_p12, %p6420_p9 }
 0x14b   : > { %6430 = shalt.err (!%p6427_p13)
}
 0x14c   : > { %5306 = dma.hbm_to_vmem [thread:$0]  (!%p7029_p4), %s7027_s22, 1024, %s7033_s8, %s693_s14, %s7850_s1, %s7850_s1, %s7856_s21  }
 0x14d   : > { %s4532_s16 = sshll.u32 %s7016_s28, 7  ;;  %s4779_s6 = sshll.u32 %s6583_s27, 11 }
 0x14e   : > { %s7864_s11 = sld [smem:[#allocation34_spill]]  ;;  %s717_s24 = scalar_lea.vmem [#allocation5], %s4532_s16 }
 0x14f   : > { %s724_s13 = sshll.u32 %s717_s24, 4  ;;  %s7865_s17 = sand.u32 1, %s6583_s27   ;;  %s7074_s13 = int_to_ptr.vmem [resolvable:$true] %s724_s13 }
 0x150   : > { %s7078_s18 = scalar_lea.sflag [#allocation6], %s7865_s17 }
 0x154   : > { %s7072_s15 = scalar_lea.hbm %s7864_s11, %s4779_s6  ;;  %s6436_s1 = scalar_lea.hbm %s7864_s11, 4096 }
 0x155   : > { %s6431_s3 = scalar_lea.hbm %s7072_s15, 2048  ;;  %p6437_p0 = scmp.lt.u32.totalorder %s7072_s15, %s7864_s11 }
 0x156   : > { %p6432_p6 = scmp.ne.s32.totalorder %s7072_s15, %s6431_s3  ;;  %p6438_p5 = scmp.lt.u32.totalorder %s6436_s1, %s6431_s3 }
 0x157   : > { %p6440_p10 = scmp.lt.u32.totalorder %s6431_s3, %s7072_s15 }
 0x158   : > { %p6434_p9 = pnand %p6432_p6, %p6403_p8  ;;  %p6439_p7 = por %p6438_p5, %p6437_p0 }
 0x15a   : > { %p6435_p3 = pneg %p6434_p9  ;;  %p6441_p1 = por %p6440_p10, %p6439_p7 }
 0x15c   : > { %p6442_p11 = pnand %p6441_p1, %p6435_p3 }
 0x15e   : > { %6445 = shalt.err (!%p6442_p11)
}
 0x15f   : > { %s6446_s17 = scalar_lea.vmem %s7074_s13, 2048  ;;  %s6601_s22 = smov [#allocation5]  }
 0x160   : > { %p6447_p12 = scmp.ne.s32.totalorder %s7074_s13, %s6446_s17  ;;  %s6451_s16 = sshll.u32 %s6601_s22, 4  ;;  %s6452_s16 = int_to_ptr.vmem [resolvable:$false] %s6451_s16 }
 0x161   : > { %s6453_s6 = scalar_lea.vmem %s6452_s16, 4096  ;;  %p6454_p9 = scmp.lt.s32.totalorder %s7074_s13, %s6452_s16 }
 0x162   : > { %p6449_p13 = pnand %p6447_p12, %p6403_p8  ;;  %p6455_p0 = scmp.lt.s32.totalorder %s6453_s6, %s6446_s17 }
 0x164   : > { %p6450_p6 = pneg %p6449_p13  ;;  %p6456_p5 = por %p6455_p0, %p6454_p9 }
 0x166   : > { %p6457_p7 = pnand %p6456_p5, %p6450_p6 }
 0x168   : > { %6460 = shalt.err (!%p6457_p7)
}
 0x169   : > { %5309 = dma.hbm_to_vmem [thread:$0]  (!%p7029_p4), %s7072_s15, 2048, %s7074_s13, %s7078_s18, %s7853_s30, %s7853_s30, %s7852_s20  }
 0x16a   : > { %p7866_p8 = scmp.ne.s32.totalorder %s7839_s0, 0 }
 0x16b   : > { %s7110_s3 = sand.u32 (!%p7866_p8), 1, %s6575_s25  }
 0x16c   : > { %736 = sbr.rel (%p7866_p8) target bundleno = 2665 (0xa69), region = 100  ;;  %s4536_s12 = sshll.u32 (!%p7866_p8), %s7110_s3, 6 }
 0x16d   : > { %s739_s19 = scalar_lea.sflag (!%p7866_p8), [#allocation3], %s7110_s3  ;;  %s7114_s24 = scalar_lea.vmem (!%p7866_p8), [#allocation2], %s4536_s12 }
 0x173   : > { %6534 = dma.done.wait (%p7006_p2), %s739_s19, 1024  }
 0x174   : > { %6536 = vsyncadd (%p7006_p2), %s739_s19, 4294966272  ;;  %s747_s10 = sand.u32 1, %s6740_s29   ;;  %s4537_s18 = sshll.u32 %s7110_s3, 7 }
 0x175   : > { %s748_s0 = scalar_lea.sflag [#allocation6], %s747_s10  ;;  %s7124_s20 = scalar_lea.vmem [#allocation5], %s4537_s18 }
 0x176   : > { %6538 = dma.done.wait (%p7006_p2), %s748_s0, 2048  }
 0x177   : > { %6540 = vsyncadd (%p7006_p2), %s748_s0, 4294965248  ;;  %p7867_p4 = scmp.eq.s32.totalorder %s6740_s29, 0 }
 0x179   : > { %6542 = dma.done.wait (%p7867_p4), [#allocation6], 3072   ;;  %p7868_p3 = pmov %p7867_p4 }
 0x17b   : > { %6544 = vsyncadd (%p7868_p3), [#allocation6], 4294964224  ;;  %p7869_p10 = pmov %p7868_p3 }
 0x17c   : > { %p7870_p1 = pmov %p7868_p3 }
 0x17d   : > { %6546 = dma.done.wait (%p7869_p10), [#allocation9], 8192  }
 0x17e   : > { %6548 = vsyncadd (%p7870_p1), [#allocation9], 4294959104  ;;  %p7871_p11 = pmov %p7870_p1 }
 0x17f   : > { %p7872_p12 = pmov %p7870_p1 }
 0x180   : > { %6550 = dma.done.wait (%p7871_p11), [#allocation12], 3072  }
 0x181   : > { %6552 = vsyncadd (%p7872_p12), [#allocation12], 4294964224  ;;  %p7873_p2 = pmov %p7870_p1 }
 0x182   : > { %p7874_p13 = pmov %p7870_p1 }
 0x183   : > { %6554 = dma.done.wait (%p7873_p2), [#allocation15], 3072  }
 0x184   : > { %6556 = vsyncadd (%p7874_p13), [#allocation15], 4294964224  ;;  %p7875_p6 = pmov %p7870_p1 }
 0x185   : > { %p7876_p9 = pmov %p7870_p1 }
 0x186   : > { %6558 = dma.done.wait (%p7875_p6), [#allocation18], 9216  }
 0x187   : > { %6560 = vsyncadd (%p7876_p9), [#allocation18], 4294958080  ;;  %v6602_v0 = vmov 0   ;;  %v5389_v1 = vld [vmem:[#allocation7 + $0x4] ss:$12 sps:$4 sm:$0xff]   ;;  %v5414_v30 = vld [vmem:[%s7114_s24 + $0x8] sm:$0xff]  }
 0x188   : > { %1134 = vmatprep.mubr.bf16.mxu0 %v6602_v0  ;;  %v5391_v2 = vld [vmem:[#allocation7] ss:$12 sps:$4 sm:$0xff]   ;;  %1102 = vmatprep.subr.bf16.mxu0 %v5389_v1  ;;  %v5392_v3 = vld [vmem:[#allocation7 + $0x1c] ss:$12 sps:$4 sm:$0xff]   ;;  %v5394_v4 = vld [vmem:[#allocation7 + $0x18] ss:$12 sps:$4 sm:$0xff]  }
 0x189   : > { %1103 = vmatpush1.bf16.msra.mxu0 %v5391_v2  ;;  %v5395_v5 = vld [vmem:[#allocation7 + $0x34] ss:$12 sps:$4 sm:$0xff]   ;;  %v5397_v6 = vld [vmem:[#allocation7 + $0x30] ss:$12 sps:$4 sm:$0xff]   ;;  %v5398_v7 = vld [vmem:[#allocation7 + $0x4c] ss:$12 sps:$4 sm:$0xff]  }
 0x18a   : > { %1104 = vmatprep.subr.bf16.mxu0 %v5392_v3  ;;  %v5400_v8 = vld [vmem:[#allocation7 + $0x48] ss:$12 sps:$4 sm:$0xff]   ;;  %v5413_v9 = vld [vmem:[%s7114_s24] sm:$0xff]   ;;  %v5409_v18 = vld [vmem:[#allocation7 + $0x90] ss:$12 sps:$4 sm:$0xff]   ;;  %v911_v3 = vlaneseq  ;;  %s7877_s13 = sld [smem:[#allocation36_spill]] }
 0x18b   : > { %v5401_v10 = vld [vmem:[#allocation7 + $0x64] ss:$12 sps:$4 sm:$0xff]   ;;  %5055 = vmatprep.mubr.bf16.mxu1 %v5413_v9  ;;  %v5403_v11 = vld [vmem:[#allocation7 + $0x60] ss:$12 sps:$4 sm:$0xff]   ;;  %v5417_v12 = vld [vmem:[#allocation7 + $0x8] ss:$12 sps:$4 sm:$0xff]  }
 0x18c   : > { %v5404_v13 = vld [vmem:[#allocation7 + $0x7c] ss:$12 sps:$4 sm:$0xff]   ;;  %5039 = vmatprep.subr.bf16.mxu1 %v5417_v12  ;;  %v5419_v14 = vld [vmem:[#allocation7 + $0x20] ss:$12 sps:$4 sm:$0xff]   ;;  %v5406_v15 = vld [vmem:[#allocation7 + $0x78] ss:$12 sps:$4 sm:$0xff]  }
 0x18d   : > { %1105 = vmatpush1.bf16.msra.mxu0 %v5394_v4  ;;  %5040 = vmatpush3.bf16.msra.mxu1 %v5417_v12  ;;  %v5420_v16 = vld [vmem:[#allocation7 + $0x38] ss:$12 sps:$4 sm:$0xff]   ;;  %v5407_v17 = vld [vmem:[#allocation7 + $0x94] ss:$12 sps:$4 sm:$0xff]   ;;  %v5422_v19 = vld [vmem:[#allocation7 + $0x50] ss:$12 sps:$4 sm:$0xff]  }
 0x18e   : > { %1106 = vmatprep.subr.bf16.mxu0 %v5395_v5  ;;  %5041 = vmatprep.subr.bf16.mxu1 %v5419_v14  ;;  %v5410_v20 = vld [vmem:[#allocation7 + $0xac] ss:$12 sps:$4 sm:$0xff]   ;;  %v5412_v21 = vld [vmem:[#allocation7 + $0xa8] ss:$12 sps:$4 sm:$0xff]   ;;  %v5428_v31 = vld [vmem:[#allocation7 + $0xb0] ss:$12 sps:$4 sm:$0xff]  }
 0x18f   : > { %v5423_v22 = vld [vmem:[#allocation7 + $0x68] ss:$12 sps:$4 sm:$0xff]   ;;  %v5431_v23 = vld [vmem:[#allocation8 + $0x4] ss:$8 sps:$4 sm:$0xff]   ;;  %v5432_v28 = vld [vmem:[#allocation8 + $0x10] ss:$8 sps:$4 sm:$0xff]  }
 0x190   : > { %v5425_v24 = vld [vmem:[#allocation7 + $0x80] ss:$12 sps:$4 sm:$0xff]   ;;  %v5434_v26 = vld [vmem:[#allocation8 + $0x14] ss:$8 sps:$4 sm:$0xff]   ;;  %v5426_v27 = vld [vmem:[#allocation7 + $0x98] ss:$12 sps:$4 sm:$0xff]  }
 0x191   : > { %1107 = vmatpush1.bf16.msra.mxu0 %v5397_v6  ;;  %5042 = vmatpush3.bf16.msra.mxu1 %v5419_v14  ;;  %v5429_v25 = vld [vmem:[#allocation8] ss:$8 sps:$4 sm:$0xff]   ;;  %v5437_v29 = vld [vmem:[#allocation8 + $0x24] ss:$8 sps:$4 sm:$0xff]   ;;  %v5440_v33 = vld [vmem:[#allocation8 + $0x34] ss:$8 sps:$4 sm:$0xff]  }
 0x192   : > { %1108 = vmatprep.subr.bf16.mxu0 %v5398_v7  ;;  %5043 = vmatprep.subr.bf16.mxu1 %v5420_v16  ;;  %v5435_v32 = vld [vmem:[#allocation8 + $0x20] ss:$8 sps:$4 sm:$0xff]   ;;  %v5438_v34 = vld [vmem:[#allocation8 + $0x30] ss:$8 sps:$4 sm:$0xff]   ;;  %v5443_v35 = vld [vmem:[#allocation8 + $0x44] ss:$8 sps:$4 sm:$0xff]  }
 0x193   : > { %v5415_v36 = vld [vmem:[%s7114_s24 + $0x10] sm:$0xff]   ;;  %v5441_v37 = vld [vmem:[#allocation8 + $0x40] ss:$8 sps:$4 sm:$0xff]   ;;  %v5449_v40 = vld [vmem:[#allocation8 + $0x64] ss:$8 sps:$4 sm:$0xff]   ;;  %v7166_v4 = vshrl.u32 %v911_v3, 7 }
 0x194   : > { %v5446_v38 = vld [vmem:[#allocation8 + $0x54] ss:$8 sps:$4 sm:$0xff]   ;;  %v5444_v39 = vld [vmem:[#allocation8 + $0x50] ss:$8 sps:$4 sm:$0xff]   ;;  %v5418_v42 = vld [vmem:[%s7114_s24 + $0x20] sm:$0xff]   ;;  %s7878_s14 = sld [smem:[#allocation38_spill]] }
 0x195   : > { %1109 = vmatpush1.bf16.msra.mxu0 %v5400_v8  ;;  %5044 = vmatpush3.bf16.msra.mxu1 %v5420_v16  ;;  %v5416_v41 = vld [vmem:[%s7114_s24 + $0x18] sm:$0xff]   ;;  %v5447_v43 = vld [vmem:[#allocation8 + $0x60] ss:$8 sps:$4 sm:$0xff]   ;;  %v5455_v46 = vld [vmem:[#allocation8 + $0x84] ss:$8 sps:$4 sm:$0xff]   ;;  %v7169_v5 = vsub.s32 0, %v7166_v4 }
 0x196   : > { %1110 = vmatprep.subr.bf16.mxu0 %v5401_v10  ;;  %5045 = vmatprep.subr.bf16.mxu1 %v5422_v19  ;;  %v5452_v44 = vld [vmem:[#allocation8 + $0x74] ss:$8 sps:$4 sm:$0xff]   ;;  %v5450_v45 = vld [vmem:[#allocation8 + $0x70] ss:$8 sps:$4 sm:$0xff]   ;;  %v5421_v47 = vld [vmem:[%s7114_s24 + $0x28] sm:$0xff]   ;;  %v7175_v7 = vsub.s32 1, %v7166_v4 }
 0x197   : > { %v5424_v48 = vld [vmem:[%s7114_s24 + $0x30] sm:$0xff]   ;;  %v5453_v49 = vld [vmem:[#allocation8 + $0x80] ss:$8 sps:$4 sm:$0xff]   ;;  %v5461_v52 = vld [vmem:[#allocation8 + $0xa4] ss:$8 sps:$4 sm:$0xff]   ;;  %s7879_s22 = sld [smem:[#allocation41_spill]] }
 0x198   : > { %v5458_v50 = vld [vmem:[#allocation8 + $0x94] ss:$8 sps:$4 sm:$0xff]   ;;  %v5456_v51 = vld [vmem:[#allocation8 + $0x90] ss:$8 sps:$4 sm:$0xff]   ;;  %v5459_v54 = vld [vmem:[#allocation8 + $0xa0] ss:$8 sps:$4 sm:$0xff]  }
 0x199   : > { %1111 = vmatpush1.bf16.msra.mxu0 %v5403_v11  ;;  %5046 = vmatpush3.bf16.msra.mxu1 %v5422_v19  ;;  %v5427_v53 = vld [vmem:[%s7114_s24 + $0x38] sm:$0xff]   ;;  %v5467_v57 = vld [vmem:[#allocation8 + $0xc4] ss:$8 sps:$4 sm:$0xff]   ;;  %v5465_v58 = vld [vmem:[#allocation8 + $0xc0] ss:$8 sps:$4 sm:$0xff]   ;;  %v921_v19 = vsub.s32 2, %v7166_v4 }
 0x19a   : > { %1112 = vmatprep.subr.bf16.mxu0 %v5404_v13  ;;  %5047 = vmatprep.subr.bf16.mxu1 %v5423_v22  ;;  %v5464_v55 = vld [vmem:[#allocation8 + $0xb4] ss:$8 sps:$4 sm:$0xff]   ;;  %v5462_v56 = vld [vmem:[#allocation8 + $0xb0] ss:$8 sps:$4 sm:$0xff]   ;;  %v5473_v61 = vld [vmem:[#allocation8 + $0xe4] ss:$8 sps:$4 sm:$0xff]  }
 0x19b   : > { %v5468_v59 = vld [vmem:[#allocation8 + $0xd0] ss:$8 sps:$4 sm:$0xff]   ;;  %v5470_v60 = vld [vmem:[#allocation8 + $0xd4] ss:$8 sps:$4 sm:$0xff]   ;;  %v5471_v62 = vld [vmem:[#allocation8 + $0xe0] ss:$8 sps:$4 sm:$0xff]  }
 0x19c   : > { %v5474_v63 = vld [vmem:[#allocation8 + $0xf0] ss:$8 sps:$4 sm:$0xff]   ;;  %v5476_v1 = vld [vmem:[#allocation8 + $0xf4] ss:$8 sps:$4 sm:$0xff]   ;;  %v5479_v2 = vld [vmem:[#allocation8 + $0x104] ss:$8 sps:$4 sm:$0xff]  }
 0x19d   : > { %1113 = vmatpush1.bf16.msra.mxu0 %v5406_v15  ;;  %5048 = vmatpush3.bf16.msra.mxu1 %v5423_v22  ;;  %v909_v6 = vld [vmem:[%s7877_s13] sm:$0x7]  ;;  %s7880_s12 = sld [smem:[#allocation43_spill]]  ;;  %s4548_s19 = sshll.u32 %s7110_s3, 8 }
 0x19e   : > { %1114 = vmatprep.subr.bf16.mxu0 %v5407_v17  ;;  %5049 = vmatprep.subr.bf16.mxu1 %v5425_v24  ;;  %v7178_v8 = vrot.slane %v909_v6, %v7169_v5  ;;  %s7399_s24 = scalar_lea.vmem [#allocation21], %s4548_s19  ;;  %s7882_s13 = sld [smem:[#allocation47_spill]] }
 0x19f   : > { %s4782_s1 = sshll.u32 %s6740_s29, 12  ;;  %s4304_s21 = sshll.u32 %s7399_s24, 4  ;;  %s7656_s21 = int_to_ptr.vmem [resolvable:$true] %s4304_s21 }
 0x1a0   : > { %s4274_s6 = scalar_lea.sflag [#allocation22], %s7110_s3  ;;  %p7885_p5 = scmp.ne.s32.totalorder %s7860_s9, 0 }
 0x1a1   : > { %1115 = vmatpush1.bf16.msra.mxu0 %v5409_v18  ;;  %5050 = vmatpush3.bf16.msra.mxu1 %v5425_v24  ;;  %s6603_s19 = smov [#allocation21]  }
 0x1a2   : > { %1116 = vmatprep.subr.bf16.mxu0 %v5410_v20  ;;  %5051 = vmatprep.subr.bf16.mxu1 %v5426_v27  ;;  %s6465_s10 = sshll.u32 %s6603_s19, 4  ;;  %s6466_s10 = int_to_ptr.vmem [resolvable:$false] %s6465_s10 }
 0x1a3   : > { %p6468_p4 = scmp.lt.s32.totalorder %s7656_s21, %s6466_s10 }
 0x1a5   : > { %1117 = vmatpush1.bf16.msra.mxu0 %v5412_v21  ;;  %5052 = vmatpush3.bf16.msra.mxu1 %v5426_v27  ;;  %v7194_v27 = vrot.slane %v909_v6, %v921_v19 }
 0x1a6   : > { %1684 = vmatprep.subr.bf16.mxu0 %v5431_v23  ;;  %5053 = vmatprep.subr.bf16.mxu1 %v5428_v31 }
 0x1a8   : > { %1135 = vmatmul.mubr.bf16.vlgmr.msra.gmra.mrb[0].mxu0 %v5413_v9  ;;  %v7181_v9 = vrot.slane %v909_v6, %v7175_v7 }
 0x1a9   : > { %1144 = vmatprep.mubr.bf16.mxu0 %v6602_v0  ;;  %1685 = vmatpush1.bf16.msra.mxu0 %v5429_v25 }
 0x1aa   : > { %1686 = vmatprep.subr.bf16.mxu0 %v5434_v26  ;;  %5054 = vmatpush3.bf16.msra.mxu1 %v5428_v31 }
 0x1ad   : > { %1687 = vmatpush1.bf16.msra.mxu0 %v5432_v28  ;;  %5056 = vmatmul.mubr.bf16.vlgmr.msra.gmra.mrb[0].mxu1 %v5414_v30  ;;  %v5501_v28 = vld [vmem:[#allocation10 + $0x40] sm:$0xff]  }
 0x1ae   : > { %1688 = vmatprep.subr.bf16.mxu0 %v5437_v29  ;;  %5059 = vmatprep.mubr.bf16.mxu1 %v5415_v36  ;;  %v5502_v29 = vld [vmem:[#allocation10] sm:$0xff]  }
 0x1af   : > { %4799 = vmatprep.subr.bf16.mxu1 %v5501_v28 }
 0x1b0   : > { %1145 = vmatmul.mubr.bf16.gmra.mrb[4].mxu0 %v5414_v30  ;;  %v5503_v30 = vld [vmem:[#allocation10 + $0x48] sm:$0xff]   ;;  %4800 = vmatpush3.bf16.msra.mxu1 %v5502_v29 }
 0x1b1   : > { %1154 = vmatprep.mubr.bf16.mxu0 %v6602_v0  ;;  %1689 = vmatpush1.bf16.msra.mxu0 %v5435_v32 }
 0x1b2   : > { %1690 = vmatprep.subr.bf16.mxu0 %v5440_v33  ;;  %4801 = vmatprep.subr.bf16.mxu1 %v5503_v30  ;;  %v5486_v30 = vld [vmem:[#allocation8 + $0x130] ss:$8 sps:$4 sm:$0xff]  }
 0x1b5   : > { %1691 = vmatpush1.bf16.msra.mxu0 %v5438_v34  ;;  %5060 = vmatmul.mubr.bf16.gmra.mrb[4].mxu1 %v5416_v41 }
 0x1b6   : > { %1692 = vmatprep.subr.bf16.mxu0 %v5443_v35  ;;  %5063 = vmatprep.mubr.bf16.mxu1 %v5418_v42  ;;  %v5504_v35 = vld [vmem:[#allocation10 + $0x8] sm:$0xff]  }
 0x1b7   : > { %4802 = vmatpush3.bf16.msra.mxu1 %v5504_v35 }
 0x1b8   : > { %1155 = vmatmul.mubr.bf16.gmra.mrb[8].mxu0 %v5415_v36 }
 0x1b9   : > { %1164 = vmatprep.mubr.bf16.mxu0 %v6602_v0  ;;  %1693 = vmatpush1.bf16.msra.mxu0 %v5441_v37 }
 0x1ba   : > { %1694 = vmatprep.subr.bf16.mxu0 %v5446_v38 }
 0x1bd   : > { %1695 = vmatpush1.bf16.msra.mxu0 %v5444_v39  ;;  %5064 = vmatmul.mubr.bf16.gmra.mrb[8].mxu1 %v5421_v47 }
 0x1be   : > { %1696 = vmatprep.subr.bf16.mxu0 %v5449_v40  ;;  %5067 = vmatprep.mubr.bf16.mxu1 %v5424_v48 }
 0x1c0   : > { %1165 = vmatmul.mubr.bf16.gmra.mrb[12].mxu0 %v5416_v41  ;;  %v5505_v41 = vld [vmem:[#allocation10 + $0x50] sm:$0xff]  }
 0x1c1   : > { %1174 = vmatprep.mubr.bf16.mxu0 %v6602_v0  ;;  %1697 = vmatpush1.bf16.msra.mxu0 %v5447_v43 }
 0x1c2   : > { %1698 = vmatprep.subr.bf16.mxu0 %v5452_v44  ;;  %4803 = vmatprep.subr.bf16.mxu1 %v5505_v41 }
 0x1c5   : > { %1699 = vmatpush1.bf16.msra.mxu0 %v5450_v45  ;;  %5068 = vmatmul.mubr.bf16.gmra.mrb[12].mxu1 %v5427_v53  ;;  %v5477_v45 = vld [vmem:[#allocation8 + $0x100] ss:$8 sps:$4 sm:$0xff]  }
 0x1c6   : > { %1700 = vmatprep.subr.bf16.mxu0 %v5455_v46 }
 0x1c8   : > { %1175 = vmatmul.mubr.bf16.gmra.mrb[16].mxu0 %v5418_v42 }
 0x1c9   : > { %1184 = vmatprep.mubr.bf16.mxu0 %v6602_v0  ;;  %1701 = vmatpush1.bf16.msra.mxu0 %v5453_v49  ;;  %v5482_v49 = vld [vmem:[#allocation8 + $0x114] ss:$8 sps:$4 sm:$0xff]  }
 0x1ca   : > { %1702 = vmatprep.subr.bf16.mxu0 %v5458_v50 }
 0x1cd   : > { %1703 = vmatpush1.bf16.msra.mxu0 %v5456_v51 }
 0x1ce   : > { %1704 = vmatprep.subr.bf16.mxu0 %v5461_v52 }
 0x1d0   : > { %1185 = vmatmul.mubr.bf16.gmra.mrb[20].mxu0 %v5421_v47 }
 0x1d1   : > { %1194 = vmatprep.mubr.bf16.mxu0 %v6602_v0  ;;  %1705 = vmatpush1.bf16.msra.mxu0 %v5459_v54  ;;  %v5506_v54 = vld [vmem:[#allocation10 + $0x10] sm:$0xff]  }
 0x1d2   : > { %1706 = vmatprep.subr.bf16.mxu0 %v5464_v55  ;;  %4804 = vmatpush3.bf16.msra.mxu1 %v5506_v54 }
 0x1d5   : > { %1707 = vmatpush1.bf16.msra.mxu0 %v5462_v56 }
 0x1d6   : > { %1708 = vmatprep.subr.bf16.mxu0 %v5467_v57  ;;  %v5507_v57 = vld [vmem:[#allocation10 + $0x58] sm:$0xff]  }
 0x1d7   : > { %4805 = vmatprep.subr.bf16.mxu1 %v5507_v57 }
 0x1d8   : > { %1195 = vmatmul.mubr.bf16.gmra.mrb[24].mxu0 %v5424_v48 }
 0x1d9   : > { %1204 = vmatprep.mubr.bf16.mxu0 %v6602_v0  ;;  %1709 = vmatpush1.bf16.msra.mxu0 %v5465_v58 }
 0x1da   : > { %1710 = vmatprep.subr.bf16.mxu0 %v5470_v60 }
 0x1dd   : > { %1711 = vmatpush1.bf16.msra.mxu0 %v5468_v59  ;;  %v5480_v59 = vld [vmem:[#allocation8 + $0x110] ss:$8 sps:$4 sm:$0xff]  }
 0x1de   : > { %1712 = vmatprep.subr.bf16.mxu0 %v5473_v61 }
 0x1e0   : > { %1205 = vmatmul.mubr.bf16.gmra.mrb[28].mxu0 %v5427_v53 }
 0x1e1   : > { %1713 = vmatpush1.bf16.msra.mxu0 %v5471_v62  ;;  %v5485_v62 = vld [vmem:[#allocation8 + $0x124] ss:$8 sps:$4 sm:$0xff]  }
 0x1e2   : > { %1714 = vmatprep.subr.bf16.mxu0 %v5476_v1 }
 0x1e5   : > { %1715 = vmatpush1.bf16.msra.mxu0 %v5474_v63 }
 0x1e6   : > { %1797 = vmatprep.subr.bf16.mxu0 %v5479_v2 }
 0x27b   : > { %v1136_v10 = vpop.f32.mrb[0].mxu0 }
 0x27c   : > { %v1137_v11 = vadd.f32 %v1136_v10, %v7178_v8  ;;  %v1138_v12 = vpop.f32.mrb[1].mxu0 }
 0x27d   : > { %v1139_v13 = vadd.f32 %v1138_v12, %v7181_v9  ;;  %v1140_v14 = vpop.f32.mrb[2].mxu0 }
 0x27e   : > { %5669 = vtanh.f32 %v1137_v11  ;;  %v1141_v15 = vadd.f32 %v1140_v14, %v7178_v8  ;;  %v1142_v16 = vpop.f32.mrb[3].mxu0 }
 0x27f   : > { %5671 = vtanh.f32 %v1139_v13  ;;  %v1143_v17 = vadd.f32 %v1142_v16, %v7181_v9 }
 0x280   : > { %5673 = vtanh.f32 %v1141_v15  ;;  %v5057_v34 = vpop.f32.mrb[0].mxu1  ;;  %v5483_v15 = vld [vmem:[#allocation8 + $0x120] ss:$8 sps:$4 sm:$0xff]  }
 0x281   : > { %5675 = vtanh.f32 %v1143_v17  ;;  %v1258_v39 = vadd.f32 %v5057_v34, %v7194_v27  ;;  %v1249_v40 = vpop.f32.mrb[1].mxu1 }
 0x282   : > { %v5058_v46 = vpop.f32.mrb[2].mxu1  ;;  %v1250_v53 = vadd.f32 %v1249_v40, %v7194_v27 }
 0x283   : > { %v1146_v18 = vpop.f32.mrb[4].mxu0  ;;  %v1252_v50 = vpop.f32.mrb[3].mxu1  ;;  %v1261_v56 = vadd.f32 %v5058_v46, %v7194_v27 }
 0x284   : > { %v1147_v20 = vadd.f32 %v1146_v18, %v7178_v8  ;;  %v1148_v21 = vpop.f32.mrb[5].mxu0  ;;  %v1253_v60 = vadd.f32 %v1252_v50, %v7194_v27  ;;  %v5494_v50 = vld [vmem:[#allocation8 + $0x154] ss:$8 sps:$4 sm:$0xff]  }
 0x285   : > { %v1149_v22 = vadd.f32 %v1148_v21, %v7181_v9  ;;  %v1150_v23 = vpop.f32.mrb[6].mxu0 }
 0x286   : > { %5677 = vtanh.f32 %v1147_v20  ;;  %v1151_v24 = vadd.f32 %v1150_v23, %v7178_v8  ;;  %v1152_v25 = vpop.f32.mrb[7].mxu0  ;;  %v5488_v20 = vld [vmem:[#allocation8 + $0x134] ss:$8 sps:$4 sm:$0xff]  }
 0x287   : > { %5679 = vtanh.f32 %v1149_v22  ;;  %v1153_v26 = vadd.f32 %v1152_v25, %v7181_v9 }
 0x288   : > { %v5670_v31 = vpop.eup %5669  ;;  %5681 = vtanh.f32 %v1151_v24  ;;  %v5061_v1 = vpop.f32.mrb[4].mxu1 }
 0x289   : > { %v5672_v32 = vpop.eup %5671  ;;  %5683 = vtanh.f32 %v1153_v26  ;;  %v1274_v10 = vadd.f32 %v5061_v1, %v7194_v27  ;;  %v1265_v11 = vpop.f32.mrb[5].mxu1 }
 0x28a   : > { %v5674_v33 = vpop.eup %5673  ;;  %5685 = vtanh.f32 %v1258_v39  ;;  %v5062_v16 = vpop.f32.mrb[6].mxu1  ;;  %v1266_v24 = vadd.f32 %v1265_v11, %v7194_v27 }
 0x28b   : > { %v5676_v36 = vpop.eup %5675  ;;  %v1156_v37 = vpop.f32.mrb[8].mxu0  ;;  %v1360_v38 = vpack.c.bf16 %v5674_v33, %v5670_v31  ;;  %v1277_v28 = vadd.f32 %v5062_v16, %v7194_v27  ;;  %v5491_v33 = vld [vmem:[#allocation8 + $0x144] ss:$8 sps:$4 sm:$0xff]  }
 0x28c   : > { %v1157_v42 = vadd.f32 %v1156_v37, %v7178_v8  ;;  %v1158_v43 = vpop.f32.mrb[9].mxu0  ;;  %v1361_v44 = vpack.c.bf16 %v5676_v36, %v5672_v32  ;;  %v1268_v21 = vpop.f32.mrb[7].mxu1 }
 0x28d   : > { %v1159_v47 = vadd.f32 %v1158_v43, %v7181_v9  ;;  %v1160_v48 = vpop.f32.mrb[10].mxu0  ;;  %v1269_v31 = vadd.f32 %v1268_v21, %v7194_v27 }
 0x28e   : > { %5687 = vtanh.f32 %v1157_v42  ;;  %v1161_v51 = vadd.f32 %v1160_v48, %v7178_v8  ;;  %v1162_v52 = vpop.f32.mrb[11].mxu0  ;;  %1716 = vmatprep.mubr.bf16.mxu0 %v1361_v44 }
 0x28f   : > { %5689 = vtanh.f32 %v1159_v47  ;;  %v1163_v55 = vadd.f32 %v1162_v52, %v7181_v9  ;;  %1717 = vmatmul.mubr.bf16.vlgmr.msra.gmra.mrb[32].mxu0 %v1360_v38 }
 0x290   : > { %v5678_v58 = vpop.eup %5677  ;;  %5691 = vtanh.f32 %v1161_v51  ;;  %1798 = vmatpush1.bf16.msra.mxu0 %v5477_v45  ;;  %v5065_v35 = vpop.f32.mrb[8].mxu1  ;;  %v5489_v45 = vld [vmem:[#allocation8 + $0x140] ss:$8 sps:$4 sm:$0xff]  }
 0x291   : > { %v5680_v61 = vpop.eup %5679  ;;  %5693 = vtanh.f32 %v1163_v55  ;;  %1799 = vmatprep.subr.bf16.mxu0 %v5482_v49  ;;  %v1290_v39 = vadd.f32 %v5065_v35, %v7194_v27  ;;  %v1281_v40 = vpop.f32.mrb[9].mxu1 }
 0x292   : > { %v5682_v63 = vpop.eup %5681  ;;  %5695 = vtanh.f32 %v1250_v53  ;;  %v5066_v46 = vpop.f32.mrb[10].mxu1 }
 0x293   : > { %v5684_v2 = vpop.eup %5683  ;;  %v1166_v3 = vpop.f32.mrb[12].mxu0  ;;  %v1363_v6 = vpack.c.bf16 %v5682_v63, %v5678_v58  ;;  %5697 = vtanh.f32 %v1261_v56  ;;  %v1282_v56 = vadd.f32 %v1281_v40, %v7194_v27 }
 0x294   : > { %v1167_v12 = vadd.f32 %v1166_v3, %v7178_v8  ;;  %v1168_v13 = vpop.f32.mrb[13].mxu0  ;;  %v1364_v14 = vpack.c.bf16 %v5684_v2, %v5680_v61  ;;  %1800 = vmatpush1.bf16.msra.mxu0 %v5480_v59  ;;  %5699 = vtanh.f32 %v1253_v60  ;;  %v7209_v25 = vpop.eup %5685  ;;  %v1293_v60 = vadd.f32 %v5066_v46, %v7194_v27  ;;  %v5497_v2 = vld [vmem:[#allocation8 + $0x164] ss:$8 sps:$4 sm:$0xff]  }
 0x295   : > { %v1169_v17 = vadd.f32 %v1168_v13, %v7181_v9  ;;  %v1170_v18 = vpop.f32.mrb[14].mxu0  ;;  %1801 = vmatprep.subr.bf16.mxu0 %v5485_v62  ;;  %5701 = vtanh.f32 %v1274_v10  ;;  %v1284_v51 = vpop.f32.mrb[11].mxu1  ;;  %v5492_v62 = vld [vmem:[#allocation8 + $0x150] ss:$8 sps:$4 sm:$0xff]  }
 0x296   : > { %5703 = vtanh.f32 %v1167_v12  ;;  %v1171_v22 = vadd.f32 %v1170_v18, %v7178_v8  ;;  %v1172_v23 = vpop.f32.mrb[15].mxu0  ;;  %1726 = vmatprep.mubr.bf16.mxu0 %v1364_v14  ;;  %v1285_v63 = vadd.f32 %v1284_v51, %v7194_v27 }
 0x297   : > { %5705 = vtanh.f32 %v1169_v17  ;;  %v1173_v26 = vadd.f32 %v1172_v23, %v7181_v9  ;;  %1727 = vmatmul.mubr.bf16.gmra.mrb[36].mxu0 %v1363_v6 }
 0x298   : > { %v5688_v29 = vpop.eup %5687  ;;  %5707 = vtanh.f32 %v1171_v22  ;;  %1802 = vmatpush1.bf16.msra.mxu0 %v5483_v15  ;;  %v5069_v6 = vpop.f32.mrb[12].mxu1 }
 0x299   : > { %v5690_v32 = vpop.eup %5689  ;;  %5709 = vtanh.f32 %v1173_v26  ;;  %1803 = vmatprep.subr.bf16.mxu0 %v5488_v20  ;;  %v1306_v13 = vadd.f32 %v5069_v6, %v7194_v27  ;;  %v1297_v14 = vpop.f32.mrb[13].mxu1  ;;  %v5495_v20 = vld [vmem:[#allocation8 + $0x160] ss:$8 sps:$4 sm:$0xff]   ;;  %v5500_v26 = vld [vmem:[#allocation8 + $0x174] ss:$8 sps:$4 sm:$0xff]  }
 0x29a   : > { %v5692_v34 = vpop.eup %5691  ;;  %5711 = vtanh.f32 %v1266_v24  ;;  %v5070_v21 = vpop.f32.mrb[14].mxu1 }
 0x29b   : > { %v5694_v36 = vpop.eup %5693  ;;  %v1176_v37 = vpop.f32.mrb[16].mxu0  ;;  %v1366_v38 = vpack.c.bf16 %v5692_v34, %v5688_v29  ;;  %5713 = vtanh.f32 %v1277_v28 }
 0x29c   : > { %v7215_v41 = vpop.eup %5695  ;;  %v1177_v42 = vadd.f32 %v1176_v37, %v7178_v8  ;;  %v1178_v43 = vpop.f32.mrb[17].mxu0  ;;  %v1367_v44 = vpack.c.bf16 %v5694_v36, %v5690_v32  ;;  %1804 = vmatpush1.bf16.msra.mxu0 %v5486_v30  ;;  %5715 = vtanh.f32 %v1269_v31  ;;  %v1309_v37 = vadd.f32 %v5070_v21, %v7194_v27 }
 0x29d   : > { %v7218_v47 = vpop.eup %5697  ;;  %v1179_v48 = vadd.f32 %v1178_v43, %v7181_v9  ;;  %v1180_v49 = vpop.f32.mrb[18].mxu0  ;;  %1805 = vmatprep.subr.bf16.mxu0 %v5491_v33  ;;  %5717 = vtanh.f32 %v1290_v39  ;;  %v1298_v33 = vadd.f32 %v1297_v14, %v7194_v27  ;;  %v5498_v39 = vld [vmem:[#allocation8 + $0x170] ss:$8 sps:$4 sm:$0xff]  }
 0x29e   : > { %v7221_v52 = vpop.eup %5699  ;;  %5719 = vtanh.f32 %v1177_v42  ;;  %v1181_v53 = vadd.f32 %v1180_v49, %v7178_v8  ;;  %v1182_v54 = vpop.f32.mrb[19].mxu0  ;;  %1736 = vmatprep.mubr.bf16.mxu0 %v1367_v44  ;;  %v1365_v55 = vpack.c.bf16 %v7218_v47, %v7209_v25  ;;  %v5509_v25 = vld [vmem:[#allocation10 + $0x60] sm:$0xff]   ;;  %v5511_v47 = vld [vmem:[#allocation10 + $0x68] sm:$0xff]  }
 0x29f   : > { %v7227_v57 = vpop.eup %5701  ;;  %5721 = vtanh.f32 %v1179_v48  ;;  %v1183_v58 = vadd.f32 %v1182_v54, %v7181_v9  ;;  %1737 = vmatmul.mubr.bf16.gmra.mrb[40].mxu0 %v1366_v38  ;;  %v1362_v59 = vpack.c.bf16 %v7221_v52, %v7215_v41  ;;  %v1300_v28 = vpop.f32.mrb[15].mxu1  ;;  %v5510_v41 = vld [vmem:[#allocation10 + $0x20] sm:$0xff]   ;;  %v5512_v52 = vld [vmem:[#allocation10 + $0x28] sm:$0xff]  }
 0x2a0   : > { %v5704_v61 = vpop.eup %5703  ;;  %5723 = vtanh.f32 %v1181_v53  ;;  %1806 = vmatpush1.bf16.msra.mxu0 %v5489_v45  ;;  %v1301_v40 = vadd.f32 %v1300_v28, %v7194_v27 }
 0x2a1   : > { %v5706_v1 = vpop.eup %5705  ;;  %5725 = vtanh.f32 %v1183_v58  ;;  %1807 = vmatprep.subr.bf16.mxu0 %v5494_v50 }
 0x2a2   : > { %v5708_v3 = vpop.eup %5707  ;;  %5727 = vtanh.f32 %v1282_v56 }
 0x2a3   : > { %v5710_v10 = vpop.eup %5709  ;;  %v1186_v11 = vpop.f32.mrb[20].mxu0  ;;  %v1369_v12 = vpack.c.bf16 %v5708_v3, %v5704_v61  ;;  %5729 = vtanh.f32 %v1293_v60 }
 0x2a4   : > { %v7235_v15 = vpop.eup %5711  ;;  %v1187_v16 = vadd.f32 %v1186_v11, %v7178_v8  ;;  %v1188_v17 = vpop.f32.mrb[21].mxu0  ;;  %v1370_v18 = vpack.c.bf16 %v5710_v10, %v5706_v1  ;;  %1808 = vmatpush1.bf16.msra.mxu0 %v5492_v62  ;;  %5731 = vtanh.f32 %v1285_v63 }
 0x2a5   : > { %v7238_v22 = vpop.eup %5713  ;;  %v1189_v23 = vadd.f32 %v1188_v17, %v7181_v9  ;;  %v1190_v24 = vpop.f32.mrb[22].mxu0  ;;  %1809 = vmatprep.subr.bf16.mxu0 %v5497_v2  ;;  %5733 = vtanh.f32 %v1306_v13 }
 0x2a6   : > { %v7241_v29 = vpop.eup %5715  ;;  %5735 = vtanh.f32 %v1187_v16  ;;  %v1191_v30 = vadd.f32 %v1190_v24, %v7178_v8  ;;  %v1192_v31 = vpop.f32.mrb[23].mxu0  ;;  %1746 = vmatprep.mubr.bf16.mxu0 %v1370_v18  ;;  %v1371_v32 = vpack.c.bf16 %v7238_v22, %v7227_v57  ;;  %v5514_v57 = vld [vmem:[#allocation10 + $0x30] sm:$0xff]   ;;  %v5517_v22 = vld [vmem:[#allocation11] sm:$0xff]  }
 0x2a7   : > { %v7247_v34 = vpop.eup %5717  ;;  %5737 = vtanh.f32 %v1189_v23  ;;  %v1193_v35 = vadd.f32 %v1192_v31, %v7181_v9  ;;  %1747 = vmatmul.mubr.bf16.gmra.mrb[44].mxu0 %v1369_v12  ;;  %v1368_v36 = vpack.c.bf16 %v7241_v29, %v7235_v15  ;;  %v5516_v15 = vld [vmem:[#allocation10 + $0x38] sm:$0xff]   ;;  %v1432_v29 = vld [vmem:[%s7878_s14] sm:$0x3]  ;;  %s7883_s14 = sld [smem:[#allocation49_spill]] }
 0x2a8   : > { %v5720_v38 = vpop.eup %5719  ;;  %5739 = vtanh.f32 %v1191_v30  ;;  %1810 = vmatpush1.bf16.msra.mxu0 %v5495_v20 }
 0x2a9   : > { %v5722_v42 = vpop.eup %5721  ;;  %5741 = vtanh.f32 %v1193_v35  ;;  %1811 = vmatprep.subr.bf16.mxu0 %v5500_v26 }
 0x2aa   : > { %v5724_v43 = vpop.eup %5723  ;;  %5743 = vtanh.f32 %v1298_v33 }
 0x2ab   : > { %v5726_v44 = vpop.eup %5725  ;;  %v1196_v45 = vpop.f32.mrb[24].mxu0  ;;  %v1372_v46 = vpack.c.bf16 %v5724_v43, %v5720_v38  ;;  %5745 = vtanh.f32 %v1309_v37 }
 0x2ac   : > { %v7254_v48 = vpop.eup %5727  ;;  %v1197_v49 = vadd.f32 %v1196_v45, %v7178_v8  ;;  %v1198_v50 = vpop.f32.mrb[25].mxu0  ;;  %v1373_v51 = vpack.c.bf16 %v5726_v44, %v5722_v42  ;;  %1812 = vmatpush1.bf16.msra.mxu0 %v5498_v39  ;;  %5747 = vtanh.f32 %v1301_v40 }
 0x2ad   : > { %v7257_v53 = vpop.eup %5729  ;;  %v1199_v27 = vadd.f32 %v1198_v50, %v7181_v9  ;;  %v1200_v54 = vpop.f32.mrb[26].mxu0 }
 0x2ae   : > { %v7260_v56 = vpop.eup %5731  ;;  %5749 = vtanh.f32 %v1197_v49  ;;  %v1201_v58 = vadd.f32 %v1200_v54, %v7178_v8  ;;  %v1202_v60 = vpop.f32.mrb[27].mxu0  ;;  %1756 = vmatprep.mubr.bf16.mxu0 %v1373_v51  ;;  %v1377_v61 = vpack.c.bf16 %v7257_v53, %v7247_v34 }
 0x2af   : > { %v7265_v62 = vpop.eup %5733  ;;  %5751 = vtanh.f32 %v1199_v27  ;;  %v1203_v63 = vadd.f32 %v1202_v60, %v7181_v9  ;;  %1757 = vmatmul.mubr.bf16.gmra.mrb[48].mxu0 %v1372_v46  ;;  %v1374_v1 = vpack.c.bf16 %v7260_v56, %v7254_v48 }
 0x2b0   : > { %v5736_v2 = vpop.eup %5735  ;;  %5753 = vtanh.f32 %v1201_v58 }
 0x2b1   : > { %v5738_v3 = vpop.eup %5737  ;;  %5755 = vtanh.f32 %v1203_v63 }
 0x2b2   : > { %v5740_v6 = vpop.eup %5739 }
 0x2b3   : > { %v5742_v10 = vpop.eup %5741  ;;  %v1206_v11 = vpop.f32.mrb[28].mxu0  ;;  %v1375_v12 = vpack.c.bf16 %v5740_v6, %v5736_v2 }
 0x2b4   : > { %v5744_v13 = vpop.eup %5743  ;;  %v1207_v14 = vadd.f32 %v1206_v11, %v7178_v8  ;;  %v1208_v16 = vpop.f32.mrb[29].mxu0  ;;  %v1376_v17 = vpack.c.bf16 %v5742_v10, %v5738_v3 }
 0x2b5   : > { %v5746_v18 = vpop.eup %5745  ;;  %v1209_v20 = vadd.f32 %v1208_v16, %v7181_v9  ;;  %v1210_v21 = vpop.f32.mrb[30].mxu0 }
 0x2b6   : > { %v5748_v23 = vpop.eup %5747  ;;  %5757 = vtanh.f32 %v1207_v14  ;;  %v1211_v24 = vadd.f32 %v1210_v21, %v7178_v8  ;;  %v1212_v26 = vpop.f32.mrb[31].mxu0  ;;  %1766 = vmatprep.mubr.bf16.mxu0 %v1376_v17  ;;  %v1383_v28 = vpack.c.bf16 %v5746_v18, %v7265_v62  ;;  %v5518_v21 = vld [vmem:[#allocation11 + $0x8] sm:$0xff]  }
 0x2b7   : > { %5759 = vtanh.f32 %v1209_v20  ;;  %v1213_v30 = vadd.f32 %v1212_v26, %v7181_v9  ;;  %1767 = vmatmul.mubr.bf16.gmra.mrb[52].mxu0 %v1375_v12  ;;  %v1380_v31 = vpack.c.bf16 %v5748_v23, %v5744_v13  ;;  %v5508_v9 = vld [vmem:[#allocation10 + $0x18] sm:$0xff]  }
 0x2b8   : > { %v5750_v33 = vpop.eup %5749  ;;  %5761 = vtanh.f32 %v1211_v24  ;;  %4806 = vmatpush3.bf16.msra.mxu1 %v5508_v9 }
 0x2b9   : > { %v5752_v34 = vpop.eup %5751  ;;  %5763 = vtanh.f32 %v1213_v30  ;;  %4807 = vmatprep.subr.bf16.mxu1 %v5509_v25 }
 0x2ba   : > { %v5754_v35 = vpop.eup %5753 }
 0x2bb   : > { %v5756_v37 = vpop.eup %5755  ;;  %v1378_v38 = vpack.c.bf16 %v5754_v35, %v5750_v33 }
 0x2bc   : > { %v1379_v39 = vpack.c.bf16 %v5756_v37, %v5752_v34  ;;  %4808 = vmatpush3.bf16.msra.mxu1 %v5510_v41 }
 0x2bd   : > { %4809 = vmatprep.subr.bf16.mxu1 %v5511_v47  ;;  %v5521_v47 = vld [vmem:[#allocation11 + $0x20] sm:$0xff]  }
 0x2be   : > { %1776 = vmatprep.mubr.bf16.mxu0 %v1379_v39 }
 0x2bf   : > { %1777 = vmatmul.mubr.bf16.gmra.mrb[56].mxu0 %v1378_v38 }
 0x2c0   : > { %v5758_v8 = vpop.eup %5757  ;;  %4810 = vmatpush3.bf16.msra.mxu1 %v5512_v52 }
 0x2c1   : > { %v5760_v40 = vpop.eup %5759 }
 0x2c2   : > { %v5762_v42 = vpop.eup %5761 }
 0x2c3   : > { %v5764_v43 = vpop.eup %5763  ;;  %v1381_v44 = vpack.c.bf16 %v5762_v42, %v5758_v8 }
 0x2c4   : > { %v1382_v45 = vpack.c.bf16 %v5764_v43, %v5760_v40  ;;  %v5520_v43 = vld [vmem:[#allocation11 + $0x18] sm:$0xff]  }
 0x2c6   : > { %1786 = vmatprep.mubr.bf16.mxu0 %v1382_v45 }
 0x2c7   : > { %1787 = vmatmul.mubr.bf16.gmra.mrb[60].mxu0 %v1381_v44 }
 0x2c8   : > { %1829 = vmatprep.mubr.bf16.mxu0 %v6602_v0 }
 0x2cf   : > { %1830 = vmatmul.mubr.bf16.vlgmr.msra.gmra.mrb[32].mxu0 %v1362_v59  ;;  %v5515_v59 = vld [vmem:[#allocation10 + $0x78] sm:$0xff]  }
 0x2d0   : > { %1839 = vmatprep.mubr.bf16.mxu0 %v6602_v0 }
 0x2d7   : > { %1840 = vmatmul.mubr.bf16.gmra.mrb[36].mxu0 %v1365_v55  ;;  %v5513_v55 = vld [vmem:[#allocation10 + $0x70] sm:$0xff]  }
 0x2d8   : > { %1849 = vmatprep.mubr.bf16.mxu0 %v6602_v0  ;;  %4811 = vmatprep.subr.bf16.mxu1 %v5513_v55 }
 0x2d9   : > { %4812 = vmatpush3.bf16.msra.mxu1 %v5514_v57 }
 0x2da   : > { %4813 = vmatprep.subr.bf16.mxu1 %v5515_v59 }
 0x2dd   : > { %4814 = vmatpush3.bf16.msra.mxu1 %v5516_v15 }
 0x2de   : > { %5071 = vmatprep.subr.bf16.mxu1 %v5517_v22 }
 0x2df   : > { %1850 = vmatmul.mubr.bf16.gmra.mrb[40].mxu0 %v1368_v36  ;;  %v7302_v36 = vrot.slane %v1432_v29, %v7175_v7 }
 0x2e0   : > { %1859 = vmatprep.mubr.bf16.mxu0 %v6602_v0 }
 0x2e7   : > { %1860 = vmatmul.mubr.bf16.gmra.mrb[44].mxu0 %v1371_v32  ;;  %v7299_v32 = vrot.slane %v1432_v29, %v7169_v5 }
 0x2e8   : > { %1869 = vmatprep.mubr.bf16.mxu0 %v6602_v0 }
 0x2ef   : > { %1870 = vmatmul.mubr.bf16.gmra.mrb[48].mxu0 %v1374_v1 }
 0x2f0   : > { %1879 = vmatprep.mubr.bf16.mxu0 %v6602_v0 }
 0x2f7   : > { %1880 = vmatmul.mubr.bf16.gmra.mrb[52].mxu0 %v1377_v61 }
 0x2f8   : > { %1889 = vmatprep.mubr.bf16.mxu0 %v6602_v0 }
 0x2ff   : > { %1890 = vmatmul.mubr.bf16.gmra.mrb[56].mxu0 %v1380_v31  ;;  %v5519_v31 = vld [vmem:[#allocation11 + $0x10] sm:$0xff]  }
 0x300   : > { %1899 = vmatprep.mubr.bf16.mxu0 %v6602_v0 }
 0x307   : > { %1900 = vmatmul.mubr.bf16.gmra.mrb[60].mxu0 %v1383_v28 }
 0x3a2   : > { %v1831_v46 = vpop.f32.mrb[32].mxu0 }
 0x3a3   : > { %v5167_v48 = vadd.f32 %v1831_v46, %v7299_v32  ;;  %v1833_v49 = vpop.f32.mrb[33].mxu0 }
 0x3a4   : > { %v5168_v50 = vadd.f32 %v1833_v49, %v7302_v36  ;;  %v1835_v51 = vpop.f32.mrb[34].mxu0 }
 0x3a5   : > { %5765 = vtanh.f32 %v5167_v48  ;;  %v5169_v53 = vadd.f32 %v1835_v51, %v7299_v32  ;;  %v1837_v27 = vpop.f32.mrb[35].mxu0 }
 0x3a6   : > { %5767 = vtanh.f32 %v5168_v50  ;;  %v5170_v54 = vadd.f32 %v1837_v27, %v7302_v36 }
 0x3a7   : > { %5769 = vtanh.f32 %v5169_v53 }
 0x3a8   : > { %5771 = vtanh.f32 %v5170_v54 }
 0x3aa   : > { %v1841_v56 = vpop.f32.mrb[36].mxu0 }
 0x3ab   : > { %v5171_v58 = vadd.f32 %v1841_v56, %v7299_v32  ;;  %v1843_v60 = vpop.f32.mrb[37].mxu0 }
 0x3ac   : > { %v5172_v61 = vadd.f32 %v1843_v60, %v7302_v36  ;;  %v1845_v62 = vpop.f32.mrb[38].mxu0 }
 0x3ad   : > { %5773 = vtanh.f32 %v5171_v58  ;;  %v5173_v63 = vadd.f32 %v1845_v62, %v7299_v32  ;;  %v1847_v1 = vpop.f32.mrb[39].mxu0 }
 0x3ae   : > { %5775 = vtanh.f32 %v5172_v61  ;;  %v5174_v2 = vadd.f32 %v1847_v1, %v7302_v36 }
 0x3af   : > { %v5766_v3 = vpop.eup %5765  ;;  %5777 = vtanh.f32 %v5173_v63 }
 0x3b0   : > { %v5768_v6 = vpop.eup %5767  ;;  %5779 = vtanh.f32 %v5174_v2 }
 0x3b1   : > { %v5770_v10 = vpop.eup %5769 }
 0x3b2   : > { %v5772_v11 = vpop.eup %5771  ;;  %v1851_v12 = vpop.f32.mrb[40].mxu0  ;;  %v1942_v13 = vpack.c.bf16 %v5770_v10, %v5766_v3 }
 0x3b3   : > { %v5175_v14 = vadd.f32 %v1851_v12, %v7299_v32  ;;  %v1853_v16 = vpop.f32.mrb[41].mxu0  ;;  %v1943_v17 = vpack.c.bf16 %v5772_v11, %v5768_v6 }
 0x3b4   : > { %v5176_v18 = vadd.f32 %v1853_v16, %v7302_v36  ;;  %v1855_v20 = vpop.f32.mrb[42].mxu0 }
 0x3b5   : > { %5781 = vtanh.f32 %v5175_v14  ;;  %v5177_v23 = vadd.f32 %v1855_v20, %v7299_v32  ;;  %v1857_v24 = vpop.f32.mrb[43].mxu0  ;;  %2125 = vmatprep.mubr.bf16.mxu1 %v1943_v17 }
 0x3b6   : > { %5783 = vtanh.f32 %v5176_v18  ;;  %v5178_v26 = vadd.f32 %v1857_v24, %v7302_v36  ;;  %2126 = vmatmul.mubr.bf16.vlgmr.msra.gmra.mrb[16].mxu1 %v1942_v13 }
 0x3b7   : > { %v5774_v28 = vpop.eup %5773  ;;  %5785 = vtanh.f32 %v5177_v23  ;;  %5072 = vmatpush3.bf16.msra.mxu1 %v5517_v22 }
 0x3b8   : > { %v5776_v30 = vpop.eup %5775  ;;  %5787 = vtanh.f32 %v5178_v26  ;;  %5073 = vmatprep.subr.bf16.mxu1 %v5518_v21 }
 0x3b9   : > { %v5778_v33 = vpop.eup %5777 }
 0x3ba   : > { %v5780_v34 = vpop.eup %5779  ;;  %v1861_v35 = vpop.f32.mrb[44].mxu0  ;;  %v1944_v37 = vpack.c.bf16 %v5778_v33, %v5774_v28 }
 0x3bb   : > { %v5179_v38 = vadd.f32 %v1861_v35, %v7299_v32  ;;  %v1863_v39 = vpop.f32.mrb[45].mxu0  ;;  %v1945_v8 = vpack.c.bf16 %v5780_v34, %v5776_v30  ;;  %5074 = vmatpush3.bf16.msra.mxu1 %v5518_v21 }
 0x3bc   : > { %v5180_v40 = vadd.f32 %v1863_v39, %v7302_v36  ;;  %v1865_v42 = vpop.f32.mrb[46].mxu0  ;;  %5075 = vmatprep.subr.bf16.mxu1 %v5519_v31 }
 0x3bd   : > { %5789 = vtanh.f32 %v5179_v38  ;;  %v5181_v44 = vadd.f32 %v1865_v42, %v7299_v32  ;;  %v1867_v45 = vpop.f32.mrb[47].mxu0  ;;  %2133 = vmatprep.mubr.bf16.mxu1 %v1945_v8 }
 0x3be   : > { %5791 = vtanh.f32 %v5180_v40  ;;  %v5182_v9 = vadd.f32 %v1867_v45, %v7302_v36  ;;  %2134 = vmatmul.mubr.bf16.gmra.mrb[20].mxu1 %v1944_v37 }
 0x3bf   : > { %v5782_v25 = vpop.eup %5781  ;;  %5793 = vtanh.f32 %v5181_v44  ;;  %5076 = vmatpush3.bf16.msra.mxu1 %v5519_v31 }
 0x3c0   : > { %v5784_v41 = vpop.eup %5783  ;;  %5795 = vtanh.f32 %v5182_v9  ;;  %5077 = vmatprep.subr.bf16.mxu1 %v5520_v43 }
 0x3c1   : > { %v5786_v52 = vpop.eup %5785 }
 0x3c2   : > { %v5788_v55 = vpop.eup %5787  ;;  %v1871_v57 = vpop.f32.mrb[48].mxu0  ;;  %v1946_v59 = vpack.c.bf16 %v5786_v52, %v5782_v25 }
 0x3c3   : > { %v5183_v15 = vadd.f32 %v1871_v57, %v7299_v32  ;;  %v1873_v22 = vpop.f32.mrb[49].mxu0  ;;  %v1947_v29 = vpack.c.bf16 %v5788_v55, %v5784_v41  ;;  %5078 = vmatpush3.bf16.msra.mxu1 %v5520_v43 }
 0x3c4   : > { %v5184_v46 = vadd.f32 %v1873_v22, %v7302_v36  ;;  %v1875_v48 = vpop.f32.mrb[50].mxu0  ;;  %5079 = vmatprep.subr.bf16.mxu1 %v5521_v47 }
 0x3c5   : > { %5797 = vtanh.f32 %v5183_v15  ;;  %v5185_v49 = vadd.f32 %v1875_v48, %v7299_v32  ;;  %v1877_v50 = vpop.f32.mrb[51].mxu0  ;;  %2141 = vmatprep.mubr.bf16.mxu1 %v1947_v29  ;;  %v5523_v48 = vld [vmem:[#allocation11 + $0x30] sm:$0xff]  }
 0x3c6   : > { %5799 = vtanh.f32 %v5184_v46  ;;  %v5186_v51 = vadd.f32 %v1877_v50, %v7302_v36  ;;  %2142 = vmatmul.mubr.bf16.gmra.mrb[24].mxu1 %v1946_v59  ;;  %v5527_v50 = vld [vmem:[#allocation13 + $0x4] ss:$8 sps:$4 sm:$0xff]  }
 0x3c7   : > { %v5790_v53 = vpop.eup %5789  ;;  %5801 = vtanh.f32 %v5185_v49  ;;  %5080 = vmatpush3.bf16.msra.mxu1 %v5521_v47  ;;  %v5524_v49 = vld [vmem:[#allocation11 + $0x38] sm:$0xff]  }
 0x3c8   : > { %v5792_v27 = vpop.eup %5791  ;;  %5803 = vtanh.f32 %v5186_v51 }
 0x3c9   : > { %v5794_v54 = vpop.eup %5793 }
 0x3ca   : > { %v5796_v56 = vpop.eup %5795  ;;  %v1881_v58 = vpop.f32.mrb[52].mxu0  ;;  %v1948_v60 = vpack.c.bf16 %v5794_v54, %v5790_v53  ;;  %v7339_v53 = vld [vmem:[%s7781_s7] ss:$0 sm:$0xff] }
 0x3cb   : > { %v5187_v61 = vadd.f32 %v1881_v58, %v7299_v32  ;;  %v1883_v62 = vpop.f32.mrb[53].mxu0  ;;  %v1949_v63 = vpack.c.bf16 %v5796_v56, %v5792_v27 }
 0x3cc   : > { %v5188_v1 = vadd.f32 %v1883_v62, %v7302_v36  ;;  %v1885_v2 = vpop.f32.mrb[54].mxu0 }
 0x3cd   : > { %5805 = vtanh.f32 %v5187_v61  ;;  %v5189_v3 = vadd.f32 %v1885_v2, %v7299_v32  ;;  %v1887_v6 = vpop.f32.mrb[55].mxu0  ;;  %2149 = vmatprep.mubr.bf16.mxu1 %v1949_v63 }
 0x3ce   : > { %5807 = vtanh.f32 %v5188_v1  ;;  %v5190_v10 = vadd.f32 %v1887_v6, %v7302_v36  ;;  %2150 = vmatmul.mubr.bf16.gmra.mrb[28].mxu1 %v1948_v60 }
 0x3cf   : > { %v5798_v11 = vpop.eup %5797  ;;  %5809 = vtanh.f32 %v5189_v3 }
 0x3d0   : > { %v5800_v12 = vpop.eup %5799  ;;  %5811 = vtanh.f32 %v5190_v10 }
 0x3d1   : > { %v5802_v13 = vpop.eup %5801 }
 0x3d2   : > { %v5804_v14 = vpop.eup %5803  ;;  %v1891_v16 = vpop.f32.mrb[56].mxu0  ;;  %v1950_v17 = vpack.c.bf16 %v5802_v13, %v5798_v11 }
 0x3d3   : > { %v5191_v18 = vadd.f32 %v1891_v16, %v7299_v32  ;;  %v1893_v20 = vpop.f32.mrb[57].mxu0  ;;  %v1951_v21 = vpack.c.bf16 %v5804_v14, %v5800_v12 }
 0x3d4   : > { %v5192_v23 = vadd.f32 %v1893_v20, %v7302_v36  ;;  %v1895_v24 = vpop.f32.mrb[58].mxu0 }
 0x3d5   : > { %5813 = vtanh.f32 %v5191_v18  ;;  %v5193_v26 = vadd.f32 %v1895_v24, %v7299_v32  ;;  %v1897_v28 = vpop.f32.mrb[59].mxu0  ;;  %2157 = vmatprep.mubr.bf16.mxu1 %v1951_v21 }
 0x3d6   : > { %5815 = vtanh.f32 %v5192_v23  ;;  %v5194_v30 = vadd.f32 %v1897_v28, %v7302_v36  ;;  %2158 = vmatmul.mubr.bf16.gmra.mrb[32].mxu1 %v1950_v17 }
 0x3d7   : > { %v5806_v31 = vpop.eup %5805  ;;  %5817 = vtanh.f32 %v5193_v26 }
 0x3d8   : > { %v5808_v33 = vpop.eup %5807  ;;  %5819 = vtanh.f32 %v5194_v30 }
 0x3d9   : > { %v5810_v34 = vpop.eup %5809 }
 0x3da   : > { %v5812_v35 = vpop.eup %5811  ;;  %v1901_v37 = vpop.f32.mrb[60].mxu0  ;;  %v1952_v38 = vpack.c.bf16 %v5810_v34, %v5806_v31 }
 0x3db   : > { %v5195_v39 = vadd.f32 %v1901_v37, %v7299_v32  ;;  %v1903_v8 = vpop.f32.mrb[61].mxu0  ;;  %v1953_v40 = vpack.c.bf16 %v5812_v35, %v5808_v33 }
 0x3dc   : > { %v5196_v42 = vadd.f32 %v1903_v8, %v7302_v36  ;;  %v1905_v43 = vpop.f32.mrb[62].mxu0 }
 0x3dd   : > { %5821 = vtanh.f32 %v5195_v39  ;;  %v5197_v44 = vadd.f32 %v1905_v43, %v7299_v32  ;;  %v1907_v45 = vpop.f32.mrb[63].mxu0  ;;  %2165 = vmatprep.mubr.bf16.mxu1 %v1953_v40  ;;  %v5530_v40 = vld [vmem:[#allocation13 + $0x14] ss:$8 sps:$4 sm:$0xff]  }
 0x3de   : > { %5823 = vtanh.f32 %v5196_v42  ;;  %v5198_v9 = vadd.f32 %v1907_v45, %v7302_v36  ;;  %2166 = vmatmul.mubr.bf16.gmra.mrb[36].mxu1 %v1952_v38  ;;  %v5522_v36 = vld [vmem:[#allocation11 + $0x28] sm:$0xff]   ;;  %v5528_v45 = vld [vmem:[#allocation13 + $0x10] ss:$8 sps:$4 sm:$0xff]  }
 0x3df   : > { %v5814_v25 = vpop.eup %5813  ;;  %5825 = vtanh.f32 %v5197_v44  ;;  %5081 = vmatprep.subr.bf16.mxu1 %v5522_v36  ;;  %v5525_v38 = vld [vmem:[#allocation13] ss:$8 sps:$4 sm:$0xff]  }
 0x3e0   : > { %v5816_v41 = vpop.eup %5815  ;;  %5827 = vtanh.f32 %v5198_v9  ;;  %5082 = vmatpush3.bf16.msra.mxu1 %v5522_v36  ;;  %v5533_v9 = vld [vmem:[#allocation13 + $0x24] ss:$8 sps:$4 sm:$0xff]  }
 0x3e1   : > { %v5818_v47 = vpop.eup %5817  ;;  %5083 = vmatprep.subr.bf16.mxu1 %v5523_v48 }
 0x3e2   : > { %v5820_v52 = vpop.eup %5819  ;;  %v1954_v55 = vpack.c.bf16 %v5818_v47, %v5814_v25 }
 0x3e3   : > { %v1955_v57 = vpack.c.bf16 %v5820_v52, %v5816_v41 }
 0x3e4   : > { %5084 = vmatpush3.bf16.msra.mxu1 %v5523_v48  ;;  %v5534_v48 = vld [vmem:[#allocation13 + $0x30] ss:$8 sps:$4 sm:$0xff]  }
 0x3e5   : > { %2173 = vmatprep.mubr.bf16.mxu1 %v1955_v57  ;;  %5085 = vmatprep.subr.bf16.mxu1 %v5524_v49 }
 0x3e6   : > { %2174 = vmatmul.mubr.bf16.gmra.mrb[40].mxu1 %v1954_v55 }
 0x3e7   : > { %v5822_v59 = vpop.eup %5821 }
 0x3e8   : > { %v5824_v15 = vpop.eup %5823  ;;  %5086 = vmatpush3.bf16.msra.mxu1 %v5524_v49 }
 0x3e9   : > { %v5826_v22 = vpop.eup %5825  ;;  %2514 = vmatprep.subr.bf16.mxu1 %v5527_v50 }
 0x3ea   : > { %v5828_v32 = vpop.eup %5827  ;;  %v1956_v29 = vpack.c.bf16 %v5826_v22, %v5822_v59  ;;  %v5531_v59 = vld [vmem:[#allocation13 + $0x20] ss:$8 sps:$4 sm:$0xff]  }
 0x3eb   : > { %v1957_v46 = vpack.c.bf16 %v5828_v32, %v5824_v15  ;;  %v5536_v32 = vld [vmem:[#allocation13 + $0x34] ss:$8 sps:$4 sm:$0xff]  }
 0x3ed   : > { %2181 = vmatprep.mubr.bf16.mxu1 %v1957_v46 }
 0x3ee   : > { %2182 = vmatmul.mubr.bf16.gmra.mrb[44].mxu1 %v1956_v29 }
 0x489   : > { %v4815_v51 = vpop.f32.mrb[16].mxu1 }
 0x48a   : > { %v4816_v27 = vpop.f32.mrb[17].mxu1 }
 0x48b   : > { %v4817_v54 = vadd.f32 %v4816_v27, %v4815_v51  ;;  %v4818_v56 = vpop.f32.mrb[18].mxu1 }
 0x48c   : > { %v4819_v58 = vpop.f32.mrb[19].mxu1 }
 0x48d   : > { %v2128_v60 = vadd.f32 %v4817_v54, %v7339_v53  ;;  %v4820_v61 = vadd.f32 %v4819_v58, %v4818_v56 }
 0x48f   : > { %v2131_v62 = vadd.f32 %v4820_v61, %v7339_v53  ;;  %5829 = vtanh.f32 %v2128_v60 }
 0x491   : > { %5831 = vtanh.f32 %v2131_v62  ;;  %v4821_v63 = vpop.f32.mrb[20].mxu1 }
 0x492   : > { %v4822_v1 = vpop.f32.mrb[21].mxu1 }
 0x493   : > { %v4823_v2 = vadd.f32 %v4822_v1, %v4821_v63  ;;  %v4824_v3 = vpop.f32.mrb[22].mxu1 }
 0x494   : > { %v4825_v6 = vpop.f32.mrb[23].mxu1 }
 0x495   : > { %v2136_v10 = vadd.f32 %v4823_v2, %v7339_v53  ;;  %v4826_v11 = vadd.f32 %v4825_v6, %v4824_v3 }
 0x497   : > { %v2139_v12 = vadd.f32 %v4826_v11, %v7339_v53  ;;  %5833 = vtanh.f32 %v2136_v10 }
 0x499   : > { %5835 = vtanh.f32 %v2139_v12  ;;  %v4827_v13 = vpop.f32.mrb[24].mxu1  ;;  %v5830_v14 = vpop.eup %5829 }
 0x49a   : > { %v4828_v16 = vpop.f32.mrb[25].mxu1 }
 0x49b   : > { %v5832_v17 = vpop.eup %5831  ;;  %v4829_v18 = vadd.f32 %v4828_v16, %v4827_v13  ;;  %v4830_v20 = vpop.f32.mrb[26].mxu1 }
 0x49c   : > { %v4831_v21 = vpop.f32.mrb[27].mxu1  ;;  %v2206_v23 = vpack.c.bf16 %v5832_v17, %v5830_v14 }
 0x49d   : > { %v2144_v24 = vadd.f32 %v4829_v18, %v7339_v53  ;;  %v4832_v26 = vadd.f32 %v4831_v21, %v4830_v20 }
 0x49e   : > { %5087 = vmatprep.mubr.bf16.mxu1 %v2206_v23 }
 0x49f   : > { %v2147_v28 = vadd.f32 %v4832_v26, %v7339_v53  ;;  %5837 = vtanh.f32 %v2144_v24 }
 0x4a1   : > { %5839 = vtanh.f32 %v2147_v28  ;;  %v4833_v30 = vpop.f32.mrb[28].mxu1  ;;  %v5834_v31 = vpop.eup %5833 }
 0x4a2   : > { %v4834_v33 = vpop.f32.mrb[29].mxu1 }
 0x4a3   : > { %v5836_v34 = vpop.eup %5835  ;;  %v4835_v35 = vadd.f32 %v4834_v33, %v4833_v30  ;;  %v4836_v37 = vpop.f32.mrb[30].mxu1 }
 0x4a4   : > { %v4837_v39 = vpop.f32.mrb[31].mxu1  ;;  %v2207_v8 = vpack.c.bf16 %v5836_v34, %v5834_v31 }
 0x4a5   : > { %v2152_v42 = vadd.f32 %v4835_v35, %v7339_v53  ;;  %v4838_v43 = vadd.f32 %v4837_v39, %v4836_v37 }
 0x4a6   : > { %5088 = vmatmul.mubr.bf16.vlgmr.msra.gmra.mrb[48].mxu1 %v2207_v8 }
 0x4a7   : > { %v2155_v44 = vadd.f32 %v4838_v43, %v7339_v53  ;;  %2515 = vmatpush1.bf16.msra.mxu1 %v5525_v38  ;;  %5841 = vtanh.f32 %v2152_v42  ;;  %v5539_v42 = vld [vmem:[#allocation13 + $0x44] ss:$8 sps:$4 sm:$0xff]   ;;  %v5537_v43 = vld [vmem:[#allocation13 + $0x40] ss:$8 sps:$4 sm:$0xff]  }
 0x4a8   : > { %2516 = vmatprep.subr.bf16.mxu1 %v5530_v40 }
 0x4a9   : > { %5843 = vtanh.f32 %v2155_v44  ;;  %v4839_v25 = vpop.f32.mrb[32].mxu1  ;;  %v5838_v41 = vpop.eup %5837  ;;  %v5542_v44 = vld [vmem:[#allocation13 + $0x54] ss:$8 sps:$4 sm:$0xff]  }
 0x4aa   : > { %v4840_v47 = vpop.f32.mrb[33].mxu1 }
 0x4ab   : > { %v5840_v52 = vpop.eup %5839  ;;  %v4841_v55 = vadd.f32 %v4840_v47, %v4839_v25  ;;  %v4842_v57 = vpop.f32.mrb[34].mxu1  ;;  %2517 = vmatpush1.bf16.msra.mxu1 %v5528_v45  ;;  %v5540_v45 = vld [vmem:[#allocation13 + $0x50] ss:$8 sps:$4 sm:$0xff]   ;;  %v5548_v25 = vld [vmem:[#allocation13 + $0x74] ss:$8 sps:$4 sm:$0xff]   ;;  %v5549_v47 = vld [vmem:[#allocation14] sm:$0xff]  }
 0x4ac   : > { %v4843_v15 = vpop.f32.mrb[35].mxu1  ;;  %v2208_v22 = vpack.c.bf16 %v5840_v52, %v5838_v41  ;;  %2518 = vmatprep.subr.bf16.mxu1 %v5533_v9  ;;  %v5545_v9 = vld [vmem:[#allocation13 + $0x64] ss:$8 sps:$4 sm:$0xff]   ;;  %v5546_v41 = vld [vmem:[#allocation13 + $0x70] ss:$8 sps:$4 sm:$0xff]   ;;  %5103 = vmatprep.subr.bf16.mxu0 %v5549_v47 }
 0x4ad   : > { %v2160_v29 = vadd.f32 %v4841_v55, %v7339_v53  ;;  %v4844_v46 = vadd.f32 %v4843_v15, %v4842_v57  ;;  %v5550_v52 = vld [vmem:[#allocation14 + $0x8] sm:$0xff]   ;;  %5104 = vmatpush3.bf16.msra.mxu0 %v5549_v47  ;;  %v5551_v55 = vld [vmem:[#allocation14 + $0x10] sm:$0xff]   ;;  %v5552_v57 = vld [vmem:[#allocation14 + $0x18] sm:$0xff]  }
 0x4ae   : > { %5091 = vmatprep.mubr.bf16.mxu1 %v2208_v22  ;;  %5105 = vmatprep.subr.bf16.mxu0 %v5550_v52 }
 0x4af   : > { %v2163_v36 = vadd.f32 %v4844_v46, %v7339_v53  ;;  %2519 = vmatpush1.bf16.msra.mxu1 %v5531_v59  ;;  %5845 = vtanh.f32 %v2160_v29  ;;  %v7361_v59 = vld [vmem:[%s7879_s22] ss:$0 sm:$0xff]  ;;  %s7884_s22 = sld [smem:[#allocation53_spill]] }
 0x4b0   : > { %2520 = vmatprep.subr.bf16.mxu1 %v5536_v32 }
 0x4b1   : > { %5847 = vtanh.f32 %v2163_v36  ;;  %v4845_v49 = vpop.f32.mrb[36].mxu1  ;;  %v5842_v50 = vpop.eup %5841  ;;  %5106 = vmatpush3.bf16.msra.mxu0 %v5550_v52 }
 0x4b2   : > { %v4846_v51 = vpop.f32.mrb[37].mxu1  ;;  %5107 = vmatprep.subr.bf16.mxu0 %v5551_v55 }
 0x4b3   : > { %v5844_v27 = vpop.eup %5843  ;;  %v4847_v54 = vadd.f32 %v4846_v51, %v4845_v49  ;;  %v4848_v56 = vpop.f32.mrb[38].mxu1  ;;  %2521 = vmatpush1.bf16.msra.mxu1 %v5534_v48 }
 0x4b4   : > { %v4849_v58 = vpop.f32.mrb[39].mxu1  ;;  %v2209_v60 = vpack.c.bf16 %v5844_v27, %v5842_v50  ;;  %2522 = vmatprep.subr.bf16.mxu1 %v5539_v42 }
 0x4b5   : > { %v2168_v61 = vadd.f32 %v4847_v54, %v7339_v53  ;;  %v4850_v62 = vadd.f32 %v4849_v58, %v4848_v56  ;;  %5108 = vmatpush3.bf16.msra.mxu0 %v5551_v55  ;;  %v5553_v55 = vld [vmem:[#allocation14 + $0x20] sm:$0xff]   ;;  %s7654_s16 = scalar_lea.hbm %s7884_s22, %s4782_s1 }
 0x4b6   : > { %5092 = vmatmul.mubr.bf16.gmra.mrb[52].mxu1 %v2209_v60  ;;  %5109 = vmatprep.subr.bf16.mxu0 %v5552_v57 }
 0x4b7   : > { %v2171_v63 = vadd.f32 %v4850_v62, %v7339_v53  ;;  %5849 = vtanh.f32 %v2168_v61  ;;  %2523 = vmatpush1.bf16.msra.mxu1 %v5537_v43 }
 0x4b8   : > { %2524 = vmatprep.subr.bf16.mxu1 %v5542_v44 }
 0x4b9   : > { %5851 = vtanh.f32 %v2171_v63  ;;  %v4851_v1 = vpop.f32.mrb[40].mxu1  ;;  %v5846_v2 = vpop.eup %5845  ;;  %5110 = vmatpush3.bf16.msra.mxu0 %v5552_v57  ;;  %v5554_v57 = vld [vmem:[#allocation14 + $0x28] sm:$0xff]  }
 0x4ba   : > { %v4852_v3 = vpop.f32.mrb[41].mxu1  ;;  %5111 = vmatprep.subr.bf16.mxu0 %v5553_v55 }
 0x4bb   : > { %v5848_v6 = vpop.eup %5847  ;;  %v4853_v10 = vadd.f32 %v4852_v3, %v4851_v1  ;;  %v4854_v11 = vpop.f32.mrb[42].mxu1  ;;  %2525 = vmatpush1.bf16.msra.mxu1 %v5540_v45 }
 0x4bc   : > { %v4855_v12 = vpop.f32.mrb[43].mxu1  ;;  %v2210_v13 = vpack.c.bf16 %v5848_v6, %v5846_v2  ;;  %2526 = vmatprep.subr.bf16.mxu1 %v5545_v9 }
 0x4bd   : > { %v2176_v14 = vadd.f32 %v4853_v10, %v7339_v53  ;;  %v4856_v16 = vadd.f32 %v4855_v12, %v4854_v11  ;;  %5112 = vmatpush3.bf16.msra.mxu0 %v5553_v55 }
 0x4be   : > { %5095 = vmatprep.mubr.bf16.mxu1 %v2210_v13  ;;  %5113 = vmatprep.subr.bf16.mxu0 %v5554_v57 }
 0x4bf   : > { %v2179_v17 = vadd.f32 %v4856_v16, %v7339_v53  ;;  %5853 = vtanh.f32 %v2176_v14 }
 0x4c1   : > { %5855 = vtanh.f32 %v2179_v17  ;;  %v4857_v18 = vpop.f32.mrb[44].mxu1  ;;  %v5850_v20 = vpop.eup %5849  ;;  %5114 = vmatpush3.bf16.msra.mxu0 %v5554_v57 }
 0x4c2   : > { %v4858_v21 = vpop.f32.mrb[45].mxu1 }
 0x4c3   : > { %v5852_v23 = vpop.eup %5851  ;;  %v4859_v24 = vadd.f32 %v4858_v21, %v4857_v18  ;;  %v4860_v26 = vpop.f32.mrb[46].mxu1 }
 0x4c4   : > { %v4861_v28 = vpop.f32.mrb[47].mxu1  ;;  %v2211_v30 = vpack.c.bf16 %v5852_v23, %v5850_v20 }
 0x4c5   : > { %v2184_v31 = vadd.f32 %v4859_v24, %v7339_v53  ;;  %v4862_v33 = vadd.f32 %v4861_v28, %v4860_v26 }
 0x4c6   : > { %5096 = vmatmul.mubr.bf16.gmra.mrb[56].mxu1 %v2211_v30 }
 0x4c7   : > { %v2187_v34 = vadd.f32 %v4862_v33, %v7339_v53  ;;  %5857 = vtanh.f32 %v2184_v31  ;;  %v5543_v53 = vld [vmem:[#allocation13 + $0x60] ss:$8 sps:$4 sm:$0xff]  }
 0x4c8   : > { %2527 = vmatpush1.bf16.msra.mxu1 %v5543_v53 }
 0x4c9   : > { %5859 = vtanh.f32 %v2187_v34  ;;  %v5854_v35 = vpop.eup %5853  ;;  %2528 = vmatprep.subr.bf16.mxu1 %v5548_v25 }
 0x4cb   : > { %v5856_v37 = vpop.eup %5855 }
 0x4cc   : > { %v2212_v38 = vpack.c.bf16 %v5856_v37, %v5854_v35  ;;  %2529 = vmatpush1.bf16.msra.mxu1 %v5546_v41 }
 0x4ce   : > { %5099 = vmatprep.mubr.bf16.mxu1 %v2212_v38 }
 0x4d1   : > { %v5858_v39 = vpop.eup %5857 }
 0x4d3   : > { %v5860_v8 = vpop.eup %5859 }
 0x4d4   : > { %v2213_v40 = vpack.c.bf16 %v5860_v8, %v5858_v39 }
 0x4d6   : > { %5100 = vmatmul.mubr.bf16.gmra.mrb[60].mxu1 %v2213_v40 }
 0x4d7   : > { %2546 = vmatprep.mubr.bf16.mxu1 %v6602_v0 }
 0x579   : > { %v5089_v15 = vpop.f32.mrb[48].mxu1 }
 0x57a   : > { %v2328_v22 = vadd.f32 %v5089_v15, %v7361_v59  ;;  %v2319_v32 = vpop.f32.mrb[49].mxu1  ;;  %v5556_v15 = vld [vmem:[#allocation14 + $0x38] sm:$0xff]  }
 0x57b   : > { %v2320_v29 = vadd.f32 %v7361_v59, %v2319_v32  ;;  %v5090_v46 = vpop.f32.mrb[50].mxu1  ;;  %v5559_v32 = vld [vmem:[#allocation16 + $0x4] ss:$8 sps:$4 sm:$0xff]  }
 0x57c   : > { %5861 = vtanh.f32 %v2328_v22  ;;  %v2331_v36 = vadd.f32 %v5090_v46, %v7361_v59  ;;  %v2322_v48 = vpop.f32.mrb[51].mxu1  ;;  %v5557_v22 = vld [vmem:[#allocation16] ss:$8 sps:$4 sm:$0xff]   ;;  %3063 = vmatprep.subr.bf16.mxu1 %v5559_v32  ;;  %v5560_v46 = vld [vmem:[#allocation16 + $0x10] ss:$8 sps:$4 sm:$0xff]  }
 0x57d   : > { %5863 = vtanh.f32 %v2320_v29  ;;  %v2323_v49 = vadd.f32 %v7361_v59, %v2322_v48  ;;  %v5562_v29 = vld [vmem:[#allocation16 + $0x14] ss:$8 sps:$4 sm:$0xff]   ;;  %v5563_v48 = vld [vmem:[#allocation16 + $0x20] ss:$8 sps:$4 sm:$0xff]  }
 0x57e   : > { %5865 = vtanh.f32 %v2331_v36  ;;  %v5565_v36 = vld [vmem:[#allocation16 + $0x24] ss:$8 sps:$4 sm:$0xff]  }
 0x57f   : > { %5867 = vtanh.f32 %v2323_v49  ;;  %v5568_v49 = vld [vmem:[#allocation16 + $0x34] ss:$8 sps:$4 sm:$0xff]  }
 0x586   : > { %v5862_v50 = vpop.eup %5861 }
 0x587   : > { %v5864_v51 = vpop.eup %5863 }
 0x588   : > { %v5866_v27 = vpop.eup %5865 }
 0x589   : > { %v5868_v54 = vpop.eup %5867  ;;  %v5093_v56 = vpop.f32.mrb[52].mxu1  ;;  %v2399_v58 = vpack.c.bf16 %v5866_v27, %v5862_v50  ;;  %v5566_v50 = vld [vmem:[#allocation16 + $0x30] ss:$8 sps:$4 sm:$0xff]   ;;  %v5569_v27 = vld [vmem:[#allocation16 + $0x40] ss:$8 sps:$4 sm:$0xff]  }
 0x58a   : > { %v2344_v60 = vadd.f32 %v5093_v56, %v7361_v59  ;;  %v2335_v61 = vpop.f32.mrb[53].mxu1  ;;  %v2398_v62 = vpack.c.bf16 %v5868_v54, %v5864_v51  ;;  %v5571_v51 = vld [vmem:[#allocation16 + $0x44] ss:$8 sps:$4 sm:$0xff]   ;;  %v5574_v54 = vld [vmem:[#allocation16 + $0x54] ss:$8 sps:$4 sm:$0xff]  }
 0x58b   : > { %v2336_v63 = vadd.f32 %v7361_v59, %v2335_v61  ;;  %v5094_v1 = vpop.f32.mrb[54].mxu1  ;;  %v5572_v56 = vld [vmem:[#allocation16 + $0x50] ss:$8 sps:$4 sm:$0xff]  }
 0x58c   : > { %5869 = vtanh.f32 %v2344_v60  ;;  %v2347_v2 = vadd.f32 %v5094_v1, %v7361_v59  ;;  %v2338_v3 = vpop.f32.mrb[55].mxu1  ;;  %2547 = vmatmul.mubr.bf16.vlgmr.msra.gmra.mrb[64].mxu1 %v2398_v62 }
 0x58d   : > { %5871 = vtanh.f32 %v2336_v63  ;;  %v2339_v6 = vadd.f32 %v7361_v59, %v2338_v3  ;;  %2556 = vmatprep.mubr.bf16.mxu1 %v6602_v0  ;;  %3064 = vmatpush1.bf16.msra.mxu1 %v5557_v22 }
 0x58e   : > { %5873 = vtanh.f32 %v2347_v2  ;;  %3065 = vmatprep.subr.bf16.mxu1 %v5562_v29 }
 0x58f   : > { %5875 = vtanh.f32 %v2339_v6 }
 0x591   : > { %3066 = vmatpush1.bf16.msra.mxu1 %v5560_v46 }
 0x592   : > { %3067 = vmatprep.subr.bf16.mxu1 %v5565_v36 }
 0x594   : > { %2557 = vmatmul.mubr.bf16.gmra.mrb[68].mxu1 %v2399_v58  ;;  %v2422_v58 = vld [vmem:[%s7880_s12] sm:$0x3]  ;;  %s6461_s12 = scalar_lea.vmem %s7656_s21, 4096 }
 0x595   : > { %2566 = vmatprep.mubr.bf16.mxu1 %v6602_v0  ;;  %3068 = vmatpush1.bf16.msra.mxu1 %v5563_v48  ;;  %v7392_v60 = vrot.slane %v2422_v58, %v7169_v5  ;;  %v7395_v61 = vrot.slane %v2422_v58, %v7175_v7  ;;  %p6462_p0 = scmp.ne.s32.totalorder %s7656_s21, %s6461_s12 }
 0x596   : > { %v5870_v10 = vpop.eup %5869  ;;  %3069 = vmatprep.subr.bf16.mxu1 %v5568_v49  ;;  %v2662_v49 = vld [vmem:[%s7124_s20 + $0x18] sm:$0xff] }
 0x597   : > { %v5872_v11 = vpop.eup %5871  ;;  %p6463_p7 = pnand %p6462_p0, %p7885_p5 }
 0x598   : > { %v5874_v12 = vpop.eup %5873 }
 0x599   : > { %v5876_v13 = vpop.eup %5875  ;;  %v5097_v14 = vpop.f32.mrb[56].mxu1  ;;  %v2401_v16 = vpack.c.bf16 %v5874_v12, %v5870_v10  ;;  %3070 = vmatpush1.bf16.msra.mxu1 %v5566_v50  ;;  %p6464_p8 = pneg %p6463_p7 }
 0x59a   : > { %v2360_v17 = vadd.f32 %v5097_v14, %v7361_v59  ;;  %v2351_v18 = vpop.f32.mrb[57].mxu1  ;;  %v2400_v20 = vpack.c.bf16 %v5876_v13, %v5872_v11  ;;  %3071 = vmatprep.subr.bf16.mxu1 %v5571_v51 }
 0x59b   : > { %v2352_v21 = vadd.f32 %v7361_v59, %v2351_v18  ;;  %v5098_v23 = vpop.f32.mrb[58].mxu1 }
 0x59c   : > { %5877 = vtanh.f32 %v2360_v17  ;;  %v2363_v24 = vadd.f32 %v5098_v23, %v7361_v59  ;;  %v2354_v26 = vpop.f32.mrb[59].mxu1  ;;  %2567 = vmatmul.mubr.bf16.gmra.mrb[72].mxu1 %v2400_v20 }
 0x59d   : > { %5879 = vtanh.f32 %v2352_v21  ;;  %v2355_v28 = vadd.f32 %v7361_v59, %v2354_v26  ;;  %2576 = vmatprep.mubr.bf16.mxu1 %v6602_v0  ;;  %3072 = vmatpush1.bf16.msra.mxu1 %v5569_v27 }
 0x59e   : > { %5881 = vtanh.f32 %v2363_v24  ;;  %3073 = vmatprep.subr.bf16.mxu1 %v5574_v54 }
 0x59f   : > { %5883 = vtanh.f32 %v2355_v28 }
 0x5a1   : > { %3074 = vmatpush1.bf16.msra.mxu1 %v5572_v56 }
 0x5a4   : > { %2577 = vmatmul.mubr.bf16.gmra.mrb[76].mxu1 %v2401_v16 }
 0x5a5   : > { %2586 = vmatprep.mubr.bf16.mxu1 %v6602_v0 }
 0x5a6   : > { %v5878_v30 = vpop.eup %5877 }
 0x5a7   : > { %v5880_v31 = vpop.eup %5879 }
 0x5a8   : > { %v5882_v33 = vpop.eup %5881 }
 0x5a9   : > { %v5884_v34 = vpop.eup %5883  ;;  %v5101_v35 = vpop.f32.mrb[60].mxu1  ;;  %v2403_v37 = vpack.c.bf16 %v5882_v33, %v5878_v30 }
 0x5aa   : > { %v2376_v38 = vadd.f32 %v5101_v35, %v7361_v59  ;;  %v2367_v39 = vpop.f32.mrb[61].mxu1  ;;  %v2402_v8 = vpack.c.bf16 %v5884_v34, %v5880_v31 }
 0x5ab   : > { %v2368_v40 = vadd.f32 %v7361_v59, %v2367_v39  ;;  %v5102_v42 = vpop.f32.mrb[62].mxu1 }
 0x5ac   : > { %5885 = vtanh.f32 %v2376_v38  ;;  %v2379_v43 = vadd.f32 %v5102_v42, %v7361_v59  ;;  %v2370_v44 = vpop.f32.mrb[63].mxu1  ;;  %2587 = vmatmul.mubr.bf16.gmra.mrb[80].mxu1 %v2402_v8 }
 0x5ad   : > { %5887 = vtanh.f32 %v2368_v40  ;;  %v2371_v45 = vadd.f32 %v7361_v59, %v2370_v44  ;;  %2596 = vmatprep.mubr.bf16.mxu1 %v6602_v0  ;;  %v5555_v59 = vld [vmem:[#allocation14 + $0x30] sm:$0xff]  }
 0x5ae   : > { %5889 = vtanh.f32 %v2379_v43  ;;  %5115 = vmatprep.subr.bf16.mxu0 %v5555_v59  ;;  %v2660_v43 = vld [vmem:[%s7124_s20 + $0x8] sm:$0xff] }
 0x5af   : > { %5891 = vtanh.f32 %v2371_v45  ;;  %5116 = vmatpush3.bf16.msra.mxu0 %v5555_v59 }
 0x5b0   : > { %5117 = vmatprep.subr.bf16.mxu0 %v5556_v15 }
 0x5b3   : > { %5118 = vmatpush3.bf16.msra.mxu0 %v5556_v15  ;;  %v2661_v15 = vld [vmem:[%s7124_s20 + $0x10] sm:$0xff] }
 0x5b4   : > { %2597 = vmatmul.mubr.bf16.gmra.mrb[84].mxu1 %v2403_v37  ;;  %v2659_v37 = vld [vmem:[%s7124_s20] sm:$0xff] }
 0x5b5   : > { %2606 = vmatprep.mubr.bf16.mxu1 %v6602_v0 }
 0x5b6   : > { %v5886_v9 = vpop.eup %5885 }
 0x5b7   : > { %v5888_v53 = vpop.eup %5887 }
 0x5b8   : > { %v5890_v25 = vpop.eup %5889 }
 0x5b9   : > { %v5892_v41 = vpop.eup %5891  ;;  %v2405_v47 = vpack.c.bf16 %v5890_v25, %v5886_v9 }
 0x5ba   : > { %v2404_v52 = vpack.c.bf16 %v5892_v41, %v5888_v53 }
 0x5bc   : > { %2607 = vmatmul.mubr.bf16.gmra.mrb[88].mxu1 %v2404_v52 }
 0x5bd   : > { %2616 = vmatprep.mubr.bf16.mxu1 %v6602_v0 }
 0x5c4   : > { %2617 = vmatmul.mubr.bf16.gmra.mrb[92].mxu1 %v2405_v47 }
 0x5c5   : > { %3095 = vmatprep.mubr.bf16.mxu1 %v6602_v0 }
 0x65f   : > { %v2548_v62 = vpop.f32.mrb[64].mxu1 }
 0x660   : > { %v2549_v63 = vadd.f32 %v2548_v62, %v7392_v60  ;;  %v2550_v1 = vpop.f32.mrb[65].mxu1 }
 0x661   : > { %v2551_v2 = vadd.f32 %v2550_v1, %v7395_v61  ;;  %v2552_v3 = vpop.f32.mrb[66].mxu1 }
 0x662   : > { %2627 = vst [vmem:[%s7399_s24] sm:$0xff] %v2549_v63  ;;  %v2553_v6 = vadd.f32 %v2552_v3, %v7392_v60  ;;  %v2554_v10 = vpop.f32.mrb[67].mxu1 }
 0x663   : > { %2628 = vst [vmem:[%s7399_s24 + $0x8] sm:$0xff] %v2551_v2  ;;  %v2675_v11 = vmul.f32 0.5, %v2551_v2  ;;  %v2555_v12 = vadd.f32 %v2554_v10, %v7395_v61 }
 0x664   : > { %2629 = vst [vmem:[%s7399_s24 + $0x10] sm:$0xff] %v2553_v6 }
 0x665   : > { %v2691_v13 = vmul.f32 1.442695, %v2675_v11  ;;  %2630 = vst [vmem:[%s7399_s24 + $0x18] sm:$0xff] %v2555_v12  ;;  %v2676_v14 = vmul.f32 0.5, %v2555_v12 }
 0x667   : > { %5893 = vpow2.f32 %v2691_v13  ;;  %v2693_v16 = vmul.f32 1.442695, %v2676_v14  ;;  %v2558_v17 = vpop.f32.mrb[68].mxu1  ;;  %v2663_v13 = vld [vmem:[%s7124_s20 + $0x20] sm:$0xff] }
 0x668   : > { %v7408_v18 = vadd.f32 %v2558_v17, %v7392_v60  ;;  %v2560_v20 = vpop.f32.mrb[69].mxu1 }
 0x669   : > { %5895 = vpow2.f32 %v2693_v16  ;;  %v2561_v21 = vadd.f32 %v2560_v20, %v7395_v61  ;;  %v2562_v23 = vpop.f32.mrb[70].mxu1 }
 0x66a   : > { %2631 = vst [vmem:[%s7399_s24 + $0x20] sm:$0xff] %v7408_v18  ;;  %v2563_v24 = vadd.f32 %v2562_v23, %v7392_v60  ;;  %v2564_v26 = vpop.f32.mrb[71].mxu1  ;;  %v2664_v23 = vld [vmem:[%s7124_s20 + $0x28] sm:$0xff] }
 0x66b   : > { %2632 = vst [vmem:[%s7399_s24 + $0x28] sm:$0xff] %v2561_v21  ;;  %v2677_v28 = vmul.f32 0.5, %v2561_v21  ;;  %v2565_v30 = vadd.f32 %v2564_v26, %v7395_v61 }
 0x66c   : > { %2633 = vst [vmem:[%s7399_s24 + $0x30] sm:$0xff] %v2563_v24 }
 0x66d   : > { %v2695_v31 = vmul.f32 1.442695, %v2677_v28  ;;  %2634 = vst [vmem:[%s7399_s24 + $0x38] sm:$0xff] %v2565_v30  ;;  %v2678_v33 = vmul.f32 0.5, %v2565_v30 }
 0x66f   : > { %5897 = vpow2.f32 %v2695_v31  ;;  %v2697_v34 = vmul.f32 1.442695, %v2678_v33  ;;  %v2568_v35 = vpop.f32.mrb[72].mxu1 }
 0x670   : > { %v7420_v38 = vadd.f32 %v2568_v35, %v7392_v60  ;;  %v2570_v39 = vpop.f32.mrb[73].mxu1 }
 0x671   : > { %v5894_v8 = vpop.eup %5893  ;;  %5899 = vpow2.f32 %v2697_v34  ;;  %v2571_v40 = vadd.f32 %v2570_v39, %v7395_v61  ;;  %v2572_v42 = vpop.f32.mrb[74].mxu1 }
 0x672   : > { %2635 = vst [vmem:[%s7399_s24 + $0x40] sm:$0xff] %v7420_v38  ;;  %v7427_v44 = vadd.f32 %v2572_v42, %v7392_v60  ;;  %v2574_v45 = vpop.f32.mrb[75].mxu1  ;;  %v2723_v9 = vmul.f32 %v5894_v8, %v2659_v37 }
 0x673   : > { %v5896_v53 = vpop.eup %5895  ;;  %2636 = vst [vmem:[%s7399_s24 + $0x48] sm:$0xff] %v2571_v40  ;;  %v2679_v25 = vmul.f32 0.5, %v2571_v40  ;;  %v2575_v41 = vadd.f32 %v2574_v45, %v7395_v61 }
 0x674   : > { %2637 = vst [vmem:[%s7399_s24 + $0x50] sm:$0xff] %v7427_v44  ;;  %v2724_v47 = vmul.f32 %v5896_v53, %v2660_v43  ;;  %v2739_v52 = vadd.f32 %v2723_v9, %v2549_v63  ;;  %v2665_v43 = vld [vmem:[%s7124_s20 + $0x30] sm:$0xff] }
 0x675   : > { %v2699_v55 = vmul.f32 1.442695, %v2679_v25  ;;  %2638 = vst [vmem:[%s7399_s24 + $0x58] sm:$0xff] %v2575_v41  ;;  %v2680_v57 = vmul.f32 0.5, %v2575_v41 }
 0x676   : > { %v2740_v59 = vadd.f32 %v2724_v47, %v2553_v6  ;;  %v2666_v47 = vld [vmem:[%s7124_s20 + $0x38] sm:$0xff] }
 0x677   : > { %5901 = vpow2.f32 %v2699_v55  ;;  %v2701_v22 = vmul.f32 1.442695, %v2680_v57  ;;  %v2578_v32 = vpop.f32.mrb[76].mxu1 }
 0x678   : > { %v7436_v29 = vadd.f32 %v2578_v32, %v7392_v60  ;;  %v2580_v46 = vpop.f32.mrb[77].mxu1  ;;  %v2755_v36 = vpack.c.bf16 %v2740_v59, %v2739_v52 }
 0x679   : > { %v5898_v48 = vpop.eup %5897  ;;  %5903 = vpow2.f32 %v2701_v22  ;;  %v2581_v50 = vadd.f32 %v2580_v46, %v7395_v61  ;;  %v2582_v51 = vpop.f32.mrb[78].mxu1 }
 0x67a   : > { %v2725_v27 = vmul.f32 %v5898_v48, %v2661_v15  ;;  %2639 = vst [vmem:[%s7399_s24 + $0x60] sm:$0xff] %v7436_v29  ;;  %v7443_v54 = vadd.f32 %v2582_v51, %v7392_v60  ;;  %v2584_v56 = vpop.f32.mrb[79].mxu1  ;;  %5119 = vmatprep.mubr.bf16.mxu0 %v2755_v36  ;;  %v2667_v51 = vld [vmem:[%s7124_s20 + $0x40] sm:$0xff] }
 0x67b   : > { %v5900_v58 = vpop.eup %5899  ;;  %2640 = vst [vmem:[%s7399_s24 + $0x68] sm:$0xff] %v2581_v50  ;;  %v2681_v62 = vmul.f32 0.5, %v2581_v50  ;;  %v2585_v63 = vadd.f32 %v2584_v56, %v7395_v61 }
 0x67c   : > { %v2726_v1 = vmul.f32 %v5900_v58, %v2662_v49  ;;  %2641 = vst [vmem:[%s7399_s24 + $0x70] sm:$0xff] %v7443_v54  ;;  %v2741_v2 = vadd.f32 %v2725_v27, %v7408_v18 }
 0x67d   : > { %v2703_v3 = vmul.f32 1.442695, %v2681_v62  ;;  %2642 = vst [vmem:[%s7399_s24 + $0x78] sm:$0xff] %v2585_v63  ;;  %v2682_v6 = vmul.f32 0.5, %v2585_v63 }
 0x67e   : > { %v2742_v10 = vadd.f32 %v2726_v1, %v2563_v24  ;;  %v2668_v1 = vld [vmem:[%s7124_s20 + $0x48] sm:$0xff] }
 0x67f   : > { %5905 = vpow2.f32 %v2703_v3  ;;  %v2705_v11 = vmul.f32 1.442695, %v2682_v6  ;;  %v2588_v12 = vpop.f32.mrb[80].mxu1 }
 0x680   : > { %v7453_v14 = vadd.f32 %v2588_v12, %v7392_v60  ;;  %v2590_v16 = vpop.f32.mrb[81].mxu1  ;;  %v2756_v17 = vpack.c.bf16 %v2742_v10, %v2741_v2 }
 0x681   : > { %v5902_v20 = vpop.eup %5901  ;;  %5907 = vpow2.f32 %v2705_v11  ;;  %v2591_v18 = vadd.f32 %v2590_v16, %v7395_v61  ;;  %v2592_v21 = vpop.f32.mrb[82].mxu1 }
 0x682   : > { %2643 = vst [vmem:[%s7399_s24 + $0x80] sm:$0xff] %v7453_v14  ;;  %v7460_v24 = vadd.f32 %v2592_v21, %v7392_v60  ;;  %v2594_v26 = vpop.f32.mrb[83].mxu1  ;;  %5120 = vmatmul.mubr.bf16.vlgmr.msra.gmra.mrb[64].mxu0 %v2756_v17  ;;  %v2727_v28 = vmul.f32 %v5902_v20, %v2663_v13 }
 0x683   : > { %v5904_v30 = vpop.eup %5903  ;;  %2644 = vst [vmem:[%s7399_s24 + $0x88] sm:$0xff] %v2591_v18  ;;  %v2683_v31 = vmul.f32 0.5, %v2591_v18  ;;  %v2595_v33 = vadd.f32 %v2594_v26, %v7395_v61 }
 0x684   : > { %2645 = vst [vmem:[%s7399_s24 + $0x90] sm:$0xff] %v7460_v24  ;;  %v2728_v34 = vmul.f32 %v5904_v30, %v2664_v23  ;;  %v2743_v35 = vadd.f32 %v2727_v28, %v7420_v38  ;;  %v2669_v23 = vld [vmem:[%s7124_s20 + $0x50] sm:$0xff] }
 0x685   : > { %v2707_v37 = vmul.f32 1.442695, %v2683_v31  ;;  %2646 = vst [vmem:[%s7399_s24 + $0x98] sm:$0xff] %v2595_v33  ;;  %v2684_v39 = vmul.f32 0.5, %v2595_v33 }
 0x686   : > { %v2744_v8 = vadd.f32 %v2728_v34, %v7427_v44  ;;  %v2670_v34 = vld [vmem:[%s7124_s20 + $0x58] sm:$0xff] }
 0x687   : > { %5909 = vpow2.f32 %v2707_v37  ;;  %v2709_v40 = vmul.f32 1.442695, %v2684_v39  ;;  %v2598_v42 = vpop.f32.mrb[84].mxu1 }
 0x688   : > { %v7471_v45 = vadd.f32 %v2598_v42, %v7392_v60  ;;  %v2600_v9 = vpop.f32.mrb[85].mxu1  ;;  %v2757_v53 = vpack.c.bf16 %v2744_v8, %v2743_v35 }
 0x689   : > { %v5906_v25 = vpop.eup %5905  ;;  %5911 = vpow2.f32 %v2709_v40  ;;  %v2601_v38 = vadd.f32 %v2600_v9, %v7395_v61  ;;  %v2602_v41 = vpop.f32.mrb[86].mxu1 }
 0x68a   : > { %2647 = vst [vmem:[%s7399_s24 + $0xa0] sm:$0xff] %v7471_v45  ;;  %v7478_v44 = vadd.f32 %v2602_v41, %v7392_v60  ;;  %v2604_v52 = vpop.f32.mrb[87].mxu1  ;;  %5123 = vmatprep.mubr.bf16.mxu0 %v2757_v53  ;;  %v2729_v55 = vmul.f32 %v5906_v25, %v2665_v43 }
 0x68b   : > { %v5908_v57 = vpop.eup %5907  ;;  %2648 = vst [vmem:[%s7399_s24 + $0xa8] sm:$0xff] %v2601_v38  ;;  %v2685_v59 = vmul.f32 0.5, %v2601_v38  ;;  %v2605_v15 = vadd.f32 %v2604_v52, %v7395_v61  ;;  %v2671_v38 = vld [vmem:[%s7124_s20 + $0x60] sm:$0xff]  ;;  %v2672_v52 = vld [vmem:[%s7124_s20 + $0x68] sm:$0xff] }
 0x68c   : > { %2649 = vst [vmem:[%s7399_s24 + $0xb0] sm:$0xff] %v7478_v44  ;;  %v2730_v22 = vmul.f32 %v5908_v57, %v2666_v47  ;;  %v2745_v32 = vadd.f32 %v2729_v55, %v7436_v29 }
 0x68d   : > { %v2711_v46 = vmul.f32 1.442695, %v2685_v59  ;;  %2650 = vst [vmem:[%s7399_s24 + $0xb8] sm:$0xff] %v2605_v15  ;;  %v2686_v36 = vmul.f32 0.5, %v2605_v15  ;;  %v2673_v15 = vld [vmem:[%s7124_s20 + $0x70] sm:$0xff] }
 0x68e   : > { %v2746_v48 = vadd.f32 %v2730_v22, %v7443_v54 }
 0x68f   : > { %5913 = vpow2.f32 %v2711_v46  ;;  %v2713_v49 = vmul.f32 1.442695, %v2686_v36  ;;  %v2608_v50 = vpop.f32.mrb[88].mxu1  ;;  %v2674_v46 = vld [vmem:[%s7124_s20 + $0x78] sm:$0xff]  ;;  %s7881_s20 = sld [smem:[#allocation45_spill]] }
 0x690   : > { %v7489_v27 = vadd.f32 %v2608_v50, %v7392_v60  ;;  %v2610_v56 = vpop.f32.mrb[89].mxu1  ;;  %v2758_v58 = vpack.c.bf16 %v2746_v48, %v2745_v32 }
 0x691   : > { %v5910_v62 = vpop.eup %5909  ;;  %5915 = vpow2.f32 %v2713_v49  ;;  %v2611_v29 = vadd.f32 %v2610_v56, %v7395_v61  ;;  %v2612_v63 = vpop.f32.mrb[90].mxu1  ;;  %v5575_v56 = vld [vmem:[#allocation16 + $0x60] ss:$8 sps:$4 sm:$0xff]  }
 0x692   : > { %2651 = vst [vmem:[%s7399_s24 + $0xc0] sm:$0xff] %v7489_v27  ;;  %v2613_v54 = vadd.f32 %v2612_v63, %v7392_v60  ;;  %v2614_v2 = vpop.f32.mrb[91].mxu1  ;;  %5124 = vmatmul.mubr.bf16.gmra.mrb[68].mxu0 %v2758_v58  ;;  %v2731_v3 = vmul.f32 %v5910_v62, %v2667_v51  ;;  %v5577_v58 = vld [vmem:[#allocation16 + $0x64] ss:$8 sps:$4 sm:$0xff]   ;;  %v5580_v62 = vld [vmem:[#allocation16 + $0x74] ss:$8 sps:$4 sm:$0xff]  }
 0x693   : > { %v5912_v6 = vpop.eup %5911  ;;  %2652 = vst [vmem:[%s7399_s24 + $0xc8] sm:$0xff] %v2611_v29  ;;  %v2687_v10 = vmul.f32 0.5, %v2611_v29  ;;  %v2615_v11 = vadd.f32 %v2614_v2, %v7395_v61  ;;  %3075 = vmatprep.subr.bf16.mxu1 %v5577_v58  ;;  %v5578_v29 = vld [vmem:[#allocation16 + $0x70] ss:$8 sps:$4 sm:$0xff]  }
 0x694   : > { %2653 = vst [vmem:[%s7399_s24 + $0xd0] sm:$0xff] %v2613_v54  ;;  %v2732_v12 = vmul.f32 %v5912_v6, %v2668_v1  ;;  %v2747_v13 = vadd.f32 %v2731_v3, %v7453_v14  ;;  %3076 = vmatpush1.bf16.msra.mxu1 %v5575_v56  ;;  %v5583_v63 = vld [vmem:[#allocation17 + $0x4] ss:$12 sps:$4 sm:$0xff]   ;;  %v5584_v1 = vld [vmem:[#allocation17 + $0xc8] ss:$12 sps:$4 sm:$0xff]  }
 0x695   : > { %v2715_v16 = vmul.f32 1.442695, %v2687_v10  ;;  %2654 = vst [vmem:[%s7399_s24 + $0xd8] sm:$0xff] %v2615_v11  ;;  %v2688_v17 = vmul.f32 0.5, %v2615_v11  ;;  %3077 = vmatprep.subr.bf16.mxu1 %v5580_v62  ;;  %3561 = vmatprep.subr.bf16.mxu0 %v5583_v63  ;;  %v5586_v2 = vld [vmem:[#allocation17 + $0x18] ss:$12 sps:$4 sm:$0xff]  }
 0x696   : > { %v2748_v20 = vadd.f32 %v2732_v12, %v7460_v24  ;;  %v5591_v3 = vld [vmem:[#allocation17 + $0x34] ss:$12 sps:$4 sm:$0xff]   ;;  %v5589_v6 = vld [vmem:[#allocation17 + $0x30] ss:$12 sps:$4 sm:$0xff]   ;;  %v5596_v10 = vld [vmem:[#allocation17 + $0x4c] ss:$12 sps:$4 sm:$0xff]  }
 0x697   : > { %5917 = vpow2.f32 %v2715_v16  ;;  %v2717_v18 = vmul.f32 1.442695, %v2688_v17  ;;  %v2618_v21 = vpop.f32.mrb[92].mxu1  ;;  %v5594_v11 = vld [vmem:[#allocation17 + $0x48] ss:$12 sps:$4 sm:$0xff]  }
 0x698   : > { %v2619_v26 = vadd.f32 %v2618_v21, %v7392_v60  ;;  %v2620_v28 = vpop.f32.mrb[93].mxu1  ;;  %v2759_v30 = vpack.c.bf16 %v2748_v20, %v2747_v13  ;;  %3078 = vmatpush1.bf16.msra.mxu1 %v5578_v29  ;;  %v5599_v12 = vld [vmem:[#allocation17 + $0x64] ss:$12 sps:$4 sm:$0xff]   ;;  %v5597_v13 = vld [vmem:[#allocation17 + $0x60] ss:$12 sps:$4 sm:$0xff]  }
 0x699   : > { %v5914_v31 = vpop.eup %5913  ;;  %5919 = vpow2.f32 %v2717_v18  ;;  %v2621_v14 = vadd.f32 %v2620_v28, %v7395_v61  ;;  %v2622_v33 = vpop.f32.mrb[94].mxu1  ;;  %4895 = vmatprep.subr.bf16.mxu1 %v5584_v1  ;;  %v5604_v16 = vld [vmem:[#allocation17 + $0x7c] ss:$12 sps:$4 sm:$0xff]   ;;  %v5602_v17 = vld [vmem:[#allocation17 + $0x78] ss:$12 sps:$4 sm:$0xff]  }
 0x69a   : > { %2655 = vst [vmem:[%s7399_s24 + $0xe0] sm:$0xff] %v2619_v26  ;;  %v2623_v24 = vadd.f32 %v2622_v33, %v7392_v60  ;;  %v2624_v35 = vpop.f32.mrb[95].mxu1  ;;  %5127 = vmatprep.mubr.bf16.mxu0 %v2759_v30  ;;  %v2733_v37 = vmul.f32 %v5914_v31, %v2669_v23  ;;  %v5607_v20 = vld [vmem:[#allocation17 + $0x94] ss:$12 sps:$4 sm:$0xff]   ;;  %v5605_v18 = vld [vmem:[#allocation17 + $0x90] ss:$12 sps:$4 sm:$0xff]  }
 0x69b   : > { %v5916_v39 = vpop.eup %5915  ;;  %2656 = vst [vmem:[%s7399_s24 + $0xe8] sm:$0xff] %v2621_v14  ;;  %v2689_v8 = vmul.f32 0.5, %v2621_v14  ;;  %v2625_v40 = vadd.f32 %v2624_v35, %v7395_v61  ;;  %v5612_v21 = vld [vmem:[#allocation17 + $0xac] ss:$12 sps:$4 sm:$0xff]   ;;  %v5610_v23 = vld [vmem:[#allocation17 + $0xa8] ss:$12 sps:$4 sm:$0xff]  }
 0x69c   : > { %2657 = vst [vmem:[%s7399_s24 + $0xf0] sm:$0xff] %v2623_v24  ;;  %v2734_v42 = vmul.f32 %v5916_v39, %v2670_v34  ;;  %v2749_v43 = vadd.f32 %v2733_v37, %v7471_v45  ;;  %v5613_v28 = vld [vmem:[#allocation17 + $0xc0] ss:$12 sps:$4 sm:$0xff]   ;;  %v5620_v30 = vld [vmem:[#allocation17 + $0xdc] ss:$12 sps:$4 sm:$0xff]  }
 0x69d   : > { %v2719_v9 = vmul.f32 1.442695, %v2689_v8  ;;  %2658 = vst [vmem:[%s7399_s24 + $0xf8] sm:$0xff] %v2625_v40  ;;  %v2690_v53 = vmul.f32 0.5, %v2625_v40  ;;  %v5618_v31 = vld [vmem:[#allocation17 + $0xd8] ss:$12 sps:$4 sm:$0xff]  }
 0x69e   : > { %v2750_v60 = vadd.f32 %v2734_v42, %v7478_v44  ;;  %v5623_v14 = vld [vmem:[#allocation17 + $0xf4] ss:$12 sps:$4 sm:$0xff]   ;;  %v5621_v33 = vld [vmem:[#allocation17 + $0xf0] ss:$12 sps:$4 sm:$0xff]   ;;  %s6467_s24 = scalar_lea.vmem %s6466_s10, 8192 }
 0x69f   : > { %5921 = vpow2.f32 %v2719_v9  ;;  %v2721_v25 = vmul.f32 1.442695, %v2690_v53  ;;  %v7522_v34 = vld [vmem:[%s7881_s20] ss:$0 sm:$0xff]  ;;  %v5617_v63 = vld [vmem:[#allocation17 + $0x68] ss:$12 sps:$4 sm:$0xff]   ;;  %p6469_p3 = scmp.lt.s32.totalorder %s6467_s24, %s6461_s12 }
 0x6a0   : > { %v2760_v41 = vpack.c.bf16 %v2750_v60, %v2749_v43 }
 0x6a1   : > { %v5918_v47 = vpop.eup %5917  ;;  %5923 = vpow2.f32 %v2721_v25  ;;  %p6470_p10 = por %p6469_p3, %p6468_p4 }
 0x6a2   : > { %5128 = vmatmul.mubr.bf16.gmra.mrb[72].mxu0 %v2760_v41  ;;  %v2735_v61 = vmul.f32 %v5918_v47, %v2671_v38  ;;  %v5585_v47 = vld [vmem:[#allocation17 + $0x8] ss:$12 sps:$4 sm:$0xff]  }
 0x6a3   : > { %v5920_v55 = vpop.eup %5919  ;;  %p6471_p1 = pnand %p6470_p10, %p6464_p8 }
 0x6a4   : > { %v2736_v57 = vmul.f32 %v5920_v55, %v2672_v52  ;;  %v2751_v45 = vadd.f32 %v2735_v61, %v7489_v27  ;;  %v5581_v27 = vld [vmem:[#allocation17] ss:$12 sps:$4 sm:$0xff]  }
 0x6a5   : > { %3562 = vmatpush1.bf16.msra.mxu0 %v5581_v27 }
 0x6a6   : > { %v2752_v59 = vadd.f32 %v2736_v57, %v2613_v54  ;;  %v5588_v54 = vld [vmem:[#allocation17 + $0x1c] ss:$12 sps:$4 sm:$0xff]   ;;  %v5592_v57 = vld [vmem:[#allocation17 + $0xe0] ss:$12 sps:$4 sm:$0xff]  }
 0x6a7   : > { %3563 = vmatprep.subr.bf16.mxu0 %v5588_v54 }
 0x6a8   : > { %v2761_v22 = vpack.c.bf16 %v2752_v59, %v2751_v45 }
 0x6a9   : > { %v5922_v32 = vpop.eup %5921  ;;  %3564 = vmatpush1.bf16.msra.mxu0 %v5586_v2 }
 0x6aa   : > { %5131 = vmatprep.mubr.bf16.mxu0 %v2761_v22  ;;  %v2737_v44 = vmul.f32 %v5922_v32, %v2673_v15  ;;  %3565 = vmatprep.subr.bf16.mxu0 %v5591_v3  ;;  %v5624_v3 = vld [vmem:[#allocation17 + $0x140] ss:$12 sps:$4 sm:$0xff]  }
 0x6ab   : > { %v5924_v36 = vpop.eup %5923 }
 0x6ac   : > { %v2738_v48 = vmul.f32 %v5924_v36, %v2674_v46  ;;  %v2753_v49 = vadd.f32 %v2737_v44, %v2619_v26  ;;  %v5615_v26 = vld [vmem:[#allocation17 + $0xc4] ss:$12 sps:$4 sm:$0xff]   ;;  %v5593_v46 = vld [vmem:[#allocation17 + $0x20] ss:$12 sps:$4 sm:$0xff]  }
 0x6ad   : > { %3566 = vmatpush1.bf16.msra.mxu0 %v5589_v6  ;;  %v5600_v44 = vld [vmem:[#allocation17 + $0xf8] ss:$12 sps:$4 sm:$0xff]  }
 0x6ae   : > { %v2754_v50 = vadd.f32 %v2738_v48, %v2623_v24  ;;  %3567 = vmatprep.subr.bf16.mxu0 %v5596_v10  ;;  %v5601_v36 = vld [vmem:[#allocation17 + $0x38] ss:$12 sps:$4 sm:$0xff]   ;;  %v5608_v48 = vld [vmem:[#allocation17 + $0x110] ss:$12 sps:$4 sm:$0xff]  }
 0x6b0   : > { %v2762_v51 = vpack.c.bf16 %v2754_v50, %v2753_v49  ;;  %v5609_v49 = vld [vmem:[#allocation17 + $0x50] ss:$12 sps:$4 sm:$0xff]  }
 0x6b1   : > { %3568 = vmatpush1.bf16.msra.mxu0 %v5594_v11 }
 0x6b2   : > { %5132 = vmatmul.mubr.bf16.gmra.mrb[76].mxu0 %v2762_v51  ;;  %3569 = vmatprep.subr.bf16.mxu0 %v5599_v12  ;;  %v5616_v51 = vld [vmem:[#allocation17 + $0x128] ss:$12 sps:$4 sm:$0xff]  }
 0x6b5   : > { %3570 = vmatpush1.bf16.msra.mxu0 %v5597_v13 }
 0x6b6   : > { %3571 = vmatprep.subr.bf16.mxu0 %v5604_v16  ;;  %v5625_v16 = vld [vmem:[#allocation17 + $0x80] ss:$12 sps:$4 sm:$0xff]  }
 0x6b9   : > { %3572 = vmatpush1.bf16.msra.mxu0 %v5602_v17 }
 0x6ba   : > { %3573 = vmatprep.subr.bf16.mxu0 %v5607_v20 }
 0x6bd   : > { %3574 = vmatpush1.bf16.msra.mxu0 %v5605_v18 }
 0x6be   : > { %3575 = vmatprep.subr.bf16.mxu0 %v5612_v21 }
 0x6c1   : > { %3576 = vmatpush1.bf16.msra.mxu0 %v5610_v23 }
 0x6c2   : > { %3577 = vmatprep.subr.bf16.mxu0 %v5615_v26 }
 0x6c5   : > { %3578 = vmatpush1.bf16.msra.mxu0 %v5613_v28 }
 0x6c6   : > { %3579 = vmatprep.subr.bf16.mxu0 %v5620_v30 }
 0x6c9   : > { %3580 = vmatpush1.bf16.msra.mxu0 %v5618_v31 }
 0x6ca   : > { %3581 = vmatprep.subr.bf16.mxu0 %v5623_v14 }
 0x6cd   : > { %3582 = vmatpush1.bf16.msra.mxu0 %v5621_v33 }
 0x755   : > { %v5121_v24 = vpop.f32.mrb[64].mxu0 }
 0x756   : > { %v2877_v35 = vadd.f32 %v5121_v24, %v7522_v34  ;;  %v2868_v37 = vpop.f32.mrb[65].mxu0 }
 0x757   : > { %v2869_v39 = vadd.f32 %v7522_v34, %v2868_v37  ;;  %v5122_v8 = vpop.f32.mrb[66].mxu0 }
 0x758   : > { %5925 = vtanh.f32 %v2877_v35  ;;  %v2880_v40 = vadd.f32 %v5122_v8, %v7522_v34  ;;  %v2871_v42 = vpop.f32.mrb[67].mxu0 }
 0x759   : > { %5927 = vtanh.f32 %v2869_v39  ;;  %v2872_v43 = vadd.f32 %v7522_v34, %v2871_v42 }
 0x75a   : > { %5929 = vtanh.f32 %v2880_v40 }
 0x75b   : > { %5931 = vtanh.f32 %v2872_v43 }
 0x762   : > { %v5926_v9 = vpop.eup %5925 }
 0x763   : > { %v5928_v53 = vpop.eup %5927 }
 0x764   : > { %v5930_v60 = vpop.eup %5929 }
 0x765   : > { %v5932_v25 = vpop.eup %5931  ;;  %v5125_v38 = vpop.f32.mrb[68].mxu0  ;;  %v2948_v41 = vpack.c.bf16 %v5930_v60, %v5926_v9  ;;  %v5626_v60 = vld [vmem:[#allocation17 + $0x108] ss:$12 sps:$4 sm:$0xff]  }
 0x766   : > { %v2893_v52 = vadd.f32 %v5125_v38, %v7522_v34  ;;  %v2884_v61 = vpop.f32.mrb[69].mxu0  ;;  %v2947_v55 = vpack.c.bf16 %v5932_v25, %v5928_v53  ;;  %v5628_v53 = vld [vmem:[#allocation17 + $0x10c] ss:$12 sps:$4 sm:$0xff]  }
 0x767   : > { %v2885_v45 = vadd.f32 %v7522_v34, %v2884_v61  ;;  %v5126_v59 = vpop.f32.mrb[70].mxu0  ;;  %3583 = vmatprep.subr.bf16.mxu0 %v5628_v53  ;;  %v5629_v25 = vld [vmem:[#allocation17 + $0x120] ss:$12 sps:$4 sm:$0xff]   ;;  %v5632_v38 = vld [vmem:[#allocation17 + $0x158] ss:$12 sps:$4 sm:$0xff]  }
 0x768   : > { %5933 = vtanh.f32 %v2893_v52  ;;  %v2896_v15 = vadd.f32 %v5126_v59, %v7522_v34  ;;  %v2887_v22 = vpop.f32.mrb[71].mxu0  ;;  %3096 = vmatmul.mubr.bf16.vlgmr.msra.gmra.mrb[96].mxu1 %v2947_v55  ;;  %3584 = vmatpush1.bf16.msra.mxu0 %v5626_v60  ;;  %v5634_v52 = vld [vmem:[#allocation17 + $0x138] ss:$12 sps:$4 sm:$0xff]   ;;  %v5639_v61 = vld [vmem:[#allocation17 + $0x154] ss:$12 sps:$4 sm:$0xff]  }
 0x769   : > { %5935 = vtanh.f32 %v2885_v45  ;;  %v2888_v32 = vadd.f32 %v7522_v34, %v2887_v22  ;;  %3105 = vmatprep.mubr.bf16.mxu1 %v6602_v0  ;;  %4896 = vmatpush3.bf16.msra.mxu1 %v5585_v47  ;;  %v5636_v47 = vld [vmem:[#allocation17 + $0x13c] ss:$12 sps:$4 sm:$0xff]   ;;  %v5644_v45 = vld [vmem:[#allocation17 + $0x16c] ss:$12 sps:$4 sm:$0xff]   ;;  %v5655_v22 = vld [vmem:[#allocation19 + $0x80] sm:$0xff]  }
 0x76a   : > { %5937 = vtanh.f32 %v2896_v15  ;;  %4897 = vmatprep.subr.bf16.mxu1 %v5592_v57  ;;  %v5637_v55 = vld [vmem:[#allocation17 + $0x150] ss:$12 sps:$4 sm:$0xff]   ;;  %v5642_v59 = vld [vmem:[#allocation17 + $0x168] ss:$12 sps:$4 sm:$0xff]   ;;  %v5645_v15 = vld [vmem:[#allocation19 + $0x40] sm:$0xff]  }
 0x76b   : > { %5939 = vtanh.f32 %v2888_v32  ;;  %v5641_v57 = vld [vmem:[#allocation17 + $0xb0] ss:$12 sps:$4 sm:$0xff]   ;;  %v2971_v32 = vld [vmem:[%s7882_s13] sm:$0x3] }
 0x76d   : > { %4898 = vmatpush3.bf16.msra.mxu1 %v5593_v46  ;;  %v7551_v46 = vrot.slane %v2971_v32, %v7169_v5 }
 0x76e   : > { %4899 = vmatprep.subr.bf16.mxu1 %v5600_v44  ;;  %v7554_v44 = vrot.slane %v2971_v32, %v7175_v7 }
 0x770   : > { %3106 = vmatmul.mubr.bf16.gmra.mrb[100].mxu1 %v2948_v41  ;;  %v5633_v41 = vld [vmem:[#allocation17 + $0x98] ss:$12 sps:$4 sm:$0xff]  }
 0x771   : > { %3115 = vmatprep.mubr.bf16.mxu1 %v6602_v0  ;;  %4900 = vmatpush3.bf16.msra.mxu1 %v5601_v36 }
 0x772   : > { %v5934_v50 = vpop.eup %5933  ;;  %4901 = vmatprep.subr.bf16.mxu1 %v5608_v48 }
 0x773   : > { %v5936_v56 = vpop.eup %5935 }
 0x774   : > { %v5938_v58 = vpop.eup %5937 }
 0x775   : > { %v5940_v62 = vpop.eup %5939  ;;  %v5129_v29 = vpop.f32.mrb[72].mxu0  ;;  %v2950_v27 = vpack.c.bf16 %v5938_v58, %v5934_v50  ;;  %4902 = vmatpush3.bf16.msra.mxu1 %v5609_v49 }
 0x776   : > { %v2909_v1 = vadd.f32 %v5129_v29, %v7522_v34  ;;  %v2900_v54 = vpop.f32.mrb[73].mxu0  ;;  %v2949_v2 = vpack.c.bf16 %v5940_v62, %v5936_v56  ;;  %4903 = vmatprep.subr.bf16.mxu1 %v5616_v51 }
 0x777   : > { %v2901_v6 = vadd.f32 %v7522_v34, %v2900_v54  ;;  %v5130_v10 = vpop.f32.mrb[74].mxu0 }
 0x778   : > { %5941 = vtanh.f32 %v2909_v1  ;;  %v2912_v11 = vadd.f32 %v5130_v10, %v7522_v34  ;;  %v2903_v12 = vpop.f32.mrb[75].mxu0  ;;  %3116 = vmatmul.mubr.bf16.gmra.mrb[104].mxu1 %v2949_v2 }
 0x779   : > { %5943 = vtanh.f32 %v2901_v6  ;;  %v2904_v13 = vadd.f32 %v7522_v34, %v2903_v12  ;;  %3125 = vmatprep.mubr.bf16.mxu1 %v6602_v0  ;;  %4904 = vmatpush3.bf16.msra.mxu1 %v5617_v63 }
 0x77a   : > { %5945 = vtanh.f32 %v2912_v11  ;;  %4905 = vmatprep.subr.bf16.mxu1 %v5624_v3 }
 0x77b   : > { %5947 = vtanh.f32 %v2904_v13 }
 0x77d   : > { %4906 = vmatpush3.bf16.msra.mxu1 %v5625_v16 }
 0x77e   : > { %4907 = vmatprep.subr.bf16.mxu1 %v5632_v38 }
 0x780   : > { %3126 = vmatmul.mubr.bf16.gmra.mrb[108].mxu1 %v2950_v27 }
 0x781   : > { %3135 = vmatprep.mubr.bf16.mxu1 %v6602_v0  ;;  %4908 = vmatpush3.bf16.msra.mxu1 %v5633_v41 }
 0x782   : > { %v5942_v17 = vpop.eup %5941 }
 0x783   : > { %v5944_v20 = vpop.eup %5943 }
 0x784   : > { %v5946_v18 = vpop.eup %5945 }
 0x785   : > { %v5948_v21 = vpop.eup %5947  ;;  %v5133_v23 = vpop.f32.mrb[76].mxu0  ;;  %v2952_v26 = vpack.c.bf16 %v5946_v18, %v5942_v17 }
 0x786   : > { %v2925_v28 = vadd.f32 %v5133_v23, %v7522_v34  ;;  %v2916_v30 = vpop.f32.mrb[77].mxu0  ;;  %v2951_v31 = vpack.c.bf16 %v5948_v21, %v5944_v20  ;;  %v5646_v23 = vld [vmem:[#allocation19] sm:$0xff]  }
 0x787   : > { %v2917_v14 = vadd.f32 %v7522_v34, %v2916_v30  ;;  %v5134_v33 = vpop.f32.mrb[78].mxu0  ;;  %v5647_v30 = vld [vmem:[#allocation19 + $0x48] sm:$0xff]  }
 0x788   : > { %5949 = vtanh.f32 %v2925_v28  ;;  %v2928_v24 = vadd.f32 %v5134_v33, %v7522_v34  ;;  %v2919_v35 = vpop.f32.mrb[79].mxu0  ;;  %3136 = vmatmul.mubr.bf16.gmra.mrb[112].mxu1 %v2951_v31  ;;  %v5658_v31 = vld [vmem:[#allocation19 + $0x88] sm:$0xff]  }
 0x789   : > { %5951 = vtanh.f32 %v2917_v14  ;;  %v2920_v37 = vadd.f32 %v7522_v34, %v2919_v35  ;;  %3145 = vmatprep.mubr.bf16.mxu1 %v6602_v0  ;;  %v5631_v34 = vld [vmem:[#allocation17 + $0x124] ss:$12 sps:$4 sm:$0xff]  }
 0x78a   : > { %5953 = vtanh.f32 %v2928_v24  ;;  %3585 = vmatprep.subr.bf16.mxu0 %v5631_v34 }
 0x78b   : > { %5955 = vtanh.f32 %v2920_v37  ;;  %3586 = vmatpush1.bf16.msra.mxu0 %v5629_v25  ;;  %v5648_v37 = vld [vmem:[#allocation19 + $0x8] sm:$0xff]   ;;  %v5650_v25 = vld [vmem:[#allocation19 + $0x10] sm:$0xff]  }
 0x78c   : > { %3587 = vmatprep.subr.bf16.mxu0 %v5636_v47  ;;  %v5651_v47 = vld [vmem:[#allocation19 + $0x58] sm:$0xff]  }
 0x78f   : > { %3588 = vmatpush1.bf16.msra.mxu0 %v5634_v52 }
 0x790   : > { %3146 = vmatmul.mubr.bf16.gmra.mrb[116].mxu1 %v2952_v26  ;;  %3589 = vmatprep.subr.bf16.mxu0 %v5639_v61 }
 0x791   : > { %3155 = vmatprep.mubr.bf16.mxu1 %v6602_v0 }
 0x792   : > { %v5950_v39 = vpop.eup %5949 }
 0x793   : > { %v5952_v8 = vpop.eup %5951  ;;  %3590 = vmatpush1.bf16.msra.mxu0 %v5637_v55 }
 0x794   : > { %v5954_v40 = vpop.eup %5953  ;;  %3591 = vmatprep.subr.bf16.mxu0 %v5644_v45 }
 0x795   : > { %v5956_v42 = vpop.eup %5955  ;;  %v2954_v43 = vpack.c.bf16 %v5954_v40, %v5950_v39 }
 0x796   : > { %v2953_v9 = vpack.c.bf16 %v5956_v42, %v5952_v8  ;;  %v5649_v8 = vld [vmem:[#allocation19 + $0x50] sm:$0xff]  }
 0x797   : > { %3592 = vmatpush1.bf16.msra.mxu0 %v5642_v59  ;;  %v5653_v59 = vld [vmem:[#allocation19 + $0x60] sm:$0xff]  }
 0x798   : > { %3156 = vmatmul.mubr.bf16.gmra.mrb[120].mxu1 %v2953_v9  ;;  %4959 = vmatprep.subr.bf16.mxu0 %v5645_v15 }
 0x799   : > { %3165 = vmatprep.mubr.bf16.mxu1 %v6602_v0  ;;  %v5640_v0 = vld [vmem:[#allocation17 + $0x170] ss:$12 sps:$4 sm:$0xff]  }
 0x79a   : > { %4909 = vmatprep.subr.bf16.mxu1 %v5640_v0 }
 0x79b   : > { %4910 = vmatpush3.bf16.msra.mxu1 %v5641_v57  ;;  %v5652_v57 = vld [vmem:[#allocation19 + $0x18] sm:$0xff]  }
 0x79c   : > { %5135 = vmatprep.subr.bf16.mxu1 %v5655_v22 }
 0x7a0   : > { %3166 = vmatmul.mubr.bf16.gmra.mrb[124].mxu1 %v2954_v43 }
 0x83b   : > { %v3097_v36 = vpop.f32.mrb[96].mxu1 }
 0x83c   : > { %v3098_v48 = vadd.f32 %v3097_v36, %v7551_v46  ;;  %v3099_v49 = vpop.f32.mrb[97].mxu1 }
 0x83d   : > { %v3100_v50 = vadd.f32 %v3099_v49, %v7554_v44  ;;  %v3101_v51 = vpop.f32.mrb[98].mxu1 }
 0x83e   : > { %5957 = vtanh.f32 %v3098_v48  ;;  %v3102_v56 = vadd.f32 %v3101_v51, %v7551_v46  ;;  %v3103_v58 = vpop.f32.mrb[99].mxu1  ;;  %v5654_v51 = vld [vmem:[#allocation19 + $0x20] sm:$0xff]  }
 0x83f   : > { %5959 = vtanh.f32 %v3100_v50  ;;  %v3104_v62 = vadd.f32 %v3103_v58, %v7554_v44 }
 0x840   : > { %5961 = vtanh.f32 %v3102_v56 }
 0x841   : > { %5963 = vtanh.f32 %v3104_v62  ;;  %v5656_v62 = vld [vmem:[#allocation19 + $0x68] sm:$0xff]  }
 0x843   : > { %v3107_v29 = vpop.f32.mrb[100].mxu1 }
 0x844   : > { %v3108_v27 = vadd.f32 %v3107_v29, %v7551_v46  ;;  %v3109_v63 = vpop.f32.mrb[101].mxu1 }
 0x845   : > { %v3110_v1 = vadd.f32 %v3109_v63, %v7554_v44  ;;  %v3111_v54 = vpop.f32.mrb[102].mxu1 }
 0x846   : > { %5965 = vtanh.f32 %v3108_v27  ;;  %v3112_v2 = vadd.f32 %v3111_v54, %v7551_v46  ;;  %v3113_v3 = vpop.f32.mrb[103].mxu1  ;;  %v5657_v54 = vld [vmem:[#allocation19 + $0x28] sm:$0xff]  }
 0x847   : > { %5967 = vtanh.f32 %v3110_v1  ;;  %v3114_v6 = vadd.f32 %v3113_v3, %v7554_v44 }
 0x848   : > { %v5958_v10 = vpop.eup %5957  ;;  %5969 = vtanh.f32 %v3112_v2 }
 0x849   : > { %v5960_v11 = vpop.eup %5959  ;;  %5971 = vtanh.f32 %v3114_v6 }
 0x84a   : > { %v5962_v12 = vpop.eup %5961 }
 0x84b   : > { %v5964_v13 = vpop.eup %5963  ;;  %v3117_v16 = vpop.f32.mrb[104].mxu1  ;;  %v3208_v17 = vpack.c.bf16 %v5962_v12, %v5958_v10 }
 0x84c   : > { %v3118_v20 = vadd.f32 %v3117_v16, %v7551_v46  ;;  %v3119_v18 = vpop.f32.mrb[105].mxu1  ;;  %v3209_v21 = vpack.c.bf16 %v5964_v13, %v5960_v11 }
 0x84d   : > { %v3120_v26 = vadd.f32 %v3119_v18, %v7554_v44  ;;  %v3121_v28 = vpop.f32.mrb[106].mxu1 }
 0x84e   : > { %5973 = vtanh.f32 %v3118_v20  ;;  %v3122_v14 = vadd.f32 %v3121_v28, %v7551_v46  ;;  %v3123_v33 = vpop.f32.mrb[107].mxu1  ;;  %3593 = vmatprep.mubr.bf16.mxu0 %v3209_v21  ;;  %3706 = vmatprep.mubr.bf16.mxu1 %v3209_v21 }
 0x84f   : > { %5975 = vtanh.f32 %v3120_v26  ;;  %v3124_v24 = vadd.f32 %v3123_v33, %v7554_v44  ;;  %3594 = vmatmul.mubr.bf16.vlgmr.msra.gmra.mrb[80].mxu0 %v3208_v17  ;;  %3707 = vmatmul.mubr.bf16.vlgmr.msra.gmra.mrb[128].mxu1 %v3208_v17 }
 0x850   : > { %v5966_v35 = vpop.eup %5965  ;;  %5977 = vtanh.f32 %v3122_v14  ;;  %4960 = vmatpush3.bf16.msra.mxu0 %v5646_v23  ;;  %5136 = vmatpush3.bf16.msra.mxu1 %v5655_v22 }
 0x851   : > { %v5968_v39 = vpop.eup %5967  ;;  %5979 = vtanh.f32 %v3124_v24  ;;  %4961 = vmatprep.subr.bf16.mxu0 %v5647_v30  ;;  %5137 = vmatprep.subr.bf16.mxu1 %v5658_v31 }
 0x852   : > { %v5970_v40 = vpop.eup %5969 }
 0x853   : > { %v5972_v42 = vpop.eup %5971  ;;  %v3127_v43 = vpop.f32.mrb[108].mxu1  ;;  %v3210_v9 = vpack.c.bf16 %v5970_v40, %v5966_v35 }
 0x854   : > { %v3128_v53 = vadd.f32 %v3127_v43, %v7551_v46  ;;  %v3129_v60 = vpop.f32.mrb[109].mxu1  ;;  %v3211_v34 = vpack.c.bf16 %v5972_v42, %v5968_v39  ;;  %4962 = vmatpush3.bf16.msra.mxu0 %v5648_v37  ;;  %5138 = vmatpush3.bf16.msra.mxu1 %v5658_v31 }
 0x855   : > { %v3130_v38 = vadd.f32 %v3129_v60, %v7554_v44  ;;  %v3131_v41 = vpop.f32.mrb[110].mxu1  ;;  %4963 = vmatprep.subr.bf16.mxu0 %v5649_v8 }
 0x856   : > { %5981 = vtanh.f32 %v3128_v53  ;;  %v3132_v52 = vadd.f32 %v3131_v41, %v7551_v46  ;;  %v3133_v61 = vpop.f32.mrb[111].mxu1  ;;  %3603 = vmatprep.mubr.bf16.mxu0 %v3211_v34  ;;  %3714 = vmatprep.mubr.bf16.mxu1 %v3211_v34 }
 0x857   : > { %5983 = vtanh.f32 %v3130_v38  ;;  %v3134_v55 = vadd.f32 %v3133_v61, %v7554_v44  ;;  %3604 = vmatmul.mubr.bf16.gmra.mrb[84].mxu0 %v3210_v9  ;;  %3715 = vmatmul.mubr.bf16.gmra.mrb[132].mxu1 %v3210_v9 }
 0x858   : > { %v5974_v0 = vpop.eup %5973  ;;  %5985 = vtanh.f32 %v3132_v52  ;;  %4964 = vmatpush3.bf16.msra.mxu0 %v5650_v25 }
 0x859   : > { %v5976_v45 = vpop.eup %5975  ;;  %5987 = vtanh.f32 %v3134_v55  ;;  %4965 = vmatprep.subr.bf16.mxu0 %v5651_v47 }
 0x85a   : > { %v5978_v15 = vpop.eup %5977 }
 0x85b   : > { %v5980_v22 = vpop.eup %5979  ;;  %v3137_v32 = vpop.f32.mrb[112].mxu1  ;;  %v3212_v36 = vpack.c.bf16 %v5978_v15, %v5974_v0 }
 0x85c   : > { %v3138_v48 = vadd.f32 %v3137_v32, %v7551_v46  ;;  %v3139_v49 = vpop.f32.mrb[113].mxu1  ;;  %v3213_v50 = vpack.c.bf16 %v5980_v22, %v5976_v45  ;;  %4966 = vmatpush3.bf16.msra.mxu0 %v5652_v57 }
 0x85d   : > { %v3140_v56 = vadd.f32 %v3139_v49, %v7554_v44  ;;  %v3141_v58 = vpop.f32.mrb[114].mxu1  ;;  %4967 = vmatprep.subr.bf16.mxu0 %v5653_v59 }
 0x85e   : > { %5989 = vtanh.f32 %v3138_v48  ;;  %v3142_v29 = vadd.f32 %v3141_v58, %v7551_v46  ;;  %v3143_v27 = vpop.f32.mrb[115].mxu1  ;;  %3613 = vmatprep.mubr.bf16.mxu0 %v3213_v50  ;;  %3722 = vmatprep.mubr.bf16.mxu1 %v3213_v50  ;;  %v5661_v58 = vld [vmem:[#allocation19 + $0x90] sm:$0xff]  }
 0x85f   : > { %5991 = vtanh.f32 %v3140_v56  ;;  %v3144_v63 = vadd.f32 %v3143_v27, %v7554_v44  ;;  %3614 = vmatmul.mubr.bf16.gmra.mrb[88].mxu0 %v3212_v36  ;;  %3723 = vmatmul.mubr.bf16.gmra.mrb[136].mxu1 %v3212_v36  ;;  %v5662_v27 = vld [vmem:[#allocation19 + $0x98] sm:$0xff]  }
 0x860   : > { %v5982_v1 = vpop.eup %5981  ;;  %5993 = vtanh.f32 %v3142_v29  ;;  %4968 = vmatpush3.bf16.msra.mxu0 %v5654_v51  ;;  %5139 = vmatprep.subr.bf16.mxu1 %v5661_v58  ;;  %v5660_v29 = vld [vmem:[#allocation19 + $0x30] sm:$0xff]  }
 0x861   : > { %v5984_v2 = vpop.eup %5983  ;;  %5995 = vtanh.f32 %v3144_v63  ;;  %4969 = vmatprep.subr.bf16.mxu0 %v5656_v62  ;;  %5140 = vmatpush3.bf16.msra.mxu1 %v5661_v58  ;;  %v5659_v62 = vld [vmem:[#allocation19 + $0x70] sm:$0xff]   ;;  %v5665_v63 = vld [vmem:[#allocation19 + $0xa0] sm:$0xff]  }
 0x862   : > { %v5986_v3 = vpop.eup %5985  ;;  %5141 = vmatprep.subr.bf16.mxu1 %v5662_v27 }
 0x863   : > { %v5988_v6 = vpop.eup %5987  ;;  %v3147_v10 = vpop.f32.mrb[116].mxu1  ;;  %v3214_v11 = vpack.c.bf16 %v5986_v3, %v5982_v1  ;;  %v5663_v1 = vld [vmem:[#allocation19 + $0x78] sm:$0xff]   ;;  %v5667_v3 = vld [vmem:[#allocation19 + $0xb0] sm:$0xff]  }
 0x864   : > { %v3148_v12 = vadd.f32 %v3147_v10, %v7551_v46  ;;  %v3149_v13 = vpop.f32.mrb[117].mxu1  ;;  %v3215_v16 = vpack.c.bf16 %v5988_v6, %v5984_v2  ;;  %4970 = vmatpush3.bf16.msra.mxu0 %v5657_v54  ;;  %v5664_v54 = vld [vmem:[#allocation19 + $0x38] sm:$0xff]   ;;  %v5666_v2 = vld [vmem:[#allocation19 + $0xa8] sm:$0xff]   ;;  %v3288_v10 = vld [vmem:[%s7883_s14] sm:$0x7] }
 0x865   : > { %v3150_v17 = vadd.f32 %v3149_v13, %v7554_v44  ;;  %v3151_v20 = vpop.f32.mrb[118].mxu1  ;;  %4971 = vmatprep.subr.bf16.mxu0 %v5659_v62  ;;  %5142 = vmatpush3.bf16.msra.mxu1 %v5662_v27  ;;  %v5668_v6 = vld [vmem:[#allocation19 + $0xb8] sm:$0xff]  }
 0x866   : > { %5997 = vtanh.f32 %v3148_v12  ;;  %v3152_v18 = vadd.f32 %v3151_v20, %v7551_v46  ;;  %v3153_v21 = vpop.f32.mrb[119].mxu1  ;;  %3623 = vmatprep.mubr.bf16.mxu0 %v3215_v16  ;;  %3730 = vmatprep.mubr.bf16.mxu1 %v3215_v16  ;;  %v7595_v12 = vrot.slane %v3288_v10, %v7175_v7 }
 0x867   : > { %5999 = vtanh.f32 %v3150_v17  ;;  %v3154_v23 = vadd.f32 %v3153_v21, %v7554_v44  ;;  %3624 = vmatmul.mubr.bf16.gmra.mrb[92].mxu0 %v3214_v11  ;;  %3731 = vmatmul.mubr.bf16.gmra.mrb[140].mxu1 %v3214_v11  ;;  %v7592_v11 = vrot.slane %v3288_v10, %v7169_v5  ;;  %v7599_v17 = vrot.slane %v3288_v10, %v921_v19 }
 0x868   : > { %v5990_v26 = vpop.eup %5989  ;;  %6001 = vtanh.f32 %v3152_v18  ;;  %4972 = vmatpush3.bf16.msra.mxu0 %v5660_v29  ;;  %5143 = vmatprep.subr.bf16.mxu1 %v5665_v63 }
 0x869   : > { %v5992_v28 = vpop.eup %5991  ;;  %6003 = vtanh.f32 %v3154_v23  ;;  %5144 = vmatpush3.bf16.msra.mxu1 %v5665_v63  ;;  %4973 = vmatprep.subr.bf16.mxu0 %v5663_v1 }
 0x86a   : > { %v5994_v30 = vpop.eup %5993  ;;  %5145 = vmatprep.subr.bf16.mxu1 %v5666_v2 }
 0x86b   : > { %v5996_v31 = vpop.eup %5995  ;;  %v3157_v14 = vpop.f32.mrb[120].mxu1  ;;  %v3216_v33 = vpack.c.bf16 %v5994_v30, %v5990_v26 }
 0x86c   : > { %v3158_v24 = vadd.f32 %v3157_v14, %v7551_v46  ;;  %v3159_v35 = vpop.f32.mrb[121].mxu1  ;;  %v3217_v37 = vpack.c.bf16 %v5996_v31, %v5992_v28  ;;  %4974 = vmatpush3.bf16.msra.mxu0 %v5664_v54 }
 0x86d   : > { %v3160_v39 = vadd.f32 %v3159_v35, %v7554_v44  ;;  %v3161_v8 = vpop.f32.mrb[122].mxu1  ;;  %5146 = vmatpush3.bf16.msra.mxu1 %v5666_v2 }
 0x86e   : > { %6005 = vtanh.f32 %v3158_v24  ;;  %v3162_v40 = vadd.f32 %v3161_v8, %v7551_v46  ;;  %v3163_v42 = vpop.f32.mrb[123].mxu1  ;;  %3633 = vmatprep.mubr.bf16.mxu0 %v3217_v37  ;;  %3738 = vmatprep.mubr.bf16.mxu1 %v3217_v37 }
 0x86f   : > { %6007 = vtanh.f32 %v3160_v39  ;;  %v3164_v43 = vadd.f32 %v3163_v42, %v7554_v44  ;;  %3634 = vmatmul.mubr.bf16.gmra.mrb[96].mxu0 %v3216_v33  ;;  %3739 = vmatmul.mubr.bf16.gmra.mrb[144].mxu1 %v3216_v33 }
 0x870   : > { %v5998_v9 = vpop.eup %5997  ;;  %6009 = vtanh.f32 %v3162_v40  ;;  %5147 = vmatprep.subr.bf16.mxu1 %v5667_v3 }
 0x871   : > { %v6000_v53 = vpop.eup %5999  ;;  %6011 = vtanh.f32 %v3164_v43  ;;  %5148 = vmatpush3.bf16.msra.mxu1 %v5667_v3 }
 0x872   : > { %v6002_v60 = vpop.eup %6001  ;;  %5149 = vmatprep.subr.bf16.mxu1 %v5668_v6 }
 0x873   : > { %v6004_v34 = vpop.eup %6003  ;;  %v3167_v25 = vpop.f32.mrb[124].mxu1  ;;  %v3218_v38 = vpack.c.bf16 %v6002_v60, %v5998_v9 }
 0x874   : > { %v3168_v41 = vadd.f32 %v3167_v25, %v7551_v46  ;;  %v3169_v47 = vpop.f32.mrb[125].mxu1  ;;  %v3219_v52 = vpack.c.bf16 %v6004_v34, %v6000_v53 }
 0x875   : > { %v3170_v61 = vadd.f32 %v3169_v47, %v7554_v44  ;;  %v3171_v55 = vpop.f32.mrb[126].mxu1  ;;  %5150 = vmatpush3.bf16.msra.mxu1 %v5668_v6 }
 0x876   : > { %6013 = vtanh.f32 %v3168_v41  ;;  %v3172_v0 = vadd.f32 %v3171_v55, %v7551_v46  ;;  %v3173_v57 = vpop.f32.mrb[127].mxu1  ;;  %3643 = vmatprep.mubr.bf16.mxu0 %v3219_v52  ;;  %3746 = vmatprep.mubr.bf16.mxu1 %v3219_v52 }
 0x877   : > { %6015 = vtanh.f32 %v3170_v61  ;;  %v3174_v45 = vadd.f32 %v3173_v57, %v7554_v44  ;;  %3644 = vmatmul.mubr.bf16.gmra.mrb[100].mxu0 %v3218_v38  ;;  %3747 = vmatmul.mubr.bf16.gmra.mrb[148].mxu1 %v3218_v38 }
 0x878   : > { %v6006_v59 = vpop.eup %6005  ;;  %6017 = vtanh.f32 %v3172_v0 }
 0x879   : > { %v6008_v15 = vpop.eup %6007  ;;  %6019 = vtanh.f32 %v3174_v45 }
 0x87a   : > { %v6010_v22 = vpop.eup %6009 }
 0x87b   : > { %v6012_v32 = vpop.eup %6011  ;;  %v3220_v36 = vpack.c.bf16 %v6010_v22, %v6006_v59 }
 0x87c   : > { %v3221_v48 = vpack.c.bf16 %v6012_v32, %v6008_v15 }
 0x87e   : > { %3653 = vmatprep.mubr.bf16.mxu0 %v3221_v48  ;;  %3754 = vmatprep.mubr.bf16.mxu1 %v3221_v48 }
 0x87f   : > { %3654 = vmatmul.mubr.bf16.gmra.mrb[104].mxu0 %v3220_v36  ;;  %3755 = vmatmul.mubr.bf16.gmra.mrb[152].mxu1 %v3220_v36 }
 0x880   : > { %v6014_v46 = vpop.eup %6013 }
 0x881   : > { %v6016_v49 = vpop.eup %6015 }
 0x882   : > { %v6018_v50 = vpop.eup %6017 }
 0x883   : > { %v6020_v51 = vpop.eup %6019  ;;  %v3222_v56 = vpack.c.bf16 %v6018_v50, %v6014_v46 }
 0x884   : > { %v3223_v44 = vpack.c.bf16 %v6020_v51, %v6016_v49 }
 0x886   : > { %3663 = vmatprep.mubr.bf16.mxu0 %v3223_v44  ;;  %3762 = vmatprep.mubr.bf16.mxu1 %v3223_v44 }
 0x887   : > { %3664 = vmatmul.mubr.bf16.gmra.mrb[108].mxu0 %v3222_v56  ;;  %3763 = vmatmul.mubr.bf16.gmra.mrb[156].mxu1 %v3222_v56 }
 0x922   : > { %v3595_v13 = vpop.f32.mrb[80].mxu0  ;;  %v4911_v16 = vpop.f32.mrb[128].mxu1 }
 0x923   : > { %v3596_v20 = vadd.f32 %v3595_v13, %v7592_v11  ;;  %v3597_v18 = vpop.f32.mrb[81].mxu0  ;;  %v4912_v21 = vpop.f32.mrb[129].mxu1 }
 0x924   : > { %v3598_v23 = vadd.f32 %v3597_v18, %v7595_v12  ;;  %v4913_v26 = vadd.f32 %v4912_v21, %v4911_v16  ;;  %v3599_v28 = vpop.f32.mrb[82].mxu0  ;;  %v4914_v30 = vpop.f32.mrb[130].mxu1 }
 0x925   : > { %6021 = vtanh.f32 %v3596_v20  ;;  %v3600_v5 = vadd.f32 %v3599_v28, %v7592_v11  ;;  %v3601_v7 = vpop.f32.mrb[83].mxu0  ;;  %v4915_v31 = vpop.f32.mrb[131].mxu1 }
 0x926   : > { %6023 = vtanh.f32 %v3598_v23  ;;  %v3709_v14 = vadd.f32 %v4913_v26, %v7599_v17  ;;  %v3602_v4 = vadd.f32 %v3601_v7, %v7595_v12  ;;  %v4916_v19 = vadd.f32 %v4915_v31, %v4914_v30 }
 0x927   : > { %6025 = vtanh.f32 %v3600_v5 }
 0x928   : > { %6027 = vtanh.f32 %v3709_v14  ;;  %v3712_v33 = vadd.f32 %v4916_v19, %v7599_v17 }
 0x929   : > { %6029 = vtanh.f32 %v3602_v4 }
 0x92a   : > { %6031 = vtanh.f32 %v3712_v33  ;;  %v3605_v24 = vpop.f32.mrb[84].mxu0  ;;  %v4917_v35 = vpop.f32.mrb[132].mxu1 }
 0x92b   : > { %v3606_v37 = vadd.f32 %v3605_v24, %v7592_v11  ;;  %v3607_v39 = vpop.f32.mrb[85].mxu0  ;;  %v4918_v8 = vpop.f32.mrb[133].mxu1 }
 0x92c   : > { %v3608_v40 = vadd.f32 %v3607_v39, %v7595_v12  ;;  %v4919_v42 = vadd.f32 %v4918_v8, %v4917_v35  ;;  %v3609_v43 = vpop.f32.mrb[86].mxu0  ;;  %v4920_v9 = vpop.f32.mrb[134].mxu1 }
 0x92d   : > { %6033 = vtanh.f32 %v3606_v37  ;;  %v3610_v53 = vadd.f32 %v3609_v43, %v7592_v11  ;;  %v3611_v60 = vpop.f32.mrb[87].mxu0  ;;  %v4921_v34 = vpop.f32.mrb[135].mxu1 }
 0x92e   : > { %6035 = vtanh.f32 %v3608_v40  ;;  %v3717_v25 = vadd.f32 %v4919_v42, %v7599_v17  ;;  %v3612_v38 = vadd.f32 %v3611_v60, %v7595_v12  ;;  %v4922_v41 = vadd.f32 %v4921_v34, %v4920_v9 }
 0x92f   : > { %v6022_v47 = vpop.eup %6021  ;;  %6037 = vtanh.f32 %v3610_v53 }
 0x930   : > { %v6024_v52 = vpop.eup %6023  ;;  %6039 = vtanh.f32 %v3717_v25  ;;  %v3720_v61 = vadd.f32 %v4922_v41, %v7599_v17 }
 0x931   : > { %v6026_v55 = vpop.eup %6025  ;;  %6041 = vtanh.f32 %v3612_v38 }
 0x932   : > { %v6028_v0 = vpop.eup %6027  ;;  %6043 = vtanh.f32 %v3720_v61  ;;  %v3615_v57 = vpop.f32.mrb[88].mxu0  ;;  %v3819_v59 = vpack.c.bf16 %v6026_v55, %v6022_v47 }
 0x933   : > { %v4923_v45 = vpop.f32.mrb[136].mxu1  ;;  %v6030_v15 = vpop.eup %6029  ;;  %v3616_v22 = vadd.f32 %v3615_v57, %v7592_v11 }
 0x934   : > { %v3617_v32 = vpop.f32.mrb[89].mxu0  ;;  %v4924_v36 = vpop.f32.mrb[137].mxu1  ;;  %v3820_v56 = vpack.c.bf16 %v6030_v15, %v6024_v52 }
 0x935   : > { %v6032_v48 = vpop.eup %6031  ;;  %v3618_v46 = vadd.f32 %v3617_v32, %v7595_v12  ;;  %v4925_v49 = vadd.f32 %v4924_v36, %v4923_v45  ;;  %v3619_v50 = vpop.f32.mrb[90].mxu0  ;;  %6045 = vtanh.f32 %v3616_v22 }
 0x936   : > { %v4926_v51 = vpop.f32.mrb[138].mxu1  ;;  %v3620_v44 = vadd.f32 %v3619_v50, %v7592_v11  ;;  %v3621_v58 = vpop.f32.mrb[91].mxu0  ;;  %v3821_v29 = vpack.c.bf16 %v6032_v48, %v6028_v0  ;;  %4074 = vmatprep.mubr.bf16.mxu0 %v3820_v56 }
 0x937   : > { %v4927_v62 = vpop.f32.mrb[139].mxu1  ;;  %6047 = vtanh.f32 %v3618_v46  ;;  %v3725_v27 = vadd.f32 %v4925_v49, %v7599_v17  ;;  %v3622_v63 = vadd.f32 %v3621_v58, %v7595_v12  ;;  %v6034_v54 = vpop.eup %6033  ;;  %4075 = vmatmul.mubr.bf16.vlgmr.msra.gmra.mrb[112].mxu0 %v3819_v59 }
 0x938   : > { %v4928_v1 = vadd.f32 %v4927_v62, %v4926_v51  ;;  %6049 = vtanh.f32 %v3620_v44  ;;  %5151 = vmatprep.mubr.bf16.mxu1 %v3821_v29  ;;  %v6036_v2 = vpop.eup %6035 }
 0x939   : > { %6051 = vtanh.f32 %v3725_v27  ;;  %v6038_v6 = vpop.eup %6037 }
 0x93a   : > { %v3728_v3 = vadd.f32 %v4928_v1, %v7599_v17  ;;  %6053 = vtanh.f32 %v3622_v63  ;;  %v6040_v10 = vpop.eup %6039  ;;  %v3625_v13 = vpop.f32.mrb[92].mxu0  ;;  %v3822_v20 = vpack.c.bf16 %v6038_v6, %v6034_v54 }
 0x93b   : > { %v4929_v16 = vpop.f32.mrb[140].mxu1  ;;  %v6042_v18 = vpop.eup %6041  ;;  %v3626_v21 = vadd.f32 %v3625_v13, %v7592_v11 }
 0x93c   : > { %6055 = vtanh.f32 %v3728_v3  ;;  %v3627_v23 = vpop.f32.mrb[93].mxu0  ;;  %v4930_v26 = vpop.f32.mrb[141].mxu1  ;;  %v3823_v14 = vpack.c.bf16 %v6042_v18, %v6036_v2 }
 0x93d   : > { %v6044_v28 = vpop.eup %6043  ;;  %v3628_v30 = vadd.f32 %v3627_v23, %v7595_v12  ;;  %v4931_v5 = vadd.f32 %v4930_v26, %v4929_v16  ;;  %v3629_v7 = vpop.f32.mrb[94].mxu0  ;;  %6057 = vtanh.f32 %v3626_v21 }
 0x93e   : > { %v4932_v31 = vpop.f32.mrb[142].mxu1  ;;  %v3630_v4 = vadd.f32 %v3629_v7, %v7592_v11  ;;  %v3631_v19 = vpop.f32.mrb[95].mxu0  ;;  %v3824_v24 = vpack.c.bf16 %v6044_v28, %v6040_v10  ;;  %4082 = vmatprep.mubr.bf16.mxu0 %v3823_v14 }
 0x93f   : > { %v4933_v33 = vpop.f32.mrb[143].mxu1  ;;  %6059 = vtanh.f32 %v3628_v30  ;;  %v3733_v35 = vadd.f32 %v4931_v5, %v7599_v17  ;;  %v3632_v37 = vadd.f32 %v3631_v19, %v7595_v12  ;;  %v6046_v8 = vpop.eup %6045  ;;  %4083 = vmatmul.mubr.bf16.gmra.mrb[116].mxu0 %v3822_v20 }
 0x940   : > { %v4934_v39 = vadd.f32 %v4933_v33, %v4932_v31  ;;  %6061 = vtanh.f32 %v3630_v4  ;;  %5152 = vmatmul.mubr.bf16.vlgmr.msra.gmra.mrb[160].mxu1 %v3824_v24 }
 0x941   : > { %v6048_v40 = vpop.eup %6047  ;;  %6063 = vtanh.f32 %v3733_v35 }
 0x942   : > { %v3736_v42 = vadd.f32 %v4934_v39, %v7599_v17  ;;  %v6050_v43 = vpop.eup %6049  ;;  %6065 = vtanh.f32 %v3632_v37  ;;  %v3635_v53 = vpop.f32.mrb[96].mxu0 }
 0x943   : > { %v6052_v9 = vpop.eup %6051  ;;  %v4935_v60 = vpop.f32.mrb[144].mxu1  ;;  %v3825_v34 = vpack.c.bf16 %v6050_v43, %v6046_v8  ;;  %v3636_v38 = vadd.f32 %v3635_v53, %v7592_v11 }
 0x944   : > { %6067 = vtanh.f32 %v3736_v42  ;;  %v6054_v25 = vpop.eup %6053  ;;  %v3637_v41 = vpop.f32.mrb[97].mxu0 }
 0x945   : > { %v4936_v47 = vpop.f32.mrb[145].mxu1  ;;  %v3638_v61 = vadd.f32 %v3637_v41, %v7595_v12  ;;  %v3639_v0 = vpop.f32.mrb[98].mxu0  ;;  %v3826_v45 = vpack.c.bf16 %v6054_v25, %v6048_v40  ;;  %6069 = vtanh.f32 %v3636_v38 }
 0x946   : > { %v6056_v52 = vpop.eup %6055  ;;  %v4937_v55 = vadd.f32 %v4936_v47, %v4935_v60  ;;  %v4938_v57 = vpop.f32.mrb[146].mxu1  ;;  %v3640_v59 = vadd.f32 %v3639_v0, %v7592_v11 }
 0x947   : > { %v3641_v15 = vpop.f32.mrb[99].mxu0  ;;  %v4939_v22 = vpop.f32.mrb[147].mxu1  ;;  %v3827_v32 = vpack.c.bf16 %v6056_v52, %v6052_v9  ;;  %6071 = vtanh.f32 %v3638_v61  ;;  %4090 = vmatprep.mubr.bf16.mxu0 %v3826_v45 }
 0x948   : > { %v3741_v36 = vadd.f32 %v4937_v55, %v7599_v17  ;;  %v3642_v48 = vadd.f32 %v3641_v15, %v7595_v12  ;;  %v4940_v46 = vadd.f32 %v4939_v22, %v4938_v57  ;;  %v6058_v49 = vpop.eup %6057  ;;  %6073 = vtanh.f32 %v3640_v59  ;;  %4091 = vmatmul.mubr.bf16.gmra.mrb[120].mxu0 %v3825_v34 }
 0x949   : > { %5155 = vmatprep.mubr.bf16.mxu1 %v3827_v32  ;;  %v6060_v50 = vpop.eup %6059 }
 0x94a   : > { %6075 = vtanh.f32 %v3741_v36  ;;  %v3744_v51 = vadd.f32 %v4940_v46, %v7599_v17  ;;  %v6062_v56 = vpop.eup %6061  ;;  %v3645_v58 = vpop.f32.mrb[100].mxu0 }
 0x94b   : > { %6077 = vtanh.f32 %v3642_v48  ;;  %v6064_v44 = vpop.eup %6063  ;;  %v4941_v62 = vpop.f32.mrb[148].mxu1  ;;  %v3828_v29 = vpack.c.bf16 %v6062_v56, %v6058_v49  ;;  %v3646_v63 = vadd.f32 %v3645_v58, %v7592_v11 }
 0x94c   : > { %6079 = vtanh.f32 %v3744_v51  ;;  %v6066_v27 = vpop.eup %6065  ;;  %v3647_v1 = vpop.f32.mrb[101].mxu0 }
 0x94d   : > { %v4942_v54 = vpop.f32.mrb[149].mxu1  ;;  %v3648_v3 = vadd.f32 %v3647_v1, %v7595_v12  ;;  %v3649_v10 = vpop.f32.mrb[102].mxu0  ;;  %v3829_v16 = vpack.c.bf16 %v6066_v27, %v6060_v50  ;;  %6081 = vtanh.f32 %v3646_v63 }
 0x94e   : > { %v6068_v2 = vpop.eup %6067  ;;  %v4943_v6 = vadd.f32 %v4942_v54, %v4941_v62  ;;  %v4944_v13 = vpop.f32.mrb[150].mxu1  ;;  %v3650_v20 = vadd.f32 %v3649_v10, %v7592_v11 }
 0x94f   : > { %v3651_v18 = vpop.f32.mrb[103].mxu0  ;;  %v4945_v21 = vpop.f32.mrb[151].mxu1  ;;  %v3830_v23 = vpack.c.bf16 %v6068_v2, %v6064_v44  ;;  %6083 = vtanh.f32 %v3648_v3  ;;  %4098 = vmatprep.mubr.bf16.mxu0 %v3829_v16 }
 0x950   : > { %v3749_v26 = vadd.f32 %v4943_v6, %v7599_v17  ;;  %v3652_v28 = vadd.f32 %v3651_v18, %v7595_v12  ;;  %v4946_v30 = vadd.f32 %v4945_v21, %v4944_v13  ;;  %v6070_v5 = vpop.eup %6069  ;;  %6085 = vtanh.f32 %v3650_v20  ;;  %4099 = vmatmul.mubr.bf16.gmra.mrb[124].mxu0 %v3828_v29 }
 0x951   : > { %5156 = vmatmul.mubr.bf16.gmra.mrb[164].mxu1 %v3830_v23  ;;  %v6072_v7 = vpop.eup %6071 }
 0x952   : > { %6087 = vtanh.f32 %v3749_v26  ;;  %v3752_v31 = vadd.f32 %v4946_v30, %v7599_v17  ;;  %v6074_v14 = vpop.eup %6073  ;;  %v3655_v19 = vpop.f32.mrb[104].mxu0 }
 0x953   : > { %6089 = vtanh.f32 %v3652_v28  ;;  %v4947_v33 = vpop.f32.mrb[152].mxu1  ;;  %v3831_v24 = vpack.c.bf16 %v6074_v14, %v6070_v5  ;;  %v3656_v37 = vadd.f32 %v3655_v19, %v7592_v11  ;;  %v3657_v39 = vpop.f32.mrb[105].mxu0 }
 0x954   : > { %v6076_v4 = vpop.eup %6075  ;;  %6091 = vtanh.f32 %v3752_v31  ;;  %v4948_v8 = vpop.f32.mrb[153].mxu1  ;;  %v3658_v42 = vadd.f32 %v3657_v39, %v7595_v12 }
 0x955   : > { %v6078_v35 = vpop.eup %6077  ;;  %v4949_v43 = vadd.f32 %v4948_v8, %v4947_v33  ;;  %v3659_v9 = vpop.f32.mrb[106].mxu0  ;;  %6093 = vtanh.f32 %v3656_v37 }
 0x956   : > { %v6080_v40 = vpop.eup %6079  ;;  %v4950_v53 = vpop.f32.mrb[154].mxu1  ;;  %v3832_v60 = vpack.c.bf16 %v6078_v35, %v6072_v7  ;;  %v3660_v34 = vadd.f32 %v3659_v9, %v7592_v11  ;;  %6095 = vtanh.f32 %v3658_v42 }
 0x957   : > { %v3661_v25 = vpop.f32.mrb[107].mxu0  ;;  %v4951_v38 = vpop.f32.mrb[155].mxu1  ;;  %v3833_v41 = vpack.c.bf16 %v6080_v40, %v6076_v4  ;;  %v3757_v47 = vadd.f32 %v4949_v43, %v7599_v17 }
 0x958   : > { %v3662_v52 = vadd.f32 %v3661_v25, %v7595_v12  ;;  %v4952_v61 = vadd.f32 %v4951_v38, %v4950_v53  ;;  %4106 = vmatprep.mubr.bf16.mxu0 %v3832_v60  ;;  %v6082_v55 = vpop.eup %6081  ;;  %6097 = vtanh.f32 %v3660_v34 }
 0x959   : > { %4107 = vmatmul.mubr.bf16.gmra.mrb[128].mxu0 %v3831_v24  ;;  %5159 = vmatprep.mubr.bf16.mxu1 %v3833_v41  ;;  %v6084_v0 = vpop.eup %6083  ;;  %6099 = vtanh.f32 %v3757_v47 }
 0x95a   : > { %v3760_v57 = vadd.f32 %v4952_v61, %v7599_v17  ;;  %v6086_v45 = vpop.eup %6085  ;;  %6101 = vtanh.f32 %v3662_v52  ;;  %v3665_v15 = vpop.f32.mrb[108].mxu0 }
 0x95b   : > { %v4953_v22 = vpop.f32.mrb[156].mxu1  ;;  %v3834_v32 = vpack.c.bf16 %v6086_v45, %v6082_v55  ;;  %v3666_v48 = vadd.f32 %v3665_v15, %v7592_v11  ;;  %v3667_v46 = vpop.f32.mrb[109].mxu0 }
 0x95c   : > { %v6088_v59 = vpop.eup %6087  ;;  %6103 = vtanh.f32 %v3760_v57  ;;  %v4954_v49 = vpop.f32.mrb[157].mxu1  ;;  %v3668_v51 = vadd.f32 %v3667_v46, %v7595_v12 }
 0x95d   : > { %v6090_v36 = vpop.eup %6089  ;;  %v4955_v56 = vadd.f32 %v4954_v49, %v4953_v22  ;;  %v3669_v44 = vpop.f32.mrb[110].mxu0  ;;  %6105 = vtanh.f32 %v3666_v48 }
 0x95e   : > { %v6092_v50 = vpop.eup %6091  ;;  %v4956_v58 = vpop.f32.mrb[158].mxu1  ;;  %v3835_v62 = vpack.c.bf16 %v6090_v36, %v6084_v0  ;;  %v3670_v29 = vadd.f32 %v3669_v44, %v7592_v11  ;;  %6107 = vtanh.f32 %v3668_v51 }
 0x95f   : > { %v3671_v27 = vpop.f32.mrb[111].mxu0  ;;  %v4957_v63 = vpop.f32.mrb[159].mxu1  ;;  %v3836_v1 = vpack.c.bf16 %v6092_v50, %v6088_v59  ;;  %v3765_v54 = vadd.f32 %v4955_v56, %v7599_v17 }
 0x960   : > { %v3672_v2 = vadd.f32 %v3671_v27, %v7595_v12  ;;  %v4958_v3 = vadd.f32 %v4957_v63, %v4956_v58  ;;  %4114 = vmatprep.mubr.bf16.mxu0 %v3835_v62  ;;  %v6094_v6 = vpop.eup %6093  ;;  %6109 = vtanh.f32 %v3670_v29 }
 0x961   : > { %4115 = vmatmul.mubr.bf16.gmra.mrb[132].mxu0 %v3834_v32  ;;  %5160 = vmatmul.mubr.bf16.gmra.mrb[168].mxu1 %v3836_v1  ;;  %v6096_v10 = vpop.eup %6095  ;;  %6111 = vtanh.f32 %v3765_v54 }
 0x962   : > { %v3768_v13 = vadd.f32 %v4958_v3, %v7599_v17  ;;  %v6098_v16 = vpop.eup %6097  ;;  %6113 = vtanh.f32 %v3672_v2 }
 0x963   : > { %v6100_v11 = vpop.eup %6099  ;;  %v3837_v20 = vpack.c.bf16 %v6098_v16, %v6094_v6 }
 0x964   : > { %6115 = vtanh.f32 %v3768_v13  ;;  %v6102_v18 = vpop.eup %6101 }
 0x965   : > { %v3838_v23 = vpack.c.bf16 %v6102_v18, %v6096_v10 }
 0x966   : > { %v6104_v21 = vpop.eup %6103 }
 0x967   : > { %v3839_v26 = vpack.c.bf16 %v6104_v21, %v6100_v11  ;;  %4122 = vmatprep.mubr.bf16.mxu0 %v3838_v23  ;;  %v6106_v12 = vpop.eup %6105 }
 0x968   : > { %v6108_v28 = vpop.eup %6107 }
 0x969   : > { %4123 = vmatmul.mubr.bf16.gmra.mrb[136].mxu0 %v3837_v20  ;;  %5163 = vmatprep.mubr.bf16.mxu1 %v3839_v26 }
 0x96a   : > { %v6110_v30 = vpop.eup %6109 }
 0x96b   : > { %v6112_v5 = vpop.eup %6111  ;;  %v3840_v17 = vpack.c.bf16 %v6110_v30, %v6106_v12 }
 0x96c   : > { %v6114_v7 = vpop.eup %6113 }
 0x96d   : > { %v3841_v14 = vpack.c.bf16 %v6114_v7, %v6108_v28 }
 0x96e   : > { %v6116_v31 = vpop.eup %6115 }
 0x96f   : > { %v3842_v4 = vpack.c.bf16 %v6116_v31, %v6112_v5  ;;  %4130 = vmatprep.mubr.bf16.mxu0 %v3841_v14 }
 0x971   : > { %4131 = vmatmul.mubr.bf16.gmra.mrb[140].mxu0 %v3840_v17  ;;  %5164 = vmatmul.mubr.bf16.gmra.mrb[172].mxu1 %v3842_v4 }
 0x972   : > { %6474 = shalt.err (!%p6471_p1)
}
 0x973   : > { %s6475_s0 = scalar_lea.hbm %s7654_s16, 4096  ;;  %s6479_s4 = scalar_lea.hbm %s7884_s22, 8192 }
 0x974   : > { %p6476_p11 = scmp.ne.s32.totalorder %s7654_s16, %s6475_s0  ;;  %p6480_p13 = scmp.lt.u32.totalorder %s7654_s16, %s7884_s22 }
 0x975   : > { %p6481_p6 = scmp.lt.u32.totalorder %s6479_s4, %s6475_s0  ;;  %p6483_p0 = scmp.lt.u32.totalorder %s6475_s0, %s7654_s16 }
 0x976   : > { %p6477_p12 = pnand %p6476_p11, %p7885_p5 }
 0x977   : > { %p6482_p9 = por %p6481_p6, %p6480_p13 }
 0x978   : > { %p6478_p2 = pneg %p6477_p12 }
 0x979   : > { %p6484_p7 = por %p6483_p0, %p6482_p9 }
 0x97b   : > { %p6485_p8 = pnand %p6484_p7, %p6478_p2 }
 0x97d   : > { %6488 = shalt.err (!%p6485_p8)
}
 0x97e   : > { %s6604_s8 = smov 256   ;;  %s6605_s14 = smov 16  }
 0x97f   : > { %5272 = dma.vmem_to_hbm [thread:$0]  (%p7885_p5), %s7656_s21, 4096, %s7654_s16, %s4274_s6, %s6604_s8, %s6604_s8, %s6605_s14  }
 0x980   : > { %s7886_s17 = sld [smem:[#allocation51_spill]]  ;;  %s7693_s21 = scalar_lea.vmem [#allocation20], %s4537_s18 }
 0x981   : > { %s4780_s18 = sshll.u32 %s6740_s29, 11  ;;  %s4287_s16 = sshll.u32 %s7693_s21, 4  ;;  %s7728_s16 = int_to_ptr.vmem [resolvable:$true] %s4287_s16 }
 0x982   : > { %s7887_s19 = sld [smem:[#allocation52_spill]]  ;;  %s4269_s24 = scalar_lea.sflag [#allocation4], %s7110_s3 }
 0x983   : > { %s6489_s0 = scalar_lea.vmem %s7728_s16, 2048  ;;  %s6606_s29 = smov [#allocation20]  }
 0x984   : > { %p6490_p4 = scmp.ne.s32.totalorder %s7728_s16, %s6489_s0  ;;  %s6493_s20 = sshll.u32 %s6606_s29, 4  ;;  %s6494_s20 = int_to_ptr.vmem [resolvable:$false] %s6493_s20 }
 0x985   : > { %s6495_s30 = scalar_lea.vmem %s6494_s20, 4096  ;;  %p6496_p1 = scmp.lt.s32.totalorder %s7728_s16, %s6494_s20 }
 0x986   : > { %v7685_v8 = vld [vmem:[%s7886_s17] ss:$0 sm:$0xff]  ;;  %p6491_p3 = pnand %p6490_p4, %p7885_p5  ;;  %p6497_p11 = scmp.lt.s32.totalorder %s6495_s30, %s6489_s0 }
 0x988   : > { %s7726_s10 = scalar_lea.hbm %s7887_s19, %s4780_s18  ;;  %p6492_p10 = pneg %p6491_p3 }
 0x989   : > { %p6498_p12 = por %p6497_p11, %p6496_p1 }
 0x98b   : > { %p6499_p2 = pnand %p6498_p12, %p6492_p10 }
 0xa0a   : > { %v4975_v19 = vpop.f32.mrb[112].mxu0 }
 0xa0b   : > { %v4976_v33 = vpop.f32.mrb[113].mxu0 }
 0xa0c   : > { %v4977_v24 = vadd.f32 %v4976_v33, %v4975_v19  ;;  %v4978_v35 = vpop.f32.mrb[114].mxu0 }
 0xa0d   : > { %v4979_v37 = vpop.f32.mrb[115].mxu0 }
 0xa0e   : > { %v4980_v39 = vadd.f32 %v4979_v37, %v4978_v35  ;;  %v4077_v43 = vadd.f32 %v4977_v24, %v7685_v8 }
 0xa10   : > { %v4080_v41 = vadd.f32 %v4980_v39, %v7685_v8 }
 0xa12   : > { %v4981_v40 = vpop.f32.mrb[116].mxu0 }
 0xa13   : > { %v5153_v42 = vpop.f32.mrb[160].mxu1  ;;  %v4982_v9 = vpop.f32.mrb[117].mxu0 }
 0xa14   : > { %v4173_v53 = vpop.f32.mrb[161].mxu1  ;;  %v4983_v60 = vadd.f32 %v4982_v9, %v4981_v40  ;;  %v4984_v34 = vpop.f32.mrb[118].mxu0 }
 0xa15   : > { %v4174_v25 = vadd.f32 %v4173_v53, %v4077_v43  ;;  %v5154_v38 = vpop.f32.mrb[162].mxu1  ;;  %v4985_v47 = vpop.f32.mrb[119].mxu0 }
 0xa16   : > { %v4176_v52 = vpop.f32.mrb[163].mxu1  ;;  %v4085_v61 = vadd.f32 %v4983_v60, %v7685_v8  ;;  %v4986_v55 = vadd.f32 %v4985_v47, %v4984_v34 }
 0xa17   : > { %6117 = vtanh.f32 %v4174_v25  ;;  %v4177_v0 = vadd.f32 %v4176_v52, %v4080_v41 }
 0xa18   : > { %v4182_v57 = vadd.f32 %v5153_v42, %v4085_v61  ;;  %v4088_v45 = vadd.f32 %v4986_v55, %v7685_v8 }
 0xa19   : > { %6119 = vtanh.f32 %v4177_v0 }
 0xa1a   : > { %6121 = vtanh.f32 %v4182_v57  ;;  %v4185_v59 = vadd.f32 %v5154_v38, %v4088_v45 }
 0xa1b   : > { %v4987_v15 = vpop.f32.mrb[120].mxu0 }
 0xa1c   : > { %v4988_v22 = vpop.f32.mrb[121].mxu0  ;;  %6123 = vtanh.f32 %v4185_v59 }
 0xa1d   : > { %v4989_v32 = vadd.f32 %v4988_v22, %v4987_v15  ;;  %v4990_v36 = vpop.f32.mrb[122].mxu0 }
 0xa1e   : > { %v4991_v48 = vpop.f32.mrb[123].mxu0 }
 0xa1f   : > { %v4992_v46 = vadd.f32 %v4991_v48, %v4990_v36  ;;  %v4093_v44 = vadd.f32 %v4989_v32, %v7685_v8 }
 0xa21   : > { %v6118_v49 = vpop.eup %6117  ;;  %v4096_v2 = vadd.f32 %v4992_v46, %v7685_v8 }
 0xa22   : > { %4252 = vst [vmem:[%s7693_s21] sm:$0xff] %v6118_v49 }
 0xa23   : > { %v6120_v50 = vpop.eup %6119  ;;  %v4993_v51 = vpop.f32.mrb[124].mxu0 }
 0xa24   : > { %v5157_v56 = vpop.f32.mrb[164].mxu1  ;;  %4253 = vst [vmem:[%s7693_s21 + $0x8] sm:$0xff] %v6120_v50  ;;  %v4994_v58 = vpop.f32.mrb[125].mxu0 }
 0xa25   : > { %v4189_v62 = vpop.f32.mrb[165].mxu1  ;;  %v6122_v29 = vpop.eup %6121  ;;  %v4995_v27 = vadd.f32 %v4994_v58, %v4993_v51 }
 0xa26   : > { %v4996_v63 = vpop.f32.mrb[126].mxu0  ;;  %v4190_v1 = vadd.f32 %v4189_v62, %v4093_v44  ;;  %v5158_v54 = vpop.f32.mrb[166].mxu1  ;;  %4254 = vst [vmem:[%s7693_s21 + $0x10] sm:$0xff] %v6122_v29 }
 0xa27   : > { %v4997_v3 = vpop.f32.mrb[127].mxu0  ;;  %v4192_v6 = vpop.f32.mrb[167].mxu1  ;;  %v4101_v13 = vadd.f32 %v4995_v27, %v7685_v8 }
 0xa28   : > { %v6124_v10 = vpop.eup %6123  ;;  %6125 = vtanh.f32 %v4190_v1  ;;  %v4998_v16 = vadd.f32 %v4997_v3, %v4996_v63  ;;  %v4193_v11 = vadd.f32 %v4192_v6, %v4096_v2 }
 0xa29   : > { %4255 = vst [vmem:[%s7693_s21 + $0x18] sm:$0xff] %v6124_v10  ;;  %v4198_v20 = vadd.f32 %v5157_v56, %v4101_v13 }
 0xa2a   : > { %v4104_v18 = vadd.f32 %v4998_v16, %v7685_v8  ;;  %6127 = vtanh.f32 %v4193_v11 }
 0xa2b   : > { %6129 = vtanh.f32 %v4198_v20 }
 0xa2c   : > { %v4201_v21 = vadd.f32 %v5158_v54, %v4104_v18  ;;  %v4999_v23 = vpop.f32.mrb[128].mxu0 }
 0xa2d   : > { %v5000_v26 = vpop.f32.mrb[129].mxu0 }
 0xa2e   : > { %6131 = vtanh.f32 %v4201_v21  ;;  %v5001_v12 = vadd.f32 %v5000_v26, %v4999_v23  ;;  %v5002_v28 = vpop.f32.mrb[130].mxu0 }
 0xa2f   : > { %v5003_v30 = vpop.f32.mrb[131].mxu0 }
 0xa30   : > { %v5004_v5 = vadd.f32 %v5003_v30, %v5002_v28  ;;  %v4109_v4 = vadd.f32 %v5001_v12, %v7685_v8 }
 0xa32   : > { %v6126_v17 = vpop.eup %6125  ;;  %v4112_v42 = vadd.f32 %v5004_v5, %v7685_v8 }
 0xa33   : > { %4256 = vst [vmem:[%s7693_s21 + $0x20] sm:$0xff] %v6126_v17 }
 0xa34   : > { %v6128_v7 = vpop.eup %6127  ;;  %v5005_v31 = vpop.f32.mrb[132].mxu0 }
 0xa35   : > { %v5161_v14 = vpop.f32.mrb[168].mxu1  ;;  %4257 = vst [vmem:[%s7693_s21 + $0x28] sm:$0xff] %v6128_v7  ;;  %v5006_v19 = vpop.f32.mrb[133].mxu0 }
 0xa36   : > { %v4205_v33 = vpop.f32.mrb[169].mxu1  ;;  %v6130_v24 = vpop.eup %6129  ;;  %v5007_v35 = vadd.f32 %v5006_v19, %v5005_v31 }
 0xa37   : > { %v5008_v37 = vpop.f32.mrb[134].mxu0  ;;  %v4206_v39 = vadd.f32 %v4205_v33, %v4109_v4  ;;  %v5162_v40 = vpop.f32.mrb[170].mxu1  ;;  %4258 = vst [vmem:[%s7693_s21 + $0x30] sm:$0xff] %v6130_v24 }
 0xa38   : > { %v5009_v43 = vpop.f32.mrb[135].mxu0  ;;  %v4208_v9 = vpop.f32.mrb[171].mxu1  ;;  %v4117_v60 = vadd.f32 %v5007_v35, %v7685_v8 }
 0xa39   : > { %v6132_v53 = vpop.eup %6131  ;;  %6133 = vtanh.f32 %v4206_v39  ;;  %v5010_v34 = vadd.f32 %v5009_v43, %v5008_v37  ;;  %v4209_v25 = vadd.f32 %v4208_v9, %v4112_v42 }
 0xa3a   : > { %4259 = vst [vmem:[%s7693_s21 + $0x38] sm:$0xff] %v6132_v53  ;;  %v4214_v38 = vadd.f32 %v5161_v14, %v4117_v60 }
 0xa3b   : > { %v4120_v41 = vadd.f32 %v5010_v34, %v7685_v8  ;;  %6135 = vtanh.f32 %v4209_v25 }
 0xa3c   : > { %6137 = vtanh.f32 %v4214_v38  ;;  %v5011_v52 = vpop.f32.mrb[136].mxu0 }
 0xa3d   : > { %v4217_v47 = vadd.f32 %v5162_v40, %v4120_v41  ;;  %v5012_v61 = vpop.f32.mrb[137].mxu0 }
 0xa3e   : > { %v5013_v55 = vadd.f32 %v5012_v61, %v5011_v52  ;;  %v5014_v0 = vpop.f32.mrb[138].mxu0 }
 0xa3f   : > { %6139 = vtanh.f32 %v4217_v47  ;;  %v5015_v57 = vpop.f32.mrb[139].mxu0 }
 0xa40   : > { %v5016_v45 = vadd.f32 %v5015_v57, %v5014_v0  ;;  %v4125_v36 = vadd.f32 %v5013_v55, %v7685_v8 }
 0xa42   : > { %v4128_v58 = vadd.f32 %v5016_v45, %v7685_v8 }
 0xa43   : > { %v6134_v59 = vpop.eup %6133 }
 0xa44   : > { %4260 = vst [vmem:[%s7693_s21 + $0x40] sm:$0xff] %v6134_v59  ;;  %v5017_v22 = vpop.f32.mrb[140].mxu0  ;;  %v5165_v32 = vpop.f32.mrb[172].mxu1 }
 0xa45   : > { %v6136_v15 = vpop.eup %6135  ;;  %v5018_v48 = vpop.f32.mrb[141].mxu0 }
 0xa46   : > { %4261 = vst [vmem:[%s7693_s21 + $0x48] sm:$0xff] %v6136_v15  ;;  %v4221_v46 = vpop.f32.mrb[173].mxu1  ;;  %v6138_v49 = vpop.eup %6137  ;;  %v5019_v50 = vadd.f32 %v5018_v48, %v5017_v22 }
 0xa47   : > { %v5020_v51 = vpop.f32.mrb[142].mxu0  ;;  %v4222_v56 = vadd.f32 %v4221_v46, %v4125_v36  ;;  %v5166_v44 = vpop.f32.mrb[174].mxu1  ;;  %4262 = vst [vmem:[%s7693_s21 + $0x50] sm:$0xff] %v6138_v49 }
 0xa48   : > { %v5021_v62 = vpop.f32.mrb[143].mxu0  ;;  %v4224_v29 = vpop.f32.mrb[175].mxu1  ;;  %v4133_v63 = vadd.f32 %v5019_v50, %v7685_v8 }
 0xa49   : > { %v6140_v27 = vpop.eup %6139  ;;  %6141 = vtanh.f32 %v4222_v56  ;;  %v5022_v1 = vadd.f32 %v5021_v62, %v5020_v51  ;;  %v4225_v54 = vadd.f32 %v4224_v29, %v4128_v58 }
 0xa4a   : > { %4263 = vst [vmem:[%s7693_s21 + $0x58] sm:$0xff] %v6140_v27  ;;  %v4230_v2 = vadd.f32 %v5165_v32, %v4133_v63 }
 0xa4b   : > { %v4136_v3 = vadd.f32 %v5022_v1, %v7685_v8  ;;  %6143 = vtanh.f32 %v4225_v54 }
 0xa4c   : > { %6145 = vtanh.f32 %v4230_v2 }
 0xa4d   : > { %v4233_v6 = vadd.f32 %v5166_v44, %v4136_v3 }
 0xa4f   : > { %6147 = vtanh.f32 %v4233_v6 }
 0xa53   : > { %v6142_v10 = vpop.eup %6141 }
 0xa54   : > { %4264 = vst [vmem:[%s7693_s21 + $0x60] sm:$0xff] %v6142_v10 }
 0xa55   : > { %v6144_v13 = vpop.eup %6143 }
 0xa56   : > { %4265 = vst [vmem:[%s7693_s21 + $0x68] sm:$0xff] %v6144_v13  ;;  %v6146_v16 = vpop.eup %6145 }
 0xa57   : > { %4266 = vst [vmem:[%s7693_s21 + $0x70] sm:$0xff] %v6146_v16 }
 0xa59   : > { %v6148_v8 = vpop.eup %6147 }
 0xa5a   : > { %4267 = vst [vmem:[%s7693_s21 + $0x78] sm:$0xff] %v6148_v8 }
 0xa5b   : > { %6502 = shalt.err (!%p6499_p2)
}
 0xa5c   : > { %s6503_s4 = scalar_lea.hbm %s7726_s10, 2048  ;;  %s6507_s8 = scalar_lea.hbm %s7887_s19, 4096 }
 0xa5d   : > { %p6504_p13 = scmp.ne.s32.totalorder %s7726_s10, %s6503_s4  ;;  %p6508_p0 = scmp.lt.u32.totalorder %s7726_s10, %s7887_s19 }
 0xa5e   : > { %p6509_p7 = scmp.lt.u32.totalorder %s6507_s8, %s6503_s4  ;;  %p6511_p4 = scmp.lt.u32.totalorder %s6503_s4, %s7726_s10 }
 0xa5f   : > { %p6505_p6 = pnand %p6504_p13, %p7885_p5 }
 0xa60   : > { %p6510_p8 = por %p6509_p7, %p6508_p0 }
 0xa61   : > { %p6506_p9 = pneg %p6505_p6 }
 0xa62   : > { %p6512_p3 = por %p6511_p4, %p6510_p8 }
 0xa64   : > { %p6513_p10 = pnand %p6512_p3, %p6506_p9 }
 0xa66   : > { %6516 = shalt.err (!%p6513_p10)
}
 0xa67   : > { %s6607_s28 = smov 128   ;;  %s6608_s17 = smov 8  }
 0xa68   : > { %5271 = dma.vmem_to_hbm [thread:$0]  (%p7885_p5), %s7728_s16, 2048, %s7726_s10, %s4269_s24, %s6607_s28, %s6607_s28, %s6608_s17  }
 0xa69 PF: > { %s4319_s21 = sand.u32 1, %s6571_s2   ;;  %p7888_p1 = scmp.ne.s32.totalorder %s7861_s23, 0 }
 0xa6a   : > { %p7889_p11 = scmp.ge.s32.totalorder %s6583_s27, 2  ;;  %s4320_s18 = scalar_lea.sflag [#allocation4], %s4319_s21 }
 0xa6c   : > { %p5311_p12 = pnand %p7889_p11, %p7888_p1 }
 0xa6e   : > { %6562 = dma.done.wait (!%p5311_p12), %s4320_s18, 2048  }
 0xa6f   : > { %6564 = vsyncadd (!%p5311_p12), %s4320_s18, 4294965248  ;;  %s4329_s6 = scalar_lea.sflag [#allocation22], %s4319_s21 }
 0xa70   : > { %6566 = dma.done.wait (!%p5311_p12), %s4329_s6, 4096  }
 0xa71   : > { %6568 = vsyncadd (!%p5311_p12), %s4329_s6, 4294963200  ;;  %s7890_s9 = sld [smem:[#allocation32_spill]]  ;;  %p45_p5 = scmp.ge.s32.totalorder %s6990_s5, 4  }
 0xa72   : > { %s7891_s2 = smov %s6575_s25  ;;  %s7892_s25 = smov %s6579_s26 }
 0xa73   : > { %s7894_s27 = smov %s6990_s5  ;;  %47 = sbr.rel (!%p45_p5) target bundleno = 35 (0x23), region = 211 }
 0xa77   : > { %s7893_s26 = smov %s7890_s9 }
 0xa7a   :  { %4334 = vsyncpa [#allocation3], 1 }
 0xa7b   :  { %4336 = vsyncpa [#allocation3 + $0x1], 1 }
 0xa7c   :  { %4337 = vsyncpa [#allocation6], 1 }
 0xa7d   :  { %4339 = vsyncpa [#allocation6 + $0x1], 1 }
 0xa7e   :  { %4340 = vsyncpa [#allocation9], 1 }
 0xa7f   :  { %4341 = vsyncpa [#allocation12], 1 }
 0xa80   :  { %4342 = vsyncpa [#allocation15], 1 }
 0xa81   :  { %4343 = vsyncpa [#allocation18], 1 }
 0xa82   :  { %4344 = vsyncpa [#allocation4], 1 }
 0xa83   :  { %4346 = vsyncpa [#allocation4 + $0x1], 1 }
 0xa84   :  { %4347 = vsyncpa [#allocation22], 1 }
 0xa85   :  { %4349 = vsyncpa [#allocation22 + $0x1], 1 }

</bundles_post_ra>
